<compile_context>
chip_gen: v5e
topology: v5e:2x2
jax: 0.10.0
libtpu: 0.0.40
codegen_flags: <defaults>
</compile_context>

<pallas_src>
import jax
import jax.numpy as jnp
from jax import lax
from jax.experimental import pallas as pl
from jax.experimental.pallas import tpu as pltpu

EPS = 1e-5  # PyTorch layer_norm_eps default


def _layer_norm(x, w, b):
    mu = jnp.mean(x, axis=-1, keepdims=True)
    xc = x - mu
    var = jnp.mean(xc * xc, axis=-1, keepdims=True)
    return xc * lax.rsqrt(var + EPS) * w + b


def _text_encoder_kernel(ids_ref, tok_ref, pos_ref, hm_ref, hmt_ref,
                         wqkv_ref, bqkv_ref, wo_ref, bo_ref,
                         ln1w_ref, ln1b_ref,
                         w1_ref, b1_ref, w2_ref, b2_ref,
                         ln2w_ref, ln2b_ref,
                         o_ref, x_scr):
    # o_ref / x_scr: (L, N, E) with L = batch-as-seq, N = seq-as-batch (batch_first=False).
    L, N, E = o_ref.shape
    H = hm_ref.shape[1]
    V = tok_ref.shape[0]
    R = L * N
    layer = pl.program_id(0)
    last = pl.num_programs(0) - 1

    # ---- layer 0 only: embedding gather (exact one-hot MXU gather) + positional add ----
    @pl.when(layer == 0)
    def _init():
        ids = ids_ref[...]                                       # (R, 1) int32
        iota = lax.broadcasted_iota(jnp.int32, (R, V), 1)
        onehot = (ids == iota).astype(jnp.float32)               # (R, V)
        x0 = jnp.dot(onehot, tok_ref[...],
                     preferred_element_type=jnp.float32)         # (R, E)
        x_scr[...] = x0.reshape(L, N, E) + pos_ref[...][None, :, :]

    x2 = x_scr[...].reshape(R, E)                                # f32 activation carry
    hm = hm_ref[...]                                             # (E, H) bf16, pre-scaled 1/sqrt(Dh)
    hmt = hmt_ref[...]                                           # (H, E) bf16

    # ---- multi-head self-attention (post-LN encoder layer) ----
    qkv = jnp.dot(x2.astype(jnp.bfloat16), wqkv_ref[...],
                  preferred_element_type=jnp.float32) + bqkv_ref[...]
    q, k, v = qkv[:, :E], qkv[:, E:2 * E], qkv[:, 2 * E:]        # 128-lane aligned slices
    qr = q.reshape(L, N, E)
    kr = k.reshape(L, N, E)
    vr = v.reshape(L, N, E)

    # All (query l, key m) elementwise products stacked -> ONE aligned bf16 MXU dot against the
    # 0/1 head-membership matrix gives all per-head scores (scale folded into hm).
    prod_all = jnp.concatenate(
        [(qr * kr[m][None, :, :]).reshape(R, E) for m in range(L)], axis=0)   # (L*R, E)
    s_all = jnp.dot(prod_all.astype(jnp.bfloat16), hm,
                    preferred_element_type=jnp.float32)                       # (L*R, H)
    s_per_m = [s_all[m * R:(m + 1) * R] for m in range(L)]

    smax = s_per_m[0]
    for m in range(1, L):
        smax = jnp.maximum(smax, s_per_m[m])
    p_per_m = [jnp.exp(sm - smax) for sm in s_per_m]
    denom = p_per_m[0]
    for m in range(1, L):
        denom = denom + p_per_m[m]
    inv = pl.reciprocal(denom, approx=True)                      # EUP slot

    # Spread per-head softmax weights across their Dh lanes with ONE bf16 MXU dot.
    w_all = jnp.concatenate([pm * inv for pm in p_per_m], axis=0)             # (L*R, H)
    wfull_all = jnp.dot(w_all.astype(jnp.bfloat16), hmt,
                        preferred_element_type=jnp.float32)                   # (L*R, E)

    o = jnp.zeros((L, N, E), jnp.float32)
    for m in range(L):
        o = o + wfull_all[m * R:(m + 1) * R].reshape(L, N, E) * vr[m][None, :, :]

    attn = jnp.dot(o.reshape(R, E).astype(jnp.bfloat16), wo_ref[...],
                   preferred_element_type=jnp.float32) + bo_ref[...]

    # TODO(synk): dropout (p=0.1) omitted -- eval-mode (identity) semantics.
    y = _layer_norm(x2 + attn, ln1w_ref[...], ln1b_ref[...])

    # ---- feed-forward (dim_feedforward, ReLU) ----
    h = jnp.dot(y.astype(jnp.bfloat16), w1_ref[...],
                preferred_element_type=jnp.float32) + b1_ref[...]
    h = jnp.maximum(h, 0.0).astype(jnp.bfloat16)                 # shrink live (R, F) bytes
    f = jnp.dot(h, w2_ref[...],
                preferred_element_type=jnp.float32) + b2_ref[...]
    x_new = _layer_norm(y + f, ln2w_ref[...], ln2b_ref[...]).reshape(L, N, E)

    x_scr[...] = x_new                                           # carry to next layer

    @pl.when(layer == last)
    def _final():
        o_ref[...] = x_new


def text_encoder_forward(input_ids, params, num_heads):
    B, S = input_ids.shape
    V, E = params['tok_emb'].shape
    F = params['w1_t'].shape[-1]
    H = num_heads
    Dh = E // H
    num_layers = params['wqkv_t'].shape[0]
    R = B * S
    scale = 1.0 / float(Dh) ** 0.5

    ids = input_ids.reshape(R, 1).astype(jnp.int32)
    pos = params['pos_emb'][0, :S, :]                            # (S, E)

    # constant head-membership matrices (lane e -> head e//Dh); scale folded into hm
    head_of_lane = jnp.arange(E, dtype=jnp.int32) // Dh
    onehot = (head_of_lane[:, None] == jnp.arange(H, dtype=jnp.int32)[None, :]
              ).astype(jnp.float32)                              # (E, H)
    hm = (onehot * scale).astype(jnp.bfloat16)
    hmt = jnp.transpose(onehot).astype(jnp.bfloat16)             # (H, E)

    def const_spec(shape):
        nd = len(shape)
        return pl.BlockSpec(shape, lambda l: (0,) * nd)

    def layer_spec(shape):  # shape excludes the leading per-layer dim (squeezed)
        nd = len(shape)
        return pl.BlockSpec((pl.Squeezed(),) + shape, lambda l: (l,) + (0,) * nd)

    flops = int(num_layers * (2 * R * E * (3 * E)    # qkv proj
                              + 2 * R * E * E        # out proj
                              + 4 * R * E * F        # ffn
                              + 8 * B * R * E))      # attention (approx)
    transcendentals = int(num_layers * (B * R * H + 8 * R))
    bytes_accessed = int(num_layers * 2 * (E * 3 * E + E * E + 2 * E * F)   # bf16 weights
                         + num_layers * 4 * (4 * E + F + 5 * E)             # f32 biases/LN
                         + 4 * (V * E + S * E + 2 * B * S * E))             # table/pos/act

    grid_spec = pltpu.PrefetchScalarGridSpec(
        num_scalar_prefetch=0,
        grid=(num_layers,),
        in_specs=[
            const_spec((R, 1)),            # input ids
            const_spec((V, E)),            # token embedding table
            const_spec((S, E)),            # positional embeddings
            const_spec((E, H)),            # hm (scaled)
            const_spec((H, E)),            # hmt
            layer_spec((E, 3 * E)),        # wqkv_t
            layer_spec((1, 3 * E)),        # bqkv
            layer_spec((E, E)),            # wo_t
            layer_spec((1, E)),            # bo
            layer_spec((1, E)),            # ln1_w
            layer_spec((1, E)),            # ln1_b
            layer_spec((E, F)),            # w1_t
            layer_spec((1, F)),            # b1
            layer_spec((F, E)),            # w2_t
            layer_spec((1, E)),            # b2
            layer_spec((1, E)),            # ln2_w
            layer_spec((1, E)),            # ln2_b
        ],
        out_specs=pl.BlockSpec((B, S, E), lambda l: (0, 0, 0)),
        scratch_shapes=[pltpu.VMEM((B, S, E), jnp.float32)],     # activation carry
    )

    return pl.pallas_call(
        _text_encoder_kernel,
        out_shape=jax.ShapeDtypeStruct((B, S, E), jnp.float32),
        grid_spec=grid_spec,
        compiler_params=pltpu.CompilerParams(dimension_semantics=("arbitrary",)),
        cost_estimate=pl.CostEstimate(flops=flops,
                                      transcendentals=transcendentals,
                                      bytes_accessed=bytes_accessed),
    )(ids, params['tok_emb'], pos, hm, hmt,
      params['wqkv_t'], params['bqkv'], params['wo_t'], params['bo'],
      params['ln1_w'], params['ln1_b'],
      params['w1_t'], params['b1'], params['w2_t'], params['b2'],
      params['ln2_w'], params['ln2_b'])


# ------------------------- parameter init (deterministic) -------------------------
def init_params(key, vocab_size, embed_dim, max_seq_len, num_layers, dim_ff=2048):
    E, F = embed_dim, dim_ff
    keys = jax.random.split(key, 2 + num_layers)
    tok_emb = jax.random.normal(keys[0], (vocab_size, E), jnp.float32)      # nn.Embedding ~ N(0,1)
    pos_emb = jax.random.normal(keys[1], (1, max_seq_len, E), jnp.float32)  # torch.randn

    def uniform(k, shape, fan_in):
        bound = 1.0 / (fan_in ** 0.5)
        return jax.random.uniform(k, shape, jnp.float32, -bound, bound)

    acc = {name: [] for name in
           ('wqkv_t', 'bqkv', 'wo_t', 'bo', 'ln1_w', 'ln1_b',
            'w1_t', 'b1', 'w2_t', 'b2', 'ln2_w', 'ln2_b')}
    for i in range(num_layers):
        ks = jax.random.split(keys[2 + i], 8)
        wqkv = uniform(ks[0], (3 * E, E), E)          # in_proj_weight (3E, E)
        wo = uniform(ks[2], (E, E), E)                # out_proj.weight (E, E)
        w1 = uniform(ks[4], (F, E), E)                # linear1.weight (F, E)
        w2 = uniform(ks[6], (E, F), F)                # linear2.weight (E, F)
        acc['wqkv_t'].append(wqkv.T.astype(jnp.bfloat16))
        acc['bqkv'].append(uniform(ks[1], (3 * E,), E).reshape(1, 3 * E))
        acc['wo_t'].append(wo.T.astype(jnp.bfloat16))
        acc['bo'].append(uniform(ks[3], (E,), E).reshape(1, E))
        acc['w1_t'].append(w1.T.astype(jnp.bfloat16))
        acc['b1'].append(uniform(ks[5], (F,), E).reshape(1, F))
        acc['w2_t'].append(w2.T.astype(jnp.bfloat16))
        acc['b2'].append(uniform(ks[7], (E,), F).reshape(1, E))
        acc['ln1_w'].append(jnp.ones((1, E), jnp.float32))
        acc['ln1_b'].append(jnp.zeros((1, E), jnp.float32))
        acc['ln2_w'].append(jnp.ones((1, E), jnp.float32))
        acc['ln2_b'].append(jnp.zeros((1, E), jnp.float32))

    params = {k: jnp.stack(v, axis=0) for k, v in acc.items()}
    params['tok_emb'] = tok_emb
    params['pos_emb'] = pos_emb
    return params


# ------------------------- pure-JAX reference (for sanity check) -------------------------
def ref_forward(input_ids, params, H):
    x = jnp.take(params['tok_emb'], input_ids, axis=0) \
        + params['pos_emb'][:, :input_ids.shape[1], :]
    L, N, E = x.shape
    num_layers = params['wqkv_t'].shape[0]
    Dh = E // H

    def ln(t, w, b):
        mu = t.mean(-1, keepdims=True)
        var = ((t - mu) ** 2).mean(-1, keepdims=True)
        return (t - mu) / jnp.sqrt(var + EPS) * w + b

    for i in range(num_layers):
        wqkv_t = params['wqkv_t'][i].astype(jnp.float32)
        wo_t = params['wo_t'][i].astype(jnp.float32)
        w1_t = params['w1_t'][i].astype(jnp.float32)
        w2_t = params['w2_t'][i].astype(jnp.float32)

        x2 = x.reshape(L * N, E)
        qkv = x2 @ wqkv_t + params['bqkv'][i]
        q, k, v = jnp.split(qkv, 3, axis=-1)

        def heads(t):
            return t.reshape(L, N, H, Dh).transpose(1, 2, 0, 3)   # (N, H, L, Dh)

        qh, kh, vh = heads(q), heads(k), heads(v)
        s = jnp.einsum('nhld,nhmd->nhlm', qh, kh) / (Dh ** 0.5)
        pr = jax.nn.softmax(s, axis=-1)
        o = jnp.einsum('nhlm,nhmd->nhld', pr, vh)
        o = o.transpose(2, 0, 1, 3).reshape(L * N, E)
        attn = o @ wo_t + params['bo'][i]

        y = ln(x2 + attn, params['ln1_w'][i], params['ln1_b'][i])
        f = jax.nn.relu(y @ w1_t + params['b1'][i]) @ w2_t + params['b2'][i]
        z = ln(y + f, params['ln2_w'][i], params['ln2_b'][i])
        x = z.reshape(L, N, E)
    return x


if __name__ == "__main__":
    vocab_size, embed_dim, max_seq_len, num_layers, num_heads = 50, 256, 32, 2, 4
    B, S = 2, 8

    key = jax.random.PRNGKey(0)
    pkey, dkey = jax.random.split(key)
    params = init_params(pkey, vocab_size, embed_dim, max_seq_len, num_layers)
    input_ids = jax.random.randint(dkey, (B, S), 0, vocab_size, dtype=jnp.int32)

    out = jax.block_until_ready(text_encoder_forward(input_ids, params, num_heads))

    assert out.shape == (B, S, embed_dim), out.shape
    assert bool(jnp.all(jnp.isfinite(out)))

    ref = jax.block_until_ready(ref_forward(input_ids, params, num_heads))
    assert bool(jnp.allclose(out, ref, rtol=5e-2, atol=5e-2)), \
        float(jnp.max(jnp.abs(out - ref)))

    print("KERNEL_OK")
</pallas_src>

<mosaic_0001>
module attributes {stable_mosaic.version = 11 : i64} {
  func.func @_text_encoder_kernel(%arg0: i32, %arg1: memref<16x1xi32, #tpu.memory_space<vmem>>, %arg2: memref<50x256xf32, #tpu.memory_space<vmem>>, %arg3: memref<8x256xf32, #tpu.memory_space<vmem>>, %arg4: memref<256x4xbf16, #tpu.memory_space<vmem>>, %arg5: memref<4x256xbf16, #tpu.memory_space<vmem>>, %arg6: memref<1x256x768xbf16, #tpu.memory_space<vmem>>, %arg7: memref<1x1x768xf32, #tpu.memory_space<vmem>>, %arg8: memref<1x256x256xbf16, #tpu.memory_space<vmem>>, %arg9: memref<1x1x256xf32, #tpu.memory_space<vmem>>, %arg10: memref<1x1x256xf32, #tpu.memory_space<vmem>>, %arg11: memref<1x1x256xf32, #tpu.memory_space<vmem>>, %arg12: memref<1x256x2048xbf16, #tpu.memory_space<vmem>>, %arg13: memref<1x1x2048xf32, #tpu.memory_space<vmem>>, %arg14: memref<1x2048x256xbf16, #tpu.memory_space<vmem>>, %arg15: memref<1x1x256xf32, #tpu.memory_space<vmem>>, %arg16: memref<1x1x256xf32, #tpu.memory_space<vmem>>, %arg17: memref<1x1x256xf32, #tpu.memory_space<vmem>>, %arg18: memref<2x8x256xf32, #tpu.memory_space<vmem>>, %arg19: memref<2x8x256xf32, #tpu.memory_space<vmem>>) attributes {dimension_semantics = [#tpu.dimension_semantics<arbitrary>], iteration_bounds = array<i64: 2>, scalar_prefetch = 0 : i64, scratch_operands = 1 : i64, tpu.core_type = #tpu.core_type<tc>, window_params = [{pipeline_mode = #tpu.pipeline_mode<synchronous>, transform_indices = @transform_0, window_bounds = array<i64: 16, 1>}, {pipeline_mode = #tpu.pipeline_mode<synchronous>, transform_indices = @transform_1, window_bounds = array<i64: 50, 256>}, {pipeline_mode = #tpu.pipeline_mode<synchronous>, transform_indices = @transform_2, window_bounds = array<i64: 8, 256>}, {pipeline_mode = #tpu.pipeline_mode<synchronous>, transform_indices = @transform_3, window_bounds = array<i64: 256, 4>}, {pipeline_mode = #tpu.pipeline_mode<synchronous>, transform_indices = @transform_4, window_bounds = array<i64: 4, 256>}, {transform_indices = @transform_5, window_bounds = array<i64: 1, 256, 768>}, {transform_indices = @transform_6, window_bounds = array<i64: 1, 1, 768>}, {transform_indices = @transform_7, window_bounds = array<i64: 1, 256, 256>}, {transform_indices = @transform_8, window_bounds = array<i64: 1, 1, 256>}, {transform_indices = @transform_9, window_bounds = array<i64: 1, 1, 256>}, {transform_indices = @transform_10, window_bounds = array<i64: 1, 1, 256>}, {transform_indices = @transform_11, window_bounds = array<i64: 1, 256, 2048>}, {transform_indices = @transform_12, window_bounds = array<i64: 1, 1, 2048>}, {transform_indices = @transform_13, window_bounds = array<i64: 1, 2048, 256>}, {transform_indices = @transform_14, window_bounds = array<i64: 1, 1, 256>}, {transform_indices = @transform_15, window_bounds = array<i64: 1, 1, 256>}, {transform_indices = @transform_16, window_bounds = array<i64: 1, 1, 256>}, {pipeline_mode = #tpu.pipeline_mode<synchronous>, transform_indices = @transform_17, window_bounds = array<i64: 2, 8, 256>}]} {
    %c0_i32 = arith.constant 0 : i32
    %0 = arith.cmpi eq, %arg0, %c0_i32 : i32
    %1 = arith.extui %0 : i1 to i32
    %c0_i32_0 = arith.constant 0 : i32
    %2 = arith.cmpi ne, %1, %c0_i32_0 : i32
    scf.if %2 {
      %c0_64 = arith.constant 0 : index
      %c0_65 = arith.constant 0 : index
      %149 = vector.load %arg1[%c0_64, %c0_65] : memref<16x1xi32, #tpu.memory_space<vmem>>, vector<16x1xi32>
      %150 = tpu.iota {dimensions = array<i32: 1>} : vector<16x50xi32>
      %151 = vector.broadcast %149 : vector<16x1xi32> to vector<16x50xi32>
      %152 = arith.cmpi eq, %151, %150 : vector<16x50xi32>
      %153 = arith.extui %152 : vector<16x50xi1> to vector<16x50xi32>
      %154 = arith.sitofp %153 : vector<16x50xi32> to vector<16x50xf32>
      %c0_66 = arith.constant 0 : index
      %c0_67 = arith.constant 0 : index
      %155 = vector.load %arg2[%c0_66, %c0_67] : memref<50x256xf32, #tpu.memory_space<vmem>>, vector<50x256xf32>
      %cst_68 = arith.constant dense<0.000000e+00> : vector<16x256xf32>
      %156 = tpu.matmul %154, %155, %cst_68 {dimension_numbers = #tpu.dot_dimension_numbers<[1], [0], [0], [1], [0, 0, 1, 1], [], []>} : vector<16x50xf32>, vector<50x256xf32>, vector<16x256xf32> -> vector<16x256xf32>
      %157 = vector.shape_cast %156 : vector<16x256xf32> to vector<2x8x256xf32>
      %c0_69 = arith.constant 0 : index
      %c0_70 = arith.constant 0 : index
      %158 = vector.load %arg3[%c0_69, %c0_70] : memref<8x256xf32, #tpu.memory_space<vmem>>, vector<8x256xf32>
      %159 = vector.shape_cast %158 : vector<8x256xf32> to vector<1x8x256xf32>
      %160 = vector.broadcast %159 : vector<1x8x256xf32> to vector<2x8x256xf32>
      %161 = arith.addf %157, %160 : vector<2x8x256xf32>
      %c0_71 = arith.constant 0 : index
      %c0_72 = arith.constant 0 : index
      %c0_73 = arith.constant 0 : index
      %162 = vector.load %arg19[%c0_71, %c0_72, %c0_73] : memref<2x8x256xf32, #tpu.memory_space<vmem>>, vector<2x8x256xf32>
      tpu.vector_store %arg19[%c0_71, %c0_72, %c0_73], %161 {strides = array<i32>} : memref<2x8x256xf32, #tpu.memory_space<vmem>>, vector<2x8x256xf32>,
    } else {
    }
    %c0 = arith.constant 0 : index
    %c0_1 = arith.constant 0 : index
    %c0_2 = arith.constant 0 : index
    %3 = vector.load %arg19[%c0, %c0_1, %c0_2] : memref<2x8x256xf32, #tpu.memory_space<vmem>>, vector<2x8x256xf32>
    %4 = vector.shape_cast %3 : vector<2x8x256xf32> to vector<16x256xf32>
    %c0_3 = arith.constant 0 : index
    %c0_4 = arith.constant 0 : index
    %5 = vector.load %arg4[%c0_3, %c0_4] : memref<256x4xbf16, #tpu.memory_space<vmem>>, vector<256x4xbf16>
    %c0_5 = arith.constant 0 : index
    %c0_6 = arith.constant 0 : index
    %6 = vector.load %arg5[%c0_5, %c0_6] : memref<4x256xbf16, #tpu.memory_space<vmem>>, vector<4x256xbf16>
    %7 = arith.truncf %4 : vector<16x256xf32> to vector<16x256xbf16>
    %c0_7 = arith.constant 0 : index
    %c0_8 = arith.constant 0 : index
    %c0_9 = arith.constant 0 : index
    %8 = vector.load %arg6[%c0_7, %c0_8, %c0_9] : memref<1x256x768xbf16, #tpu.memory_space<vmem>>, vector<1x256x768xbf16>
    %9 = vector.shape_cast %8 : vector<1x256x768xbf16> to vector<256x768xbf16>
    %cst = arith.constant dense<0.000000e+00> : vector<16x768xf32>
    %10 = tpu.matmul %7, %9, %cst {dimension_numbers = #tpu.dot_dimension_numbers<[1], [0], [0], [1], [0, 0, 1, 1], [], []>} : vector<16x256xbf16>, vector<256x768xbf16>, vector<16x768xf32> -> vector<16x768xf32>
    %c0_10 = arith.constant 0 : index
    %c0_11 = arith.constant 0 : index
    %c0_12 = arith.constant 0 : index
    %11 = vector.load %arg7[%c0_10, %c0_11, %c0_12] : memref<1x1x768xf32, #tpu.memory_space<vmem>>, vector<1x1x768xf32>
    %12 = vector.shape_cast %11 : vector<1x1x768xf32> to vector<1x768xf32>
    %13 = vector.broadcast %12 : vector<1x768xf32> to vector<16x768xf32>
    %14 = arith.addf %10, %13 : vector<16x768xf32>
    %15 = vector.extract_strided_slice %14 {offsets = [0, 0], sizes = [16, 256], strides = [1, 1]} : vector<16x768xf32> to vector<16x256xf32>
    %16 = vector.extract_strided_slice %14 {offsets = [0, 256], sizes = [16, 256], strides = [1, 1]} : vector<16x768xf32> to vector<16x256xf32>
    %17 = vector.extract_strided_slice %14 {offsets = [0, 512], sizes = [16, 256], strides = [1, 1]} : vector<16x768xf32> to vector<16x256xf32>
    %18 = vector.shape_cast %15 : vector<16x256xf32> to vector<2x8x256xf32>
    %19 = vector.shape_cast %16 : vector<16x256xf32> to vector<2x8x256xf32>
    %20 = vector.shape_cast %17 : vector<16x256xf32> to vector<2x8x256xf32>
    %21 = vector.extract_strided_slice %19 {offsets = [0, 0, 0], sizes = [1, 8, 256], strides = [1, 1, 1]} : vector<2x8x256xf32> to vector<1x8x256xf32>
    %22 = vector.shape_cast %21 : vector<1x8x256xf32> to vector<8x256xf32>
    %23 = vector.shape_cast %22 : vector<8x256xf32> to vector<1x8x256xf32>
    %24 = vector.broadcast %23 : vector<1x8x256xf32> to vector<2x8x256xf32>
    %25 = arith.mulf %18, %24 : vector<2x8x256xf32>
    %26 = vector.shape_cast %25 : vector<2x8x256xf32> to vector<16x256xf32>
    %27 = vector.extract_strided_slice %19 {offsets = [1, 0, 0], sizes = [1, 8, 256], strides = [1, 1, 1]} : vector<2x8x256xf32> to vector<1x8x256xf32>
    %28 = vector.shape_cast %27 : vector<1x8x256xf32> to vector<8x256xf32>
    %29 = vector.shape_cast %28 : vector<8x256xf32> to vector<1x8x256xf32>
    %30 = vector.broadcast %29 : vector<1x8x256xf32> to vector<2x8x256xf32>
    %31 = arith.mulf %18, %30 : vector<2x8x256xf32>
    %32 = vector.shape_cast %31 : vector<2x8x256xf32> to vector<16x256xf32>
    %33 = tpu.concatenate %26, %32 in 0 : vector<16x256xf32>, vector<16x256xf32> -> vector<32x256xf32>
    %34 = arith.truncf %33 : vector<32x256xf32> to vector<32x256xbf16>
    %cst_13 = arith.constant dense<0.000000e+00> : vector<32x4xf32>
    %35 = tpu.matmul %34, %5, %cst_13 {dimension_numbers = #tpu.dot_dimension_numbers<[1], [0], [0], [1], [0, 0, 1, 1], [], []>} : vector<32x256xbf16>, vector<256x4xbf16>, vector<32x4xf32> -> vector<32x4xf32>
    %36 = vector.extract_strided_slice %35 {offsets = [0, 0], sizes = [16, 4], strides = [1, 1]} : vector<32x4xf32> to vector<16x4xf32>
    %37 = vector.extract_strided_slice %35 {offsets = [16, 0], sizes = [16, 4], strides = [1, 1]} : vector<32x4xf32> to vector<16x4xf32>
    %38 = arith.maximumf %36, %37 : vector<16x4xf32>
    %39 = arith.subf %36, %38 : vector<16x4xf32>
    %40 = math.exp %39 : vector<16x4xf32>
    %41 = arith.subf %37, %38 : vector<16x4xf32>
    %42 = math.exp %41 : vector<16x4xf32>
    %43 = arith.addf %40, %42 : vector<16x4xf32>
    %44 = tpu.reciprocal %43 {approx = true} : vector<16x4xf32> -> vector<16x4xf32>
    %45 = arith.mulf %40, %44 : vector<16x4xf32>
    %46 = arith.mulf %42, %44 : vector<16x4xf32>
    %47 = tpu.concatenate %45, %46 in 0 : vector<16x4xf32>, vector<16x4xf32> -> vector<32x4xf32>
    %48 = arith.truncf %47 : vector<32x4xf32> to vector<32x4xbf16>
    %cst_14 = arith.constant dense<0.000000e+00> : vector<32x256xf32>
    %49 = tpu.matmul %48, %6, %cst_14 {dimension_numbers = #tpu.dot_dimension_numbers<[1], [0], [0], [1], [0, 0, 1, 1], [], []>} : vector<32x4xbf16>, vector<4x256xbf16>, vector<32x256xf32> -> vector<32x256xf32>
    %cst_15 = arith.constant 0.000000e+00 : f32
    %50 = vector.broadcast %cst_15 : f32 to vector<2x8x256xf32>
    %51 = vector.extract_strided_slice %49 {offsets = [0, 0], sizes = [16, 256], strides = [1, 1]} : vector<32x256xf32> to vector<16x256xf32>
    %52 = vector.shape_cast %51 : vector<16x256xf32> to vector<2x8x256xf32>
    %53 = vector.extract_strided_slice %20 {offsets = [0, 0, 0], sizes = [1, 8, 256], strides = [1, 1, 1]} : vector<2x8x256xf32> to vector<1x8x256xf32>
    %54 = vector.shape_cast %53 : vector<1x8x256xf32> to vector<8x256xf32>
    %55 = vector.shape_cast %54 : vector<8x256xf32> to vector<1x8x256xf32>
    %56 = vector.broadcast %55 : vector<1x8x256xf32> to vector<2x8x256xf32>
    %57 = arith.mulf %52, %56 : vector<2x8x256xf32>
    %58 = arith.addf %50, %57 : vector<2x8x256xf32>
    %59 = vector.extract_strided_slice %49 {offsets = [16, 0], sizes = [16, 256], strides = [1, 1]} : vector<32x256xf32> to vector<16x256xf32>
    %60 = vector.shape_cast %59 : vector<16x256xf32> to vector<2x8x256xf32>
    %61 = vector.extract_strided_slice %20 {offsets = [1, 0, 0], sizes = [1, 8, 256], strides = [1, 1, 1]} : vector<2x8x256xf32> to vector<1x8x256xf32>
    %62 = vector.shape_cast %61 : vector<1x8x256xf32> to vector<8x256xf32>
    %63 = vector.shape_cast %62 : vector<8x256xf32> to vector<1x8x256xf32>
    %64 = vector.broadcast %63 : vector<1x8x256xf32> to vector<2x8x256xf32>
    %65 = arith.mulf %60, %64 : vector<2x8x256xf32>
    %66 = arith.addf %58, %65 : vector<2x8x256xf32>
    %67 = vector.shape_cast %66 : vector<2x8x256xf32> to vector<16x256xf32>
    %68 = arith.truncf %67 : vector<16x256xf32> to vector<16x256xbf16>
    %c0_16 = arith.constant 0 : index
    %c0_17 = arith.constant 0 : index
    %c0_18 = arith.constant 0 : index
    %69 = vector.load %arg8[%c0_16, %c0_17, %c0_18] : memref<1x256x256xbf16, #tpu.memory_space<vmem>>, vector<1x256x256xbf16>
    %70 = vector.shape_cast %69 : vector<1x256x256xbf16> to vector<256x256xbf16>
    %cst_19 = arith.constant dense<0.000000e+00> : vector<16x256xf32>
    %71 = tpu.matmul %68, %70, %cst_19 {dimension_numbers = #tpu.dot_dimension_numbers<[1], [0], [0], [1], [0, 0, 1, 1], [], []>} : vector<16x256xbf16>, vector<256x256xbf16>, vector<16x256xf32> -> vector<16x256xf32>
    %c0_20 = arith.constant 0 : index
    %c0_21 = arith.constant 0 : index
    %c0_22 = arith.constant 0 : index
    %72 = vector.load %arg9[%c0_20, %c0_21, %c0_22] : memref<1x1x256xf32, #tpu.memory_space<vmem>>, vector<1x1x256xf32>
    %73 = vector.shape_cast %72 : vector<1x1x256xf32> to vector<1x256xf32>
    %74 = vector.broadcast %73 : vector<1x256xf32> to vector<16x256xf32>
    %75 = arith.addf %71, %74 : vector<16x256xf32>
    %76 = arith.addf %4, %75 : vector<16x256xf32>
    %c0_23 = arith.constant 0 : index
    %c0_24 = arith.constant 0 : index
    %c0_25 = arith.constant 0 : index
    %77 = vector.load %arg10[%c0_23, %c0_24, %c0_25] : memref<1x1x256xf32, #tpu.memory_space<vmem>>, vector<1x1x256xf32>
    %78 = vector.shape_cast %77 : vector<1x1x256xf32> to vector<1x256xf32>
    %c0_26 = arith.constant 0 : index
    %c0_27 = arith.constant 0 : index
    %c0_28 = arith.constant 0 : index
    %79 = vector.load %arg11[%c0_26, %c0_27, %c0_28] : memref<1x1x256xf32, #tpu.memory_space<vmem>>, vector<1x1x256xf32>
    %80 = vector.shape_cast %79 : vector<1x1x256xf32> to vector<1x256xf32>
    %cst_29 = arith.constant dense<0.000000e+00> : vector<16xf32>
    %81 = vector.multi_reduction <add>, %76, %cst_29 [1] : vector<16x256xf32> to vector<16xf32>
    %82 = vector.shape_cast %81 : vector<16xf32> to vector<16x1xf32>
    %cst_30 = arith.constant 2.560000e+02 : f32
    %83 = vector.broadcast %cst_30 : f32 to vector<16x1xf32>
    %84 = arith.divf %82, %83 : vector<16x1xf32>
    %85 = vector.broadcast %84 : vector<16x1xf32> to vector<16x256xf32>
    %86 = arith.subf %76, %85 : vector<16x256xf32>
    %87 = arith.mulf %86, %86 : vector<16x256xf32>
    %cst_31 = arith.constant dense<0.000000e+00> : vector<16xf32>
    %88 = vector.multi_reduction <add>, %87, %cst_31 [1] : vector<16x256xf32> to vector<16xf32>
    %89 = vector.shape_cast %88 : vector<16xf32> to vector<16x1xf32>
    %cst_32 = arith.constant 2.560000e+02 : f32
    %90 = vector.broadcast %cst_32 : f32 to vector<16x1xf32>
    %91 = arith.divf %89, %90 : vector<16x1xf32>
    %cst_33 = arith.constant 9.99999974E-6 : f32
    %92 = vector.broadcast %cst_33 : f32 to vector<16x1xf32>
    %93 = arith.addf %91, %92 : vector<16x1xf32>
    %94 = math.rsqrt %93 : vector<16x1xf32>
    %95 = vector.broadcast %94 : vector<16x1xf32> to vector<16x256xf32>
    %96 = arith.mulf %86, %95 : vector<16x256xf32>
    %97 = vector.broadcast %78 : vector<1x256xf32> to vector<16x256xf32>
    %98 = arith.mulf %96, %97 : vector<16x256xf32>
    %99 = vector.broadcast %80 : vector<1x256xf32> to vector<16x256xf32>
    %100 = arith.addf %98, %99 : vector<16x256xf32>
    %101 = arith.truncf %100 : vector<16x256xf32> to vector<16x256xbf16>
    %c0_34 = arith.constant 0 : index
    %c0_35 = arith.constant 0 : index
    %c0_36 = arith.constant 0 : index
    %102 = vector.load %arg12[%c0_34, %c0_35, %c0_36] : memref<1x256x2048xbf16, #tpu.memory_space<vmem>>, vector<1x256x2048xbf16>
    %103 = vector.shape_cast %102 : vector<1x256x2048xbf16> to vector<256x2048xbf16>
    %cst_37 = arith.constant dense<0.000000e+00> : vector<16x2048xf32>
    %104 = tpu.matmul %101, %103, %cst_37 {dimension_numbers = #tpu.dot_dimension_numbers<[1], [0], [0], [1], [0, 0, 1, 1], [], []>} : vector<16x256xbf16>, vector<256x2048xbf16>, vector<16x2048xf32> -> vector<16x2048xf32>
    %c0_38 = arith.constant 0 : index
    %c0_39 = arith.constant 0 : index
    %c0_40 = arith.constant 0 : index
    %105 = vector.load %arg13[%c0_38, %c0_39, %c0_40] : memref<1x1x2048xf32, #tpu.memory_space<vmem>>, vector<1x1x2048xf32>
    %106 = vector.shape_cast %105 : vector<1x1x2048xf32> to vector<1x2048xf32>
    %107 = vector.broadcast %106 : vector<1x2048xf32> to vector<16x2048xf32>
    %108 = arith.addf %104, %107 : vector<16x2048xf32>
    %cst_41 = arith.constant 0.000000e+00 : f32
    %109 = vector.broadcast %cst_41 : f32 to vector<16x2048xf32>
    %110 = arith.maximumf %108, %109 : vector<16x2048xf32>
    %111 = arith.truncf %110 : vector<16x2048xf32> to vector<16x2048xbf16>
    %c0_42 = arith.constant 0 : index
    %c0_43 = arith.constant 0 : index
    %c0_44 = arith.constant 0 : index
    %112 = vector.load %arg14[%c0_42, %c0_43, %c0_44] : memref<1x2048x256xbf16, #tpu.memory_space<vmem>>, vector<1x2048x256xbf16>
    %113 = vector.shape_cast %112 : vector<1x2048x256xbf16> to vector<2048x256xbf16>
    %cst_45 = arith.constant dense<0.000000e+00> : vector<16x256xf32>
    %114 = tpu.matmul %111, %113, %cst_45 {dimension_numbers = #tpu.dot_dimension_numbers<[1], [0], [0], [1], [0, 0, 1, 1], [], []>} : vector<16x2048xbf16>, vector<2048x256xbf16>, vector<16x256xf32> -> vector<16x256xf32>
    %c0_46 = arith.constant 0 : index
    %c0_47 = arith.constant 0 : index
    %c0_48 = arith.constant 0 : index
    %115 = vector.load %arg15[%c0_46, %c0_47, %c0_48] : memref<1x1x256xf32, #tpu.memory_space<vmem>>, vector<1x1x256xf32>
    %116 = vector.shape_cast %115 : vector<1x1x256xf32> to vector<1x256xf32>
    %117 = vector.broadcast %116 : vector<1x256xf32> to vector<16x256xf32>
    %118 = arith.addf %114, %117 : vector<16x256xf32>
    %119 = arith.addf %100, %118 : vector<16x256xf32>
    %c0_49 = arith.constant 0 : index
    %c0_50 = arith.constant 0 : index
    %c0_51 = arith.constant 0 : index
    %120 = vector.load %arg16[%c0_49, %c0_50, %c0_51] : memref<1x1x256xf32, #tpu.memory_space<vmem>>, vector<1x1x256xf32>
    %121 = vector.shape_cast %120 : vector<1x1x256xf32> to vector<1x256xf32>
    %c0_52 = arith.constant 0 : index
    %c0_53 = arith.constant 0 : index
    %c0_54 = arith.constant 0 : index
    %122 = vector.load %arg17[%c0_52, %c0_53, %c0_54] : memref<1x1x256xf32, #tpu.memory_space<vmem>>, vector<1x1x256xf32>
    %123 = vector.shape_cast %122 : vector<1x1x256xf32> to vector<1x256xf32>
    %cst_55 = arith.constant dense<0.000000e+00> : vector<16xf32>
    %124 = vector.multi_reduction <add>, %119, %cst_55 [1] : vector<16x256xf32> to vector<16xf32>
    %125 = vector.shape_cast %124 : vector<16xf32> to vector<16x1xf32>
    %cst_56 = arith.constant 2.560000e+02 : f32
    %126 = vector.broadcast %cst_56 : f32 to vector<16x1xf32>
    %127 = arith.divf %125, %126 : vector<16x1xf32>
    %128 = vector.broadcast %127 : vector<16x1xf32> to vector<16x256xf32>
    %129 = arith.subf %119, %128 : vector<16x256xf32>
    %130 = arith.mulf %129, %129 : vector<16x256xf32>
    %cst_57 = arith.constant dense<0.000000e+00> : vector<16xf32>
    %131 = vector.multi_reduction <add>, %130, %cst_57 [1] : vector<16x256xf32> to vector<16xf32>
    %132 = vector.shape_cast %131 : vector<16xf32> to vector<16x1xf32>
    %cst_58 = arith.constant 2.560000e+02 : f32
    %133 = vector.broadcast %cst_58 : f32 to vector<16x1xf32>
    %134 = arith.divf %132, %133 : vector<16x1xf32>
    %cst_59 = arith.constant 9.99999974E-6 : f32
    %135 = vector.broadcast %cst_59 : f32 to vector<16x1xf32>
    %136 = arith.addf %134, %135 : vector<16x1xf32>
    %137 = math.rsqrt %136 : vector<16x1xf32>
    %138 = vector.broadcast %137 : vector<16x1xf32> to vector<16x256xf32>
    %139 = arith.mulf %129, %138 : vector<16x256xf32>
    %140 = vector.broadcast %121 : vector<1x256xf32> to vector<16x256xf32>
    %141 = arith.mulf %139, %140 : vector<16x256xf32>
    %142 = vector.broadcast %123 : vector<1x256xf32> to vector<16x256xf32>
    %143 = arith.addf %141, %142 : vector<16x256xf32>
    %144 = vector.shape_cast %143 : vector<16x256xf32> to vector<2x8x256xf32>
    %c0_60 = arith.constant 0 : index
    %c0_61 = arith.constant 0 : index
    %c0_62 = arith.constant 0 : index
    %145 = vector.load %arg19[%c0_60, %c0_61, %c0_62] : memref<2x8x256xf32, #tpu.memory_space<vmem>>, vector<2x8x256xf32>
    tpu.vector_store %arg19[%c0_60, %c0_61, %c0_62], %144 {strides = array<i32>} : memref<2x8x256xf32, #tpu.memory_space<vmem>>, vector<2x8x256xf32>,
    %c1_i32 = arith.constant 1 : i32
    %146 = arith.cmpi eq, %arg0, %c1_i32 : i32
    %147 = arith.extui %146 : i1 to i32
    %c0_i32_63 = arith.constant 0 : i32
    %148 = arith.cmpi ne, %147, %c0_i32_63 : i32
    scf.if %148 {
      %c0_64 = arith.constant 0 : index
      %c0_65 = arith.constant 0 : index
      %c0_66 = arith.constant 0 : index
      %149 = vector.load %arg18[%c0_64, %c0_65, %c0_66] : memref<2x8x256xf32, #tpu.memory_space<vmem>>, vector<2x8x256xf32>
      tpu.vector_store %arg18[%c0_64, %c0_65, %c0_66], %144 {strides = array<i32>} : memref<2x8x256xf32, #tpu.memory_space<vmem>>, vector<2x8x256xf32>,
    } else {
    }
    return
  }
  func.func @transform_0(%arg0: i32) -> (i32, i32) {
    %c0_i32 = arith.constant 0 : i32
    %c0_i32_0 = arith.constant 0 : i32
    %c0_i32_1 = arith.constant 0 : i32
    return %c0_i32, %c0_i32_0 : i32, i32
  }
  func.func @transform_1(%arg0: i32) -> (i32, i32) {
    %c0_i32 = arith.constant 0 : i32
    %c0_i32_0 = arith.constant 0 : i32
    %c0_i32_1 = arith.constant 0 : i32
    return %c0_i32, %c0_i32_0 : i32, i32
  }
  func.func @transform_2(%arg0: i32) -> (i32, i32) {
    %c0_i32 = arith.constant 0 : i32
    %c0_i32_0 = arith.constant 0 : i32
    %c0_i32_1 = arith.constant 0 : i32
    return %c0_i32, %c0_i32_0 : i32, i32
  }
  func.func @transform_3(%arg0: i32) -> (i32, i32) {
    %c0_i32 = arith.constant 0 : i32
    %c0_i32_0 = arith.constant 0 : i32
    %c0_i32_1 = arith.constant 0 : i32
    return %c0_i32, %c0_i32_0 : i32, i32
  }
  func.func @transform_4(%arg0: i32) -> (i32, i32) {
    %c0_i32 = arith.constant 0 : i32
    %c0_i32_0 = arith.constant 0 : i32
    %c0_i32_1 = arith.constant 0 : i32
    return %c0_i32, %c0_i32_0 : i32, i32
  }
  func.func @transform_5(%arg0: i32) -> (i32, i32, i32) {
    %c0_i32 = arith.constant 0 : i32
    %c0_i32_0 = arith.constant 0 : i32
    %c0_i32_1 = arith.constant 0 : i32
    return %arg0, %c0_i32, %c0_i32_0 : i32, i32, i32
  }
  func.func @transform_6(%arg0: i32) -> (i32, i32, i32) {
    %c0_i32 = arith.constant 0 : i32
    %c0_i32_0 = arith.constant 0 : i32
    %c0_i32_1 = arith.constant 0 : i32
    return %arg0, %c0_i32, %c0_i32_0 : i32, i32, i32
  }
  func.func @transform_7(%arg0: i32) -> (i32, i32, i32) {
    %c0_i32 = arith.constant 0 : i32
    %c0_i32_0 = arith.constant 0 : i32
    %c0_i32_1 = arith.constant 0 : i32
    return %arg0, %c0_i32, %c0_i32_0 : i32, i32, i32
  }
  func.func @transform_8(%arg0: i32) -> (i32, i32, i32) {
    %c0_i32 = arith.constant 0 : i32
    %c0_i32_0 = arith.constant 0 : i32
    %c0_i32_1 = arith.constant 0 : i32
    return %arg0, %c0_i32, %c0_i32_0 : i32, i32, i32
  }
  func.func @transform_9(%arg0: i32) -> (i32, i32, i32) {
    %c0_i32 = arith.constant 0 : i32
    %c0_i32_0 = arith.constant 0 : i32
    %c0_i32_1 = arith.constant 0 : i32
    return %arg0, %c0_i32, %c0_i32_0 : i32, i32, i32
  }
  func.func @transform_10(%arg0: i32) -> (i32, i32, i32) {
    %c0_i32 = arith.constant 0 : i32
    %c0_i32_0 = arith.constant 0 : i32
    %c0_i32_1 = arith.constant 0 : i32
    return %arg0, %c0_i32, %c0_i32_0 : i32, i32, i32
  }
  func.func @transform_11(%arg0: i32) -> (i32, i32, i32) {
    %c0_i32 = arith.constant 0 : i32
    %c0_i32_0 = arith.constant 0 : i32
    %c0_i32_1 = arith.constant 0 : i32
    return %arg0, %c0_i32, %c0_i32_0 : i32, i32, i32
  }
  func.func @transform_12(%arg0: i32) -> (i32, i32, i32) {
    %c0_i32 = arith.constant 0 : i32
    %c0_i32_0 = arith.constant 0 : i32
    %c0_i32_1 = arith.constant 0 : i32
    return %arg0, %c0_i32, %c0_i32_0 : i32, i32, i32
  }
  func.func @transform_13(%arg0: i32) -> (i32, i32, i32) {
    %c0_i32 = arith.constant 0 : i32
    %c0_i32_0 = arith.constant 0 : i32
    %c0_i32_1 = arith.constant 0 : i32
    return %arg0, %c0_i32, %c0_i32_0 : i32, i32, i32
  }
  func.func @transform_14(%arg0: i32) -> (i32, i32, i32) {
    %c0_i32 = arith.constant 0 : i32
    %c0_i32_0 = arith.constant 0 : i32
    %c0_i32_1 = arith.constant 0 : i32
    return %arg0, %c0_i32, %c0_i32_0 : i32, i32, i32
  }
  func.func @transform_15(%arg0: i32) -> (i32, i32, i32) {
    %c0_i32 = arith.constant 0 : i32
    %c0_i32_0 = arith.constant 0 : i32
    %c0_i32_1 = arith.constant 0 : i32
    return %arg0, %c0_i32, %c0_i32_0 : i32, i32, i32
  }
  func.func @transform_16(%arg0: i32) -> (i32, i32, i32) {
    %c0_i32 = arith.constant 0 : i32
    %c0_i32_0 = arith.constant 0 : i32
    %c0_i32_1 = arith.constant 0 : i32
    return %arg0, %c0_i32, %c0_i32_0 : i32, i32, i32
  }
  func.func @transform_17(%arg0: i32) -> (i32, i32, i32) {
    %c0_i32 = arith.constant 0 : i32
    %c0_i32_0 = arith.constant 0 : i32
    %c0_i32_1 = arith.constant 0 : i32
    %c0_i32_2 = arith.constant 0 : i32
    return %c0_i32, %c0_i32_0, %c0_i32_1 : i32, i32, i32
  }
}

</mosaic_0001>

<bundles_post_ra>
// kernel: tpu_custom_call.1
= control target key start
LH: loop header
LB: loop body
LE: loop exit
PB: predicated region body
PF: predicated region fallthrough
CT: control target
= control target key end

     0   :  { %s13251_s0 = inlined_call_operand.vmem [shape: s32[16,1], index: 0, kind: input, shape index: {}]   ;;  %s13252_s1 = inlined_call_operand.hbm [shape: f32[50,256], index: 1, kind: input, shape index: {}]   ;;  %s13253_s2 = inlined_call_operand.hbm [shape: f32[8,256], index: 2, kind: input, shape index: {}]   ;;  %s13254_s3 = inlined_call_operand.vmem [shape: bf16[256,4], index: 3, kind: input, shape index: {}]   ;;  %s13255_s4 = inlined_call_operand.hbm [shape: bf16[4,256], index: 4, kind: input, shape index: {}]   ;;  %s13256_s5 = inlined_call_operand.hbm [shape: bf16[2,256,768], index: 5, kind: input, shape index: {}]   ;;  %s13257_s6 = inlined_call_operand.hbm [shape: f32[2,1,768], index: 6, kind: input, shape index: {}]   ;;  %s13258_s7 = inlined_call_operand.hbm [shape: bf16[2,256,256], index: 7, kind: input, shape index: {}]   ;;  %s13259_s8 = inlined_call_operand.hbm [shape: f32[2,1,256], index: 8, kind: input, shape index: {}]   ;;  %s13260_s9 = inlined_call_operand.hbm [shape: f32[2,1,256], index: 9, kind: input, shape index: {}]   ;;  %s13261_s10 = inlined_call_operand.hbm [shape: f32[2,1,256], index: 10, kind: input, shape index: {}]   ;;  %s13262_s11 = inlined_call_operand.hbm [shape: bf16[2,256,2048], index: 11, kind: input, shape index: {}]   ;;  %s13263_s12 = inlined_call_operand.hbm [shape: f32[2,1,2048], index: 12, kind: input, shape index: {}]   ;;  %s13264_s13 = inlined_call_operand.hbm [shape: bf16[2,2048,256], index: 13, kind: input, shape index: {}]   ;;  %s13265_s14 = inlined_call_operand.hbm [shape: f32[2,1,256], index: 14, kind: input, shape index: {}]   ;;  %s13266_s15 = inlined_call_operand.hbm [shape: f32[2,1,256], index: 15, kind: input, shape index: {}]   ;;  %s13267_s16 = inlined_call_operand.hbm [shape: f32[2,1,256], index: 16, kind: input, shape index: {}]   ;;  %s13268_s17 = inlined_call_operand.hbm [shape: f32[2,8,256], index: 17, kind: output, shape index: {}]  }
   0x1   :  { %13286 = sst [smem:[#allocation44_spill]] %s13251_s0 }
   0x2   :  { %13287 = sst [smem:[#allocation45_spill]] %s13252_s1 }
   0x3   :  { %13288 = sst [smem:[#allocation46_spill]] %s13253_s2 }
   0x4   :  { %13289 = sst [smem:[#allocation47_spill]] %s13254_s3 }
   0x5   :  { %13290 = sst [smem:[#allocation48_spill]] %s13255_s4 }
   0x6   :  { %13291 = sst [smem:[#allocation49_spill]] %s13256_s5 }
   0x7   :  { %13292 = sst [smem:[#allocation50_spill]] %s13258_s7 }
   0x8   :  { %13293 = sst [smem:[#allocation51_spill]] %s13260_s9 }
   0x9   :  { %13294 = sst [smem:[#allocation52_spill]] %s13262_s11 }
   0xa   :  { %13295 = sst [smem:[#allocation53_spill]] %s13267_s16 }
   0xb   :  { %13296 = sst [smem:[#allocation54_spill]] %s13268_s17 }
   0xc   :  { %22 = vsyncpa [#allocation4], 0 }
   0xd   :  { %23 = vsyncpa [#allocation7], 0 }
   0xe   :  { %24 = vsyncpa [#allocation10], 0 }
   0xf   :  { %26 = vsyncpa [#allocation10 + $0x1], 0 }
  0x10   :  { %27 = vsyncpa [#allocation13], 0 }
  0x11   :  { %29 = vsyncpa [#allocation13 + $0x1], 0 }
  0x12   :  { %30 = vsyncpa [#allocation16], 0 }
  0x13   :  { %32 = vsyncpa [#allocation16 + $0x1], 0 }
  0x14   :  { %33 = vsyncpa [#allocation19], 0 }
  0x15   :  { %35 = vsyncpa [#allocation19 + $0x1], 0 }
  0x16   :  { %36 = vsyncpa [#allocation22], 0 }
  0x17   :  { %38 = vsyncpa [#allocation22 + $0x1], 0 }
  0x18   :  { %39 = vsyncpa [#allocation25], 0 }
  0x19   :  { %41 = vsyncpa [#allocation25 + $0x1], 0 }
  0x1a   :  { %42 = vsyncpa [#allocation5], 0  ;;  %s11103_s24 = smov 0   ;;  %s11105_s25 = smov 0  }
  0x1b   :  { %s11107_s26 = smov 0   ;;  %s11109_s27 = smov 0  }
  0x1c LB: > { %13297 = sst [smem:[#allocation37_spill]] %s10986_s25  ;;  %s11122_s28 = sadd.s32 4294967295, %s10994_s27   ;;  %s10994_s27 = sphi %s11109_s27, %s13333_s27   ;;  %s10990_s26 = sphi %s11107_s26, %s13336_s26   ;;  %s10986_s25 = sphi %s11105_s25, %s13335_s25   ;;  %s10982_s24 = sphi %s11103_s24, %s13334_s24  }
  0x1d   : > { %13298 = sst [smem:[#allocation38_spill]] %s10990_s26  ;;  %s11125_s29 = sadd.s32 1, %s10994_s27  }
  0x1e   : > { %13299 = sst [smem:[#allocation39_spill]] %s11122_s28  ;;  %s157_s0 = ssub.s32 %s10994_s27, %s11125_s29 }
  0x1f   : > { %13300 = sst [smem:[#allocation40_spill]] %s11125_s29  ;;  %s160_s30 = sadd.s32 1, %s10990_s26 }
  0x20   : > { %p158_p0 = scmp.eq.s32.totalorder %s157_s0, 0  ;;  %p167_p1 = scmp.ne.s32.totalorder %s10990_s26, %s10986_s25 }
  0x21   : > { %p168_p2 = scmp.eq.s32.totalorder %s10994_s27, 0  ;;  %p173_p3 = scmp.ne.s32.totalorder %s10986_s25, %s10982_s24 }
  0x22   : > { %s11135_s18 = scalar_select %p158_p0, %s10990_s26, %s160_s30  }
  0x23   : > { %p11137_p4 = por %p168_p2, %p167_p1  ;;  %p174_p5 = scmp.eq.s32.totalorder %s11122_s28, 0 }
  0x24   : > { %13301 = sst [smem:[#allocation41_spill]] %s11135_s18  ;;  %p6976_p6 = scmp.ge.s32.totalorder %s10994_s27, 1 }
  0x25   : > { %p491_p7 = scmp.lt.s32.totalorder %s10994_s27, 3  ;;  %p11146_p8 = por %p174_p5, %p173_p3 }
  0x26   : > { %p6977_p9 = scmp.ne.s32.totalorder %s11122_s28, 0  ;;  %s13307_s2 = sld [smem:[#allocation46_spill]] }
  0x27   : > { %s13303_s1 = scalar_select %p11146_p8, 1, 0 }
  0x28   : > { %p11151_p10 = pnand %p6976_p6, %p491_p7  ;;  %s10996_s24 = smov [#allocation6]  }
  0x29   : > { %13304 = sst [smem:[#allocation42_spill]] %s13303_s1  ;;  %s522_s0 = sshll.u32 %s10996_s24, 4  ;;  %s523_s0 = int_to_ptr.vmem [resolvable:$true] %s522_s0 }
  0x2a   : > { %s13305_s20 = scalar_select %p11151_p10, 1, 0 }
  0x2b   : > { %p10380_p11 = pneg %p11151_p10  ;;  %s13308_s29 = sld [smem:[#allocation45_spill]] }
  0x2c   : > { %13306 = sst [smem:[#allocation43_spill]] %s13305_s20  ;;  %s520_s23 = sshll.u32 %s13307_s2, 4  ;;  %s521_s23 = int_to_ptr.hbm [resolvable:$true] %s520_s23 }
  0x2d   : > { %p11165_p12 = pnand %p10380_p11, %p174_p5  ;;  %s10997_s21 = smov [#allocation3]  }
  0x2e   : > { %s507_s22 = sshll.u32 %s10997_s21, 4  ;;  %s10998_s24 = smov 256   ;;  %s508_s22 = int_to_ptr.vmem [resolvable:$true] %s507_s22 }
  0x2f   : > { %10386 = dma.hbm_to_vmem [thread:$0]  (!%p11165_p12), %s521_s23, 256, %s523_s0, [#allocation7]  }
  0x30   : > { %s10999_s2 = smov 16   ;;  %s13310_s4 = sld [smem:[#allocation48_spill]] }
  0x31   : > { %s505_s17 = sshll.u32 %s13308_s29, 4  ;;  %s11000_s1 = smov [#allocation8]   ;;  %s506_s17 = int_to_ptr.hbm [resolvable:$true] %s505_s17 }
  0x32   : > { %10383 = dma.hbm_to_vmem [thread:$0]  (!%p11165_p12), %s506_s17, 1792, %s508_s22, [#allocation4], %s10998_s24, %s10998_s24, %s10999_s2  }
  0x33   : > { %s537_s25 = sshll.u32 %s11000_s1, 4  ;;  %p6980_p13 = scmp.ge.s32.totalorder %s10994_s27, 2  ;;  %s538_s25 = int_to_ptr.vmem [resolvable:$true] %s537_s25 }
  0x34   : > { %s11180_s23 = sand.u32 (!%p6980_p13), 1, %s10994_s27   ;;  %s11183_s2 = sand.u32 (!%p6980_p13), 1, %s10990_s26  }
  0x35   : > { %544 = sbr.rel (%p6980_p13) target bundleno = 262 (0x106), region = 36  ;;  %s13311_s5 = sld [smem:[#allocation49_spill]] (!%p6980_p13) }
  0x36   : > { %s535_s30 = sshll.u32 %s13310_s4, 4  ;;  %s10334_s17 = smul.u32 (!%p6980_p13), 768, %s11183_s2  ;;  %s536_s30 = int_to_ptr.hbm [resolvable:$true] %s535_s30 }
  0x37   : > { %10389 = dma.hbm_to_vmem [thread:$0]  (!%p11165_p12), %s536_s30, 64, %s538_s25, [#allocation7]  }
  0x38   : > { %s10335_s0 = smul.u32 (!%p6980_p13), 768, %s10994_s27  ;;  %s552_s25 = scalar_lea.vmem (!%p6980_p13), [#allocation9], %s10334_s17 }
  0x39   : > { %s560_s22 = sshll.u32 (!%p6980_p13), %s552_s25, 4  ;;  %s13280_s18 = scalar_lea.sflag (!%p6980_p13), [#allocation10], %s11180_s23  ;;  %s561_s22 = int_to_ptr.vmem [resolvable:$true] %s560_s22 }
  0x3b   : > { %s557_s3 = scalar_lea.hbm %s13311_s5, %s10335_s0  ;;  %s10570_s28 = scalar_lea.hbm %s13311_s5, 1536 }
  0x3c   : > { %s558_s24 = sshll.u32 %s557_s3, 4  ;;  %s559_s24 = int_to_ptr.hbm [resolvable:$true] %s558_s24 }
  0x3d   : > { %s10564_s29 = sshra.s32 %s559_s24, 4  ;;  %s10565_s29 = int_to_ptr.hbm [resolvable:$true] %s10564_s29 }
  0x3e   : > { %s10566_s30 = scalar_lea.hbm %s10565_s29, 768  ;;  %p10571_p3 = scmp.lt.s32.totalorder %s10565_s29, %s13311_s5 }
  0x3f   : > { %p10567_p0 = scmp.ne.s32.totalorder %s10565_s29, %s10566_s30  ;;  %p10572_p6 = scmp.lt.s32.totalorder %s10570_s28, %s10566_s30 }
  0x41   : > { %p10568_p1 = pnand %p10567_p0, %p11137_p4  ;;  %p10573_p7 = por %p10572_p6, %p10571_p3 }
  0x43   : > { %p10569_p2 = pneg %p10568_p1 }
  0x45   : > { %p10574_p11 = pnand %p10573_p7, %p10569_p2 }
  0x47   : > { %10577 = shalt.err (!%p10574_p11)
}
  0x48   : > { %s11001_s17 = smov 384   ;;  %s11002_s0 = smov 24  }
  0x49   : > { %10346 = dma.hbm_to_vmem [thread:$0]  (%p11137_p4), %s559_s24, 12288, %s561_s22, %s13280_s18, %s11001_s17, %s11001_s17, %s11002_s0  }
  0x4a   : > { %s6982_s4 = sshll.u32 %s11183_s2, 8  ;;  %s9661_s26 = sshll.u32 %s10994_s27, 8 }
  0x4b   : > { %s13312_s7 = sld [smem:[#allocation50_spill]]  ;;  %s593_s25 = scalar_lea.vmem [#allocation12], %s6982_s4 }
  0x4c   : > { %s601_s29 = sshll.u32 %s593_s25, 4  ;;  %s13281_s30 = scalar_lea.sflag [#allocation13], %s11180_s23  ;;  %s602_s29 = int_to_ptr.vmem [resolvable:$true] %s601_s29 }
  0x51   : > { %s598_s28 = scalar_lea.hbm %s13312_s7, %s9661_s26  ;;  %s10598_s17 = scalar_lea.hbm %s13312_s7, 512 }
  0x52   : > { %s599_s3 = sshll.u32 %s598_s28, 4  ;;  %s600_s3 = int_to_ptr.hbm [resolvable:$true] %s599_s3 }
  0x53   : > { %s10592_s21 = sshra.s32 %s600_s3, 4  ;;  %s10593_s21 = int_to_ptr.hbm [resolvable:$true] %s10592_s21 }
  0x54   : > { %s10594_s5 = scalar_lea.hbm %s10593_s21, 256  ;;  %p10599_p1 = scmp.lt.s32.totalorder %s10593_s21, %s13312_s7 }
  0x55   : > { %p10595_p12 = scmp.ne.s32.totalorder %s10593_s21, %s10594_s5  ;;  %p10600_p2 = scmp.lt.s32.totalorder %s10598_s17, %s10594_s5 }
  0x57   : > { %p10596_p13 = pnand %p10595_p12, %p11137_p4  ;;  %p10601_p3 = por %p10600_p2, %p10599_p1 }
  0x59   : > { %p10597_p0 = pneg %p10596_p13 }
  0x5b   : > { %p10602_p6 = pnand %p10601_p3, %p10597_p0 }
  0x5d   : > { %10605 = shalt.err (!%p10602_p6)
}
  0x5e   : > { %s13282_s4 = smov 128   ;;  %s13283_s26 = smov 8  }
  0x5f   : > { %10348 = dma.hbm_to_vmem [thread:$0]  (%p11137_p4), %s600_s3, 4096, %s602_s29, %s13281_s30, %s13282_s4, %s13282_s4, %s13283_s26  }
  0x60   : > { %s11225_s20 = sshll.u32 %s11183_s2, 1  ;;  %s11228_s5 = sshll.u32 %s10994_s27, 1 }
  0x61   : > { %s13313_s9 = sld [smem:[#allocation51_spill]]  ;;  %s634_s22 = scalar_lea.vmem [#allocation15], %s11225_s20 }
  0x62   : > { %s642_s24 = sshll.u32 %s634_s22, 4  ;;  %s13284_s0 = scalar_lea.sflag [#allocation16], %s11180_s23  ;;  %s643_s24 = int_to_ptr.vmem [resolvable:$true] %s642_s24 }
  0x67   : > { %s638_s21 = scalar_lea.hbm %s13313_s9, %s11228_s5  ;;  %s10626_s30 = scalar_lea.hbm %s13313_s9, 4 }
  0x68   : > { %s640_s17 = sshll.u32 %s638_s21, 4  ;;  %s641_s17 = int_to_ptr.hbm [resolvable:$true] %s640_s17 }
  0x69   : > { %s10620_s1 = sshra.s32 %s641_s17, 4  ;;  %s10621_s1 = int_to_ptr.hbm [resolvable:$true] %s10620_s1 }
  0x6a   : > { %s10622_s18 = scalar_lea.hbm %s10621_s1, 2  ;;  %p10627_p13 = scmp.lt.s32.totalorder %s10621_s1, %s13313_s9 }
  0x6b   : > { %p10623_p7 = scmp.ne.s32.totalorder %s10621_s1, %s10622_s18  ;;  %p10628_p0 = scmp.lt.s32.totalorder %s10626_s30, %s10622_s18 }
  0x6d   : > { %p10624_p11 = pnand %p10623_p7, %p11137_p4  ;;  %p10629_p1 = por %p10628_p0, %p10627_p13 }
  0x6f   : > { %p10625_p12 = pneg %p10624_p11 }
  0x71   : > { %p10630_p2 = pnand %p10629_p1, %p10625_p12 }
  0x73   : > { %10633 = shalt.err (!%p10630_p2)
}
  0x74   : > { %10350 = dma.hbm_to_vmem [thread:$0]  (%p11137_p4), %s641_s17, 32, %s643_s24, %s13284_s0  }
  0x75   : > { %s6991_s25 = sshll.u32 %s11183_s2, 11  ;;  %s9662_s21 = sshll.u32 %s10994_s27, 11 }
  0x76   : > { %s13314_s11 = sld [smem:[#allocation52_spill]]  ;;  %s672_s18 = scalar_lea.vmem [#allocation18], %s6991_s25 }
  0x77   : > { %s680_s30 = sshll.u32 %s672_s18, 4  ;;  %s669_s29 = scalar_lea.sflag [#allocation19], %s11180_s23  ;;  %s681_s30 = int_to_ptr.vmem [resolvable:$true] %s680_s30 }
  0x7c   : > { %s677_s4 = scalar_lea.hbm %s13314_s11, %s9662_s21  ;;  %s10654_s0 = scalar_lea.hbm %s13314_s11, 4096 }
  0x7d   : > { %s678_s1 = sshll.u32 %s677_s4, 4  ;;  %s679_s1 = int_to_ptr.hbm [resolvable:$true] %s678_s1 }
  0x7e   : > { %s10648_s28 = sshra.s32 %s679_s1, 4  ;;  %s10649_s28 = int_to_ptr.hbm [resolvable:$true] %s10648_s28 }
  0x7f   : > { %s10650_s26 = scalar_lea.hbm %s10649_s28, 2048  ;;  %p10655_p11 = scmp.lt.s32.totalorder %s10649_s28, %s13314_s11 }
  0x80   : > { %p10651_p3 = scmp.ne.s32.totalorder %s10649_s28, %s10650_s26  ;;  %p10656_p12 = scmp.lt.s32.totalorder %s10654_s0, %s10650_s26 }
  0x82   : > { %p10652_p6 = pnand %p10651_p3, %p11137_p4  ;;  %p10657_p13 = por %p10656_p12, %p10655_p11 }
  0x84   : > { %p10653_p7 = pneg %p10652_p6 }
  0x86   : > { %p10658_p0 = pnand %p10657_p13, %p10653_p7 }
  0x88   : > { %10661 = shalt.err (!%p10658_p0)
}
  0x89   : > { %s11005_s3 = smov 1024   ;;  %s11006_s4 = smov 64  }
  0x8a   : > { %10352 = dma.hbm_to_vmem [thread:$0]  (%p11137_p4), %s679_s1, 32768, %s681_s30, %s669_s29, %s11005_s3, %s11005_s3, %s11006_s4  }
  0x8b   : > { %s718_s17 = scalar_lea.hbm %s13264_s13, %s9662_s21  ;;  %s713_s9 = scalar_lea.vmem [#allocation21], %s6991_s25 }
  0x8c   : > { %s721_s7 = sshll.u32 %s713_s9, 4  ;;  %s719_s28 = sshll.u32 %s718_s17, 4  ;;  %s722_s7 = int_to_ptr.vmem [resolvable:$true] %s721_s7  ;;  %s720_s28 = int_to_ptr.hbm [resolvable:$true] %s719_s28 }
  0x8d   : > { %s710_s26 = scalar_lea.sflag [#allocation22], %s11180_s23  ;;  %s10676_s0 = sshra.s32 %s720_s28, 4  ;;  %s10677_s0 = int_to_ptr.hbm [resolvable:$true] %s10676_s0 }
  0x8e   : > { %s10678_s22 = scalar_lea.hbm %s10677_s0, 2048  ;;  %s10682_s1 = scalar_lea.hbm %s13264_s13, 4096 }
  0x8f   : > { %p10679_p1 = scmp.ne.s32.totalorder %s10677_s0, %s10678_s22  ;;  %p10683_p6 = scmp.lt.s32.totalorder %s10677_s0, %s13264_s13 }
  0x90   : > { %p10684_p7 = scmp.lt.s32.totalorder %s10682_s1, %s10678_s22 }
  0x91   : > { %p10680_p2 = pnand %p10679_p1, %p11137_p4 }
  0x92   : > { %p10685_p11 = por %p10684_p7, %p10683_p6 }
  0x93   : > { %p10681_p3 = pneg %p10680_p2 }
  0x95   : > { %p10686_p12 = pnand %p10685_p11, %p10681_p3 }
  0x97   : > { %10689 = shalt.err (!%p10686_p12)
}
  0x98   : > { %s13315_s9 = smov 8   ;;  %s13316_s25 = smov 128  }
  0x99   : > { %10354 = dma.hbm_to_vmem [thread:$0]  (%p11137_p4), %s720_s28, 32768, %s722_s7, %s710_s26, %s13316_s25, %s13316_s25, %s13315_s9  }
  0x9a   : > { %s758_s21 = scalar_lea.hbm %s13266_s15, %s11228_s5  ;;  %s754_s18 = scalar_lea.vmem [#allocation24], %s11225_s20 }
  0x9b   : > { %s760_s4 = sshll.u32 %s758_s21, 4  ;;  %s762_s24 = sshll.u32 %s754_s18, 4  ;;  %s761_s4 = int_to_ptr.hbm [resolvable:$true] %s760_s4  ;;  %s763_s24 = int_to_ptr.vmem [resolvable:$true] %s762_s24 }
  0x9c   : > { %s751_s17 = scalar_lea.sflag [#allocation25], %s11180_s23  ;;  %s10704_s0 = sshra.s32 %s761_s4, 4  ;;  %s10705_s0 = int_to_ptr.hbm [resolvable:$true] %s10704_s0 }
  0x9d   : > { %s10706_s22 = scalar_lea.hbm %s10705_s0, 2  ;;  %s10710_s7 = scalar_lea.hbm %s13266_s15, 4 }
  0x9e   : > { %p10707_p13 = scmp.ne.s32.totalorder %s10705_s0, %s10706_s22  ;;  %p10711_p2 = scmp.lt.s32.totalorder %s10705_s0, %s13266_s15 }
  0x9f   : > { %p10712_p3 = scmp.lt.s32.totalorder %s10710_s7, %s10706_s22 }
  0xa0   : > { %p10708_p0 = pnand %p10707_p13, %p11137_p4 }
  0xa1   : > { %p10713_p6 = por %p10712_p3, %p10711_p2 }
  0xa2   : > { %p10709_p1 = pneg %p10708_p0 }
  0xa4   : > { %p10714_p7 = pnand %p10713_p6, %p10709_p1 }
  0xa6   : > { %10717 = shalt.err (!%p10714_p7)
}
  0xa7   : > { %10356 = dma.hbm_to_vmem [thread:$0]  (%p11137_p4), %s761_s4, 32, %s763_s24, %s751_s17  }
  0xa8   : > { %s10336_s9 = smul.u32 6, %s11183_s2  ;;  %s619_s21 = scalar_lea.hbm %s13259_s8, %s11228_s5 }
  0xa9   : > { %s10337_s25 = smul.u32 6, %s10994_s27  ;;  %s11309_s18 = sshll.u32 %s619_s21, 4  ;;  %s622_s18 = int_to_ptr.hbm [resolvable:$true] %s11309_s18 }
  0xaa   : > { %s574_s30 = scalar_lea.vmem [#allocation11], %s10336_s9  ;;  %s10738_s16 = scalar_lea.hbm %s13257_s6, 12 }
  0xab   : > { %s578_s1 = scalar_lea.hbm %s13257_s6, %s10337_s25  ;;  %s582_s7 = sshll.u32 %s574_s30, 4  ;;  %s583_s7 = int_to_ptr.vmem [resolvable:$true] %s582_s7 }
  0xac   : > { %s580_s28 = sshll.u32 %s578_s1, 4  ;;  %s581_s28 = int_to_ptr.hbm [resolvable:$true] %s580_s28 }
  0xad   : > { %s10732_s4 = sshra.s32 %s581_s28, 4  ;;  %s10733_s4 = int_to_ptr.hbm [resolvable:$true] %s10732_s4 }
  0xae   : > { %s10734_s24 = scalar_lea.hbm %s10733_s4, 6  ;;  %p10739_p0 = scmp.lt.s32.totalorder %s10733_s4, %s13257_s6 }
  0xaf   : > { %p10735_p11 = scmp.ne.s32.totalorder %s10733_s4, %s10734_s24  ;;  %p10740_p1 = scmp.lt.s32.totalorder %s10738_s16, %s10734_s24 }
  0xb1   : > { %p10736_p12 = pnand %p10735_p11, %p11137_p4  ;;  %p10741_p2 = por %p10740_p1, %p10739_p0 }
  0xb3   : > { %p10737_p13 = pneg %p10736_p12 }
  0xb5   : > { %p10742_p3 = pnand %p10741_p2, %p10737_p13 }
  0xb7   : > { %10745 = shalt.err (!%p10742_p3)
}
  0xb8   : > { %s13317_s9 = scalar_lea.sflag [#allocation10], %s11180_s23  ;;  %s615_s25 = scalar_lea.vmem [#allocation14], %s11225_s20 }
  0xb9   : > { %10347 = dma.hbm_to_vmem [thread:$0]  (%p11137_p4), %s581_s28, 96, %s583_s7, %s13317_s9  }
  0xba   : > { %s623_s22 = sshll.u32 %s615_s25, 4  ;;  %s657_s4 = scalar_lea.hbm %s13261_s10, %s11228_s5  ;;  %s624_s22 = int_to_ptr.vmem [resolvable:$true] %s623_s22 }
  0xbb   : > { %s10760_s24 = sshra.s32 %s622_s18, 4  ;;  %s10766_s21 = scalar_lea.hbm %s13259_s8, 4  ;;  %s10761_s24 = int_to_ptr.hbm [resolvable:$true] %s10760_s24 }
  0xbc   : > { %s10762_s3 = scalar_lea.hbm %s10761_s24, 2  ;;  %p10767_p12 = scmp.lt.s32.totalorder %s10761_s24, %s13259_s8 }
  0xbd   : > { %p10763_p6 = scmp.ne.s32.totalorder %s10761_s24, %s10762_s3  ;;  %p10768_p13 = scmp.lt.s32.totalorder %s10766_s21, %s10762_s3 }
  0xbf   : > { %p10764_p7 = pnand %p10763_p6, %p11137_p4  ;;  %p10769_p0 = por %p10768_p13, %p10767_p12 }
  0xc1   : > { %p10765_p11 = pneg %p10764_p7 }
  0xc3   : > { %p10770_p1 = pnand %p10769_p0, %p10765_p11 }
  0xc5   : > { %10773 = shalt.err (!%p10770_p1)
}
  0xc6   : > { %s13318_s0 = scalar_lea.sflag [#allocation13], %s11180_s23  ;;  %s659_s9 = sshll.u32 %s657_s4, 4  ;;  %s660_s9 = int_to_ptr.hbm [resolvable:$true] %s659_s9 }
  0xc7   : > { %10349 = dma.hbm_to_vmem [thread:$0]  (%p11137_p4), %s622_s18, 32, %s624_s22, %s13318_s0  }
  0xc8   : > { %s653_s25 = scalar_lea.vmem [#allocation17], %s11225_s20  ;;  %s10788_s30 = sshra.s32 %s660_s9, 4  ;;  %s10789_s30 = int_to_ptr.hbm [resolvable:$true] %s10788_s30 }
  0xc9   : > { %s661_s1 = sshll.u32 %s653_s25, 4  ;;  %s10790_s24 = scalar_lea.hbm %s10789_s30, 2  ;;  %s662_s1 = int_to_ptr.vmem [resolvable:$true] %s661_s1 }
  0xca   : > { %p10791_p2 = scmp.ne.s32.totalorder %s10789_s30, %s10790_s24  ;;  %s10794_s16 = scalar_lea.hbm %s13261_s10, 4 }
  0xcb   : > { %p10795_p7 = scmp.lt.s32.totalorder %s10789_s30, %s13261_s10  ;;  %p10796_p11 = scmp.lt.s32.totalorder %s10794_s16, %s10790_s24 }
  0xcc   : > { %p10792_p3 = pnand %p10791_p2, %p11137_p4 }
  0xcd   : > { %p10797_p12 = por %p10796_p11, %p10795_p7 }
  0xce   : > { %p10793_p6 = pneg %p10792_p3 }
  0xd0   : > { %p10798_p13 = pnand %p10797_p12, %p10793_p6 }
  0xd2   : > { %10801 = shalt.err (!%p10798_p13)
}
  0xd3   : > { %s13319_s18 = scalar_lea.sflag [#allocation16], %s11180_s23  ;;  %s6994_s22 = sshll.u32 %s11183_s2, 4 }
  0xd4   : > { %10351 = dma.hbm_to_vmem [thread:$0]  (%p11137_p4), %s660_s9, 32, %s662_s1, %s13319_s18  }
  0xd5   : > { %s6995_s4 = sshll.u32 %s10994_s27, 4  ;;  %s694_s30 = scalar_lea.vmem [#allocation20], %s6994_s22 }
  0xd6   : > { %s698_s25 = scalar_lea.hbm %s13263_s12, %s6995_s4  ;;  %s702_s24 = sshll.u32 %s694_s30, 4  ;;  %s703_s24 = int_to_ptr.vmem [resolvable:$true] %s702_s24 }
  0xd7   : > { %s700_s3 = sshll.u32 %s698_s25, 4  ;;  %s10822_s27 = scalar_lea.hbm %s13263_s12, 32  ;;  %s701_s3 = int_to_ptr.hbm [resolvable:$true] %s700_s3 }
  0xd8   : > { %s10816_s11 = sshra.s32 %s701_s3, 4  ;;  %s10817_s11 = int_to_ptr.hbm [resolvable:$true] %s10816_s11 }
  0xd9   : > { %s10818_s16 = scalar_lea.hbm %s10817_s11, 16  ;;  %p10823_p3 = scmp.lt.s32.totalorder %s10817_s11, %s13263_s12 }
  0xda   : > { %p10819_p0 = scmp.ne.s32.totalorder %s10817_s11, %s10818_s16  ;;  %p10824_p6 = scmp.lt.s32.totalorder %s10822_s27, %s10818_s16 }
  0xdc   : > { %p10820_p1 = pnand %p10819_p0, %p11137_p4  ;;  %p10825_p7 = por %p10824_p6, %p10823_p3 }
  0xde   : > { %p10821_p2 = pneg %p10820_p1 }
  0xe0   : > { %p10826_p11 = pnand %p10825_p7, %p10821_p2 }
  0xe2   : > { %10829 = shalt.err (!%p10826_p11)
}
  0xe3   : > { %10353 = dma.hbm_to_vmem [thread:$0]  (%p11137_p4), %s701_s3, 256, %s703_s24, %s669_s29  }
  0xe4   : > { %s739_s22 = scalar_lea.hbm %s13265_s14, %s11228_s5  ;;  %s735_s28 = scalar_lea.vmem [#allocation23], %s11225_s20 }
  0xe5   : > { %s741_s4 = sshll.u32 %s739_s22, 4  ;;  %s743_s0 = sshll.u32 %s735_s28, 4  ;;  %s742_s4 = int_to_ptr.hbm [resolvable:$true] %s741_s4  ;;  %s744_s0 = int_to_ptr.vmem [resolvable:$true] %s743_s0 }
  0xe6   : > { %s10844_s25 = sshra.s32 %s742_s4, 4  ;;  %s10850_s29 = scalar_lea.hbm %s13265_s14, 4  ;;  %s10845_s25 = int_to_ptr.hbm [resolvable:$true] %s10844_s25 }
  0xe7   : > { %s10846_s30 = scalar_lea.hbm %s10845_s25, 2  ;;  %p10851_p1 = scmp.lt.s32.totalorder %s10845_s25, %s13265_s14 }
  0xe8   : > { %p10847_p12 = scmp.ne.s32.totalorder %s10845_s25, %s10846_s30  ;;  %p10852_p2 = scmp.lt.s32.totalorder %s10850_s29, %s10846_s30 }
  0xea   : > { %p10848_p13 = pnand %p10847_p12, %p11137_p4  ;;  %p10853_p3 = por %p10852_p2, %p10851_p1 }
  0xec   : > { %p10849_p0 = pneg %p10848_p13 }
  0xee   : > { %p10854_p6 = pnand %p10853_p3, %p10849_p0 }
  0xf0   : > { %10857 = shalt.err (!%p10854_p6)
}
  0xf1   : > { %10355 = dma.hbm_to_vmem [thread:$0]  (%p11137_p4), %s742_s4, 32, %s744_s0, %s710_s26  }
  0xf2   : > { %s13320_s27 = sld [smem:[#allocation53_spill]]  ;;  %s773_s18 = scalar_lea.vmem [#allocation26], %s11225_s20 }
  0xf3   : > { %s781_s22 = sshll.u32 %s773_s18, 4  ;;  %s782_s22 = int_to_ptr.vmem [resolvable:$true] %s781_s22 }
  0xf8   : > { %s13321_s2 = smov %s13320_s27  ;;  %s777_s1 = scalar_lea.hbm %s13320_s27, %s11228_s5 }
  0xf9   : > { %s779_s7 = sshll.u32 %s777_s1, 4  ;;  %s10878_s26 = scalar_lea.hbm %s13321_s2, 4  ;;  %s780_s7 = int_to_ptr.hbm [resolvable:$true] %s779_s7 }
  0xfa   : > { %s10872_s28 = sshra.s32 %s780_s7, 4  ;;  %s10873_s28 = int_to_ptr.hbm [resolvable:$true] %s10872_s28 }
  0xfb   : > { %s10874_s25 = scalar_lea.hbm %s10873_s28, 2  ;;  %p10879_p13 = scmp.lt.s32.totalorder %s10873_s28, %s13321_s2 }
  0xfc   : > { %p10875_p7 = scmp.ne.s32.totalorder %s10873_s28, %s10874_s25  ;;  %p10880_p0 = scmp.lt.s32.totalorder %s10878_s26, %s10874_s25 }
  0xfe   : > { %p10876_p11 = pnand %p10875_p7, %p11137_p4  ;;  %p10881_p1 = por %p10880_p0, %p10879_p13 }
 0x100   : > { %p10877_p12 = pneg %p10876_p11 }
 0x102   : > { %p10882_p2 = pnand %p10881_p1, %p10877_p12 }
 0x104   : > { %10885 = shalt.err (!%p10882_p2)
}
 0x105   : > { %10357 = dma.hbm_to_vmem [thread:$0]  (%p11137_p4), %s780_s7, 32, %s782_s22, %s751_s17  }
 0x106 PF: > { %790 = sbr.rel (%p11151_p10) target bundleno = 2411 (0x96b), region = 88  ;;  %s13323_s5 = sld [smem:[#allocation39_spill]] (!%p11151_p10) }
 0x10b   : > { %10945 = dma.done.wait (%p174_p5), [#allocation4], 1792  }
 0x10c   : > { %10947 = vsyncadd (%p174_p5), [#allocation4], 4294965504 }
 0x10d   : > { %10949 = dma.done.wait (%p174_p5), [#allocation7], 320  }
 0x10e   : > { %10951 = vsyncadd (%p174_p5), [#allocation7], 4294966976  ;;  %s13324_s19 = sld [smem:[#allocation37_spill]]  ;;  %s11423_s17 = sand.u32 1, %s13323_s5  }
 0x10f   : > { %s808_s3 = scalar_lea.sflag [#allocation10], %s11423_s17 }
 0x114   : > { %s809_s16 = sand.u32 1, %s13324_s19  }
 0x115   : > { %s10338_s29 = smul.u32 768, %s809_s16 }
 0x117   : > { %s11427_s24 = scalar_lea.vmem [#allocation9], %s10338_s29 }
 0x118   : > { %10953 = dma.done.wait (%p11146_p8), %s808_s3, 12384  }
 0x119   : > { %10955 = vsyncadd (%p11146_p8), %s808_s3, 4294954912  ;;  %s10339_s21 = smul.u32 6, %s809_s16  ;;  %s7009_s9 = sshll.u32 %s809_s16, 8 }
 0x11a   : > { %s828_s1 = scalar_lea.sflag [#allocation13], %s11423_s17  ;;  %s11436_s7 = scalar_lea.vmem [#allocation12], %s7009_s9 }
 0x11b   : > { %s11433_s27 = scalar_lea.vmem [#allocation11], %s10339_s21 }
 0x11c   : > { %10957 = dma.done.wait (%p11146_p8), %s828_s1, 4128  }
 0x11d   : > { %10959 = vsyncadd (%p11146_p8), %s828_s1, 4294963168  ;;  %s11442_s18 = sshll.u32 %s809_s16, 1  ;;  %s848_s28 = scalar_lea.sflag [#allocation16], %s11423_s17 }
 0x11e   : > { %s841_s22 = scalar_lea.vmem [#allocation14], %s11442_s18  ;;  %s851_s25 = scalar_lea.vmem [#allocation15], %s11442_s18 }
 0x11f   : > { %10961 = dma.done.wait (%p11146_p8), %s848_s28, 64  }
 0x120   : > { %10963 = vsyncadd (%p11146_p8), %s848_s28, 4294967232  ;;  %s7013_s30 = sshll.u32 %s809_s16, 11  ;;  %s861_s11 = scalar_lea.vmem [#allocation17], %s11442_s18 }
 0x121   : > { %s868_s26 = scalar_lea.sflag [#allocation19], %s11423_s17  ;;  %s11453_s4 = scalar_lea.vmem [#allocation18], %s7013_s30 }
 0x122   : > { %10965 = dma.done.wait (%p11146_p8), %s868_s26, 33024  }
 0x123   : > { %10967 = vsyncadd (%p11146_p8), %s868_s26, 4294934272  ;;  %s7014_s0 = sshll.u32 %s809_s16, 4  ;;  %s888_s19 = scalar_lea.sflag [#allocation22], %s11423_s17 }
 0x124   : > { %s11459_s20 = scalar_lea.vmem [#allocation20], %s7014_s0  ;;  %s11462_s29 = scalar_lea.vmem [#allocation21], %s7013_s30 }
 0x125   : > { %10969 = dma.done.wait (%p11146_p8), %s888_s19, 32800  }
 0x126   : > { %10971 = vsyncadd (%p11146_p8), %s888_s19, 4294934496  ;;  %s901_s3 = scalar_lea.vmem [#allocation23], %s11442_s18  ;;  %s908_s21 = scalar_lea.sflag [#allocation25], %s11423_s17 }
 0x127   : > { %10973 = dma.done.wait (%p11146_p8), %s908_s21, 64  }
 0x128   : > { %10975 = vsyncadd (%p11146_p8), %s908_s21, 4294967232  ;;  %1027 = sbr.rel (%p6977_p9) target bundleno = 558 (0x22e), region = 152  ;;  %s13326_s30 = sld [smem:[#allocation44_spill]] (!%p6977_p9) }
 0x12d   : > { %v1056_v1 = vld [vmem:[#allocation3 + $0x60] sm:$0x3]  ;;  %vm1065_vm0 = vcmask 1041408   ;;  %v11007_v2 = vmov 0   ;;  %v1057_v3 = vld [vmem:[#allocation3 + $0x68] sm:$0x3]  ;;  %v1030_v17 = vlaneseq }
 0x12e   : > { %v1029_v0 = vld [vmem:[%s13326_s30 + $0x8] sm:$0xff]  ;;  %10447 = vset.pattern.permute.xlu0 %v11007_v2  ;;  %10320 = vmatpush.msk.msra.mxu2 %vm1065_vm0, %v1056_v1  ;;  %v1054_v4 = vld [vmem:[#allocation3 + $0x50] sm:$0xff]  ;;  %v1055_v5 = vld [vmem:[#allocation3 + $0x58] sm:$0xff]  ;;  %vm1058_vm1 = vcmask 408576   ;;  %v11008_v20 = vmov 0.0  }
 0x12f   : > { %1036 = vperm.xlu0 %10447, %v1029_v0   ;;  %10327 = vmatpush.msk.msra.mxu3 %vm1065_vm0, %v1057_v3  ;;  %v1052_v6 = vld [vmem:[#allocation3 + $0x40] sm:$0xff]  ;;  %v1053_v7 = vld [vmem:[#allocation3 + $0x48] sm:$0xff]  ;;  %v1050_v8 = vld [vmem:[#allocation3 + $0x30] sm:$0xff]  ;;  %v1031_v18 = vand.u32 127, %v1030_v17 }
 0x130   : > { %10321 = vmatpush.msra.mxu2 %v1054_v4  ;;  %7022 = vmatpush.msk.msra.mxu0 %vm1065_vm0, %v1056_v1  ;;  %v1051_v9 = vld [vmem:[#allocation3 + $0x38] sm:$0xff]  ;;  %v1048_v10 = vld [vmem:[#allocation3 + $0x20] sm:$0xff]  ;;  %v1049_v12 = vld [vmem:[#allocation3 + $0x28] sm:$0xff] }
 0x131   : > { %10328 = vmatpush.msra.mxu3 %v1055_v5  ;;  %7025 = vmatpush.msk.msra.mxu1 %vm1065_vm0, %v1057_v3  ;;  %v1028_v11 = vld [vmem:[%s13326_s30] sm:$0xff]  ;;  %v1046_v13 = vld [vmem:[#allocation3 + $0x10] sm:$0xff]  ;;  %v1044_v15 = vld [vmem:[#allocation3] sm:$0xff] }
 0x132   : > { %10322 = vmatpush.msra.mxu2 %v1052_v6  ;;  %1082 = vmatpush.msra.mxu0 %v1054_v4  ;;  %v1047_v14 = vld [vmem:[#allocation3 + $0x18] sm:$0xff]  ;;  %v1045_v16 = vld [vmem:[#allocation3 + $0x8] sm:$0xff]  ;;  %v1118_v24 = vld [vmem:[#allocation6] sm:$0xff] }
 0x133   : > { %10329 = vmatpush.msra.mxu3 %v1053_v7  ;;  %1105 = vmatpush.msra.mxu1 %v1055_v5  ;;  %v1119_v25 = vld [vmem:[#allocation6 + $0x8] sm:$0xff] }
 0x134   : > { %10323 = vmatpush.msra.mxu2 %v1050_v8  ;;  %1083 = vmatpush.msra.mxu0 %v1052_v6 }
 0x135   : > { %10330 = vmatpush.msra.mxu3 %v1051_v9  ;;  %1106 = vmatpush.msra.mxu1 %v1053_v7 }
 0x136   : > { %10324 = vmatpush.msra.mxu2 %v1048_v10  ;;  %1084 = vmatpush.msra.mxu0 %v1050_v8 }
 0x137   : > { %1033 = vperm.xlu0 %10447, %v1028_v11   ;;  %10331 = vmatpush.msra.mxu3 %v1049_v12 }
 0x138   : > { %10325 = vmatpush.msra.mxu2 %v1046_v13  ;;  %1107 = vmatpush.msra.mxu1 %v1051_v9 }
 0x139   : > { %10332 = vmatpush.msra.mxu3 %v1047_v14  ;;  %1085 = vmatpush.msra.mxu0 %v1048_v10 }
 0x13a   : > { %1108 = vmatpush.msra.mxu1 %v1049_v12  ;;  %10326 = vmatpush.msra.mxu2 %v1044_v15 }
 0x13b   : > { %1086 = vmatpush.msra.mxu0 %v1046_v13  ;;  %10333 = vmatpush.msra.mxu3 %v1045_v16 }
 0x13c   : > { %1109 = vmatpush.msra.mxu1 %v1047_v14 }
 0x13d   : > { %1087 = vmatpush.msra.mxu0 %v1044_v15 }
 0x13e   : > { %1110 = vmatpush.msra.mxu1 %v1045_v16 }
 0x1a1   : > { %v1037_v19 = vpop.permute.xlu0 %1036 }
 0x1a2   : > { %vm1039_vm2 = vcmp.eq.s32.totalorder %v1037_v19, %v1031_v18 }
 0x1a3   : > { %v7021_v21 = vsel %vm1039_vm2, 1.0, %v11008_v20 }
 0x1a4   : > { %7024 = vmatmul.msk.f32.vlgmr.msra.gmra.mxu2 %vm1058_vm1, %v7021_v21  ;;  %7027 = vmatmul.msk.f32.vlgmr.msra.gmra.mxu3 %vm1058_vm1, %v7021_v21 }
 0x1a9   : > { %v1034_v22 = vpop.permute.xlu0 %1033 }
 0x1aa   : > { %vm1038_vm3 = vcmp.eq.s32.totalorder %v1034_v22, %v1031_v18 }
 0x1ab   : > { %v7020_v23 = vsel %vm1038_vm3, 1.0, %v11008_v20 }
 0x1ac   : > { %7023 = vmatmul.msk.f32.vlgmr.msra.gmra.mxu0 %vm1058_vm1, %v7020_v23  ;;  %7026 = vmatmul.msk.f32.vlgmr.msra.gmra.mxu1 %vm1058_vm1, %v7020_v23 }
 0x227   : > { %v1092_v26 = vpop.f32.mrf.mxu2  ;;  %v1115_v27 = vpop.f32.mrf.mxu3 }
 0x228   : > { %v1122_v28 = vadd.f32 %v1118_v24, %v1092_v26  ;;  %v1123_v29 = vadd.f32 %v1119_v25, %v1115_v27 }
 0x229   : > { %v1089_v30 = vpop.f32.mrf.mxu0  ;;  %v1112_v31 = vpop.f32.mrf.mxu1 }
 0x22a   : > { %1126 = vst [vmem:[#allocation2 + $0x18] sm:$0xff] %v1122_v28  ;;  %v1120_v32 = vadd.f32 %v1118_v24, %v1089_v30  ;;  %v1121_v33 = vadd.f32 %v1119_v25, %v1112_v31 }
 0x22b   : > { %1127 = vst [vmem:[#allocation2 + $0x8] sm:$0xff] %v1123_v29 }
 0x22c   : > { %1124 = vst [vmem:[#allocation2 + $0x10] sm:$0xff] %v1120_v32 }
 0x22d   : > { %1125 = vst [vmem:[#allocation2] sm:$0xff] %v1121_v33 }
 0x22e PF: > { %v7198_v34 = vld [vmem:[%s11427_s24 + $0x150] sm:$0xf]  ;;  %v9725_v35 = vld [vmem:[%s11427_s24 + $0x164] sm:$0xf0]  ;;  %v9722_v39 = vld [vmem:[%s11427_s24 + $0x154] sm:$0xf] }
 0x22f   : > { %v7390_v36 = vld [vmem:[%s11427_s24 + $0x2d0] sm:$0xf]  ;;  %v7199_v37 = vor.u32 %v9725_v35, %v7198_v34  ;;  %v9773_v38 = vld [vmem:[%s11427_s24 + $0x2e4] sm:$0xf0]  ;;  %v7200_v40 = vld [vmem:[%s11427_s24 + $0x168] sm:$0xf0] }
 0x230   : > { %v7391_v41 = vor.u32 %v9773_v38, %v7390_v36  ;;  %v7203_v42 = vor.u32 %v9722_v39, %v7200_v40  ;;  %v9770_v43 = vld [vmem:[%s11427_s24 + $0x2d4] sm:$0xf]  ;;  %v7392_v44 = vld [vmem:[%s11427_s24 + $0x2e8] sm:$0xf0]  ;;  %v7174_v45 = vld [vmem:[%s11427_s24 + $0x120] sm:$0xf] }
 0x231   : > { %1757 = vmatpush.bf16.msra.mxu0 %v7199_v37  ;;  %v7395_v46 = vor.u32 %v9770_v43, %v7392_v44  ;;  %v9719_v47 = vld [vmem:[%s11427_s24 + $0x134] sm:$0xf0]  ;;  %v7366_v48 = vld [vmem:[%s11427_s24 + $0x2a0] sm:$0xf]  ;;  %v9716_v52 = vld [vmem:[%s11427_s24 + $0x124] sm:$0xf] }
 0x232   : > { %v9767_v49 = vld [vmem:[%s11427_s24 + $0x2b4] sm:$0xf0]  ;;  %1771 = vmatpush.bf16.msra.mxu1 %v7391_v41  ;;  %1785 = vmatpush.bf16.msra.mxu2 %v7203_v42  ;;  %v7175_v50 = vor.u32 %v9719_v47, %v7174_v45  ;;  %v7176_v53 = vld [vmem:[%s11427_s24 + $0x138] sm:$0xf0]  ;;  %v9764_v54 = vld [vmem:[%s11427_s24 + $0x2a4] sm:$0xf] }
 0x233   : > { %v7367_v51 = vor.u32 %v9767_v49, %v7366_v48  ;;  %1799 = vmatpush.bf16.msra.mxu3 %v7395_v46  ;;  %v7179_v55 = vor.u32 %v9716_v52, %v7176_v53  ;;  %v7368_v56 = vld [vmem:[%s11427_s24 + $0x2b8] sm:$0xf0]  ;;  %v7150_v57 = vld [vmem:[%s11427_s24 + $0xf0] sm:$0xf]  ;;  %v9713_v58 = vld [vmem:[%s11427_s24 + $0x104] sm:$0xf0] }
 0x234   : > { %v7371_v59 = vor.u32 %v9764_v54, %v7368_v56  ;;  %v7342_v60 = vld [vmem:[%s11427_s24 + $0x270] sm:$0xf]  ;;  %v9761_v61 = vld [vmem:[%s11427_s24 + $0x284] sm:$0xf0]  ;;  %v9710_v62 = vld [vmem:[%s11427_s24 + $0xf4] sm:$0xf]  ;;  %v7151_v63 = vor.u32 %v9713_v58, %v7150_v57 }
 0x235   : > { %1758 = vmatpush.bf16.msra.mxu0 %v7175_v50  ;;  %v7152_v0 = vld [vmem:[%s11427_s24 + $0x108] sm:$0xf0]  ;;  %v9758_v1 = vld [vmem:[%s11427_s24 + $0x274] sm:$0xf]  ;;  %v7343_v3 = vor.u32 %v9761_v61, %v7342_v60  ;;  %v7126_v5 = vld [vmem:[%s11427_s24 + $0xc0] sm:$0xf] }
 0x236   : > { %v7344_v2 = vld [vmem:[%s11427_s24 + $0x288] sm:$0xf0]  ;;  %1772 = vmatpush.bf16.msra.mxu1 %v7367_v51  ;;  %1786 = vmatpush.bf16.msra.mxu2 %v7179_v55  ;;  %v7155_v4 = vor.u32 %v9710_v62, %v7152_v0  ;;  %v9707_v6 = vld [vmem:[%s11427_s24 + $0xd4] sm:$0xf0]  ;;  %v7318_v7 = vld [vmem:[%s11427_s24 + $0x240] sm:$0xf] }
 0x237   : > { %1800 = vmatpush.bf16.msra.mxu3 %v7371_v59  ;;  %v7347_v8 = vor.u32 %v9758_v1, %v7344_v2  ;;  %v9755_v9 = vld [vmem:[%s11427_s24 + $0x254] sm:$0xf0]  ;;  %v9704_v10 = vld [vmem:[%s11427_s24 + $0xc4] sm:$0xf]  ;;  %v7128_v11 = vld [vmem:[%s11427_s24 + $0xd8] sm:$0xf0]  ;;  %v7127_v14 = vor.u32 %v9707_v6, %v7126_v5 }
 0x238   : > { %v9752_v12 = vld [vmem:[%s11427_s24 + $0x244] sm:$0xf]  ;;  %v7320_v13 = vld [vmem:[%s11427_s24 + $0x258] sm:$0xf0]  ;;  %v7319_v15 = vor.u32 %v9755_v9, %v7318_v7  ;;  %v7131_v16 = vor.u32 %v9704_v10, %v7128_v11  ;;  %v7102_v17 = vld [vmem:[%s11427_s24 + $0x90] sm:$0xf] }
 0x239   : > { %1759 = vmatpush.bf16.msra.mxu0 %v7151_v63  ;;  %v9701_v18 = vld [vmem:[%s11427_s24 + $0xa4] sm:$0xf0]  ;;  %v7294_v19 = vld [vmem:[%s11427_s24 + $0x210] sm:$0xf]  ;;  %v7323_v20 = vor.u32 %v9752_v12, %v7320_v13  ;;  %v9698_v22 = vld [vmem:[%s11427_s24 + $0x94] sm:$0xf] }
 0x23a   : > { %1773 = vmatpush.bf16.msra.mxu1 %v7343_v3  ;;  %1787 = vmatpush.bf16.msra.mxu2 %v7155_v4  ;;  %v9749_v21 = vld [vmem:[%s11427_s24 + $0x224] sm:$0xf0]  ;;  %v7104_v23 = vld [vmem:[%s11427_s24 + $0xa8] sm:$0xf0]  ;;  %v9746_v24 = vld [vmem:[%s11427_s24 + $0x214] sm:$0xf]  ;;  %v7103_v26 = vor.u32 %v9701_v18, %v7102_v17 }
 0x23b   : > { %1801 = vmatpush.bf16.msra.mxu3 %v7347_v8  ;;  %v7296_v25 = vld [vmem:[%s11427_s24 + $0x228] sm:$0xf0]  ;;  %v7295_v27 = vor.u32 %v9749_v21, %v7294_v19  ;;  %v7107_v28 = vor.u32 %v9698_v22, %v7104_v23  ;;  %v7078_v29 = vld [vmem:[%s11427_s24 + $0x60] sm:$0xf]  ;;  %v9695_v30 = vld [vmem:[%s11427_s24 + $0x74] sm:$0xf0] }
 0x23c   : > { %v7270_v31 = vld [vmem:[%s11427_s24 + $0x1e0] sm:$0xf]  ;;  %v7299_v32 = vor.u32 %v9746_v24, %v7296_v25  ;;  %v9743_v33 = vld [vmem:[%s11427_s24 + $0x1f4] sm:$0xf0]  ;;  %v9692_v34 = vld [vmem:[%s11427_s24 + $0x64] sm:$0xf]  ;;  %v7079_v38 = vor.u32 %v9695_v30, %v7078_v29 }
 0x23d   : > { %1760 = vmatpush.bf16.msra.mxu0 %v7127_v14  ;;  %v7080_v35 = vld [vmem:[%s11427_s24 + $0x78] sm:$0xf0]  ;;  %v9740_v36 = vld [vmem:[%s11427_s24 + $0x1e4] sm:$0xf]  ;;  %v7271_v39 = vor.u32 %v9743_v33, %v7270_v31  ;;  %v7054_v41 = vld [vmem:[%s11427_s24 + $0x30] sm:$0xf] }
 0x23e   : > { %1774 = vmatpush.bf16.msra.mxu1 %v7319_v15  ;;  %1788 = vmatpush.bf16.msra.mxu2 %v7131_v16  ;;  %v7272_v37 = vld [vmem:[%s11427_s24 + $0x1f8] sm:$0xf0]  ;;  %v7083_v40 = vor.u32 %v9692_v34, %v7080_v35  ;;  %v9689_v42 = vld [vmem:[%s11427_s24 + $0x44] sm:$0xf0]  ;;  %v7246_v43 = vld [vmem:[%s11427_s24 + $0x1b0] sm:$0xf] }
 0x23f   : > { %1802 = vmatpush.bf16.msra.mxu3 %v7323_v20  ;;  %v7275_v44 = vor.u32 %v9740_v36, %v7272_v37  ;;  %v9737_v45 = vld [vmem:[%s11427_s24 + $0x1c4] sm:$0xf0]  ;;  %v9686_v46 = vld [vmem:[%s11427_s24 + $0x34] sm:$0xf]  ;;  %v7056_v47 = vld [vmem:[%s11427_s24 + $0x48] sm:$0xf0]  ;;  %v7055_v50 = vor.u32 %v9689_v42, %v7054_v41 }
 0x240   : > { %v9734_v48 = vld [vmem:[%s11427_s24 + $0x1b4] sm:$0xf]  ;;  %v7248_v49 = vld [vmem:[%s11427_s24 + $0x1c8] sm:$0xf0]  ;;  %v7030_v51 = vld [vmem:[%s11427_s24] sm:$0xf]  ;;  %v7247_v54 = vor.u32 %v9737_v45, %v7246_v43  ;;  %v7059_v55 = vor.u32 %v9686_v46, %v7056_v47 }
 0x241   : > { %1761 = vmatpush.bf16.msra.mxu0 %v7103_v26  ;;  %v9683_v52 = vld [vmem:[%s11427_s24 + $0x14] sm:$0xf0]  ;;  %v7222_v53 = vld [vmem:[%s11427_s24 + $0x180] sm:$0xf]  ;;  %v9680_v57 = vld [vmem:[%s11427_s24 + $0x4] sm:$0xf]  ;;  %v7251_v59 = vor.u32 %v9734_v48, %v7248_v49 }
 0x242   : > { %1775 = vmatpush.bf16.msra.mxu1 %v7295_v27  ;;  %1789 = vmatpush.bf16.msra.mxu2 %v7107_v28  ;;  %v9731_v56 = vld [vmem:[%s11427_s24 + $0x194] sm:$0xf0]  ;;  %v7032_v58 = vld [vmem:[%s11427_s24 + $0x18] sm:$0xf0]  ;;  %v9728_v60 = vld [vmem:[%s11427_s24 + $0x184] sm:$0xf]  ;;  %v7031_v2 = vor.u32 %v9683_v52, %v7030_v51 }
 0x243   : > { %1803 = vmatpush.bf16.msra.mxu3 %v7299_v32  ;;  %v7224_v61 = vld [vmem:[%s11427_s24 + $0x198] sm:$0xf0]  ;;  %v7206_v62 = vld [vmem:[%s11427_s24 + $0x158] sm:$0xf]  ;;  %v9726_v63 = vld [vmem:[%s11427_s24 + $0x16c] sm:$0xf0]  ;;  %v7223_v6 = vor.u32 %v9731_v56, %v7222_v53  ;;  %v7035_v7 = vor.u32 %v9680_v57, %v7032_v58 }
 0x244   : > { %v7398_v0 = vld [vmem:[%s11427_s24 + $0x2d8] sm:$0xf]  ;;  %v9774_v1 = vld [vmem:[%s11427_s24 + $0x2ec] sm:$0xf0]  ;;  %v9723_v3 = vld [vmem:[%s11427_s24 + $0x15c] sm:$0xf]  ;;  %v7227_v11 = vor.u32 %v9728_v60, %v7224_v61  ;;  %v7207_v12 = vor.u32 %v9726_v63, %v7206_v62 }
 0x245   : > { %1762 = vmatpush.bf16.msra.mxu0 %v7079_v38  ;;  %v7208_v4 = vld [vmem:[%s11427_s24 + $0x170] sm:$0xf0]  ;;  %v9771_v5 = vld [vmem:[%s11427_s24 + $0x2dc] sm:$0xf]  ;;  %v1128_v9 = vld [vmem:[#allocation2 + $0x10] sm:$0xff]  ;;  %v7399_v15 = vor.u32 %v9774_v1, %v7398_v0  ;;  %s13327_s0 = sld [smem:[#allocation47_spill]] }
 0x246   : > { %1776 = vmatpush.bf16.msra.mxu1 %v7271_v39  ;;  %1790 = vmatpush.bf16.msra.mxu2 %v7083_v40  ;;  %v7400_v8 = vld [vmem:[%s11427_s24 + $0x2f0] sm:$0xf0]  ;;  %v7182_v13 = vld [vmem:[%s11427_s24 + $0x128] sm:$0xf]  ;;  %v9720_v14 = vld [vmem:[%s11427_s24 + $0x13c] sm:$0xf0]  ;;  %v7211_v16 = vor.u32 %v9723_v3, %v7208_v4 }
 0x247   : > { %1804 = vmatpush.bf16.msra.mxu3 %v7275_v44  ;;  %v1130_v10 = vld [vmem:[#allocation2 + $0x18] sm:$0xff]  ;;  %v7374_v17 = vld [vmem:[%s11427_s24 + $0x2a8] sm:$0xf]  ;;  %v1129_v18 = vld [vmem:[#allocation2] sm:$0xff]  ;;  %v7403_v20 = vor.u32 %v9771_v5, %v7400_v8  ;;  %v7183_v28 = vor.u32 %v9720_v14, %v7182_v13  ;;  %vm2106_vm4 = vcmask 1041408   ;;  %vm2099_vm5 = vcmask 31744  }
 0x248   : > { %v1131_v19 = vld [vmem:[#allocation2 + $0x8] sm:$0xff]  ;;  %v9768_v21 = vld [vmem:[%s11427_s24 + $0x2bc] sm:$0xf0]  ;;  %v9717_v22 = vld [vmem:[%s11427_s24 + $0x12c] sm:$0xf]  ;;  %v11562_v24 = vpack.c.bf16 %v1130_v10, %v1128_v9 }
 0x249   : > { %1763 = vmatpush.bf16.msra.mxu0 %v7055_v50  ;;  %v7184_v23 = vld [vmem:[%s11427_s24 + $0x140] sm:$0xf0]  ;;  %v9765_v25 = vld [vmem:[%s11427_s24 + $0x2ac] sm:$0xf]  ;;  %v11566_v27 = vpack.c.bf16 %v1131_v19, %v1129_v18  ;;  %v7375_v29 = vor.u32 %v9768_v21, %v7374_v17  ;;  %v7158_v31 = vld [vmem:[%s11427_s24 + $0xf8] sm:$0xf] }
 0x24a   : > { %1777 = vmatpush.bf16.msra.mxu1 %v7247_v54  ;;  %1791 = vmatpush.bf16.msra.mxu2 %v7059_v55  ;;  %v7376_v26 = vld [vmem:[%s11427_s24 + $0x2c0] sm:$0xf0]  ;;  %v7187_v30 = vor.u32 %v9717_v22, %v7184_v23  ;;  %v9714_v32 = vld [vmem:[%s11427_s24 + $0x10c] sm:$0xf0]  ;;  %v7350_v33 = vld [vmem:[%s11427_s24 + $0x278] sm:$0xf] }
 0x24b   : > { %1805 = vmatpush.bf16.msra.mxu3 %v7251_v59  ;;  %v7379_v34 = vor.u32 %v9765_v25, %v7376_v26  ;;  %v9762_v35 = vld [vmem:[%s11427_s24 + $0x28c] sm:$0xf0]  ;;  %v9711_v36 = vld [vmem:[%s11427_s24 + $0xfc] sm:$0xf]  ;;  %v7160_v37 = vld [vmem:[%s11427_s24 + $0x110] sm:$0xf0]  ;;  %v7159_v40 = vor.u32 %v9714_v32, %v7158_v31 }
 0x24c   : > { %v9759_v38 = vld [vmem:[%s11427_s24 + $0x27c] sm:$0xf]  ;;  %v7352_v39 = vld [vmem:[%s11427_s24 + $0x290] sm:$0xf0]  ;;  %v7351_v41 = vor.u32 %v9762_v35, %v7350_v33  ;;  %v7163_v42 = vor.u32 %v9711_v36, %v7160_v37  ;;  %v7134_v43 = vld [vmem:[%s11427_s24 + $0xc8] sm:$0xf] }
 0x24d   : > { %1764 = vmatpush.bf16.msra.mxu0 %v7031_v2  ;;  %v9708_v44 = vld [vmem:[%s11427_s24 + $0xdc] sm:$0xf0]  ;;  %v7326_v45 = vld [vmem:[%s11427_s24 + $0x248] sm:$0xf]  ;;  %v7355_v46 = vor.u32 %v9759_v38, %v7352_v39  ;;  %v9705_v48 = vld [vmem:[%s11427_s24 + $0xcc] sm:$0xf] }
 0x24e   : > { %1778 = vmatpush.bf16.msra.mxu1 %v7223_v6  ;;  %1792 = vmatpush.bf16.msra.mxu2 %v7035_v7  ;;  %v9756_v47 = vld [vmem:[%s11427_s24 + $0x25c] sm:$0xf0]  ;;  %v7136_v49 = vld [vmem:[%s11427_s24 + $0xe0] sm:$0xf0]  ;;  %v9753_v50 = vld [vmem:[%s11427_s24 + $0x24c] sm:$0xf]  ;;  %v7135_v52 = vor.u32 %v9708_v44, %v7134_v43 }
 0x24f   : > { %1806 = vmatpush.bf16.msra.mxu3 %v7227_v11  ;;  %v7328_v51 = vld [vmem:[%s11427_s24 + $0x260] sm:$0xf0]  ;;  %v7327_v53 = vor.u32 %v9756_v47, %v7326_v45  ;;  %v7139_v54 = vor.u32 %v9705_v48, %v7136_v49  ;;  %v7110_v55 = vld [vmem:[%s11427_s24 + $0x98] sm:$0xf]  ;;  %v9702_v56 = vld [vmem:[%s11427_s24 + $0xac] sm:$0xf0] }
 0x250   : > { %1765 = vmatmul.bf16.vlgmr.msra.gmra.mxu0 %v11562_v24  ;;  %v7302_v57 = vld [vmem:[%s11427_s24 + $0x218] sm:$0xf]  ;;  %v7331_v58 = vor.u32 %v9753_v50, %v7328_v51  ;;  %v9750_v59 = vld [vmem:[%s11427_s24 + $0x22c] sm:$0xf0]  ;;  %v9699_v60 = vld [vmem:[%s11427_s24 + $0x9c] sm:$0xf]  ;;  %v7111_v0 = vor.u32 %v9702_v56, %v7110_v55 }
 0x251   : > { %1813 = vmatpush.bf16.msrb.mxu0 %v7207_v12  ;;  %1793 = vmatmul.bf16.vlgmr.msra.gmra.mxu2 %v11562_v24  ;;  %v7112_v61 = vld [vmem:[%s11427_s24 + $0xb0] sm:$0xf0]  ;;  %v9747_v62 = vld [vmem:[%s11427_s24 + $0x21c] sm:$0xf]  ;;  %v7303_v1 = vor.u32 %v9750_v59, %v7302_v57  ;;  %v7086_v3 = vld [vmem:[%s11427_s24 + $0x68] sm:$0xf] }
 0x252   : > { %1827 = vmatpush.bf16.msrb.mxu1 %v7399_v15  ;;  %1841 = vmatpush.bf16.msrb.mxu2 %v7211_v16  ;;  %v7304_v63 = vld [vmem:[%s11427_s24 + $0x230] sm:$0xf0]  ;;  %v7115_v2 = vor.u32 %v9699_v60, %v7112_v61  ;;  %v9696_v4 = vld [vmem:[%s11427_s24 + $0x7c] sm:$0xf0]  ;;  %v7278_v5 = vld [vmem:[%s11427_s24 + $0x1e8] sm:$0xf] }
 0x253   : > { %1855 = vmatpush.bf16.msrb.mxu3 %v7403_v20  ;;  %1779 = vmatmul.bf16.vlgmr.msra.gmra.mxu1 %v11566_v27  ;;  %v7307_v6 = vor.u32 %v9747_v62, %v7304_v63  ;;  %v9744_v7 = vld [vmem:[%s11427_s24 + $0x1fc] sm:$0xf0]  ;;  %v9693_v8 = vld [vmem:[%s11427_s24 + $0x6c] sm:$0xf]  ;;  %v7088_v9 = vld [vmem:[%s11427_s24 + $0x80] sm:$0xf0]  ;;  %v7087_v12 = vor.u32 %v9696_v4, %v7086_v3 }
 0x254   : > { %1807 = vmatmul.bf16.vlgmr.msra.gmra.mxu3 %v11566_v27  ;;  %v9741_v10 = vld [vmem:[%s11427_s24 + $0x1ec] sm:$0xf]  ;;  %v7280_v11 = vld [vmem:[%s11427_s24 + $0x200] sm:$0xf0]  ;;  %v7279_v13 = vor.u32 %v9744_v7, %v7278_v5  ;;  %v7091_v14 = vor.u32 %v9693_v8, %v7088_v9  ;;  %v7062_v15 = vld [vmem:[%s11427_s24 + $0x38] sm:$0xf] }
 0x255   : > { %1814 = vmatpush.bf16.msrb.mxu0 %v7183_v28  ;;  %v9690_v16 = vld [vmem:[%s11427_s24 + $0x4c] sm:$0xf0]  ;;  %v7254_v17 = vld [vmem:[%s11427_s24 + $0x1b8] sm:$0xf]  ;;  %v7283_v18 = vor.u32 %v9741_v10, %v7280_v11  ;;  %v9687_v20 = vld [vmem:[%s11427_s24 + $0x3c] sm:$0xf] }
 0x256   : > { %1828 = vmatpush.bf16.msrb.mxu1 %v7375_v29  ;;  %1842 = vmatpush.bf16.msrb.mxu2 %v7187_v30  ;;  %v9738_v19 = vld [vmem:[%s11427_s24 + $0x1cc] sm:$0xf0]  ;;  %v7064_v21 = vld [vmem:[%s11427_s24 + $0x50] sm:$0xf0]  ;;  %v9735_v22 = vld [vmem:[%s11427_s24 + $0x1bc] sm:$0xf]  ;;  %v7063_v25 = vor.u32 %v9690_v16, %v7062_v15 }
 0x257   : > { %1856 = vmatpush.bf16.msrb.mxu3 %v7379_v34  ;;  %v7256_v23 = vld [vmem:[%s11427_s24 + $0x1d0] sm:$0xf0]  ;;  %v7038_v26 = vld [vmem:[%s11427_s24 + $0x8] sm:$0xf]  ;;  %v7255_v28 = vor.u32 %v9738_v19, %v7254_v17  ;;  %v7067_v29 = vor.u32 %v9687_v20, %v7064_v21  ;;  %v9684_v30 = vld [vmem:[%s11427_s24 + $0x1c] sm:$0xf0] }
 0x258   : > { %v7230_v31 = vld [vmem:[%s11427_s24 + $0x188] sm:$0xf]  ;;  %v9732_v32 = vld [vmem:[%s11427_s24 + $0x19c] sm:$0xf0]  ;;  %v7259_v33 = vor.u32 %v9735_v22, %v7256_v23  ;;  %v9681_v34 = vld [vmem:[%s11427_s24 + $0xc] sm:$0xf] }
 0x259   : > { %1815 = vmatpush.bf16.msrb.mxu0 %v7159_v40  ;;  %v7040_v35 = vld [vmem:[%s11427_s24 + $0x20] sm:$0xf0]  ;;  %v9729_v36 = vld [vmem:[%s11427_s24 + $0x18c] sm:$0xf]  ;;  %v7214_v38 = vld [vmem:[%s11427_s24 + $0x160] sm:$0xf]  ;;  %v7039_v40 = vor.u32 %v9684_v30, %v7038_v26  ;;  %v7231_v43 = vor.u32 %v9732_v32, %v7230_v31 }
 0x25a   : > { %1829 = vmatpush.bf16.msrb.mxu1 %v7351_v41  ;;  %1843 = vmatpush.bf16.msrb.mxu2 %v7163_v42  ;;  %v7232_v37 = vld [vmem:[%s11427_s24 + $0x1a0] sm:$0xf0]  ;;  %v9727_v39 = vld [vmem:[%s11427_s24 + $0x174] sm:$0xf0]  ;;  %v7406_v41 = vld [vmem:[%s11427_s24 + $0x2e0] sm:$0xf]  ;;  %v7043_v44 = vor.u32 %v9681_v34, %v7040_v35 }
 0x25b   : > { %1857 = vmatpush.bf16.msrb.mxu3 %v7355_v46  ;;  %v9775_v42 = vld [vmem:[%s11427_s24 + $0x2f4] sm:$0xf0]  ;;  %v7235_v45 = vor.u32 %v9729_v36, %v7232_v37  ;;  %v7215_v46 = vor.u32 %v9727_v39, %v7214_v38  ;;  %v7190_v47 = vld [vmem:[%s11427_s24 + $0x130] sm:$0xf]  ;;  %v9721_v48 = vld [vmem:[%s11427_s24 + $0x144] sm:$0xf0] }
 0x25c   : > { %v7407_v49 = vor.u32 %v9775_v42, %v7406_v41  ;;  %v7382_v50 = vld [vmem:[%s11427_s24 + $0x2b0] sm:$0xf]  ;;  %v9769_v51 = vld [vmem:[%s11427_s24 + $0x2c4] sm:$0xf0]  ;;  %v7358_v56 = vld [vmem:[%s11427_s24 + $0x280] sm:$0xf] }
 0x25d   : > { %1816 = vmatpush.bf16.msrb.mxu0 %v7135_v52  ;;  %v7191_v52 = vor.u32 %v9721_v48, %v7190_v47  ;;  %v7383_v55 = vor.u32 %v9769_v51, %v7382_v50  ;;  %v9763_v57 = vld [vmem:[%s11427_s24 + $0x294] sm:$0xf0]  ;;  %v7142_v59 = vld [vmem:[%s11427_s24 + $0xd0] sm:$0xf]  ;;  %v9709_v60 = vld [vmem:[%s11427_s24 + $0xe4] sm:$0xf0] }
 0x25e   : > { %1830 = vmatpush.bf16.msrb.mxu1 %v7327_v53  ;;  %1844 = vmatpush.bf16.msrb.mxu2 %v7139_v54  ;;  %v7166_v53 = vld [vmem:[%s11427_s24 + $0x100] sm:$0xf]  ;;  %v9715_v54 = vld [vmem:[%s11427_s24 + $0x114] sm:$0xf0]  ;;  %v7359_v61 = vor.u32 %v9763_v57, %v7358_v56  ;;  %v7334_v62 = vld [vmem:[%s11427_s24 + $0x250] sm:$0xf] }
 0x25f   : > { %1858 = vmatpush.bf16.msrb.mxu3 %v7331_v58  ;;  %v7167_v58 = vor.u32 %v9715_v54, %v7166_v53  ;;  %v9757_v63 = vld [vmem:[%s11427_s24 + $0x264] sm:$0xf0]  ;;  %v7310_v4 = vld [vmem:[%s11427_s24 + $0x220] sm:$0xf]  ;;  %v9751_v5 = vld [vmem:[%s11427_s24 + $0x234] sm:$0xf0] }
 0x260   : > { %v7335_v3 = vor.u32 %v9757_v63, %v7334_v62  ;;  %v7094_v7 = vld [vmem:[%s11427_s24 + $0x70] sm:$0xf]  ;;  %v9697_v8 = vld [vmem:[%s11427_s24 + $0x84] sm:$0xf0]  ;;  %v7311_v9 = vor.u32 %v9751_v5, %v7310_v4  ;;  %v7262_v16 = vld [vmem:[%s11427_s24 + $0x1c0] sm:$0xf] }
 0x261   : > { %1817 = vmatpush.bf16.msrb.mxu0 %v7111_v0  ;;  %v7143_v0 = vor.u32 %v9709_v60, %v7142_v59  ;;  %v7286_v10 = vld [vmem:[%s11427_s24 + $0x1f0] sm:$0xf]  ;;  %v9745_v11 = vld [vmem:[%s11427_s24 + $0x204] sm:$0xf0]  ;;  %v9739_v17 = vld [vmem:[%s11427_s24 + $0x1d4] sm:$0xf0] }
 0x262   : > { %1831 = vmatpush.bf16.msrb.mxu1 %v7303_v1  ;;  %1845 = vmatpush.bf16.msrb.mxu2 %v7115_v2  ;;  %v7118_v1 = vld [vmem:[%s11427_s24 + $0xa0] sm:$0xf]  ;;  %v9703_v2 = vld [vmem:[%s11427_s24 + $0xb4] sm:$0xf0]  ;;  %v7287_v15 = vor.u32 %v9745_v11, %v7286_v10  ;;  %v7046_v19 = vld [vmem:[%s11427_s24 + $0x10] sm:$0xf]  ;;  %v7263_v21 = vor.u32 %v9739_v17, %v7262_v16 }
 0x263   : > { %1859 = vmatpush.bf16.msrb.mxu3 %v7307_v6  ;;  %v7119_v6 = vor.u32 %v9703_v2, %v7118_v1  ;;  %v9685_v20 = vld [vmem:[%s11427_s24 + $0x24] sm:$0xf0]  ;;  %v9671_v23 = vld [vmem:[%s13327_s0 + $0x38] sm:$0xff]  ;;  %v9669_v31 = vld [vmem:[%s13327_s0 + $0x28] sm:$0xff] }
 0x264   : > { %v7047_v22 = vor.u32 %v9685_v20, %v7046_v19  ;;  %v7238_v26 = vld [vmem:[%s11427_s24 + $0x190] sm:$0xf]  ;;  %v9678_v32 = vld [vmem:[%s13327_s0 + $0x70] sm:$0xff]  ;;  %v9677_v34 = vld [vmem:[%s13327_s0 + $0x68] sm:$0xff] }
 0x265   : > { %1818 = vmatpush.bf16.msrb.mxu0 %v7087_v12  ;;  %v7095_v12 = vor.u32 %v9697_v8, %v7094_v7  ;;  %v9679_v30 = vld [vmem:[%s13327_s0 + $0x78] sm:$0xff]  ;;  %v9676_v36 = vld [vmem:[%s13327_s0 + $0x60] sm:$0xff]  ;;  %v9666_v37 = vld [vmem:[%s13327_s0 + $0x10] sm:$0xff] }
 0x266   : > { %1832 = vmatpush.bf16.msrb.mxu1 %v7279_v13  ;;  %1846 = vmatpush.bf16.msrb.mxu2 %v7091_v14  ;;  %v7070_v13 = vld [vmem:[%s11427_s24 + $0x40] sm:$0xf]  ;;  %v9691_v14 = vld [vmem:[%s11427_s24 + $0x54] sm:$0xf0]  ;;  %v9667_v35 = vld [vmem:[%s13327_s0 + $0x18] sm:$0xff] }
 0x267   : > { %1860 = vmatpush.bf16.msrb.mxu3 %v7283_v18  ;;  %v7071_v18 = vor.u32 %v9691_v14, %v7070_v13  ;;  %v9675_v38 = vld [vmem:[%s13327_s0 + $0x58] sm:$0xff]  ;;  %v9665_v39 = vld [vmem:[%s13327_s0 + $0x8] sm:$0xff]  ;;  %v9664_v41 = vld [vmem:[%s13327_s0] sm:$0xff] }
 0x268   : > { %v9673_v42 = vld [vmem:[%s13327_s0 + $0x48] sm:$0xff] }
 0x269   : > { %1819 = vmatpush.bf16.msrb.mxu0 %v7063_v25  ;;  %v9670_v25 = vld [vmem:[%s13327_s0 + $0x30] sm:$0xff] }
 0x26a   : > { %1833 = vmatpush.bf16.msrb.mxu1 %v7255_v28  ;;  %1847 = vmatpush.bf16.msrb.mxu2 %v7067_v29  ;;  %v9733_v28 = vld [vmem:[%s11427_s24 + $0x1a4] sm:$0xf0] }
 0x26b   : > { %1861 = vmatpush.bf16.msrb.mxu3 %v7259_v33  ;;  %v7239_v29 = vor.u32 %v9733_v28, %v7238_v26  ;;  %v9668_v33 = vld [vmem:[%s13327_s0 + $0x20] sm:$0xff]  ;;  %v11707_v48 = vld [vmem:[%s11433_s27] sm:$0x3f]  ;;  %s13329_s27 = scalar_lea.vmem [#allocation26], %s11442_s18 }
 0x26c   : > { %v1265_v51 = vperm.slane %v11707_v48, 0  ;;  %v1266_v59 = vperm.slane %v11707_v48, 1 }
 0x26d   : > { %1820 = vmatpush.bf16.msrb.mxu0 %v7039_v40  ;;  %v9674_v40 = vld [vmem:[%s13327_s0 + $0x50] sm:$0xff] }
 0x26e   : > { %1834 = vmatpush.bf16.msrb.mxu1 %v7231_v43  ;;  %1848 = vmatpush.bf16.msrb.mxu2 %v7043_v44  ;;  %v9672_v43 = vld [vmem:[%s13327_s0 + $0x40] sm:$0xff] }
 0x26f   : > { %1862 = vmatpush.bf16.msrb.mxu3 %v7235_v45 }
 0x270   : > { %1821 = vmatmul.bf16.vlgmr.msrb.gmra.mxu0 %v11562_v24 }
 0x271   : > { %1869 = vmatpush.bf16.msra.mxu0 %v7215_v46  ;;  %1835 = vmatmul.bf16.vlgmr.msrb.gmra.mxu1 %v11566_v27 }
 0x272   : > { %1883 = vmatpush.bf16.msra.mxu1 %v7407_v49  ;;  %1849 = vmatmul.bf16.vlgmr.msrb.gmra.mxu2 %v11562_v24 }
 0x273   : > { %1863 = vmatmul.bf16.vlgmr.msrb.gmra.mxu3 %v11566_v27 }
 0x275   : > { %1870 = vmatpush.bf16.msra.mxu0 %v7191_v52  ;;  %v1267_v52 = vperm.slane %v11707_v48, 2 }
 0x276   : > { %1884 = vmatpush.bf16.msra.mxu1 %v7383_v55 }
 0x279   : > { %1871 = vmatpush.bf16.msra.mxu0 %v7167_v58 }
 0x27a   : > { %1885 = vmatpush.bf16.msra.mxu1 %v7359_v61 }
 0x27d   : > { %1872 = vmatpush.bf16.msra.mxu0 %v7143_v0  ;;  %v1268_v0 = vperm.slane %v11707_v48, 3 }
 0x27e   : > { %1886 = vmatpush.bf16.msra.mxu1 %v7335_v3 }
 0x281   : > { %1873 = vmatpush.bf16.msra.mxu0 %v7119_v6 }
 0x282   : > { %1887 = vmatpush.bf16.msra.mxu1 %v7311_v9 }
 0x285   : > { %1874 = vmatpush.bf16.msra.mxu0 %v7095_v12 }
 0x286   : > { %1888 = vmatpush.bf16.msra.mxu1 %v7287_v15 }
 0x289   : > { %1875 = vmatpush.bf16.msra.mxu0 %v7071_v18 }
 0x28a   : > { %1889 = vmatpush.bf16.msra.mxu1 %v7263_v21 }
 0x28d   : > { %1876 = vmatpush.bf16.msra.mxu0 %v7047_v22 }
 0x28e   : > { %1890 = vmatpush.bf16.msra.mxu1 %v7239_v29 }
 0x290   : > { %1877 = vmatmul.bf16.vlgmr.msra.gmra.mxu0 %v11562_v24 }
 0x291   : > { %2033 = vmatpush.bf16.msrb.mxu0 %v9671_v23  ;;  %1891 = vmatmul.bf16.vlgmr.msra.gmra.mxu1 %v11566_v27 }
 0x292   : > { %2052 = vmatpush.bf16.msrb.mxu1 %v9679_v30 }
 0x295   : > { %2034 = vmatpush.bf16.msrb.mxu0 %v9670_v25 }
 0x296   : > { %2053 = vmatpush.bf16.msrb.mxu1 %v9678_v32 }
 0x299   : > { %2035 = vmatpush.bf16.msrb.mxu0 %v9669_v31  ;;  %v1269_v31 = vperm.slane %v11707_v48, 4 }
 0x29a   : > { %2054 = vmatpush.bf16.msrb.mxu1 %v9677_v34 }
 0x29d   : > { %2036 = vmatpush.bf16.msrb.mxu0 %v9668_v33 }
 0x29e   : > { %2055 = vmatpush.bf16.msrb.mxu1 %v9676_v36  ;;  %v9724_v36 = vld [vmem:[%s11427_s24 + $0x164] sm:$0xf] }
 0x2a1   : > { %2037 = vmatpush.bf16.msrb.mxu0 %v9667_v35 }
 0x2a2   : > { %2056 = vmatpush.bf16.msrb.mxu1 %v9675_v38  ;;  %v9772_v38 = vld [vmem:[%s11427_s24 + $0x2e4] sm:$0xf] }
 0x2a5   : > { %2038 = vmatpush.bf16.msrb.mxu0 %v9666_v37  ;;  %v7216_v37 = vld [vmem:[%s11427_s24 + $0x178] sm:$0xf0] }
 0x2a6   : > { %2057 = vmatpush.bf16.msrb.mxu1 %v9674_v40  ;;  %v7408_v40 = vld [vmem:[%s11427_s24 + $0x2f8] sm:$0xf0] }
 0x2a9   : > { %2039 = vmatpush.bf16.msrb.mxu0 %v9665_v39  ;;  %v7219_v39 = vor.u32 %v9724_v36, %v7216_v37 }
 0x2aa   : > { %2058 = vmatpush.bf16.msrb.mxu1 %v9673_v42  ;;  %v9718_v42 = vld [vmem:[%s11427_s24 + $0x134] sm:$0xf] }
 0x2ab   : > { %1897 = vmatpush.bf16.msra.mxu2 %v7219_v39 }
 0x2ad   : > { %2040 = vmatpush.bf16.msrb.mxu0 %v9664_v41  ;;  %v7411_v41 = vor.u32 %v9772_v38, %v7408_v40 }
 0x2ae   : > { %2059 = vmatpush.bf16.msrb.mxu1 %v9672_v43  ;;  %v7192_v43 = vld [vmem:[%s11427_s24 + $0x148] sm:$0xf0] }
 0x2af   : > { %1911 = vmatpush.bf16.msra.mxu3 %v7411_v41 }
 0x2cd   : > { %v1766_v44 = vpop.f32.mrf.mxu0 }
 0x2ce   : > { %v1767_v53 = vadd.f32 %v1766_v44, %v1265_v51  ;;  %v7195_v44 = vor.u32 %v9718_v42, %v7192_v43 }
 0x2d0   : > { %v1780_v45 = vpop.f32.mrf.mxu1  ;;  %1898 = vmatpush.bf16.msra.mxu2 %v7195_v44 }
 0x2d1   : > { %v1781_v61 = vadd.f32 %v1780_v45, %v1767_v53  ;;  %v9766_v45 = vld [vmem:[%s11427_s24 + $0x2b4] sm:$0xf] }
 0x2d4   : > { %v1794_v46 = vpop.f32.mrf.mxu2 }
 0x2d5   : > { %v1768_v49 = vpop.f32.mrf.mxu0  ;;  %v1795_v3 = vadd.f32 %v1794_v46, %v1266_v59  ;;  %v7384_v46 = vld [vmem:[%s11427_s24 + $0x2c8] sm:$0xf0] }
 0x2d6   : > { %v1769_v54 = vadd.f32 %v1768_v49, %v1265_v51  ;;  %v7387_v49 = vor.u32 %v9766_v45, %v7384_v46  ;;  %v9760_v51 = vld [vmem:[%s11427_s24 + $0x284] sm:$0xf] }
 0x2d7   : > { %v1808_v47 = vpop.f32.mrf.mxu3 }
 0x2d8   : > { %v1782_v50 = vpop.f32.mrf.mxu1  ;;  %v1809_v10 = vadd.f32 %v1808_v47, %v1795_v3  ;;  %v9712_v47 = vld [vmem:[%s11427_s24 + $0x104] sm:$0xf]  ;;  %1912 = vmatpush.bf16.msra.mxu3 %v7387_v49  ;;  %v9694_v3 = vld [vmem:[%s11427_s24 + $0x74] sm:$0xf] }
 0x2d9   : > { %v1783_v62 = vadd.f32 %v1782_v50, %v1769_v54  ;;  %v7168_v50 = vld [vmem:[%s11427_s24 + $0x118] sm:$0xf0] }
 0x2da   : > { %v7171_v53 = vor.u32 %v9712_v47, %v7168_v50 }
 0x2dc   : > { %v1796_v55 = vpop.f32.mrf.mxu2  ;;  %1899 = vmatpush.bf16.msra.mxu2 %v7171_v53 }
 0x2dd   : > { %v1797_v4 = vadd.f32 %v1796_v55, %v1266_v59  ;;  %v9706_v55 = vld [vmem:[%s11427_s24 + $0xd4] sm:$0xf]  ;;  %v7336_v59 = vld [vmem:[%s11427_s24 + $0x268] sm:$0xf0] }
 0x2df   : > { %v1810_v57 = vpop.f32.mrf.mxu3 }
 0x2e0   : > { %v1811_v11 = vadd.f32 %v1810_v57, %v1797_v4  ;;  %v7096_v4 = vld [vmem:[%s11427_s24 + $0x88] sm:$0xf0] }
 0x2ed   : > { %v1822_v56 = vpop.f32.mrf.mxu0 }
 0x2ee   : > { %v1823_v58 = vadd.f32 %v1822_v56, %v1267_v52  ;;  %v1836_v60 = vpop.f32.mrf.mxu1  ;;  %v7144_v56 = vld [vmem:[%s11427_s24 + $0xe8] sm:$0xf0] }
 0x2ef   : > { %v7147_v57 = vor.u32 %v9706_v55, %v7144_v56 }
 0x2f0   : > { %v1837_v63 = vadd.f32 %v1836_v60, %v1823_v58  ;;  %v9754_v58 = vld [vmem:[%s11427_s24 + $0x254] sm:$0xf]  ;;  %v9700_v60 = vld [vmem:[%s11427_s24 + $0xa4] sm:$0xf] }
 0x2f1   : > { %1900 = vmatpush.bf16.msra.mxu2 %v7147_v57 }
 0x2f2   : > { %v1925_v1 = vmul.f32 %v1837_v63, %v1781_v61  ;;  %v1927_v2 = vmul.f32 %v1837_v63, %v1783_v62  ;;  %v9748_v63 = vld [vmem:[%s11427_s24 + $0x224] sm:$0xf] }
 0x2f4   : > { %v1933_v5 = vpack.c.bf16 %v1927_v2, %v1925_v1 }
 0x2f5   : > { %v1850_v6 = vpop.f32.mrf.mxu2  ;;  %v1824_v8 = vpop.f32.mrf.mxu0 }
 0x2f6   : > { %v1851_v7 = vadd.f32 %v1850_v6, %v1268_v0  ;;  %v1864_v9 = vpop.f32.mrf.mxu3  ;;  %2041 = vmatmul.bf16.vlgmr.msrb.gmra.mxu0 %v1933_v5  ;;  %v1825_v13 = vadd.f32 %v1824_v8, %v1267_v52  ;;  %v1838_v17 = vpop.f32.mrf.mxu1  ;;  %v7360_v52 = vld [vmem:[%s11427_s24 + $0x298] sm:$0xf0]  ;;  %v7099_v5 = vor.u32 %v9694_v3, %v7096_v4  ;;  %v7288_v8 = vld [vmem:[%s11427_s24 + $0x208] sm:$0xf0]  ;;  %v9791_v4 = vld [vmem:[%s11436_s7 + $0x74] sm:$0xf0] }
 0x2f7   : > { %v7363_v54 = vor.u32 %v9760_v51, %v7360_v52  ;;  %v7538_v3 = vld [vmem:[%s11436_s7 + $0x70] sm:$0xf] }
 0x2f8   : > { %v1865_v12 = vadd.f32 %v1864_v9, %v1851_v7  ;;  %v1839_v18 = vadd.f32 %v1838_v17, %v1825_v13  ;;  %v9742_v7 = vld [vmem:[%s11427_s24 + $0x1f4] sm:$0xf]  ;;  %v9736_v13 = vld [vmem:[%s11427_s24 + $0x1c4] sm:$0xf] }
 0x2f9   : > { %1913 = vmatpush.bf16.msra.mxu3 %v7363_v54  ;;  %v7291_v9 = vor.u32 %v9742_v7, %v7288_v8  ;;  %v9682_v17 = vld [vmem:[%s11427_s24 + $0x14] sm:$0xf]  ;;  %v7539_v7 = vor.u32 %v9791_v4, %v7538_v3  ;;  %v9807_v8 = vld [vmem:[%s11436_s7 + $0xf4] sm:$0xf0]  ;;  %v9798_v3 = vld [vmem:[%s11436_s7 + $0xb4] sm:$0xf] }
 0x2fa   : > { %v1926_v14 = vmul.f32 %v1865_v12, %v1809_v10  ;;  %v1928_v15 = vmul.f32 %v1865_v12, %v1811_v11  ;;  %v1929_v21 = vmul.f32 %v1839_v18, %v1781_v61  ;;  %v1931_v22 = vmul.f32 %v1839_v18, %v1783_v62  ;;  %v7120_v62 = vld [vmem:[%s11427_s24 + $0xb8] sm:$0xf0]  ;;  %v7048_v18 = vld [vmem:[%s11427_s24 + $0x28] sm:$0xf0]  ;;  %v7572_v4 = vld [vmem:[%s11436_s7 + $0xb8] sm:$0xf0] }
 0x2fb   : > { %v7339_v61 = vor.u32 %v9754_v58, %v7336_v59  ;;  %v7123_v1 = vor.u32 %v9700_v60, %v7120_v62 }
 0x2fc   : > { %v1934_v16 = vpack.c.bf16 %v1928_v15, %v1926_v14  ;;  %v1935_v26 = vpack.c.bf16 %v1931_v22, %v1929_v21  ;;  %v7264_v14 = vld [vmem:[%s11427_s24 + $0x1d8] sm:$0xf0]  ;;  %v9730_v21 = vld [vmem:[%s11427_s24 + $0x194] sm:$0xf]  ;;  %v7240_v22 = vld [vmem:[%s11427_s24 + $0x1a8] sm:$0xf0] }
 0x2fd   : > { %v1852_v19 = vpop.f32.mrf.mxu2  ;;  %1914 = vmatpush.bf16.msra.mxu3 %v7339_v61  ;;  %1901 = vmatpush.bf16.msra.mxu2 %v7123_v1  ;;  %v7267_v15 = vor.u32 %v9736_v13, %v7264_v14  ;;  %v9806_v13 = vld [vmem:[%s11436_s7 + $0xf4] sm:$0xf]  ;;  %v7604_v14 = vld [vmem:[%s11436_s7 + $0xf8] sm:$0xf0] }
 0x2fe   : > { %2060 = vmatmul.bf16.vlgmr.msrb.gmra.mxu1 %v1934_v16  ;;  %v1853_v20 = vadd.f32 %v1852_v19, %v1268_v0  ;;  %v1866_v23 = vpop.f32.mrf.mxu3  ;;  %v7312_v0 = vld [vmem:[%s11427_s24 + $0x238] sm:$0xf0]  ;;  %v7051_v19 = vor.u32 %v9682_v17, %v7048_v18  ;;  %v7530_v17 = vld [vmem:[%s11436_s7 + $0x60] sm:$0xf]  ;;  %v9789_v18 = vld [vmem:[%s11436_s7 + $0x64] sm:$0xf0] }
 0x2ff   : > { %v7315_v2 = vor.u32 %v9748_v63, %v7312_v0 }
 0x300   : > { %v1867_v25 = vadd.f32 %v1866_v23, %v1853_v20  ;;  %v7243_v23 = vor.u32 %v9730_v21, %v7240_v22  ;;  %v9805_v21 = vld [vmem:[%s11436_s7 + $0xe4] sm:$0xf0]  ;;  %v9788_v22 = vld [vmem:[%s11436_s7 + $0x64] sm:$0xf] }
 0x301   : > { %1915 = vmatpush.bf16.msra.mxu3 %v7315_v2  ;;  %1902 = vmatpush.bf16.msra.mxu2 %v7099_v5  ;;  %v7602_v5 = vld [vmem:[%s11436_s7 + $0xf0] sm:$0xf] }
 0x302   : > { %v1930_v28 = vmul.f32 %v1867_v25, %v1809_v10  ;;  %v1932_v29 = vmul.f32 %v1867_v25, %v1811_v11  ;;  %v9688_v10 = vld [vmem:[%s11427_s24 + $0x44] sm:$0xf]  ;;  %v7072_v11 = vld [vmem:[%s11427_s24 + $0x58] sm:$0xf0]  ;;  %s13328_s24 = scalar_lea.vmem [#allocation24], %s11442_s18 }
 0x303   : > { %v7075_v12 = vor.u32 %v9688_v10, %v7072_v11  ;;  %v7540_v10 = vld [vmem:[%s11436_s7 + $0x78] sm:$0xf0]  ;;  %v7603_v11 = vor.u32 %v9807_v8, %v7602_v5  ;;  %v7575_v5 = vor.u32 %v9798_v3, %v7572_v4  ;;  %v9781_v8 = vld [vmem:[%s11436_s7 + $0x24] sm:$0xf0] }
 0x304   : > { %v1936_v30 = vpack.c.bf16 %v1932_v29, %v1930_v28  ;;  %v1164_v29 = vld [vmem:[#allocation8] sm:$0xf] }
 0x305   : > { %1916 = vmatpush.bf16.msra.mxu3 %v7291_v9  ;;  %1903 = vmatpush.bf16.msra.mxu2 %v7075_v12  ;;  %2096 = vst [vmem:[#allocation1] ss:$4 sm:$0xff] %v1164_v29  ;;  %v9790_v9 = vld [vmem:[%s11436_s7 + $0x74] sm:$0xf]  ;;  %v7596_v29 = vld [vmem:[%s11436_s7 + $0xe8] sm:$0xf0] }
 0x306   : > { %2046 = vmatmul.bf16.gmra.mxu0 %v1935_v26  ;;  %v7543_v12 = vor.u32 %v9790_v9, %v7540_v10  ;;  %v7562_v9 = vld [vmem:[%s11436_s7 + $0xa0] sm:$0xf] }
 0x308   : > { %2393 = vmatpush.bf16.msra.mxu0 %v7543_v12  ;;  %v9780_v12 = vld [vmem:[%s11436_s7 + $0x24] sm:$0xf] }
 0x309   : > { %1917 = vmatpush.bf16.msra.mxu3 %v7267_v15  ;;  %1904 = vmatpush.bf16.msra.mxu2 %v7051_v19  ;;  %v7607_v15 = vor.u32 %v9806_v13, %v7604_v14  ;;  %v7594_v19 = vld [vmem:[%s11436_s7 + $0xe0] sm:$0xf]  ;;  %v7500_v13 = vld [vmem:[%s11436_s7 + $0x28] sm:$0xf0] }
 0x30b   : > { %2407 = vmatpush.bf16.msra.mxu1 %v7607_v15  ;;  %v7503_v15 = vor.u32 %v9780_v12, %v7500_v13 }
 0x30c   : > { %1905 = vmatmul.bf16.vlgmr.msra.gmra.mxu2 %v11562_v24  ;;  %v2097_v36 = vld.sshfl [vmem:[#allocation1] sm:$0xff pattern:$0x73625140]  ;;  %v2098_v38 = vld.sshfl [vmem:[#allocation1 + $0x8] sm:$0xff pattern:$0x73625140] }
 0x30d   : > { %v1878_v32 = vpop.f32.mrf.mxu0  ;;  %1918 = vmatpush.bf16.msra.mxu3 %v7243_v23  ;;  %v2107_v37 = vsel %vm2106_vm4, %v2097_v36, 0  ;;  %v2109_v40 = vsel %vm2106_vm4, %v2098_v38, 0  ;;  %v7532_v23 = vld [vmem:[%s11436_s7 + $0x68] sm:$0xf0]  ;;  %v9786_v38 = vld [vmem:[%s11436_s7 + $0x54] sm:$0xf] }
 0x30e   : > { %2065 = vmatmul.bf16.gmra.mxu1 %v1936_v30  ;;  %v1879_v33 = vadd.f32 %v1878_v32, %v1269_v31  ;;  %v1892_v34 = vpop.f32.mrf.mxu1  ;;  %2118 = vmatpush.bf16.msrb.mxu2 %v2107_v37  ;;  %v9803_v37 = vld [vmem:[%s11436_s7 + $0xd4] sm:$0xf0] }
 0x310   : > { %v11716_v35 = vadd.f32 %v1892_v34, %v1879_v33  ;;  %1919 = vmatmul.bf16.vlgmr.msra.gmra.mxu3 %v11566_v27 }
 0x311   : > { %2137 = vmatpush.bf16.msrb.mxu3 %v2109_v40 }
 0x312   : > { %2365 = vmatpush.bf16.msra.mxu2 %v7539_v7  ;;  %v7498_v7 = vld [vmem:[%s11436_s7 + $0x20] sm:$0xf] }
 0x313   : > { %v7499_v10 = vor.u32 %v9781_v8, %v7498_v7 }
 0x315   : > { %v11740_v6 = vpop.f32.mrf.mxu0  ;;  %2379 = vmatpush.bf16.msra.mxu3 %v7603_v11  ;;  %v9797_v11 = vld [vmem:[%s11436_s7 + $0xa4] sm:$0xf0] }
 0x316   : > { %v11748_v16 = vpop.f32.mrf.mxu1  ;;  %v7563_v14 = vor.u32 %v9797_v11, %v7562_v9 }
 0x373   : > { %v2042_v20 = vpop.f32.mrf.mxu0 }
 0x37b   : > { %v2061_v25 = vpop.f32.mrf.mxu1  ;;  %v2044_v26 = vpop.f32.mrf.mxu0 }
 0x37c   : > { %v2062_v33 = vadd.f32 %v2061_v25, %v2042_v20  ;;  %v7531_v20 = vor.u32 %v9789_v18, %v7530_v17  ;;  %v7595_v25 = vor.u32 %v9805_v21, %v7594_v19  ;;  %v9796_v17 = vld [vmem:[%s11436_s7 + $0xa4] sm:$0xf]  ;;  %v7564_v18 = vld [vmem:[%s11436_s7 + $0xa8] sm:$0xf0]  ;;  %v9779_v21 = vld [vmem:[%s11436_s7 + $0x14] sm:$0xf0] }
 0x37d   : > { %v7567_v19 = vor.u32 %v9796_v17, %v7564_v18 }
 0x37e   : > { %2366 = vmatpush.bf16.msra.mxu2 %v7531_v20  ;;  %2380 = vmatpush.bf16.msra.mxu3 %v7595_v25  ;;  %v7490_v20 = vld [vmem:[%s11436_s7 + $0x10] sm:$0xf]  ;;  %v9795_v25 = vld [vmem:[%s11436_s7 + $0x94] sm:$0xf0] }
 0x383   : > { %v2063_v28 = vpop.f32.mrf.mxu1  ;;  %v2047_v30 = vpop.f32.mrf.mxu0 }
 0x384   : > { %v2064_v45 = vadd.f32 %v2063_v28, %v2044_v26  ;;  %v7535_v26 = vor.u32 %v9788_v22, %v7532_v23  ;;  %v9804_v28 = vld [vmem:[%s11436_s7 + $0xe4] sm:$0xf]  ;;  %v7554_v22 = vld [vmem:[%s11436_s7 + $0x90] sm:$0xf]  ;;  %v7491_v23 = vor.u32 %v9779_v21, %v7490_v20 }
 0x386   : > { %2394 = vmatpush.bf16.msra.mxu0 %v7535_v26  ;;  %v9778_v26 = vld [vmem:[%s11436_s7 + $0x14] sm:$0xf] }
 0x38b   : > { %v2066_v32 = vpop.f32.mrf.mxu1  ;;  %v2049_v43 = vpop.f32.mrf.mxu0 }
 0x38c   : > { %v2067_v34 = vadd.f32 %v2066_v32, %v2047_v30  ;;  %v7599_v30 = vor.u32 %v9804_v28, %v7596_v29  ;;  %v7522_v32 = vld [vmem:[%s11436_s7 + $0x50] sm:$0xf]  ;;  %v7492_v28 = vld [vmem:[%s11436_s7 + $0x18] sm:$0xf0]  ;;  %v7555_v29 = vor.u32 %v9795_v25, %v7554_v22  ;;  %v10470_v25 = vld [vmem:[#allocation2 + $0x10] sm:$0xff] }
 0x38e   : > { %v2071_v39 = vmax.f32 %v2062_v33, %v2067_v34  ;;  %2408 = vmatpush.bf16.msra.mxu1 %v7599_v30  ;;  %v7495_v30 = vor.u32 %v9778_v26, %v7492_v28  ;;  %v10471_v28 = vld [vmem:[#allocation2] sm:$0xff] }
 0x390   : > { %v2073_v24 = vsub.f32 %v2062_v33, %v2071_v39  ;;  %v2079_v41 = vsub.f32 %v2067_v34, %v2071_v39  ;;  %v9787_v33 = vld [vmem:[%s11436_s7 + $0x54] sm:$0xf0]  ;;  %v7586_v34 = vld [vmem:[%s11436_s7 + $0xd0] sm:$0xf]  ;;  %v7524_v39 = vld [vmem:[%s11436_s7 + $0x58] sm:$0xf0] }
 0x391   : > { %v7523_v36 = vor.u32 %v9787_v33, %v7522_v32  ;;  %v7587_v40 = vor.u32 %v9803_v37, %v7586_v34  ;;  %v9794_v32 = vld [vmem:[%s11436_s7 + $0x94] sm:$0xf]  ;;  %v7556_v33 = vld [vmem:[%s11436_s7 + $0x98] sm:$0xf0] }
 0x392   : > { %v2075_v42 = vmul.f32 1.442695, %v2073_v24  ;;  %v2081_v27 = vmul.f32 1.442695, %v2079_v41  ;;  %v7527_v24 = vor.u32 %v9786_v38, %v7524_v39  ;;  %v9802_v41 = vld [vmem:[%s11436_s7 + $0xd4] sm:$0xf]  ;;  %v7559_v37 = vor.u32 %v9794_v32, %v7556_v33 }
 0x393   : > { %v2068_v44 = vpop.f32.mrf.mxu1  ;;  %2367 = vmatpush.bf16.msra.mxu2 %v7523_v36  ;;  %2381 = vmatpush.bf16.msra.mxu3 %v7587_v40  ;;  %v7482_v38 = vld [vmem:[%s11436_s7] sm:$0xf]  ;;  %v9777_v39 = vld [vmem:[%s11436_s7 + $0x4] sm:$0xf0] }
 0x394   : > { %v2069_v46 = vadd.f32 %v2068_v44, %v2049_v43  ;;  %10448 = vpow2.f32 %v2075_v42  ;;  %v7588_v42 = vld [vmem:[%s11436_s7 + $0xd8] sm:$0xf0]  ;;  %2395 = vmatpush.bf16.msra.mxu0 %v7527_v24  ;;  %v7514_v43 = vld [vmem:[%s11436_s7 + $0x40] sm:$0xf]  ;;  %v9785_v44 = vld [vmem:[%s11436_s7 + $0x44] sm:$0xf0]  ;;  %v7483_v24 = vor.u32 %v9777_v39, %v7482_v38 }
 0x395   : > { %10450 = vpow2.f32 %v2081_v27  ;;  %v7591_v27 = vor.u32 %v9802_v41, %v7588_v42  ;;  %v7546_v40 = vld [vmem:[%s11436_s7 + $0x80] sm:$0xf]  ;;  %v9793_v41 = vld [vmem:[%s11436_s7 + $0x84] sm:$0xf0]  ;;  %v9776_v42 = vld [vmem:[%s11436_s7 + $0x4] sm:$0xf] }
 0x396   : > { %v2072_v47 = vmax.f32 %v2064_v45, %v2069_v46  ;;  %v10472_v39 = vld [vmem:[#allocation2 + $0x18] sm:$0xff] }
 0x397   : > { %2409 = vmatpush.bf16.msra.mxu1 %v7591_v27  ;;  %v7484_v27 = vld [vmem:[%s11436_s7 + $0x8] sm:$0xf0] }
 0x398   : > { %v2074_v49 = vsub.f32 %v2064_v45, %v2072_v47  ;;  %v2080_v50 = vsub.f32 %v2069_v46, %v2072_v47  ;;  %v7578_v45 = vld [vmem:[%s11436_s7 + $0xc0] sm:$0xf]  ;;  %v7515_v46 = vor.u32 %v9785_v44, %v7514_v43  ;;  %v9801_v47 = vld [vmem:[%s11436_s7 + $0xc4] sm:$0xf0]  ;;  %v7547_v43 = vor.u32 %v9793_v41, %v7546_v40 }
 0x399   : > { %v7487_v44 = vor.u32 %v9776_v42, %v7484_v27  ;;  %v11009_v27 = vmov 256.0  }
 0x39a   : > { %v2077_v51 = vmul.f32 1.442695, %v2074_v49  ;;  %v2083_v52 = vmul.f32 1.442695, %v2080_v50  ;;  %v10449_v53 = vpop.eup %10448  ;;  %v9784_v49 = vld [vmem:[%s11436_s7 + $0x44] sm:$0xf]  ;;  %2368 = vmatpush.bf16.msra.mxu2 %v7515_v46 }
 0x39b   : > { %v10451_v54 = vpop.eup %10450  ;;  %v7516_v50 = vld [vmem:[%s11436_s7 + $0x48] sm:$0xf0] }
 0x39c   : > { %10452 = vpow2.f32 %v2077_v51  ;;  %v2085_v55 = vadd.f32 %v10451_v54, %v10449_v53  ;;  %v7579_v51 = vor.u32 %v9801_v47, %v7578_v45  ;;  %v9792_v45 = vld [vmem:[%s11436_s7 + $0x84] sm:$0xf]  ;;  %v7548_v46 = vld [vmem:[%s11436_s7 + $0x88] sm:$0xf0] }
 0x39d   : > { %10454 = vpow2.f32 %v2083_v52  ;;  %v7519_v52 = vor.u32 %v9784_v49, %v7516_v50  ;;  %v7551_v47 = vor.u32 %v9792_v45, %v7548_v46  ;;  %v8058_v46 = vld [vmem:[%s11453_s4 + $0x380] sm:$0xf] }
 0x39e   : > { %10456 = vrcp.f32 %v2085_v55  ;;  %2382 = vmatpush.bf16.msra.mxu3 %v7579_v51 }
 0x39f   : > { %2396 = vmatpush.bf16.msra.mxu0 %v7519_v52 }
 0x3a2   : > { %v10453_v56 = vpop.eup %10452 }
 0x3a3   : > { %v10455_v57 = vpop.eup %10454 }
 0x3a4   : > { %v2086_v58 = vadd.f32 %v10455_v57, %v10453_v56  ;;  %v10457_v59 = vpop.eup %10456 }
 0x3a5   : > { %v2089_v61 = vmul.f32 %v10457_v59, %v10449_v53  ;;  %v2091_v1 = vmul.f32 %v10457_v59, %v10451_v54  ;;  %v9800_v53 = vld [vmem:[%s11436_s7 + $0xc4] sm:$0xf]  ;;  %v7580_v54 = vld [vmem:[%s11436_s7 + $0xc8] sm:$0xf0]  ;;  %v11791_v59 = vpop.f32.mrf.mxu2 }
 0x3a6   : > { %10458 = vrcp.f32 %v2086_v58  ;;  %v7583_v55 = vor.u32 %v9800_v53, %v7580_v54  ;;  %v7570_v58 = vld [vmem:[%s11436_s7 + $0xb0] sm:$0xf]  ;;  %v1270_v53 = vperm.slane %v11707_v48, 5 }
 0x3a7   : > { %10460 = vrcp.f32 %v11009_v27  ;;  %v7804_v27 = vld [vmem:[%s11453_s4 + $0x1c0] sm:$0xf0] }
 0x3a8   : > { %2410 = vmatpush.bf16.msra.mxu1 %v7583_v55 }
 0x3ac   : > { %v10459_v60 = vpop.eup %10458  ;;  %2411 = vmatpush.bf16.msra.mxu1 %v7575_v5 }
 0x3ad   : > { %v2090_v62 = vmul.f32 %v10459_v60, %v10453_v56  ;;  %v2092_v0 = vmul.f32 %v10459_v60, %v10455_v57  ;;  %v7506_v56 = vld [vmem:[%s11436_s7 + $0x30] sm:$0xf]  ;;  %v9783_v57 = vld [vmem:[%s11436_s7 + $0x34] sm:$0xf0]  ;;  %v11793_v60 = vpop.f32.mrf.mxu3  ;;  %v1908_v34 = vpop.f32.mrf.mxu2 }
 0x3af   : > { %v2093_v63 = vpack.c.bf16 %v2090_v62, %v2089_v61  ;;  %v2094_v2 = vpack.c.bf16 %v2092_v0, %v2091_v1  ;;  %v7507_v61 = vor.u32 %v9783_v57, %v7506_v56  ;;  %v9799_v62 = vld [vmem:[%s11436_s7 + $0xb4] sm:$0xf0]  ;;  %v7508_v0 = vld [vmem:[%s11436_s7 + $0x38] sm:$0xf0]  ;;  %v1881_v56 = vadd.f32 %v11740_v6, %v1269_v31 }
 0x3b0   : > { %v7571_v1 = vor.u32 %v9799_v62, %v7570_v58  ;;  %2412 = vmatpush.bf16.msra.mxu1 %v7567_v19  ;;  %v1909_v57 = vadd.f32 %v1908_v34, %v1270_v53  ;;  %v1907_v58 = vadd.f32 %v11791_v59, %v1270_v53  ;;  %v8060_v53 = vld [vmem:[%s11453_s4 + $0x3c0] sm:$0xf0] }
 0x3b1   : > { %7476 = vmatmul.msk.bf16.vlgmr.msrb.gmra.mxu2 %vm2099_vm5, %v2093_v63  ;;  %7478 = vmatmul.msk.bf16.vlgmr.msrb.gmra.mxu3 %vm2099_vm5, %v2093_v63  ;;  %v9782_v63 = vld [vmem:[%s11436_s7 + $0x34] sm:$0xf]  ;;  %s13330_s7 = sld [smem:[#allocation39_spill]] }
 0x3b2   : > { %2369 = vmatpush.bf16.msra.mxu2 %v7507_v61  ;;  %2383 = vmatpush.bf16.msra.mxu3 %v7571_v1  ;;  %v1895_v61 = vadd.f32 %v11748_v16, %v1881_v56  ;;  %v10048_v56 = vld [vmem:[%s11453_s4 + $0x784] sm:$0xf] }
 0x3b4   : > { %2413 = vmatpush.bf16.msra.mxu1 %v7559_v37 }
 0x3b5   : > { %v1922_v36 = vpop.f32.mrf.mxu3 }
 0x3b6   : > { %2370 = vmatpush.bf16.msra.mxu2 %v7499_v10  ;;  %2384 = vmatpush.bf16.msra.mxu3 %v7563_v14  ;;  %v1923_v62 = vadd.f32 %v1922_v36, %v1909_v57  ;;  %v8572_v57 = vld [vmem:[%s11453_s4 + $0x7c0] sm:$0xf0] }
 0x3b7   : > { %p9656_p4 = scmp.ne.s32.totalorder %s13330_s7, 1 }
 0x3b8   : > { %2414 = vmatpush.bf16.msra.mxu1 %v7551_v47  ;;  %v9928_v47 = vld [vmem:[%s11453_s4 + $0x3bc] sm:$0xf0] }
 0x3ba   : > { %2371 = vmatpush.bf16.msra.mxu2 %v7491_v23  ;;  %2385 = vmatpush.bf16.msra.mxu3 %v7555_v29 }
 0x3be   : > { %2372 = vmatpush.bf16.msra.mxu2 %v7483_v24  ;;  %2386 = vmatpush.bf16.msra.mxu3 %v7547_v43  ;;  %v10473_v24 = vld [vmem:[#allocation2 + $0x8] sm:$0xff]  ;;  %v11847_v43 = vpop.eup %10460 }
 0x3bf   : > { %vm2438_vm6 = vweird.f32 %v11847_v43 }
 0x3c1   : > { %7477 = vmatmul.msk.bf16.gmra.mxu2 %vm2099_vm5, %v2094_v2  ;;  %7479 = vmatmul.msk.bf16.gmra.mxu3 %vm2099_vm5, %v2094_v2  ;;  %v7511_v2 = vor.u32 %v9782_v63, %v7508_v0  ;;  %v1921_v63 = vadd.f32 %v11793_v60, %v1907_v58  ;;  %v2199_v60 = vld [vmem:[%s841_s22] sm:$0x3]  ;;  %v7994_v58 = vld [vmem:[%s11453_s4 + $0x300] sm:$0xf] }
 0x3c2   : > { %v2202_v12 = vperm.slane %v2199_v60, 1 }
 0x3c3   : > { %2397 = vmatpush.bf16.msra.mxu0 %v7511_v2 }
 0x3c7   : > { %2398 = vmatpush.bf16.msra.mxu0 %v7503_v15  ;;  %v2201_v15 = vperm.slane %v2199_v60, 0  ;;  %v7932_v60 = vld [vmem:[%s11453_s4 + $0x2c0] sm:$0xf0] }
 0x3cb   : > { %2399 = vmatpush.bf16.msra.mxu0 %v7495_v30 }
 0x3cf   : > { %2400 = vmatpush.bf16.msra.mxu0 %v7487_v44  ;;  %v2434_v44 = vmul.f32 256.0, %v11847_v43 }
 0x3d1   : > { %v2435_v45 = vsub.f32 1.0, %v2434_v44  ;;  %v9984_v44 = vld [vmem:[%s11453_s4 + $0x584] sm:$0xf] }
 0x434   : > { %v2120_v49 = vpop.f32.mrf.mxu2  ;;  %v2139_v50 = vpop.f32.mrf.mxu3 }
 0x435   : > { %v2149_v2 = vmul.f32 %v2120_v49, %v11716_v35  ;;  %v2150_v3 = vmul.f32 %v2139_v50, %v1921_v63  ;;  %v8570_v49 = vld [vmem:[%s11453_s4 + $0x780] sm:$0xf]  ;;  %v8059_v50 = vor.u32 %v9928_v47, %v8058_v46 }
 0x437   : > { %4076 = vmatpush.bf16.msrb.mxu2 %v8059_v50 }
 0x43c   : > { %v2122_v51 = vpop.f32.mrf.mxu2  ;;  %v2141_v52 = vpop.f32.mrf.mxu3 }
 0x43d   : > { %v2151_v48 = vmul.f32 %v2122_v51, %v11716_v35  ;;  %v2152_v7 = vmul.f32 %v2141_v52, %v1921_v63  ;;  %v10056_v51 = vld [vmem:[%s11453_s4 + $0x7bc] sm:$0xf0]  ;;  %v9920_v52 = vld [vmem:[%s11453_s4 + $0x384] sm:$0xf] }
 0x43e   : > { %v8506_v63 = vld [vmem:[%s11453_s4 + $0x700] sm:$0xf] }
 0x444   : > { %v2125_v54 = vpop.f32.mrf.mxu2  ;;  %v2144_v55 = vpop.f32.mrf.mxu3 }
 0x445   : > { %v2157_v0 = vmul.f32 %v2125_v54, %v1895_v61  ;;  %v2158_v1 = vmul.f32 %v2144_v55, %v1923_v62  ;;  %v8571_v54 = vor.u32 %v10056_v51, %v8570_v49  ;;  %v8063_v55 = vor.u32 %v9920_v52, %v8060_v53 }
 0x447   : > { %v2161_v8 = vadd.f32 %v2157_v0, %v2149_v2  ;;  %v2162_v59 = vadd.f32 %v2158_v1, %v2150_v3  ;;  %v10040_v0 = vld [vmem:[%s11453_s4 + $0x73c] sm:$0xf0]  ;;  %4090 = vmatpush.bf16.msrb.mxu3 %v8571_v54  ;;  %4104 = vmatpush.bf16.msrb.mxu0 %v8063_v55  ;;  %v9904_v3 = vld [vmem:[%s11453_s4 + $0x304] sm:$0xf] }
 0x448   : > { %v8507_v2 = vor.u32 %v10040_v0, %v8506_v63  ;;  %v7738_v0 = vld [vmem:[%s11453_s4 + $0x100] sm:$0xf] }
 0x44b   : > { %4091 = vmatpush.bf16.msrb.mxu3 %v8507_v2  ;;  %v8250_v2 = vld [vmem:[%s11453_s4 + $0x500] sm:$0xf] }
 0x44c   : > { %v2127_v4 = vpop.f32.mrf.mxu2  ;;  %v2146_v5 = vpop.f32.mrf.mxu3 }
 0x44d   : > { %v2159_v31 = vmul.f32 %v2127_v4, %v1895_v61  ;;  %v2160_v6 = vmul.f32 %v2146_v5, %v1923_v62  ;;  %v8575_v61 = vor.u32 %v10048_v56, %v8572_v57  ;;  %v9912_v62 = vld [vmem:[%s11453_s4 + $0x33c] sm:$0xf0]  ;;  %v7996_v4 = vld [vmem:[%s11453_s4 + $0x340] sm:$0xf0] }
 0x44e   : > { %v7995_v1 = vor.u32 %v9912_v62, %v7994_v58  ;;  %v10032_v5 = vld [vmem:[%s11453_s4 + $0x704] sm:$0xf] }
 0x44f   : > { %v2163_v9 = vadd.f32 %v2159_v31, %v2151_v48  ;;  %v2164_v16 = vadd.f32 %v2160_v6, %v2152_v7  ;;  %v2436_v48 = vmul.f32 %v11847_v43, %v2435_v45  ;;  %4118 = vmatpush.bf16.msrb.mxu1 %v8575_v61  ;;  %v7999_v7 = vor.u32 %v9904_v3, %v7996_v4  ;;  %v8508_v31 = vld [vmem:[%s11453_s4 + $0x740] sm:$0xf0]  ;;  %v7930_v6 = vld [vmem:[%s11453_s4 + $0x280] sm:$0xf] }
 0x450   : > { %4077 = vmatpush.bf16.msrb.mxu2 %v7995_v1  ;;  %v8316_v45 = vld [vmem:[%s11453_s4 + $0x5c0] sm:$0xf0]  ;;  %v9848_v1 = vld [vmem:[%s11453_s4 + $0x13c] sm:$0xf0] }
 0x451   : > { %v2165_v10 = vpack.c.bf16 %v2163_v9, %v2161_v8  ;;  %v2166_v11 = vpack.c.bf16 %v2164_v16, %v2162_v59  ;;  %v9896_v8 = vld [vmem:[%s11453_s4 + $0x2bc] sm:$0xf0]  ;;  %v8511_v59 = vor.u32 %v10032_v5, %v8508_v31  ;;  %4105 = vmatpush.bf16.msrb.mxu0 %v7999_v7  ;;  %v8319_v52 = vor.u32 %v9984_v44, %v8316_v45  ;;  %v9840_v4 = vld [vmem:[%s11453_s4 + $0x104] sm:$0xf]  ;;  %v8068_v44 = vld [vmem:[%s11453_s4 + $0x3c8] sm:$0xf0] }
 0x452   : > { %v8442_v9 = vld [vmem:[%s11453_s4 + $0x680] sm:$0xf]  ;;  %v9968_v7 = vld [vmem:[%s11453_s4 + $0x504] sm:$0xf]  ;;  %v10049_v45 = vld [vmem:[%s11453_s4 + $0x78c] sm:$0xf] }
 0x453   : > { %2373 = vmatmul.bf16.vlgmr.msra.gmra.mxu2 %v2165_v10  ;;  %2387 = vmatmul.bf16.vlgmr.msra.gmra.mxu3 %v2166_v11  ;;  %v10024_v16 = vld [vmem:[%s11453_s4 + $0x6bc] sm:$0xf0]  ;;  %v8252_v31 = vld [vmem:[%s11453_s4 + $0x540] sm:$0xf0] }
 0x454   : > { %2401 = vmatmul.bf16.vlgmr.msra.gmra.mxu0 %v2165_v10  ;;  %2415 = vmatmul.bf16.vlgmr.msra.gmra.mxu1 %v2166_v11  ;;  %v9888_v10 = vld [vmem:[%s11453_s4 + $0x284] sm:$0xf]  ;;  %v7931_v11 = vor.u32 %v9896_v8, %v7930_v6  ;;  %v9976_v3 = vld [vmem:[%s11453_s4 + $0x53c] sm:$0xf0]  ;;  %v8255_v6 = vor.u32 %v9968_v7, %v8252_v31  ;;  %v10017_v31 = vld [vmem:[%s11453_s4 + $0x68c] sm:$0xf] }
 0x455   : > { %4119 = vmatpush.bf16.msrb.mxu1 %v8511_v59  ;;  %v8251_v5 = vor.u32 %v9976_v3, %v8250_v2  ;;  %v7674_v8 = vld [vmem:[%s11453_s4 + $0x80] sm:$0xf]  ;;  %v9897_v2 = vld [vmem:[%s11453_s4 + $0x2c4] sm:$0xf0] }
 0x456   : > { %4078 = vmatpush.bf16.msrb.mxu2 %v7931_v11  ;;  %v9832_v59 = vld [vmem:[%s11453_s4 + $0xbc] sm:$0xf0]  ;;  %v9824_v11 = vld [vmem:[%s11453_s4 + $0x84] sm:$0xf] }
 0x4d1   : > { %v2402_v13 = vpop.f32.mrf.mxu0  ;;  %v2416_v35 = vpop.f32.mrf.mxu1 }
 0x4d2   : > { %v2403_v14 = vadd.f32 %v2402_v13, %v2202_v12  ;;  %v8444_v13 = vld [vmem:[%s11453_s4 + $0x6c0] sm:$0xf0] }
 0x4d4   : > { %v2417_v19 = vadd.f32 %v2416_v35, %v2403_v14  ;;  %v8443_v14 = vor.u32 %v10024_v16, %v8442_v9  ;;  %v7866_v35 = vld [vmem:[%s11453_s4 + $0x200] sm:$0xf]  ;;  %v7675_v16 = vor.u32 %v9832_v59, %v7674_v8  ;;  %v7874_v59 = vld [vmem:[%s11453_s4 + $0x208] sm:$0xf] }
 0x4d5   : > { %v8186_v9 = vld [vmem:[%s11453_s4 + $0x480] sm:$0xf] }
 0x4d6   : > { %v2374_v17 = vpop.f32.mrf.mxu2  ;;  %v2388_v18 = vpop.f32.mrf.mxu3  ;;  %v11837_v29 = vadd.f32 %v10471_v28, %v2417_v19  ;;  %v2437_v19 = vadd.f32 %v11847_v43, %v2436_v48  ;;  %v8380_v28 = vld [vmem:[%s11453_s4 + $0x640] sm:$0xf0]  ;;  %4092 = vmatpush.bf16.msrb.mxu3 %v8443_v14 }
 0x4d7   : > { %v2375_v20 = vadd.f32 %v2374_v17, %v2201_v15  ;;  %v9880_v17 = vld [vmem:[%s11453_s4 + $0x23c] sm:$0xf0]  ;;  %v9952_v14 = vld [vmem:[%s11453_s4 + $0x484] sm:$0xf] }
 0x4d9   : > { %v2389_v21 = vadd.f32 %v2388_v18, %v2375_v20  ;;  %v2404_v22 = vpop.f32.mrf.mxu0  ;;  %v2418_v32 = vpop.f32.mrf.mxu1  ;;  %v8378_v18 = vld [vmem:[%s11453_s4 + $0x600] sm:$0xf] }
 0x4da   : > { %v2405_v23 = vadd.f32 %v2404_v22, %v2202_v12  ;;  %v10016_v12 = vld [vmem:[%s11453_s4 + $0x684] sm:$0xf] }
 0x4db   : > { %v11835_v26 = vadd.f32 %v10470_v25, %v2389_v21  ;;  %v8447_v20 = vor.u32 %v10016_v12, %v8444_v13  ;;  %v10008_v21 = vld [vmem:[%s11453_s4 + $0x63c] sm:$0xf0]  ;;  %v9872_v22 = vld [vmem:[%s11453_s4 + $0x204] sm:$0xf] }
 0x4dc   : > { %v2419_v34 = vadd.f32 %v2418_v32, %v2405_v23  ;;  %v7868_v23 = vld [vmem:[%s11453_s4 + $0x240] sm:$0xf0]  ;;  %v8379_v32 = vor.u32 %v10008_v21, %v8378_v18  ;;  %v9816_v18 = vld [vmem:[%s11453_s4 + $0x3c] sm:$0xf0] }
 0x4dd   : > { %v2427_v30 = vadd.f32 %v11837_v29, %v11835_v26  ;;  %v10000_v25 = vld [vmem:[%s11453_s4 + $0x604] sm:$0xf]  ;;  %4120 = vmatpush.bf16.msrb.mxu1 %v8447_v20  ;;  %v9944_v21 = vld [vmem:[%s11453_s4 + $0x43c] sm:$0xf0] }
 0x4de   : > { %v2376_v33 = vpop.f32.mrf.mxu2  ;;  %v2390_v37 = vpop.f32.mrf.mxu3  ;;  %v11843_v41 = vadd.f32 %v10473_v24, %v2419_v34  ;;  %v7802_v34 = vld [vmem:[%s11453_s4 + $0x180] sm:$0xf]  ;;  %4093 = vmatpush.bf16.msrb.mxu3 %v8379_v32  ;;  %v8124_v32 = vld [vmem:[%s11453_s4 + $0x440] sm:$0xf0] }
 0x4df   : > { %v2377_v36 = vadd.f32 %v2376_v33, %v2201_v15  ;;  %2428 = vadd.xlane.f32.xlu0 %v2427_v30  ;;  %v7935_v15 = vor.u32 %v9888_v10, %v7932_v60  ;;  %v7867_v30 = vor.u32 %v9880_v17, %v7866_v35  ;;  %v7871_v33 = vor.u32 %v9872_v22, %v7868_v23  ;;  %v9992_v24 = vld [vmem:[%s11453_s4 + $0x5bc] sm:$0xf0]  ;;  %v7676_v60 = vld [vmem:[%s11453_s4 + $0xc0] sm:$0xf0] }
 0x4e0   : > { %v9960_v10 = vld [vmem:[%s11453_s4 + $0x4bc] sm:$0xf0]  ;;  %v7679_v13 = vor.u32 %v9824_v11, %v7676_v60  ;;  %v9808_v22 = vld [vmem:[%s11453_s4 + $0x4] sm:$0xf]  ;;  %v10009_v11 = vld [vmem:[%s11453_s4 + $0x644] sm:$0xf0] }
 0x4e1   : > { %v2391_v38 = vadd.f32 %v2390_v37, %v2377_v36  ;;  %4106 = vmatpush.bf16.msrb.mxu0 %v7935_v15  ;;  %v9864_v36 = vld [vmem:[%s11453_s4 + $0x1bc] sm:$0xf0]  ;;  %4079 = vmatpush.bf16.msrb.mxu2 %v7867_v30  ;;  %v8187_v12 = vor.u32 %v9960_v10, %v8186_v9  ;;  %v8188_v15 = vld [vmem:[%s11453_s4 + $0x4c0] sm:$0xf0]  ;;  %v9881_v9 = vld [vmem:[%s11453_s4 + $0x244] sm:$0xf0] }
 0x4e2   : > { %v8314_v37 = vld [vmem:[%s11453_s4 + $0x580] sm:$0xf]  ;;  %v7803_v47 = vor.u32 %v9864_v36, %v7802_v34  ;;  %v8191_v35 = vor.u32 %v9952_v14, %v8188_v15  ;;  %v7612_v23 = vld [vmem:[%s11453_s4 + $0x40] sm:$0xf0]  ;;  %v9929_v36 = vld [vmem:[%s11453_s4 + $0x3c4] sm:$0xf0]  ;;  %v7875_v10 = vor.u32 %v9881_v9, %v7874_v59 }
 0x4e3   : > { %v11841_v40 = vadd.f32 %v10472_v39, %v2391_v38  ;;  %v11889_v38 = vsel %vm2438_vm6, %v11847_v43, %v2437_v19  ;;  %v8383_v39 = vor.u32 %v10000_v25, %v8380_v28  ;;  %v8315_v50 = vor.u32 %v9992_v24, %v8314_v37  ;;  %v7610_v17 = vld [vmem:[%s11453_s4] sm:$0xf]  ;;  %v9936_v30 = vld [vmem:[%s11453_s4 + $0x404] sm:$0xf]  ;;  %v8578_v37 = vld [vmem:[%s11453_s4 + $0x788] sm:$0xf] }
 0x4e4   : > { %v8122_v19 = vld [vmem:[%s11453_s4 + $0x400] sm:$0xf]  ;;  %v7611_v20 = vor.u32 %v9816_v18, %v7610_v17  ;;  %v7615_v28 = vor.u32 %v9808_v22, %v7612_v23  ;;  %v8127_v34 = vor.u32 %v9936_v30, %v8124_v32  ;;  %v9873_v60 = vld [vmem:[%s11453_s4 + $0x20c] sm:$0xf]  ;;  %v7810_v18 = vld [vmem:[%s11453_s4 + $0x188] sm:$0xf] }
 0x4e5   : > { %v2430_v42 = vadd.f32 %v11843_v41, %v11841_v40  ;;  %4107 = vmatpush.bf16.msrb.mxu0 %v7871_v33  ;;  %4121 = vmatpush.bf16.msrb.mxu1 %v8383_v39  ;;  %v8123_v25 = vor.u32 %v9944_v21, %v8122_v19  ;;  %v8066_v33 = vld [vmem:[%s11453_s4 + $0x388] sm:$0xf]  ;;  %v10001_v15 = vld [vmem:[%s11453_s4 + $0x60c] sm:$0xf] }
 0x4e6   : > { %4080 = vmatpush.bf16.msrb.mxu2 %v7803_v47  ;;  %4094 = vmatpush.bf16.msrb.mxu3 %v8315_v50  ;;  %v10057_v39 = vld [vmem:[%s11453_s4 + $0x7c4] sm:$0xf0]  ;;  %v8067_v24 = vor.u32 %v9929_v36, %v8066_v33  ;;  %v8580_v47 = vld [vmem:[%s11453_s4 + $0x7c8] sm:$0xf0] }
 0x4e7   : > { %2431 = vadd.xlane.f32.xlu0 %v2430_v42  ;;  %v9856_v42 = vld [vmem:[%s11453_s4 + $0x184] sm:$0xf]  ;;  %v9913_v50 = vld [vmem:[%s11453_s4 + $0x344] sm:$0xf0]  ;;  %v9857_v23 = vld [vmem:[%s11453_s4 + $0x18c] sm:$0xf] }
 0x4e8   : > { %v7807_v51 = vor.u32 %v9856_v42, %v7804_v27  ;;  %v8579_v42 = vor.u32 %v10057_v39, %v8578_v37  ;;  %v9921_v27 = vld [vmem:[%s11453_s4 + $0x38c] sm:$0xf]  ;;  %v9865_v19 = vld [vmem:[%s11453_s4 + $0x1c4] sm:$0xf0] }
 0x4e9   : > { %4122 = vmatpush.bf16.msrb.mxu1 %v8319_v52  ;;  %v7811_v21 = vor.u32 %v9865_v19, %v7810_v18  ;;  %v9993_v22 = vld [vmem:[%s11453_s4 + $0x5c4] sm:$0xf0]  ;;  %v9985_v32 = vld [vmem:[%s11453_s4 + $0x58c] sm:$0xf] }
 0x4ea   : > { %4108 = vmatpush.bf16.msrb.mxu0 %v7807_v51  ;;  %4095 = vmatpush.bf16.msrb.mxu3 %v8251_v5  ;;  %v8583_v51 = vor.u32 %v10049_v45, %v8580_v47  ;;  %v7940_v5 = vld [vmem:[%s11453_s4 + $0x2c8] sm:$0xf0]  ;;  %v7746_v36 = vld [vmem:[%s11453_s4 + $0x108] sm:$0xf] }
 0x4eb   : > { %v8324_v33 = vld [vmem:[%s11453_s4 + $0x5c8] sm:$0xf0]  ;;  %v9849_v37 = vld [vmem:[%s11453_s4 + $0x144] sm:$0xf0] }
 0x4ec   : > { %v8258_v39 = vld [vmem:[%s11453_s4 + $0x508] sm:$0xf]  ;;  %v9969_v47 = vld [vmem:[%s11453_s4 + $0x50c] sm:$0xf] }
 0x4ed   : > { %4123 = vmatpush.bf16.msrb.mxu1 %v8255_v6  ;;  %v8452_v6 = vld [vmem:[%s11453_s4 + $0x6c8] sm:$0xf0] }
 0x4ee   : > { %4096 = vmatpush.bf16.msrb.mxu3 %v8187_v12  ;;  %v8455_v8 = vor.u32 %v10017_v31, %v8452_v6  ;;  %v7876_v12 = vld [vmem:[%s11453_s4 + $0x248] sm:$0xf0] }
 0x4ef   : > { %v7879_v14 = vor.u32 %v9873_v60, %v7876_v12  ;;  %v9809_v31 = vld [vmem:[%s11453_s4 + $0xc] sm:$0xf] }
 0x4f0   : > { %v7620_v6 = vld [vmem:[%s11453_s4 + $0x48] sm:$0xf0] }
 0x4f1   : > { %4124 = vmatpush.bf16.msrb.mxu1 %v8191_v35  ;;  %v8388_v35 = vld [vmem:[%s11453_s4 + $0x648] sm:$0xf0]  ;;  %v7623_v59 = vor.u32 %v9809_v31, %v7620_v6  ;;  %v8524_v31 = vld [vmem:[%s11453_s4 + $0x750] sm:$0xf0] }
 0x4f2   : > { %4097 = vmatpush.bf16.msrb.mxu3 %v8123_v25  ;;  %v8391_v17 = vor.u32 %v10001_v15, %v8388_v35  ;;  %v7812_v25 = vld [vmem:[%s11453_s4 + $0x1c8] sm:$0xf0] }
 0x4f3   : > { %v7815_v30 = vor.u32 %v9857_v23, %v7812_v25  ;;  %v9937_v9 = vld [vmem:[%s11453_s4 + $0x40c] sm:$0xf] }
 0x4f5   : > { %4125 = vmatpush.bf16.msrb.mxu1 %v8127_v34  ;;  %v8327_v34 = vor.u32 %v9985_v32, %v8324_v33 }
 0x4f6   : > { %4146 = vmatpush.bf16.msra.mxu3 %v8579_v42  ;;  %v9977_v42 = vld [vmem:[%s11453_s4 + $0x544] sm:$0xf0] }
 0x4f7   : > { %v8259_v45 = vor.u32 %v9977_v42, %v8258_v39 }
 0x4f9   : > { %4174 = vmatpush.bf16.msra.mxu1 %v8583_v51 }
 0x552   : > { %v2429_v46 = vpop.xlane.xlu0 %2428 }
 0x553   : > { %v2440_v49 = vmul.f32 %v11889_v38, %v2429_v46  ;;  %v8071_v46 = vor.u32 %v9921_v27, %v8068_v44  ;;  %v9841_v27 = vld [vmem:[%s11453_s4 + $0x10c] sm:$0xf] }
 0x554   : > { %v7748_v44 = vld [vmem:[%s11453_s4 + $0x148] sm:$0xf0] }
 0x555   : > { %v11898_v43 = vsub.f32 %v11835_v26, %v2440_v49  ;;  %v11901_v53 = vsub.f32 %v11837_v29, %v2440_v49  ;;  %v8002_v49 = vld [vmem:[%s11453_s4 + $0x308] sm:$0xf] }
 0x556   : > { %v8003_v52 = vor.u32 %v9913_v50, %v8002_v49  ;;  %v8260_v49 = vld [vmem:[%s11453_s4 + $0x548] sm:$0xf0] }
 0x557   : > { %v2446_v54 = vmul.f32 %v11898_v43, %v11898_v43  ;;  %v2447_v55 = vmul.f32 %v11901_v53, %v11901_v53  ;;  %v8263_v50 = vor.u32 %v9969_v47, %v8260_v49  ;;  %v9930_v49 = vld [vmem:[%s11453_s4 + $0x3cc] sm:$0xf0] }
 0x559   : > { %v2450_v26 = vadd.f32 %v2447_v55, %v2446_v54  ;;  %v8514_v54 = vld [vmem:[%s11453_s4 + $0x708] sm:$0xf] }
 0x55a   : > { %v2432_v56 = vpop.xlane.xlu0 %2431  ;;  %v10041_v55 = vld [vmem:[%s11453_s4 + $0x744] sm:$0xf0] }
 0x55b   : > { %v2441_v29 = vmul.f32 %v11889_v38, %v2432_v56  ;;  %2451 = vadd.xlane.f32.xlu1 %v2450_v26  ;;  %v9905_v26 = vld [vmem:[%s11453_s4 + $0x30c] sm:$0xf]  ;;  %v8515_v56 = vor.u32 %v10041_v55, %v8514_v54  ;;  %v9833_v54 = vld [vmem:[%s11453_s4 + $0xc4] sm:$0xf0] }
 0x55c   : > { %v8194_v55 = vld [vmem:[%s11453_s4 + $0x488] sm:$0xf] }
 0x55d   : > { %v11909_v57 = vsub.f32 %v11841_v40, %v2441_v29  ;;  %v11912_v58 = vsub.f32 %v11843_v41, %v2441_v29  ;;  %v7739_v40 = vor.u32 %v9848_v1, %v7738_v0  ;;  %v7740_v41 = vld [vmem:[%s11453_s4 + $0x140] sm:$0xf0]  ;;  %v8004_v29 = vld [vmem:[%s11453_s4 + $0x348] sm:$0xf0]  ;;  %v7938_v1 = vld [vmem:[%s11453_s4 + $0x288] sm:$0xf]  ;;  %4147 = vmatpush.bf16.msra.mxu3 %v8515_v56 }
 0x55e   : > { %v7743_v48 = vor.u32 %v9840_v4, %v7740_v41  ;;  %v7939_v3 = vor.u32 %v9897_v2, %v7938_v1  ;;  %v10025_v4 = vld [vmem:[%s11453_s4 + $0x6c4] sm:$0xf0]  ;;  %v9889_v41 = vld [vmem:[%s11453_s4 + $0x28c] sm:$0xf] }
 0x55f   : > { %v2448_v61 = vmul.f32 %v11909_v57, %v11909_v57  ;;  %v2449_v62 = vmul.f32 %v11912_v58, %v11912_v58  ;;  %4081 = vmatpush.bf16.msrb.mxu2 %v7739_v40  ;;  %v8450_v40 = vld [vmem:[%s11453_s4 + $0x688] sm:$0xf]  ;;  %v7943_v7 = vor.u32 %v9889_v41, %v7940_v5  ;;  %v9953_v1 = vld [vmem:[%s11453_s4 + $0x48c] sm:$0xf] }
 0x560   : > { %4109 = vmatpush.bf16.msrb.mxu0 %v7743_v48  ;;  %v8451_v48 = vor.u32 %v10025_v4, %v8450_v40  ;;  %v8196_v2 = vld [vmem:[%s11453_s4 + $0x4c8] sm:$0xf0]  ;;  %v7618_v4 = vld [vmem:[%s11453_s4 + $0x8] sm:$0xf] }
 0x561   : > { %v2453_v63 = vadd.f32 %v2449_v62, %v2448_v61  ;;  %v10033_v61 = vld [vmem:[%s11453_s4 + $0x70c] sm:$0xf]  ;;  %v9817_v41 = vld [vmem:[%s11453_s4 + $0x44] sm:$0xf0] }
 0x562   : > { %v8516_v62 = vld [vmem:[%s11453_s4 + $0x748] sm:$0xf0]  ;;  %4148 = vmatpush.bf16.msra.mxu3 %v8451_v48  ;;  %v8130_v5 = vld [vmem:[%s11453_s4 + $0x408] sm:$0xf]  ;;  %v7619_v48 = vor.u32 %v9817_v41, %v7618_v4  ;;  %v8522_v4 = vld [vmem:[%s11453_s4 + $0x710] sm:$0xf] }
 0x563   : > { %2454 = vadd.xlane.f32.xlu1 %v2453_v63  ;;  %4082 = vmatpush.bf16.msrb.mxu2 %v7675_v16  ;;  %v8007_v63 = vor.u32 %v9905_v26, %v8004_v29  ;;  %v8519_v0 = vor.u32 %v10033_v61, %v8516_v62  ;;  %v8386_v16 = vld [vmem:[%s11453_s4 + $0x608] sm:$0xf]  ;;  %v9825_v61 = vld [vmem:[%s11453_s4 + $0x8c] sm:$0xf]  ;;  %v10042_v41 = vld [vmem:[%s11453_s4 + $0x74c] sm:$0xf0] }
 0x564   : > { %4110 = vmatpush.bf16.msrb.mxu0 %v7679_v13  ;;  %v8387_v13 = vor.u32 %v10009_v11, %v8386_v16  ;;  %v9961_v29 = vld [vmem:[%s11453_s4 + $0x4c4] sm:$0xf0]  ;;  %v7684_v62 = vld [vmem:[%s11453_s4 + $0xc8] sm:$0xf0] }
 0x565   : > { %4175 = vmatpush.bf16.msra.mxu1 %v8519_v0  ;;  %v7687_v0 = vor.u32 %v9825_v61, %v7684_v62  ;;  %v8132_v16 = vld [vmem:[%s11453_s4 + $0x448] sm:$0xf0] }
 0x566   : > { %4149 = vmatpush.bf16.msra.mxu3 %v8387_v13 }
 0x567   : > { %4083 = vmatpush.bf16.msrb.mxu2 %v7611_v20  ;;  %v8322_v20 = vld [vmem:[%s11453_s4 + $0x588] sm:$0xf] }
 0x568   : > { %4111 = vmatpush.bf16.msrb.mxu0 %v7615_v28  ;;  %v8323_v28 = vor.u32 %v9993_v22, %v8322_v20  ;;  %v2425_v22 = vld [vmem:[%s851_s25] sm:$0x3] }
 0x569   : > { %4176 = vmatpush.bf16.msra.mxu1 %v8455_v8  ;;  %v2485_v32 = vperm.slane %v2425_v22, 0  ;;  %v2486_v33 = vperm.slane %v2425_v22, 1  ;;  %v8394_v22 = vld [vmem:[%s11453_s4 + $0x610] sm:$0xf] }
 0x56a   : > { %4150 = vmatpush.bf16.msra.mxu3 %v8323_v28 }
 0x56b   : > { %4132 = vmatpush.bf16.msra.mxu2 %v8067_v24  ;;  %v7747_v24 = vor.u32 %v9849_v37, %v7746_v36 }
 0x56c   : > { %4160 = vmatpush.bf16.msra.mxu0 %v8071_v46  ;;  %v7751_v46 = vor.u32 %v9841_v27, %v7748_v44 }
 0x56d   : > { %4177 = vmatpush.bf16.msra.mxu1 %v8391_v17 }
 0x56e   : > { %4151 = vmatpush.bf16.msra.mxu3 %v8259_v45 }
 0x56f   : > { %4133 = vmatpush.bf16.msra.mxu2 %v8003_v52  ;;  %v7682_v52 = vld [vmem:[%s11453_s4 + $0x88] sm:$0xf] }
 0x570   : > { %4161 = vmatpush.bf16.msra.mxu0 %v8007_v63  ;;  %v7683_v56 = vor.u32 %v9833_v54, %v7682_v52  ;;  %v8195_v63 = vor.u32 %v9961_v29, %v8194_v55  ;;  %v9922_v52 = vld [vmem:[%s11453_s4 + $0x394] sm:$0xf] }
 0x571   : > { %4178 = vmatpush.bf16.msra.mxu1 %v8327_v34  ;;  %v8588_v29 = vld [vmem:[%s11453_s4 + $0x7d0] sm:$0xf0] }
 0x572   : > { %4152 = vmatpush.bf16.msra.mxu3 %v8195_v63 }
 0x573   : > { %4134 = vmatpush.bf16.msra.mxu2 %v7939_v3  ;;  %v8199_v3 = vor.u32 %v9953_v1, %v8196_v2  ;;  %v8010_v1 = vld [vmem:[%s11453_s4 + $0x310] sm:$0xf] }
 0x574   : > { %4162 = vmatpush.bf16.msra.mxu0 %v7943_v7  ;;  %v9945_v7 = vld [vmem:[%s11453_s4 + $0x444] sm:$0xf0]  ;;  %v9914_v2 = vld [vmem:[%s11453_s4 + $0x34c] sm:$0xf0] }
 0x575   : > { %4179 = vmatpush.bf16.msra.mxu1 %v8263_v50  ;;  %v8131_v8 = vor.u32 %v9945_v7, %v8130_v5  ;;  %v8586_v50 = vld [vmem:[%s11453_s4 + $0x790] sm:$0xf]  ;;  %v9906_v5 = vld [vmem:[%s11453_s4 + $0x314] sm:$0xf]  ;;  %v8011_v6 = vor.u32 %v9914_v2, %v8010_v1 }
 0x576   : > { %v10034_v7 = vld [vmem:[%s11453_s4 + $0x714] sm:$0xf] }
 0x577   : > { %4135 = vmatpush.bf16.msra.mxu2 %v7875_v10  ;;  %v8135_v10 = vor.u32 %v9937_v9, %v8132_v16  ;;  %4153 = vmatpush.bf16.msra.mxu3 %v8131_v8  ;;  %v8523_v8 = vor.u32 %v10042_v41, %v8522_v4  ;;  %v9898_v9 = vld [vmem:[%s11453_s4 + $0x2cc] sm:$0xf0]  ;;  %v8268_v1 = vld [vmem:[%s11453_s4 + $0x550] sm:$0xf0] }
 0x578   : > { %4163 = vmatpush.bf16.msra.mxu0 %v7879_v14  ;;  %v9834_v4 = vld [vmem:[%s11453_s4 + $0xcc] sm:$0xf0] }
 0x579   : > { %4180 = vmatpush.bf16.msra.mxu1 %v8199_v3 }
 0x57b   : > { %4136 = vmatpush.bf16.msra.mxu2 %v7811_v21 }
 0x57c   : > { %4164 = vmatpush.bf16.msra.mxu0 %v7815_v30  ;;  %v2426_v30 = vld [vmem:[%s861_s11] sm:$0x3] }
 0x57d   : > { %4181 = vmatpush.bf16.msra.mxu1 %v8135_v10  ;;  %v2494_v39 = vperm.slane %v2426_v30, 0  ;;  %v8527_v10 = vor.u32 %v10034_v7, %v8524_v31  ;;  %v9962_v7 = vld [vmem:[%s11453_s4 + $0x4cc] sm:$0xf0]  ;;  %v9826_v31 = vld [vmem:[%s11453_s4 + $0x94] sm:$0xf] }
 0x57f   : > { %4137 = vmatpush.bf16.msra.mxu2 %v7747_v24  ;;  %v2495_v24 = vperm.slane %v2426_v30, 1  ;;  %v10002_v30 = vld [vmem:[%s11453_s4 + $0x614] sm:$0xf] }
 0x580   : > { %4165 = vmatpush.bf16.msra.mxu0 %v7751_v46 }
 0x583   : > { %4138 = vmatpush.bf16.msra.mxu2 %v7683_v56  ;;  %v10050_v56 = vld [vmem:[%s11453_s4 + $0x794] sm:$0xf] }
 0x584   : > { %4166 = vmatpush.bf16.msra.mxu0 %v7687_v0  ;;  %v8591_v3 = vor.u32 %v10050_v56, %v8588_v29  ;;  %v9978_v56 = vld [vmem:[%s11453_s4 + $0x54c] sm:$0xf0]  ;;  %v9842_v29 = vld [vmem:[%s11453_s4 + $0x114] sm:$0xf] }
 0x587   : > { %4139 = vmatpush.bf16.msra.mxu2 %v7619_v48  ;;  %v8012_v48 = vld [vmem:[%s11453_s4 + $0x350] sm:$0xf0] }
 0x588   : > { %4167 = vmatpush.bf16.msra.mxu0 %v7623_v59  ;;  %v7946_v59 = vld [vmem:[%s11453_s4 + $0x290] sm:$0xf]  ;;  %v8015_v16 = vor.u32 %v9906_v5, %v8012_v48 }
 0x589   : > { %v8202_v48 = vld [vmem:[%s11453_s4 + $0x490] sm:$0xf] }
 0x5ce   : > { %v2452_v51 = vpop.xlane.xlu1 %2451 }
 0x5cf   : > { %v2456_v26 = vmul.f32 %v2452_v51, %v11889_v38  ;;  %v10058_v51 = vld [vmem:[%s11453_s4 + $0x7cc] sm:$0xf0] }
 0x5d0   : > { %v8587_v0 = vor.u32 %v10058_v51, %v8586_v50  ;;  %v9850_v50 = vld [vmem:[%s11453_s4 + $0x14c] sm:$0xf0] }
 0x5d1   : > { %v2458_v40 = vadd.f32 1e-05, %v2456_v26 }
 0x5d3   : > { %10462 = vrsqrt.f32 %v2458_v40  ;;  %vm2466_vm8 = vweird.f32 %v2458_v40 }
 0x5d6   : > { %v2455_v11 = vpop.xlane.xlu1 %2454 }
 0x5d7   : > { %v2457_v60 = vmul.f32 %v2455_v11, %v11889_v38  ;;  %v8458_v11 = vld [vmem:[%s11453_s4 + $0x690] sm:$0xf] }
 0x5d9   : > { %v10463_v12 = vpop.eup %10462  ;;  %v2459_v13 = vadd.f32 1e-05, %v2457_v60  ;;  %v10026_v60 = vld [vmem:[%s11453_s4 + $0x6cc] sm:$0xf0] }
 0x5da   : > { %v2461_v14 = vmul.f32 %v10463_v12, %v2458_v40  ;;  %vm2467_vm7 = vweird.f32 %v10463_v12 }
 0x5db   : > { %10464 = vrsqrt.f32 %v2459_v13  ;;  %vm2468_vm9 = vmor %vm2466_vm8, %vm2467_vm7  ;;  %vm2476_vm11 = vweird.f32 %v2459_v13 }
 0x5dc   : > { %v2462_v15 = vmul.f32 %v10463_v12, %v2461_v14  ;;  %v10018_v14 = vld [vmem:[%s11453_s4 + $0x694] sm:$0xf] }
 0x5de   : > { %v2463_v35 = vmul.f32 0.5, %v2462_v15  ;;  %v8460_v15 = vld [vmem:[%s11453_s4 + $0x6d0] sm:$0xf0] }
 0x5e0   : > { %v2464_v17 = vsub.f32 1.5, %v2463_v35  ;;  %v7947_v35 = vor.u32 %v9898_v9, %v7946_v59  ;;  %v8204_v59 = vld [vmem:[%s11453_s4 + $0x4d0] sm:$0xf0]  ;;  %v7626_v9 = vld [vmem:[%s11453_s4 + $0x10] sm:$0xf] }
 0x5e1   : > { %v10465_v18 = vpop.eup %10464 }
 0x5e2   : > { %v2465_v19 = vmul.f32 %v10463_v12, %v2464_v17  ;;  %v2471_v20 = vmul.f32 %v10465_v18, %v2459_v13  ;;  %vm2477_vm10 = vweird.f32 %v10465_v18  ;;  %v7948_v13 = vld [vmem:[%s11453_s4 + $0x2d0] sm:$0xf0]  ;;  %v8459_v17 = vor.u32 %v10026_v60, %v8458_v11  ;;  %v9818_v11 = vld [vmem:[%s11453_s4 + $0x4c] sm:$0xf0] }
 0x5e3   : > { %vm2478_vm12 = vmor %vm2476_vm11, %vm2477_vm10  ;;  %v8138_v60 = vld [vmem:[%s11453_s4 + $0x410] sm:$0xf] }
 0x5e4   : > { %v2472_v21 = vmul.f32 %v10465_v18, %v2471_v20  ;;  %v2469_v23 = vsel %vm2468_vm9, %v10463_v12, %v2465_v19  ;;  %v9890_v12 = vld [vmem:[%s11453_s4 + $0x294] sm:$0xf]  ;;  %v9882_v19 = vld [vmem:[%s11453_s4 + $0x24c] sm:$0xf0] }
 0x5e5   : > { %v2480_v34 = vmul.f32 %v2469_v23, %v11898_v43  ;;  %v2481_v36 = vmul.f32 %v2469_v23, %v11901_v53  ;;  %v8074_v53 = vld [vmem:[%s11453_s4 + $0x390] sm:$0xf]  ;;  %v7951_v20 = vor.u32 %v9890_v12, %v7948_v13 }
 0x5e6   : > { %v2473_v25 = vmul.f32 0.5, %v2472_v21  ;;  %v8075_v63 = vor.u32 %v9930_v49, %v8074_v53  ;;  %v8463_v21 = vor.u32 %v10018_v14, %v8460_v15  ;;  %v10010_v23 = vld [vmem:[%s11453_s4 + $0x64c] sm:$0xf0]  ;;  %v9810_v15 = vld [vmem:[%s11453_s4 + $0x14] sm:$0xf] }
 0x5e7   : > { %v2489_v27 = vmul.f32 %v2485_v32, %v2480_v34  ;;  %v2490_v44 = vmul.f32 %v2486_v33, %v2481_v36  ;;  %v8395_v34 = vor.u32 %v10010_v23, %v8394_v22  ;;  %v7818_v36 = vld [vmem:[%s11453_s4 + $0x190] sm:$0xf]  ;;  %v10059_v22 = vld [vmem:[%s11453_s4 + $0x7d4] sm:$0xf0]  ;;  %v9923_v23 = vld [vmem:[%s11453_s4 + $0x39c] sm:$0xf] }
 0x5e8   : > { %v2474_v28 = vsub.f32 1.5, %v2473_v25  ;;  %v9874_v25 = vld [vmem:[%s11453_s4 + $0x214] sm:$0xf]  ;;  %v7754_v49 = vld [vmem:[%s11453_s4 + $0x110] sm:$0xf] }
 0x5e9   : > { %v12021_v54 = vadd.f32 %v2494_v39, %v2489_v27  ;;  %v12023_v55 = vadd.f32 %v2495_v24, %v2490_v44  ;;  %v9994_v27 = vld [vmem:[%s11453_s4 + $0x5cc] sm:$0xf0]  ;;  %v9858_v44 = vld [vmem:[%s11453_s4 + $0x194] sm:$0xf]  ;;  %v7755_v2 = vor.u32 %v9850_v50, %v7754_v49  ;;  %v8532_v49 = vld [vmem:[%s11453_s4 + $0x758] sm:$0xf0] }
 0x5ea   : > { %v2475_v37 = vmul.f32 %v10465_v18, %v2474_v28  ;;  %v7884_v28 = vld [vmem:[%s11453_s4 + $0x250] sm:$0xf0]  ;;  %v9946_v12 = vld [vmem:[%s11453_s4 + $0x44c] sm:$0xf0] }
 0x5ec   : > { %v2479_v42 = vsel %vm2478_vm12, %v10465_v18, %v2475_v37  ;;  %v7882_v18 = vld [vmem:[%s11453_s4 + $0x210] sm:$0xf] }
 0x5ed   : > { %v2482_v45 = vmul.f32 %v2479_v42, %v11909_v57  ;;  %v2483_v43 = vmul.f32 %v2479_v42, %v11912_v58  ;;  %v8076_v58 = vld [vmem:[%s11453_s4 + $0x3d0] sm:$0xf0]  ;;  %v9866_v37 = vld [vmem:[%s11453_s4 + $0x1cc] sm:$0xf0] }
 0x5ee   : > { %v8079_v40 = vor.u32 %v9922_v52, %v8076_v58  ;;  %v8330_v42 = vld [vmem:[%s11453_s4 + $0x590] sm:$0xf] }
 0x5ef   : > { %v2491_v46 = vmul.f32 %v2485_v32, %v2482_v45  ;;  %v2492_v47 = vmul.f32 %v2486_v33, %v2483_v43  ;;  %v8396_v32 = vld [vmem:[%s11453_s4 + $0x650] sm:$0xf0]  ;;  %v7883_v33 = vor.u32 %v9882_v19, %v7882_v18  ;;  %v8331_v53 = vor.u32 %v9994_v27, %v8330_v42  ;;  %v8266_v58 = vld [vmem:[%s11453_s4 + $0x510] sm:$0xf]  ;;  %v8082_v19 = vld [vmem:[%s11453_s4 + $0x398] sm:$0xf] }
 0x5f0   : > { %v7820_v45 = vld [vmem:[%s11453_s4 + $0x1d0] sm:$0xf0]  ;;  %v9915_v42 = vld [vmem:[%s11453_s4 + $0x354] sm:$0xf0] }
 0x5f1   : > { %v12025_v26 = vadd.f32 %v2494_v39, %v2491_v46  ;;  %v12027_v57 = vadd.f32 %v2495_v24, %v2492_v47  ;;  %v7887_v39 = vor.u32 %v9874_v25, %v7884_v28  ;;  %v8399_v24 = vor.u32 %v10002_v30, %v8396_v32  ;;  %v9986_v43 = vld [vmem:[%s11453_s4 + $0x594] sm:$0xf]  ;;  %v8084_v30 = vld [vmem:[%s11453_s4 + $0x3d8] sm:$0xf0] }
 0x5f2   : > { %v8332_v46 = vld [vmem:[%s11453_s4 + $0x5d0] sm:$0xf0]  ;;  %v7819_v47 = vor.u32 %v9866_v37, %v7818_v36  ;;  %v7823_v51 = vor.u32 %v9858_v44, %v7820_v45  ;;  %v7627_v25 = vor.u32 %v9818_v11, %v7626_v9  ;;  %v8139_v28 = vor.u32 %v9946_v12, %v8138_v60  ;;  %v10051_v32 = vld [vmem:[%s11453_s4 + $0x79c] sm:$0xf]  ;;  %v8530_v45 = vld [vmem:[%s11453_s4 + $0x718] sm:$0xf] }
 0x5f3   : > { %v12034_v61 = vpack.c.bf16 %v12025_v26, %v12021_v54  ;;  %v12038_v62 = vpack.c.bf16 %v12027_v57, %v12023_v55  ;;  %v8335_v52 = vor.u32 %v9986_v43, %v8332_v46  ;;  %v8140_v18 = vld [vmem:[%s11453_s4 + $0x450] sm:$0xf0]  ;;  %v8087_v27 = vor.u32 %v9923_v23, %v8084_v30  ;;  %v10043_v43 = vld [vmem:[%s11453_s4 + $0x754] sm:$0xf0]  ;;  %v9907_v46 = vld [vmem:[%s11453_s4 + $0x31c] sm:$0xf] }
 0x5f4   : > { %v7892_v9 = vld [vmem:[%s11453_s4 + $0x258] sm:$0xf0]  ;;  %v7826_v12 = vld [vmem:[%s11453_s4 + $0x198] sm:$0xf] }
 0x5f5   : > { %4084 = vmatmul.bf16.vlgmr.msrb.gmra.mxu2 %v12034_v61  ;;  %4098 = vmatmul.bf16.vlgmr.msrb.gmra.mxu3 %v12038_v62 }
 0x5f6   : > { %4112 = vmatmul.bf16.vlgmr.msrb.gmra.mxu0 %v12034_v61  ;;  %4126 = vmatmul.bf16.vlgmr.msrb.gmra.mxu1 %v12038_v62 }
 0x5f7   : > { %4188 = vmatpush.bf16.msrb.mxu2 %v8075_v63  ;;  %4202 = vmatpush.bf16.msrb.mxu3 %v8587_v0  ;;  %v7756_v63 = vld [vmem:[%s11453_s4 + $0x150] sm:$0xf0] }
 0x5f8   : > { %4216 = vmatpush.bf16.msrb.mxu0 %v8079_v40  ;;  %4230 = vmatpush.bf16.msrb.mxu1 %v8591_v3  ;;  %v9970_v0 = vld [vmem:[%s11453_s4 + $0x514] sm:$0xf]  ;;  %v8267_v40 = vor.u32 %v9978_v56, %v8266_v58  ;;  %v7690_v3 = vld [vmem:[%s11453_s4 + $0x90] sm:$0xf]  ;;  %v7759_v41 = vor.u32 %v9842_v29, %v7756_v63  ;;  %v9899_v58 = vld [vmem:[%s11453_s4 + $0x2d4] sm:$0xf0] }
 0x5f9   : > { %v8271_v5 = vor.u32 %v9970_v0, %v8268_v1  ;;  %v8466_v63 = vld [vmem:[%s11453_s4 + $0x698] sm:$0xf]  ;;  %v9891_v1 = vld [vmem:[%s11453_s4 + $0x29c] sm:$0xf] }
 0x5fa   : > { %v10027_v0 = vld [vmem:[%s11453_s4 + $0x6d4] sm:$0xf0] }
 0x5fb   : > { %4189 = vmatpush.bf16.msrb.mxu2 %v8011_v6  ;;  %4203 = vmatpush.bf16.msrb.mxu3 %v8523_v8  ;;  %v7692_v6 = vld [vmem:[%s11453_s4 + $0xd0] sm:$0xf0] }
 0x5fc   : > { %4217 = vmatpush.bf16.msrb.mxu0 %v8015_v16  ;;  %4231 = vmatpush.bf16.msrb.mxu1 %v8527_v10  ;;  %v9954_v8 = vld [vmem:[%s11453_s4 + $0x494] sm:$0xf]  ;;  %v7691_v16 = vor.u32 %v9834_v4, %v7690_v3  ;;  %v8203_v10 = vor.u32 %v9962_v7, %v8202_v48  ;;  %v7695_v13 = vor.u32 %v9826_v31, %v7692_v6  ;;  %v8468_v3 = vld [vmem:[%s11453_s4 + $0x6d8] sm:$0xf0]  ;;  %v9883_v48 = vld [vmem:[%s11453_s4 + $0x254] sm:$0xf0] }
 0x5fd   : > { %v8207_v14 = vor.u32 %v9954_v8, %v8204_v59  ;;  %v8402_v6 = vld [vmem:[%s11453_s4 + $0x618] sm:$0xf]  ;;  %v9875_v59 = vld [vmem:[%s11453_s4 + $0x21c] sm:$0xf] }
 0x5fe   : > { %v10011_v8 = vld [vmem:[%s11453_s4 + $0x654] sm:$0xf0] }
 0x5ff   : > { %4190 = vmatpush.bf16.msrb.mxu2 %v7947_v35  ;;  %4204 = vmatpush.bf16.msrb.mxu3 %v8459_v17  ;;  %v7628_v35 = vld [vmem:[%s11453_s4 + $0x50] sm:$0xf0]  ;;  %v8403_v60 = vor.u32 %v10011_v8, %v8402_v6  ;;  %v10060_v6 = vld [vmem:[%s11453_s4 + $0x7dc] sm:$0xf0]  ;;  %v9924_v8 = vld [vmem:[%s11453_s4 + $0x3a4] sm:$0xf] }
 0x600   : > { %4218 = vmatpush.bf16.msrb.mxu0 %v7951_v20  ;;  %4232 = vmatpush.bf16.msrb.mxu1 %v8463_v21  ;;  %v9938_v17 = vld [vmem:[%s11453_s4 + $0x414] sm:$0xf]  ;;  %v9931_v20 = vld [vmem:[%s11453_s4 + $0x3d4] sm:$0xf0] }
 0x601   : > { %v8594_v21 = vld [vmem:[%s11453_s4 + $0x798] sm:$0xf]  ;;  %v8143_v36 = vor.u32 %v9938_v17, %v8140_v18  ;;  %v8083_v37 = vor.u32 %v9931_v20, %v8082_v19  ;;  %v9859_v18 = vld [vmem:[%s11453_s4 + $0x19c] sm:$0xf] }
 0x602   : > { %v9995_v17 = vld [vmem:[%s11453_s4 + $0x5d4] sm:$0xf0]  ;;  %v7828_v19 = vld [vmem:[%s11453_s4 + $0x1d8] sm:$0xf0] }
 0x603   : > { %4191 = vmatpush.bf16.msrb.mxu2 %v7883_v33  ;;  %4205 = vmatpush.bf16.msrb.mxu3 %v8395_v34  ;;  %v8596_v33 = vld [vmem:[%s11453_s4 + $0x7d8] sm:$0xf0]  ;;  %v7631_v34 = vor.u32 %v9810_v15, %v7628_v35  ;;  %v8338_v35 = vld [vmem:[%s11453_s4 + $0x598] sm:$0xf]  ;;  %v7831_v30 = vor.u32 %v9859_v18, %v7828_v19  ;;  %v8538_v19 = vld [vmem:[%s11453_s4 + $0x720] sm:$0xf] }
 0x604   : > { %4219 = vmatpush.bf16.msrb.mxu0 %v7887_v39  ;;  %4233 = vmatpush.bf16.msrb.mxu1 %v8399_v24  ;;  %v8595_v39 = vor.u32 %v10059_v22, %v8594_v21  ;;  %v8018_v24 = vld [vmem:[%s11453_s4 + $0x318] sm:$0xf]  ;;  %v8599_v44 = vor.u32 %v10051_v32, %v8596_v33  ;;  %v9987_v20 = vld [vmem:[%s11453_s4 + $0x59c] sm:$0xf]  ;;  %v8339_v23 = vor.u32 %v9995_v17, %v8338_v35  ;;  %v9916_v35 = vld [vmem:[%s11453_s4 + $0x35c] sm:$0xf0] }
 0x605   : > { %4140 = vmatmul.bf16.vlgmr.msra.gmra.mxu2 %v12034_v61  ;;  %4154 = vmatmul.bf16.vlgmr.msra.gmra.mxu3 %v12038_v62  ;;  %v8019_v50 = vor.u32 %v9915_v42, %v8018_v24  ;;  %v8340_v21 = vld [vmem:[%s11453_s4 + $0x5d8] sm:$0xf0]  ;;  %v8274_v33 = vld [vmem:[%s11453_s4 + $0x518] sm:$0xf] }
 0x606   : > { %4168 = vmatmul.bf16.vlgmr.msra.gmra.mxu0 %v12034_v61  ;;  %4182 = vmatmul.bf16.vlgmr.msra.gmra.mxu1 %v12038_v62  ;;  %v8343_v32 = vor.u32 %v9987_v20, %v8340_v21  ;;  %v8276_v24 = vld [vmem:[%s11453_s4 + $0x558] sm:$0xf0]  ;;  %v10044_v20 = vld [vmem:[%s11453_s4 + $0x75c] sm:$0xf0]  ;;  %v9908_v21 = vld [vmem:[%s11453_s4 + $0x324] sm:$0xf] }
 0x607   : > { %4192 = vmatpush.bf16.msrb.mxu2 %v7819_v47  ;;  %4206 = vmatpush.bf16.msrb.mxu3 %v8331_v53  ;;  %v8020_v47 = vld [vmem:[%s11453_s4 + $0x358] sm:$0xf0] }
 0x608   : > { %4220 = vmatpush.bf16.msrb.mxu0 %v7823_v51  ;;  %4234 = vmatpush.bf16.msrb.mxu1 %v8335_v52  ;;  %v10035_v53 = vld [vmem:[%s11453_s4 + $0x71c] sm:$0xf]  ;;  %v8531_v51 = vor.u32 %v10043_v43, %v8530_v45  ;;  %v7954_v52 = vld [vmem:[%s11453_s4 + $0x298] sm:$0xf]  ;;  %v8023_v56 = vor.u32 %v9907_v46, %v8020_v47 }
 0x609   : > { %v8535_v29 = vor.u32 %v10035_v53, %v8532_v49  ;;  %v7955_v4 = vor.u32 %v9899_v58, %v7954_v52  ;;  %v9835_v45 = vld [vmem:[%s11453_s4 + $0xd4] sm:$0xf0]  ;;  %v9827_v49 = vld [vmem:[%s11453_s4 + $0x9c] sm:$0xf] }
 0x60a   : > { %v8210_v47 = vld [vmem:[%s11453_s4 + $0x498] sm:$0xf]  ;;  %v8212_v52 = vld [vmem:[%s11453_s4 + $0x4d8] sm:$0xf0] }
 0x60b   : > { %4193 = vmatpush.bf16.msrb.mxu2 %v7755_v2  ;;  %4207 = vmatpush.bf16.msrb.mxu3 %v8267_v40  ;;  %v7956_v2 = vld [vmem:[%s11453_s4 + $0x2d8] sm:$0xf0]  ;;  %v9963_v53 = vld [vmem:[%s11453_s4 + $0x4d4] sm:$0xf0] }
 0x60c   : > { %4221 = vmatpush.bf16.msrb.mxu0 %v7759_v41  ;;  %4235 = vmatpush.bf16.msrb.mxu1 %v8271_v5  ;;  %v10019_v40 = vld [vmem:[%s11453_s4 + $0x69c] sm:$0xf]  ;;  %v8467_v41 = vor.u32 %v10027_v0, %v8466_v63  ;;  %v7890_v5 = vld [vmem:[%s11453_s4 + $0x218] sm:$0xf]  ;;  %v7959_v7 = vor.u32 %v9891_v1, %v7956_v2 }
 0x60d   : > { %v8471_v31 = vor.u32 %v10019_v40, %v8468_v3  ;;  %v7891_v11 = vor.u32 %v9883_v48, %v7890_v5  ;;  %v7634_v58 = vld [vmem:[%s11453_s4 + $0x18] sm:$0xf]  ;;  %v9811_v3 = vld [vmem:[%s11453_s4 + $0x1c] sm:$0xf]  ;;  %v8090_v48 = vld [vmem:[%s11453_s4 + $0x3a0] sm:$0xf] }
 0x60e   : > { %v9819_v63 = vld [vmem:[%s11453_s4 + $0x54] sm:$0xf0]  ;;  %v8148_v5 = vld [vmem:[%s11453_s4 + $0x458] sm:$0xf0] }
 0x60f   : > { %4194 = vmatpush.bf16.msrb.mxu2 %v7691_v16  ;;  %4208 = vmatpush.bf16.msrb.mxu3 %v8203_v10  ;;  %v10003_v16 = vld [vmem:[%s11453_s4 + $0x61c] sm:$0xf]  ;;  %v8146_v0 = vld [vmem:[%s11453_s4 + $0x418] sm:$0xf] }
 0x610   : > { %4222 = vmatpush.bf16.msrb.mxu0 %v7695_v13  ;;  %4236 = vmatpush.bf16.msrb.mxu1 %v8207_v14  ;;  %v8404_v10 = vld [vmem:[%s11453_s4 + $0x658] sm:$0xf0]  ;;  %v9867_v13 = vld [vmem:[%s11453_s4 + $0x1d4] sm:$0xf0]  ;;  %v7895_v14 = vor.u32 %v9875_v59, %v7892_v9  ;;  %v7635_v59 = vor.u32 %v9819_v63, %v7634_v58  ;;  %v7900_v58 = vld [vmem:[%s11453_s4 + $0x260] sm:$0xf0] }
 0x611   : > { %v8407_v15 = vor.u32 %v10003_v16, %v8404_v10  ;;  %v7827_v22 = vor.u32 %v9867_v13, %v7826_v12  ;;  %v9947_v1 = vld [vmem:[%s11453_s4 + $0x454] sm:$0xf0]  ;;  %v8092_v16 = vld [vmem:[%s11453_s4 + $0x3e0] sm:$0xf0] }
 0x612   : > { %v8147_v9 = vor.u32 %v9947_v1, %v8146_v0  ;;  %v10052_v10 = vld [vmem:[%s11453_s4 + $0x7a4] sm:$0xf]  ;;  %v8095_v17 = vor.u32 %v9924_v8, %v8092_v16  ;;  %v7834_v1 = vld [vmem:[%s11453_s4 + $0x1a0] sm:$0xf] }
 0x613   : > { %4195 = vmatpush.bf16.msrb.mxu2 %v7627_v25  ;;  %4209 = vmatpush.bf16.msrb.mxu3 %v8139_v28  ;;  %v7762_v25 = vld [vmem:[%s11453_s4 + $0x118] sm:$0xf] }
 0x614   : > { %4223 = vmatpush.bf16.msrb.mxu0 %v7631_v34  ;;  %4237 = vmatpush.bf16.msrb.mxu1 %v8143_v36  ;;  %v9851_v28 = vld [vmem:[%s11453_s4 + $0x154] sm:$0xf0]  ;;  %v9843_v36 = vld [vmem:[%s11453_s4 + $0x11c] sm:$0xf] }
 0x615   : > { %v9979_v34 = vld [vmem:[%s11453_s4 + $0x554] sm:$0xf0]  ;;  %v7763_v42 = vor.u32 %v9851_v28, %v7762_v25  ;;  %v8540_v25 = vld [vmem:[%s11453_s4 + $0x760] sm:$0xf0] }
 0x616   : > { %4196 = vmatmul.bf16.vlgmr.msrb.gmra.mxu2 %v12034_v61  ;;  %4210 = vmatmul.bf16.vlgmr.msrb.gmra.mxu3 %v12038_v62 }
 0x617   : > { %4244 = vmatpush.bf16.msra.mxu2 %v8083_v37  ;;  %4258 = vmatpush.bf16.msra.mxu3 %v8595_v39  ;;  %v7764_v37 = vld [vmem:[%s11453_s4 + $0x158] sm:$0xf0] }
 0x618   : > { %4272 = vmatpush.bf16.msra.mxu0 %v8087_v27  ;;  %4286 = vmatpush.bf16.msra.mxu1 %v8599_v44  ;;  %v9971_v39 = vld [vmem:[%s11453_s4 + $0x51c] sm:$0xf]  ;;  %v8275_v27 = vor.u32 %v9979_v34, %v8274_v33  ;;  %v7698_v44 = vld [vmem:[%s11453_s4 + $0x98] sm:$0xf]  ;;  %v7767_v43 = vor.u32 %v9843_v36, %v7764_v37  ;;  %v9900_v33 = vld [vmem:[%s11453_s4 + $0x2dc] sm:$0xf0] }
 0x619   : > { %4224 = vmatmul.bf16.vlgmr.msrb.gmra.mxu0 %v12034_v61  ;;  %4238 = vmatmul.bf16.vlgmr.msrb.gmra.mxu1 %v12038_v62  ;;  %v8279_v46 = vor.u32 %v9971_v39, %v8276_v24  ;;  %v8474_v37 = vld [vmem:[%s11453_s4 + $0x6a0] sm:$0xf]  ;;  %v9892_v24 = vld [vmem:[%s11453_s4 + $0x2a4] sm:$0xf] }
 0x61a   : > { %v10028_v39 = vld [vmem:[%s11453_s4 + $0x6dc] sm:$0xf0] }
 0x61b   : > { %4245 = vmatpush.bf16.msra.mxu2 %v8019_v50  ;;  %4259 = vmatpush.bf16.msra.mxu3 %v8531_v51  ;;  %v7700_v50 = vld [vmem:[%s11453_s4 + $0xd8] sm:$0xf0] }
 0x61c   : > { %4273 = vmatpush.bf16.msra.mxu0 %v8023_v56  ;;  %4287 = vmatpush.bf16.msra.mxu1 %v8535_v29  ;;  %v9955_v51 = vld [vmem:[%s11453_s4 + $0x49c] sm:$0xf]  ;;  %v7699_v56 = vor.u32 %v9835_v45, %v7698_v44  ;;  %v8211_v29 = vor.u32 %v9963_v53, %v8210_v47  ;;  %v7703_v2 = vor.u32 %v9827_v49, %v7700_v50  ;;  %v8476_v44 = vld [vmem:[%s11453_s4 + $0x6e0] sm:$0xf0]  ;;  %v9884_v47 = vld [vmem:[%s11453_s4 + $0x25c] sm:$0xf0] }
 0x61d   : > { %v8215_v40 = vor.u32 %v9955_v51, %v8212_v52  ;;  %v8410_v50 = vld [vmem:[%s11453_s4 + $0x620] sm:$0xf]  ;;  %v9876_v52 = vld [vmem:[%s11453_s4 + $0x224] sm:$0xf] }
 0x61e   : > { %v10012_v51 = vld [vmem:[%s11453_s4 + $0x65c] sm:$0xf0] }
 0x61f   : > { %4246 = vmatpush.bf16.msra.mxu2 %v7955_v4  ;;  %4260 = vmatpush.bf16.msra.mxu3 %v8467_v41  ;;  %v7636_v4 = vld [vmem:[%s11453_s4 + $0x58] sm:$0xf0]  ;;  %v8411_v0 = vor.u32 %v10012_v51, %v8410_v50  ;;  %v10061_v50 = vld [vmem:[%s11453_s4 + $0x7e4] sm:$0xf0]  ;;  %v9925_v51 = vld [vmem:[%s11453_s4 + $0x3ac] sm:$0xf] }
 0x620   : > { %4274 = vmatpush.bf16.msra.mxu0 %v7959_v7  ;;  %4288 = vmatpush.bf16.msra.mxu1 %v8471_v31  ;;  %v9939_v41 = vld [vmem:[%s11453_s4 + $0x41c] sm:$0xf]  ;;  %v9932_v7 = vld [vmem:[%s11453_s4 + $0x3dc] sm:$0xf0] }
 0x621   : > { %v8602_v31 = vld [vmem:[%s11453_s4 + $0x7a0] sm:$0xf]  ;;  %v8151_v12 = vor.u32 %v9939_v41, %v8148_v5  ;;  %v8091_v13 = vor.u32 %v9932_v7, %v8090_v48  ;;  %v9860_v5 = vld [vmem:[%s11453_s4 + $0x1a4] sm:$0xf] }
 0x622   : > { %v9996_v41 = vld [vmem:[%s11453_s4 + $0x5dc] sm:$0xf0]  ;;  %v7836_v48 = vld [vmem:[%s11453_s4 + $0x1e0] sm:$0xf0] }
 0x623   : > { %4247 = vmatpush.bf16.msra.mxu2 %v7891_v11  ;;  %4261 = vmatpush.bf16.msra.mxu3 %v8403_v60  ;;  %v8604_v11 = vld [vmem:[%s11453_s4 + $0x7e0] sm:$0xf0]  ;;  %v7639_v60 = vor.u32 %v9811_v3, %v7636_v4  ;;  %v8346_v4 = vld [vmem:[%s11453_s4 + $0x5a0] sm:$0xf]  ;;  %v7839_v16 = vor.u32 %v9860_v5, %v7836_v48  ;;  %v8546_v48 = vld [vmem:[%s11453_s4 + $0x728] sm:$0xf] }
 0x624   : > { %4275 = vmatpush.bf16.msra.mxu0 %v7895_v14  ;;  %4289 = vmatpush.bf16.msra.mxu1 %v8407_v15  ;;  %v8603_v14 = vor.u32 %v10060_v6, %v8602_v31  ;;  %v8026_v15 = vld [vmem:[%s11453_s4 + $0x320] sm:$0xf]  ;;  %v8607_v18 = vor.u32 %v10052_v10, %v8604_v11  ;;  %v9988_v7 = vld [vmem:[%s11453_s4 + $0x5a4] sm:$0xf]  ;;  %v8347_v8 = vor.u32 %v9996_v41, %v8346_v4  ;;  %v9917_v4 = vld [vmem:[%s11453_s4 + $0x364] sm:$0xf0] }
 0x625   : > { %v8027_v28 = vor.u32 %v9916_v35, %v8026_v15  ;;  %v8348_v31 = vld [vmem:[%s11453_s4 + $0x5e0] sm:$0xf0]  ;;  %v8282_v11 = vld [vmem:[%s11453_s4 + $0x520] sm:$0xf] }
 0x626   : > { %v8351_v10 = vor.u32 %v9988_v7, %v8348_v31  ;;  %v8284_v15 = vld [vmem:[%s11453_s4 + $0x560] sm:$0xf0]  ;;  %v10045_v7 = vld [vmem:[%s11453_s4 + $0x764] sm:$0xf0]  ;;  %v9909_v31 = vld [vmem:[%s11453_s4 + $0x32c] sm:$0xf] }
 0x627   : > { %4248 = vmatpush.bf16.msra.mxu2 %v7827_v22  ;;  %4262 = vmatpush.bf16.msra.mxu3 %v8339_v23  ;;  %v8028_v22 = vld [vmem:[%s11453_s4 + $0x360] sm:$0xf0] }
 0x628   : > { %4276 = vmatpush.bf16.msra.mxu0 %v7831_v30  ;;  %4290 = vmatpush.bf16.msra.mxu1 %v8343_v32  ;;  %v10036_v23 = vld [vmem:[%s11453_s4 + $0x724] sm:$0xf]  ;;  %v8539_v30 = vor.u32 %v10044_v20, %v8538_v19  ;;  %v7962_v32 = vld [vmem:[%s11453_s4 + $0x2a0] sm:$0xf]  ;;  %v8031_v34 = vor.u32 %v9908_v21, %v8028_v22 }
 0x629   : > { %v8543_v36 = vor.u32 %v10036_v23, %v8540_v25  ;;  %v7963_v45 = vor.u32 %v9900_v33, %v7962_v32  ;;  %v9836_v19 = vld [vmem:[%s11453_s4 + $0xdc] sm:$0xf0]  ;;  %v9828_v25 = vld [vmem:[%s11453_s4 + $0xa4] sm:$0xf] }
 0x62a   : > { %v8218_v22 = vld [vmem:[%s11453_s4 + $0x4a0] sm:$0xf]  ;;  %v8220_v32 = vld [vmem:[%s11453_s4 + $0x4e0] sm:$0xf0] }
 0x62b   : > { %4249 = vmatpush.bf16.msra.mxu2 %v7763_v42  ;;  %4263 = vmatpush.bf16.msra.mxu3 %v8275_v27  ;;  %v7964_v42 = vld [vmem:[%s11453_s4 + $0x2e0] sm:$0xf0]  ;;  %v9964_v23 = vld [vmem:[%s11453_s4 + $0x4dc] sm:$0xf0] }
 0x62c   : > { %4277 = vmatpush.bf16.msra.mxu0 %v7767_v43  ;;  %4291 = vmatpush.bf16.msra.mxu1 %v8279_v46  ;;  %v10020_v27 = vld [vmem:[%s11453_s4 + $0x6a4] sm:$0xf]  ;;  %v8475_v43 = vor.u32 %v10028_v39, %v8474_v37  ;;  %v7898_v46 = vld [vmem:[%s11453_s4 + $0x220] sm:$0xf]  ;;  %v7967_v53 = vor.u32 %v9892_v24, %v7964_v42 }
 0x62d   : > { %v8479_v49 = vor.u32 %v10020_v27, %v8476_v44  ;;  %v7899_v63 = vor.u32 %v9884_v47, %v7898_v46  ;;  %v7642_v33 = vld [vmem:[%s11453_s4 + $0x20] sm:$0xf]  ;;  %v9812_v44 = vld [vmem:[%s11453_s4 + $0x24] sm:$0xf]  ;;  %v8098_v47 = vld [vmem:[%s11453_s4 + $0x3a8] sm:$0xf] }
 0x62e   : > { %v9820_v37 = vld [vmem:[%s11453_s4 + $0x5c] sm:$0xf0]  ;;  %v8156_v46 = vld [vmem:[%s11453_s4 + $0x460] sm:$0xf0] }
 0x62f   : > { %4250 = vmatpush.bf16.msra.mxu2 %v7699_v56  ;;  %4264 = vmatpush.bf16.msra.mxu3 %v8211_v29  ;;  %v10004_v56 = vld [vmem:[%s11453_s4 + $0x624] sm:$0xf]  ;;  %v8154_v39 = vld [vmem:[%s11453_s4 + $0x420] sm:$0xf] }
 0x630   : > { %4278 = vmatpush.bf16.msra.mxu0 %v7703_v2  ;;  %4292 = vmatpush.bf16.msra.mxu1 %v8215_v40  ;;  %v8412_v29 = vld [vmem:[%s11453_s4 + $0x660] sm:$0xf0]  ;;  %v9868_v2 = vld [vmem:[%s11453_s4 + $0x1dc] sm:$0xf0]  ;;  %v7903_v40 = vor.u32 %v9876_v52, %v7900_v58  ;;  %v7643_v52 = vor.u32 %v9820_v37, %v7642_v33  ;;  %v7908_v33 = vld [vmem:[%s11453_s4 + $0x268] sm:$0xf0] }
 0x631   : > { %v8415_v3 = vor.u32 %v10004_v56, %v8412_v29  ;;  %v7835_v6 = vor.u32 %v9868_v2, %v7834_v1  ;;  %v9948_v24 = vld [vmem:[%s11453_s4 + $0x45c] sm:$0xf0]  ;;  %v8100_v56 = vld [vmem:[%s11453_s4 + $0x3e8] sm:$0xf0] }
 0x632   : > { %v8155_v58 = vor.u32 %v9948_v24, %v8154_v39  ;;  %v10053_v29 = vld [vmem:[%s11453_s4 + $0x7ac] sm:$0xf]  ;;  %v8103_v41 = vor.u32 %v9925_v51, %v8100_v56  ;;  %v7842_v24 = vld [vmem:[%s11453_s4 + $0x1a8] sm:$0xf] }
 0x633   : > { %4251 = vmatpush.bf16.msra.mxu2 %v7635_v59  ;;  %4265 = vmatpush.bf16.msra.mxu3 %v8147_v9  ;;  %v7770_v59 = vld [vmem:[%s11453_s4 + $0x120] sm:$0xf] }
 0x634   : > { %4279 = vmatpush.bf16.msra.mxu0 %v7639_v60  ;;  %4293 = vmatpush.bf16.msra.mxu1 %v8151_v12  ;;  %v9852_v9 = vld [vmem:[%s11453_s4 + $0x15c] sm:$0xf0]  ;;  %v9844_v12 = vld [vmem:[%s11453_s4 + $0x124] sm:$0xf] }
 0x635   : > { %v9980_v60 = vld [vmem:[%s11453_s4 + $0x55c] sm:$0xf0]  ;;  %v7771_v35 = vor.u32 %v9852_v9, %v7770_v59  ;;  %v8548_v59 = vld [vmem:[%s11453_s4 + $0x768] sm:$0xf0] }
 0x636   : > { %4252 = vmatmul.bf16.vlgmr.msra.gmra.mxu2 %v12034_v61  ;;  %4266 = vmatmul.bf16.vlgmr.msra.gmra.mxu3 %v12038_v62 }
 0x637   : > { %4300 = vmatpush.bf16.msrb.mxu2 %v8091_v13  ;;  %4314 = vmatpush.bf16.msrb.mxu3 %v8603_v14  ;;  %v7772_v13 = vld [vmem:[%s11453_s4 + $0x160] sm:$0xf0] }
 0x638   : > { %4328 = vmatpush.bf16.msrb.mxu0 %v8095_v17  ;;  %4342 = vmatpush.bf16.msrb.mxu1 %v8607_v18  ;;  %v9972_v14 = vld [vmem:[%s11453_s4 + $0x524] sm:$0xf]  ;;  %v8283_v17 = vor.u32 %v9980_v60, %v8282_v11  ;;  %v7706_v18 = vld [vmem:[%s11453_s4 + $0xa0] sm:$0xf]  ;;  %v7775_v20 = vor.u32 %v9844_v12, %v7772_v13  ;;  %v9901_v11 = vld [vmem:[%s11453_s4 + $0x2e4] sm:$0xf0] }
 0x639   : > { %4280 = vmatmul.bf16.vlgmr.msra.gmra.mxu0 %v12034_v61  ;;  %4294 = vmatmul.bf16.vlgmr.msra.gmra.mxu1 %v12038_v62  ;;  %v8287_v21 = vor.u32 %v9972_v14, %v8284_v15  ;;  %v8482_v13 = vld [vmem:[%s11453_s4 + $0x6a8] sm:$0xf]  ;;  %v9893_v15 = vld [vmem:[%s11453_s4 + $0x2ac] sm:$0xf] }
 0x63a   : > { %v10029_v14 = vld [vmem:[%s11453_s4 + $0x6e4] sm:$0xf0] }
 0x63b   : > { %4301 = vmatpush.bf16.msrb.mxu2 %v8027_v28  ;;  %4315 = vmatpush.bf16.msrb.mxu3 %v8539_v30  ;;  %v7708_v28 = vld [vmem:[%s11453_s4 + $0xe0] sm:$0xf0] }
 0x63c   : > { %4329 = vmatpush.bf16.msrb.mxu0 %v8031_v34  ;;  %4343 = vmatpush.bf16.msrb.mxu1 %v8543_v36  ;;  %v9956_v30 = vld [vmem:[%s11453_s4 + $0x4a4] sm:$0xf]  ;;  %v7707_v34 = vor.u32 %v9836_v19, %v7706_v18  ;;  %v8219_v36 = vor.u32 %v9964_v23, %v8218_v22  ;;  %v7711_v42 = vor.u32 %v9828_v25, %v7708_v28  ;;  %v8484_v18 = vld [vmem:[%s11453_s4 + $0x6e8] sm:$0xf0]  ;;  %v9885_v22 = vld [vmem:[%s11453_s4 + $0x264] sm:$0xf0] }
 0x63d   : > { %v8223_v27 = vor.u32 %v9956_v30, %v8220_v32  ;;  %v8418_v28 = vld [vmem:[%s11453_s4 + $0x628] sm:$0xf]  ;;  %v9877_v32 = vld [vmem:[%s11453_s4 + $0x22c] sm:$0xf] }
 0x63e   : > { %v10013_v30 = vld [vmem:[%s11453_s4 + $0x664] sm:$0xf0] }
 0x63f   : > { %4302 = vmatpush.bf16.msrb.mxu2 %v7963_v45  ;;  %4316 = vmatpush.bf16.msrb.mxu3 %v8475_v43  ;;  %v7644_v45 = vld [vmem:[%s11453_s4 + $0x60] sm:$0xf0]  ;;  %v8419_v39 = vor.u32 %v10013_v30, %v8418_v28  ;;  %v10062_v28 = vld [vmem:[%s11453_s4 + $0x7ec] sm:$0xf0]  ;;  %v9926_v30 = vld [vmem:[%s11453_s4 + $0x3b4] sm:$0xf] }
 0x640   : > { %4330 = vmatpush.bf16.msrb.mxu0 %v7967_v53  ;;  %4344 = vmatpush.bf16.msrb.mxu1 %v8479_v49  ;;  %v9940_v43 = vld [vmem:[%s11453_s4 + $0x424] sm:$0xf]  ;;  %v9933_v53 = vld [vmem:[%s11453_s4 + $0x3e4] sm:$0xf0] }
 0x641   : > { %v8610_v49 = vld [vmem:[%s11453_s4 + $0x7a8] sm:$0xf]  ;;  %v8159_v1 = vor.u32 %v9940_v43, %v8156_v46  ;;  %v8099_v2 = vor.u32 %v9933_v53, %v8098_v47  ;;  %v9861_v46 = vld [vmem:[%s11453_s4 + $0x1ac] sm:$0xf] }
 0x642   : > { %v9997_v43 = vld [vmem:[%s11453_s4 + $0x5e4] sm:$0xf0]  ;;  %v7844_v47 = vld [vmem:[%s11453_s4 + $0x1e8] sm:$0xf0] }
 0x643   : > { %4303 = vmatpush.bf16.msrb.mxu2 %v7899_v63  ;;  %4317 = vmatpush.bf16.msrb.mxu3 %v8411_v0  ;;  %v8612_v63 = vld [vmem:[%s11453_s4 + $0x7e8] sm:$0xf0]  ;;  %v7647_v0 = vor.u32 %v9812_v44, %v7644_v45  ;;  %v8354_v45 = vld [vmem:[%s11453_s4 + $0x5a8] sm:$0xf]  ;;  %v7847_v56 = vor.u32 %v9861_v46, %v7844_v47  ;;  %v8554_v47 = vld [vmem:[%s11453_s4 + $0x730] sm:$0xf] }
 0x644   : > { %4331 = vmatpush.bf16.msrb.mxu0 %v7903_v40  ;;  %4345 = vmatpush.bf16.msrb.mxu1 %v8415_v3  ;;  %v8611_v40 = vor.u32 %v10061_v50, %v8610_v49  ;;  %v8034_v3 = vld [vmem:[%s11453_s4 + $0x328] sm:$0xf]  ;;  %v8615_v5 = vor.u32 %v10053_v29, %v8612_v63  ;;  %v9989_v53 = vld [vmem:[%s11453_s4 + $0x5ac] sm:$0xf]  ;;  %v8355_v51 = vor.u32 %v9997_v43, %v8354_v45  ;;  %v9918_v45 = vld [vmem:[%s11453_s4 + $0x36c] sm:$0xf0] }
 0x645   : > { %v8035_v9 = vor.u32 %v9917_v4, %v8034_v3  ;;  %v8356_v49 = vld [vmem:[%s11453_s4 + $0x5e8] sm:$0xf0]  ;;  %v8290_v63 = vld [vmem:[%s11453_s4 + $0x528] sm:$0xf] }
 0x646   : > { %v8359_v29 = vor.u32 %v9989_v53, %v8356_v49  ;;  %v8292_v3 = vld [vmem:[%s11453_s4 + $0x568] sm:$0xf0]  ;;  %v10046_v53 = vld [vmem:[%s11453_s4 + $0x76c] sm:$0xf0]  ;;  %v9910_v49 = vld [vmem:[%s11453_s4 + $0x334] sm:$0xf] }
 0x647   : > { %4304 = vmatpush.bf16.msrb.mxu2 %v7835_v6  ;;  %4318 = vmatpush.bf16.msrb.mxu3 %v8347_v8  ;;  %v8036_v6 = vld [vmem:[%s11453_s4 + $0x368] sm:$0xf0] }
 0x648   : > { %4332 = vmatpush.bf16.msrb.mxu0 %v7839_v16  ;;  %4346 = vmatpush.bf16.msrb.mxu1 %v8351_v10  ;;  %v10037_v8 = vld [vmem:[%s11453_s4 + $0x72c] sm:$0xf]  ;;  %v8547_v16 = vor.u32 %v10045_v7, %v8546_v48  ;;  %v7970_v10 = vld [vmem:[%s11453_s4 + $0x2a8] sm:$0xf]  ;;  %v8039_v60 = vor.u32 %v9909_v31, %v8036_v6 }
 0x649   : > { %v8551_v12 = vor.u32 %v10037_v8, %v8548_v59  ;;  %v7971_v19 = vor.u32 %v9901_v11, %v7970_v10  ;;  %v9837_v48 = vld [vmem:[%s11453_s4 + $0xe4] sm:$0xf0]  ;;  %v9829_v59 = vld [vmem:[%s11453_s4 + $0xac] sm:$0xf] }
 0x64a   : > { %v8226_v6 = vld [vmem:[%s11453_s4 + $0x4a8] sm:$0xf]  ;;  %v8228_v10 = vld [vmem:[%s11453_s4 + $0x4e8] sm:$0xf0] }
 0x64b   : > { %4305 = vmatpush.bf16.msrb.mxu2 %v7771_v35  ;;  %4319 = vmatpush.bf16.msrb.mxu3 %v8283_v17  ;;  %v7972_v35 = vld [vmem:[%s11453_s4 + $0x2e8] sm:$0xf0]  ;;  %v9965_v8 = vld [vmem:[%s11453_s4 + $0x4e4] sm:$0xf0] }
 0x64c   : > { %4333 = vmatpush.bf16.msrb.mxu0 %v7775_v20  ;;  %4347 = vmatpush.bf16.msrb.mxu1 %v8287_v21  ;;  %v10021_v17 = vld [vmem:[%s11453_s4 + $0x6ac] sm:$0xf]  ;;  %v8483_v20 = vor.u32 %v10029_v14, %v8482_v13  ;;  %v7906_v21 = vld [vmem:[%s11453_s4 + $0x228] sm:$0xf]  ;;  %v7975_v23 = vor.u32 %v9893_v15, %v7972_v35 }
 0x64d   : > { %v8487_v25 = vor.u32 %v10021_v17, %v8484_v18  ;;  %v7907_v37 = vor.u32 %v9885_v22, %v7906_v21  ;;  %v7650_v11 = vld [vmem:[%s11453_s4 + $0x28] sm:$0xf]  ;;  %v9813_v18 = vld [vmem:[%s11453_s4 + $0x2c] sm:$0xf]  ;;  %v8106_v22 = vld [vmem:[%s11453_s4 + $0x3b0] sm:$0xf] }
 0x64e   : > { %v9821_v13 = vld [vmem:[%s11453_s4 + $0x64] sm:$0xf0]  ;;  %v8164_v21 = vld [vmem:[%s11453_s4 + $0x468] sm:$0xf0] }
 0x64f   : > { %4306 = vmatpush.bf16.msrb.mxu2 %v7707_v34  ;;  %4320 = vmatpush.bf16.msrb.mxu3 %v8219_v36  ;;  %v10005_v34 = vld [vmem:[%s11453_s4 + $0x62c] sm:$0xf]  ;;  %v8162_v14 = vld [vmem:[%s11453_s4 + $0x428] sm:$0xf] }
 0x650   : > { %4334 = vmatpush.bf16.msrb.mxu0 %v7711_v42  ;;  %4348 = vmatpush.bf16.msrb.mxu1 %v8223_v27  ;;  %v8420_v36 = vld [vmem:[%s11453_s4 + $0x668] sm:$0xf0]  ;;  %v9869_v42 = vld [vmem:[%s11453_s4 + $0x1e4] sm:$0xf0]  ;;  %v7911_v27 = vor.u32 %v9877_v32, %v7908_v33  ;;  %v7651_v32 = vor.u32 %v9821_v13, %v7650_v11  ;;  %v7916_v11 = vld [vmem:[%s11453_s4 + $0x270] sm:$0xf0] }
 0x651   : > { %v8423_v44 = vor.u32 %v10005_v34, %v8420_v36  ;;  %v7843_v50 = vor.u32 %v9869_v42, %v7842_v24  ;;  %v9949_v15 = vld [vmem:[%s11453_s4 + $0x464] sm:$0xf0]  ;;  %v8108_v34 = vld [vmem:[%s11453_s4 + $0x3f0] sm:$0xf0] }
 0x652   : > { %v8163_v33 = vor.u32 %v9949_v15, %v8162_v14  ;;  %v10054_v36 = vld [vmem:[%s11453_s4 + $0x7b4] sm:$0xf]  ;;  %v8111_v43 = vor.u32 %v9926_v30, %v8108_v34  ;;  %v7850_v15 = vld [vmem:[%s11453_s4 + $0x1b0] sm:$0xf] }
 0x653   : > { %4307 = vmatpush.bf16.msrb.mxu2 %v7643_v52  ;;  %4321 = vmatpush.bf16.msrb.mxu3 %v8155_v58  ;;  %v7778_v52 = vld [vmem:[%s11453_s4 + $0x128] sm:$0xf] }
 0x654   : > { %4335 = vmatpush.bf16.msrb.mxu0 %v7647_v0  ;;  %4349 = vmatpush.bf16.msrb.mxu1 %v8159_v1  ;;  %v9853_v58 = vld [vmem:[%s11453_s4 + $0x164] sm:$0xf0]  ;;  %v9845_v1 = vld [vmem:[%s11453_s4 + $0x12c] sm:$0xf] }
 0x655   : > { %v9981_v0 = vld [vmem:[%s11453_s4 + $0x564] sm:$0xf0]  ;;  %v7779_v4 = vor.u32 %v9853_v58, %v7778_v52  ;;  %v8556_v52 = vld [vmem:[%s11453_s4 + $0x770] sm:$0xf0] }
 0x656   : > { %4308 = vmatmul.bf16.vlgmr.msrb.gmra.mxu2 %v12034_v61  ;;  %4322 = vmatmul.bf16.vlgmr.msrb.gmra.mxu3 %v12038_v62 }
 0x657   : > { %4356 = vmatpush.bf16.msra.mxu2 %v8099_v2  ;;  %4370 = vmatpush.bf16.msra.mxu3 %v8611_v40  ;;  %v7780_v2 = vld [vmem:[%s11453_s4 + $0x168] sm:$0xf0] }
 0x658   : > { %4384 = vmatpush.bf16.msra.mxu0 %v8103_v41  ;;  %4398 = vmatpush.bf16.msra.mxu1 %v8615_v5  ;;  %v9973_v40 = vld [vmem:[%s11453_s4 + $0x52c] sm:$0xf]  ;;  %v8291_v41 = vor.u32 %v9981_v0, %v8290_v63  ;;  %v7714_v5 = vld [vmem:[%s11453_s4 + $0xa8] sm:$0xf]  ;;  %v7783_v7 = vor.u32 %v9845_v1, %v7780_v2  ;;  %v9902_v63 = vld [vmem:[%s11453_s4 + $0x2ec] sm:$0xf0] }
 0x659   : > { %4336 = vmatmul.bf16.vlgmr.msrb.gmra.mxu0 %v12034_v61  ;;  %4350 = vmatmul.bf16.vlgmr.msrb.gmra.mxu1 %v12038_v62  ;;  %v8295_v31 = vor.u32 %v9973_v40, %v8292_v3  ;;  %v8490_v2 = vld [vmem:[%s11453_s4 + $0x6b0] sm:$0xf]  ;;  %v9894_v3 = vld [vmem:[%s11453_s4 + $0x2b4] sm:$0xf] }
 0x65a   : > { %v10030_v40 = vld [vmem:[%s11453_s4 + $0x6ec] sm:$0xf0] }
 0x65b   : > { %4357 = vmatpush.bf16.msra.mxu2 %v8035_v9  ;;  %4371 = vmatpush.bf16.msra.mxu3 %v8547_v16  ;;  %v7716_v9 = vld [vmem:[%s11453_s4 + $0xe8] sm:$0xf0] }
 0x65c   : > { %4385 = vmatpush.bf16.msra.mxu0 %v8039_v60  ;;  %4399 = vmatpush.bf16.msra.mxu1 %v8551_v12  ;;  %v9957_v16 = vld [vmem:[%s11453_s4 + $0x4ac] sm:$0xf]  ;;  %v7715_v60 = vor.u32 %v9837_v48, %v7714_v5  ;;  %v8227_v12 = vor.u32 %v9965_v8, %v8226_v6  ;;  %v7719_v35 = vor.u32 %v9829_v59, %v7716_v9  ;;  %v8492_v5 = vld [vmem:[%s11453_s4 + $0x6f0] sm:$0xf0]  ;;  %v9886_v6 = vld [vmem:[%s11453_s4 + $0x26c] sm:$0xf0] }
 0x65d   : > { %v8231_v17 = vor.u32 %v9957_v16, %v8228_v10  ;;  %v8426_v9 = vld [vmem:[%s11453_s4 + $0x630] sm:$0xf]  ;;  %v9878_v10 = vld [vmem:[%s11453_s4 + $0x234] sm:$0xf] }
 0x65e   : > { %v10014_v16 = vld [vmem:[%s11453_s4 + $0x66c] sm:$0xf0] }
 0x65f   : > { %4358 = vmatpush.bf16.msra.mxu2 %v7971_v19  ;;  %4372 = vmatpush.bf16.msra.mxu3 %v8483_v20  ;;  %v7652_v19 = vld [vmem:[%s11453_s4 + $0x68] sm:$0xf0]  ;;  %v8427_v14 = vor.u32 %v10014_v16, %v8426_v9  ;;  %v10063_v9 = vld [vmem:[%s11453_s4 + $0x7f4] sm:$0xf0]  ;;  %v9927_v16 = vld [vmem:[%s11453_s4 + $0x3bc] sm:$0xf] }
 0x660   : > { %4386 = vmatpush.bf16.msra.mxu0 %v7975_v23  ;;  %4400 = vmatpush.bf16.msra.mxu1 %v8487_v25  ;;  %v9941_v20 = vld [vmem:[%s11453_s4 + $0x42c] sm:$0xf]  ;;  %v9934_v23 = vld [vmem:[%s11453_s4 + $0x3ec] sm:$0xf0] }
 0x661   : > { %v8618_v25 = vld [vmem:[%s11453_s4 + $0x7b0] sm:$0xf]  ;;  %v8167_v24 = vor.u32 %v9941_v20, %v8164_v21  ;;  %v8107_v42 = vor.u32 %v9934_v23, %v8106_v22  ;;  %v9862_v21 = vld [vmem:[%s11453_s4 + $0x1b4] sm:$0xf] }
 0x662   : > { %v9998_v20 = vld [vmem:[%s11453_s4 + $0x5ec] sm:$0xf0]  ;;  %v7852_v22 = vld [vmem:[%s11453_s4 + $0x1f0] sm:$0xf0] }
 0x663   : > { %4359 = vmatpush.bf16.msra.mxu2 %v7907_v37  ;;  %4373 = vmatpush.bf16.msra.mxu3 %v8419_v39  ;;  %v8620_v37 = vld [vmem:[%s11453_s4 + $0x7f0] sm:$0xf0]  ;;  %v7655_v39 = vor.u32 %v9813_v18, %v7652_v19  ;;  %v8362_v19 = vld [vmem:[%s11453_s4 + $0x5b0] sm:$0xf]  ;;  %v7855_v34 = vor.u32 %v9862_v21, %v7852_v22  ;;  %v8562_v22 = vld [vmem:[%s11453_s4 + $0x738] sm:$0xf] }
 0x664   : > { %4387 = vmatpush.bf16.msra.mxu0 %v7911_v27  ;;  %4401 = vmatpush.bf16.msra.mxu1 %v8423_v44  ;;  %v8619_v27 = vor.u32 %v10062_v28, %v8618_v25  ;;  %v8042_v44 = vld [vmem:[%s11453_s4 + $0x330] sm:$0xf]  ;;  %v8623_v46 = vor.u32 %v10054_v36, %v8620_v37  ;;  %v9990_v23 = vld [vmem:[%s11453_s4 + $0x5b4] sm:$0xf]  ;;  %v8363_v30 = vor.u32 %v9998_v20, %v8362_v19  ;;  %v9919_v19 = vld [vmem:[%s11453_s4 + $0x374] sm:$0xf0] }
 0x665   : > { %v8043_v58 = vor.u32 %v9918_v45, %v8042_v44  ;;  %v8364_v25 = vld [vmem:[%s11453_s4 + $0x5f0] sm:$0xf0]  ;;  %v8298_v37 = vld [vmem:[%s11453_s4 + $0x530] sm:$0xf] }
 0x666   : > { %v8367_v36 = vor.u32 %v9990_v23, %v8364_v25  ;;  %v8300_v44 = vld [vmem:[%s11453_s4 + $0x570] sm:$0xf0]  ;;  %v10047_v23 = vld [vmem:[%s11453_s4 + $0x774] sm:$0xf0]  ;;  %v9911_v25 = vld [vmem:[%s11453_s4 + $0x33c] sm:$0xf] }
 0x667   : > { %4360 = vmatpush.bf16.msra.mxu2 %v7843_v50  ;;  %4374 = vmatpush.bf16.msra.mxu3 %v8355_v51  ;;  %v8044_v50 = vld [vmem:[%s11453_s4 + $0x370] sm:$0xf0] }
 0x668   : > { %4388 = vmatpush.bf16.msra.mxu0 %v7847_v56  ;;  %4402 = vmatpush.bf16.msra.mxu1 %v8359_v29  ;;  %v10038_v51 = vld [vmem:[%s11453_s4 + $0x734] sm:$0xf]  ;;  %v8555_v56 = vor.u32 %v10046_v53, %v8554_v47  ;;  %v7978_v29 = vld [vmem:[%s11453_s4 + $0x2b0] sm:$0xf]  ;;  %v8047_v0 = vor.u32 %v9910_v49, %v8044_v50 }
 0x669   : > { %v8559_v1 = vor.u32 %v10038_v51, %v8556_v52  ;;  %v7979_v48 = vor.u32 %v9902_v63, %v7978_v29  ;;  %v9838_v47 = vld [vmem:[%s11453_s4 + $0xec] sm:$0xf0]  ;;  %v9830_v52 = vld [vmem:[%s11453_s4 + $0xb4] sm:$0xf] }
 0x66a   : > { %v8234_v50 = vld [vmem:[%s11453_s4 + $0x4b0] sm:$0xf]  ;;  %v8236_v29 = vld [vmem:[%s11453_s4 + $0x4f0] sm:$0xf0] }
 0x66b   : > { %4361 = vmatpush.bf16.msra.mxu2 %v7779_v4  ;;  %4375 = vmatpush.bf16.msra.mxu3 %v8291_v41  ;;  %v7980_v4 = vld [vmem:[%s11453_s4 + $0x2f0] sm:$0xf0]  ;;  %v9966_v51 = vld [vmem:[%s11453_s4 + $0x4ec] sm:$0xf0] }
 0x66c   : > { %4389 = vmatpush.bf16.msra.mxu0 %v7783_v7  ;;  %4403 = vmatpush.bf16.msra.mxu1 %v8295_v31  ;;  %v10022_v41 = vld [vmem:[%s11453_s4 + $0x6b4] sm:$0xf]  ;;  %v8491_v7 = vor.u32 %v10030_v40, %v8490_v2  ;;  %v7914_v31 = vld [vmem:[%s11453_s4 + $0x230] sm:$0xf]  ;;  %v7983_v8 = vor.u32 %v9894_v3, %v7980_v4 }
 0x66d   : > { %v8495_v59 = vor.u32 %v10022_v41, %v8492_v5  ;;  %v7915_v13 = vor.u32 %v9886_v6, %v7914_v31  ;;  %v7658_v63 = vld [vmem:[%s11453_s4 + $0x30] sm:$0xf]  ;;  %v9814_v5 = vld [vmem:[%s11453_s4 + $0x34] sm:$0xf]  ;;  %v8114_v6 = vld [vmem:[%s11453_s4 + $0x3b8] sm:$0xf] }
 0x66e   : > { %v9822_v2 = vld [vmem:[%s11453_s4 + $0x6c] sm:$0xf0]  ;;  %v8172_v31 = vld [vmem:[%s11453_s4 + $0x470] sm:$0xf0] }
 0x66f   : > { %4362 = vmatpush.bf16.msra.mxu2 %v7715_v60  ;;  %4376 = vmatpush.bf16.msra.mxu3 %v8227_v12  ;;  %v10006_v60 = vld [vmem:[%s11453_s4 + $0x634] sm:$0xf]  ;;  %v8170_v40 = vld [vmem:[%s11453_s4 + $0x430] sm:$0xf] }
 0x670   : > { %4390 = vmatpush.bf16.msra.mxu0 %v7719_v35  ;;  %4404 = vmatpush.bf16.msra.mxu1 %v8231_v17  ;;  %v8428_v12 = vld [vmem:[%s11453_s4 + $0x670] sm:$0xf0]  ;;  %v9870_v35 = vld [vmem:[%s11453_s4 + $0x1ec] sm:$0xf0]  ;;  %v7919_v17 = vor.u32 %v9878_v10, %v7916_v11  ;;  %v7659_v10 = vor.u32 %v9822_v2, %v7658_v63  ;;  %v9879_v63 = vld [vmem:[%s11453_s4 + $0x23c] sm:$0xf] }
 0x671   : > { %v8431_v18 = vor.u32 %v10006_v60, %v8428_v12  ;;  %v7851_v28 = vor.u32 %v9870_v35, %v7850_v15  ;;  %v9950_v3 = vld [vmem:[%s11453_s4 + $0x46c] sm:$0xf0]  ;;  %v8116_v60 = vld [vmem:[%s11453_s4 + $0x3f8] sm:$0xf0] }
 0x672   : > { %v8171_v11 = vor.u32 %v9950_v3, %v8170_v40  ;;  %v10055_v12 = vld [vmem:[%s11453_s4 + $0x7bc] sm:$0xf]  ;;  %v8119_v20 = vor.u32 %v9927_v16, %v8116_v60 }
 0x673   : > { %4363 = vmatpush.bf16.msra.mxu2 %v7651_v32  ;;  %4377 = vmatpush.bf16.msra.mxu3 %v8163_v33  ;;  %v7786_v32 = vld [vmem:[%s11453_s4 + $0x130] sm:$0xf]  ;;  %v10007_v2 = vld [vmem:[%s11453_s4 + $0x63c] sm:$0xf]  ;;  %v12416_v3 = vpop.f32.mrf.mxu1 }
 0x674   : > { %4391 = vmatpush.bf16.msra.mxu0 %v7655_v39  ;;  %4405 = vmatpush.bf16.msra.mxu1 %v8167_v24  ;;  %v9854_v33 = vld [vmem:[%s11453_s4 + $0x16c] sm:$0xf0]  ;;  %v9846_v24 = vld [vmem:[%s11453_s4 + $0x134] sm:$0xf]  ;;  %v8436_v40 = vld [vmem:[%s11453_s4 + $0x678] sm:$0xf0] }
 0x675   : > { %v9982_v39 = vld [vmem:[%s11453_s4 + $0x56c] sm:$0xf0]  ;;  %v7787_v45 = vor.u32 %v9854_v33, %v7786_v32  ;;  %v8564_v32 = vld [vmem:[%s11453_s4 + $0x778] sm:$0xf0] }
 0x676   : > { %4364 = vmatmul.bf16.vlgmr.msra.gmra.mxu2 %v12034_v61  ;;  %4378 = vmatmul.bf16.vlgmr.msra.gmra.mxu3 %v12038_v62  ;;  %v7860_v16 = vld [vmem:[%s11453_s4 + $0x1f8] sm:$0xf0] }
 0x677   : > { %4412 = vmatpush.bf16.msrb.mxu2 %v8107_v42  ;;  %4426 = vmatpush.bf16.msrb.mxu3 %v8619_v27  ;;  %v7788_v42 = vld [vmem:[%s11453_s4 + $0x170] sm:$0xf0] }
 0x678   : > { %4440 = vmatpush.bf16.msrb.mxu0 %v8111_v43  ;;  %4454 = vmatpush.bf16.msrb.mxu1 %v8623_v46  ;;  %v9974_v27 = vld [vmem:[%s11453_s4 + $0x534] sm:$0xf]  ;;  %v8299_v43 = vor.u32 %v9982_v39, %v8298_v37  ;;  %v7722_v46 = vld [vmem:[%s11453_s4 + $0xb0] sm:$0xf]  ;;  %v7791_v53 = vor.u32 %v9846_v24, %v7788_v42  ;;  %v9903_v37 = vld [vmem:[%s11453_s4 + $0x2f4] sm:$0xf0] }
 0x679   : > { %4392 = vmatmul.bf16.vlgmr.msra.gmra.mxu0 %v12034_v61  ;;  %4406 = vmatmul.bf16.vlgmr.msra.gmra.mxu1 %v12038_v62  ;;  %v8303_v49 = vor.u32 %v9974_v27, %v8300_v44  ;;  %v8498_v42 = vld [vmem:[%s11453_s4 + $0x6b8] sm:$0xf]  ;;  %v9895_v44 = vld [vmem:[%s11453_s4 + $0x2bc] sm:$0xf] }
 0x67a   : > { %v10031_v27 = vld [vmem:[%s11453_s4 + $0x6f4] sm:$0xf0] }
 0x67b   : > { %4413 = vmatpush.bf16.msrb.mxu2 %v8043_v58  ;;  %4427 = vmatpush.bf16.msrb.mxu3 %v8555_v56  ;;  %v7724_v58 = vld [vmem:[%s11453_s4 + $0xf0] sm:$0xf0] }
 0x67c   : > { %4441 = vmatpush.bf16.msrb.mxu0 %v8047_v0  ;;  %4455 = vmatpush.bf16.msrb.mxu1 %v8559_v1  ;;  %v9958_v56 = vld [vmem:[%s11453_s4 + $0x4b4] sm:$0xf]  ;;  %v7723_v0 = vor.u32 %v9838_v47, %v7722_v46  ;;  %v8235_v1 = vor.u32 %v9966_v51, %v8234_v50  ;;  %v7727_v4 = vor.u32 %v9830_v52, %v7724_v58  ;;  %v8500_v46 = vld [vmem:[%s11453_s4 + $0x6f8] sm:$0xf0]  ;;  %v12404_v47 = vpop.f32.mrf.mxu0  ;;  %v7922_v50 = vld [vmem:[%s11453_s4 + $0x238] sm:$0xf] }
 0x67d   : > { %v8239_v41 = vor.u32 %v9958_v56, %v8236_v29  ;;  %v9887_v51 = vld [vmem:[%s11453_s4 + $0x274] sm:$0xf0] }
 0x67e   : > { %v8434_v56 = vld [vmem:[%s11453_s4 + $0x638] sm:$0xf] }
 0x67f   : > { %4414 = vmatpush.bf16.msrb.mxu2 %v7979_v48  ;;  %4428 = vmatpush.bf16.msrb.mxu3 %v8491_v7  ;;  %v7660_v48 = vld [vmem:[%s11453_s4 + $0x70] sm:$0xf0]  ;;  %v10015_v29 = vld [vmem:[%s11453_s4 + $0x674] sm:$0xf0] }
 0x680   : > { %4442 = vmatpush.bf16.msrb.mxu0 %v7983_v8  ;;  %4456 = vmatpush.bf16.msrb.mxu1 %v8495_v59  ;;  %v9942_v7 = vld [vmem:[%s11453_s4 + $0x434] sm:$0xf]  ;;  %v9935_v8 = vld [vmem:[%s11453_s4 + $0x3f4] sm:$0xf0] }
 0x681   : > { %v8626_v59 = vld [vmem:[%s11453_s4 + $0x7b8] sm:$0xf]  ;;  %v8175_v15 = vor.u32 %v9942_v7, %v8172_v31  ;;  %v8115_v35 = vor.u32 %v9935_v8, %v8114_v6  ;;  %v12420_v7 = vpop.f32.mrf.mxu3  ;;  %v8439_v6 = vor.u32 %v10007_v2, %v8436_v40  ;;  %v8180_v2 = vld [vmem:[%s11453_s4 + $0x478] sm:$0xf0]  ;;  %v8690_v40 = vld [vmem:[%s11462_s29 + $0x70] sm:$0xf] }
 0x682   : > { %v8370_v8 = vld [vmem:[%s11453_s4 + $0x5b8] sm:$0xf] }
 0x683   : > { %4415 = vmatpush.bf16.msrb.mxu2 %v7915_v13  ;;  %4429 = vmatpush.bf16.msrb.mxu3 %v8427_v14  ;;  %v8628_v13 = vld [vmem:[%s11453_s4 + $0x7f8] sm:$0xf0]  ;;  %v7663_v14 = vor.u32 %v9814_v5, %v7660_v48  ;;  %v7858_v5 = vld [vmem:[%s11453_s4 + $0x1b8] sm:$0xf] }
 0x684   : > { %4443 = vmatpush.bf16.msrb.mxu0 %v7919_v17  ;;  %4457 = vmatpush.bf16.msrb.mxu1 %v8431_v18  ;;  %v8627_v17 = vor.u32 %v10063_v9, %v8626_v59  ;;  %v8050_v18 = vld [vmem:[%s11453_s4 + $0x338] sm:$0xf]  ;;  %v8631_v21 = vor.u32 %v10055_v12, %v8628_v13  ;;  %v9863_v9 = vld [vmem:[%s11453_s4 + $0x1bc] sm:$0xf] }
 0x685   : > { %v8051_v33 = vor.u32 %v9919_v19, %v8050_v18  ;;  %v9871_v48 = vld [vmem:[%s11453_s4 + $0x1f4] sm:$0xf0]  ;;  %v9847_v19 = vld [vmem:[%s11453_s4 + $0x13c] sm:$0xf] }
 0x686   : > { %v9999_v59 = vld [vmem:[%s11453_s4 + $0x5f4] sm:$0xf0]  ;;  %v7859_v60 = vor.u32 %v9871_v48, %v7858_v5  ;;  %v8818_v48 = vld [vmem:[%s11462_s29 + $0x170] sm:$0xf] }
 0x687   : > { %4416 = vmatpush.bf16.msrb.mxu2 %v7851_v28  ;;  %4430 = vmatpush.bf16.msrb.mxu3 %v8363_v30  ;;  %v8052_v28 = vld [vmem:[%s11453_s4 + $0x378] sm:$0xf0]  ;;  %v8371_v12 = vor.u32 %v9999_v59, %v8370_v8  ;;  %v7794_v13 = vld [vmem:[%s11453_s4 + $0x138] sm:$0xf] }
 0x688   : > { %4444 = vmatpush.bf16.msrb.mxu0 %v7855_v34  ;;  %4458 = vmatpush.bf16.msrb.mxu1 %v8367_v36  ;;  %v10039_v30 = vld [vmem:[%s11453_s4 + $0x73c] sm:$0xf]  ;;  %v8563_v34 = vor.u32 %v10047_v23, %v8562_v22  ;;  %v7986_v36 = vld [vmem:[%s11453_s4 + $0x2b8] sm:$0xf]  ;;  %v8055_v39 = vor.u32 %v9911_v25, %v8052_v28 }
 0x689   : > { %v8567_v24 = vor.u32 %v10039_v30, %v8564_v32  ;;  %v9983_v18 = vld [vmem:[%s11453_s4 + $0x574] sm:$0xf0]  ;;  %v9975_v22 = vld [vmem:[%s11453_s4 + $0x53c] sm:$0xf] }
 0x68a   : > { %v8308_v23 = vld [vmem:[%s11453_s4 + $0x578] sm:$0xf0]  ;;  %v7730_v32 = vld [vmem:[%s11453_s4 + $0xb8] sm:$0xf] }
 0x68b   : > { %4417 = vmatpush.bf16.msrb.mxu2 %v7787_v45  ;;  %4431 = vmatpush.bf16.msrb.mxu3 %v8299_v43  ;;  %v7988_v45 = vld [vmem:[%s11453_s4 + $0x2f8] sm:$0xf0]  ;;  %v10095_v5 = vld [vmem:[%s11462_s29 + $0xf4] sm:$0xf0] }
 0x68c   : > { %4445 = vmatpush.bf16.msrb.mxu0 %v7791_v53  ;;  %4459 = vmatpush.bf16.msrb.mxu1 %v8303_v49  ;;  %v10023_v43 = vld [vmem:[%s11453_s4 + $0x6bc] sm:$0xf]  ;;  %v7987_v53 = vor.u32 %v9903_v37, %v7986_v36  ;;  %v8499_v49 = vor.u32 %v10031_v27, %v8498_v42  ;;  %v7991_v52 = vor.u32 %v9895_v44, %v7988_v45  ;;  %v10111_v59 = vld [vmem:[%s11462_s29 + $0x174] sm:$0xf0] }
 0x68d   : > { %v8503_v58 = vor.u32 %v10023_v43, %v8500_v46  ;;  %v8311_v37 = vor.u32 %v9975_v22, %v8308_v23  ;;  %v9831_v42 = vld [vmem:[%s11453_s4 + $0xbc] sm:$0xf]  ;;  %v12450_v43 = vpop.f32.mrf.mxu3  ;;  %v7666_v46 = vld [vmem:[%s11453_s4 + $0x38] sm:$0xf]  ;;  %v8810_v22 = vld [vmem:[%s11462_s29 + $0x160] sm:$0xf] }
 0x68e   : > { %v7732_v27 = vld [vmem:[%s11453_s4 + $0xf8] sm:$0xf0]  ;;  %v10109_v23 = vld [vmem:[%s11462_s29 + $0x164] sm:$0xf0] }
 0x68f   : > { %4418 = vmatpush.bf16.msrb.mxu2 %v7723_v0  ;;  %4432 = vmatpush.bf16.msrb.mxu3 %v8235_v1  ;;  %v12411_v0 = vpop.f32.mrf.mxu2  ;;  %v7924_v1 = vld [vmem:[%s11453_s4 + $0x278] sm:$0xf0] }
 0x690   : > { %4446 = vmatpush.bf16.msrb.mxu0 %v7727_v4  ;;  %4460 = vmatpush.bf16.msrb.mxu1 %v8239_v41  ;;  %v7923_v4 = vor.u32 %v9887_v51, %v7922_v50  ;;  %v8435_v41 = vor.u32 %v10015_v29, %v8434_v56  ;;  %v7927_v31 = vor.u32 %v9879_v63, %v7924_v1  ;;  %v9959_v44 = vld [vmem:[%s11453_s4 + $0x4bc] sm:$0xf]  ;;  %v9823_v50 = vld [vmem:[%s11453_s4 + $0x74] sm:$0xf0] }
 0x691   : > { %v8244_v45 = vld [vmem:[%s11453_s4 + $0x4f8] sm:$0xf0]  ;;  %v8178_v51 = vld [vmem:[%s11453_s4 + $0x438] sm:$0xf] }
 0x692   : > { %v8247_v56 = vor.u32 %v9959_v44, %v8244_v45  ;;  %v9815_v29 = vld [vmem:[%s11453_s4 + $0x3c] sm:$0xf]  ;;  %v10091_v44 = vld [vmem:[%s11462_s29 + $0xd4] sm:$0xf0]  ;;  %v8802_v45 = vld [vmem:[%s11462_s29 + $0x150] sm:$0xf] }
 0x693   : > { %4419 = vmatpush.bf16.msrb.mxu2 %v7659_v10  ;;  %4433 = vmatpush.bf16.msrb.mxu3 %v8171_v11  ;;  %v9991_v10 = vld [vmem:[%s11453_s4 + $0x5bc] sm:$0xf] }
 0x694   : > { %4447 = vmatpush.bf16.msrb.mxu0 %v7663_v14  ;;  %4461 = vmatpush.bf16.msrb.mxu1 %v8175_v15  ;;  %v8372_v11 = vld [vmem:[%s11453_s4 + $0x5f8] sm:$0xf0]  ;;  %v9855_v14 = vld [vmem:[%s11453_s4 + $0x174] sm:$0xf0]  ;;  %v7863_v15 = vor.u32 %v9863_v9, %v7860_v16  ;;  %v8882_v9 = vld [vmem:[%s11462_s29 + $0x1f0] sm:$0xf] }
 0x695   : > { %v7795_v28 = vor.u32 %v9855_v14, %v7794_v13  ;;  %v7668_v63 = vld [vmem:[%s11453_s4 + $0x78] sm:$0xf0]  ;;  %v10127_v16 = vld [vmem:[%s11462_s29 + $0x1f4] sm:$0xf0]  ;;  %v8682_v14 = vld [vmem:[%s11462_s29 + $0x60] sm:$0xf] }
 0x696   : > { %4420 = vmatmul.bf16.vlgmr.msrb.gmra.mxu2 %v12034_v61  ;;  %4434 = vmatmul.bf16.vlgmr.msrb.gmra.mxu3 %v12038_v62  ;;  %v9943_v1 = vld [vmem:[%s11453_s4 + $0x43c] sm:$0xf] }
 0x697   : > { %4468 = vmatpush.bf16.msra.mxu2 %v8115_v35  ;;  %4482 = vmatpush.bf16.msra.mxu3 %v8627_v17  ;;  %v8375_v35 = vor.u32 %v9991_v10, %v8372_v11  ;;  %v8306_v17 = vld [vmem:[%s11453_s4 + $0x538] sm:$0xf]  ;;  %v12438_v25 = vpop.f32.mrf.mxu2  ;;  %v7671_v10 = vor.u32 %v9815_v29, %v7668_v63  ;;  %v8183_v11 = vor.u32 %v9943_v1, %v8180_v2  ;;  %v10073_v29 = vld [vmem:[%s11462_s29 + $0x44] sm:$0xf0]  ;;  %v8794_v2 = vld [vmem:[%s11462_s29 + $0x140] sm:$0xf] }
 0x698   : > { %4496 = vmatpush.bf16.msra.mxu0 %v8119_v20  ;;  %4510 = vmatpush.bf16.msra.mxu1 %v8631_v21  ;;  %v12433_v20 = vpop.f32.mrf.mxu0  ;;  %v7796_v21 = vld [vmem:[%s11453_s4 + $0x178] sm:$0xf0]  ;;  %v8307_v30 = vor.u32 %v9983_v18, %v8306_v17  ;;  %v8819_v17 = vor.u32 %v10111_v59, %v8818_v48  ;;  %v8883_v18 = vor.u32 %v10127_v16, %v8882_v9  ;;  %v10089_v1 = vld [vmem:[%s11462_s29 + $0xc4] sm:$0xf0]  ;;  %v8658_v16 = vld [vmem:[%s11462_s29 + $0x30] sm:$0xf] }
 0x699   : > { %4448 = vmatmul.bf16.vlgmr.msrb.gmra.mxu0 %v12034_v61  ;;  %4462 = vmatmul.bf16.vlgmr.msrb.gmra.mxu1 %v12038_v62  ;;  %v7799_v36 = vor.u32 %v9847_v19, %v7796_v21  ;;  %v8746_v19 = vld [vmem:[%s11462_s29 + $0xe0] sm:$0xf]  ;;  %v10093_v21 = vld [vmem:[%s11462_s29 + $0xe4] sm:$0xf0] }
 0x69b   : > { %4469 = vmatpush.bf16.msra.mxu2 %v8051_v33  ;;  %4483 = vmatpush.bf16.msra.mxu3 %v8563_v34  ;;  %v9839_v33 = vld [vmem:[%s11453_s4 + $0xf4] sm:$0xf0]  ;;  %v12442_v34 = vpop.f32.mrf.mxu1 }
 0x69c   : > { %4497 = vmatpush.bf16.msra.mxu0 %v8055_v39  ;;  %4511 = vmatpush.bf16.msra.mxu1 %v8567_v24  ;;  %v8242_v39 = vld [vmem:[%s11453_s4 + $0x4b8] sm:$0xf] }
 0x69d   : > { %v9967_v24 = vld [vmem:[%s11453_s4 + $0x4f4] sm:$0xf0] }
 0x69f   : > { %4470 = vmatpush.bf16.msra.mxu2 %v7987_v53  ;;  %4484 = vmatpush.bf16.msra.mxu3 %v8499_v49  ;;  %v7731_v53 = vor.u32 %v9839_v33, %v7730_v32  ;;  %v8243_v49 = vor.u32 %v9967_v24, %v8242_v39  ;;  %v12482_v32 = vpop.f32.mrf.mxu3  ;;  %v10075_v39 = vld [vmem:[%s11462_s29 + $0x54] sm:$0xf0]  ;;  %v8811_v24 = vor.u32 %v10109_v23, %v8810_v22 }
 0x6a0   : > { %4498 = vmatpush.bf16.msra.mxu0 %v7991_v52  ;;  %4512 = vmatpush.bf16.msra.mxu1 %v8503_v58  ;;  %v9951_v52 = vld [vmem:[%s11453_s4 + $0x474] sm:$0xf0]  ;;  %v7735_v58 = vor.u32 %v9831_v42, %v7732_v27  ;;  %v8738_v27 = vld [vmem:[%s11462_s29 + $0xd0] sm:$0xf] }
 0x6a1   : > { %v8179_v8 = vor.u32 %v9951_v52, %v8178_v51 }
 0x6a3   : > { %4471 = vmatpush.bf16.msra.mxu2 %v7923_v4  ;;  %4485 = vmatpush.bf16.msra.mxu3 %v8435_v41  ;;  %v10079_v4 = vld [vmem:[%s11462_s29 + $0x74] sm:$0xf0]  ;;  %v8754_v41 = vld [vmem:[%s11462_s29 + $0xf0] sm:$0xf] }
 0x6a4   : > { %4499 = vmatpush.bf16.msra.mxu0 %v7927_v31  ;;  %4513 = vmatpush.bf16.msra.mxu1 %v8439_v6  ;;  %v12465_v31 = vpop.f32.mrf.mxu0  ;;  %v7667_v6 = vor.u32 %v9823_v50, %v7666_v46  ;;  %v8755_v13 = vor.u32 %v10095_v5, %v8754_v41  ;;  %v10107_v46 = vld [vmem:[%s11462_s29 + $0x154] sm:$0xf0]  ;;  %v12497_v50 = vld [vmem:[%s11459_s20] sm:$0xff]  ;;  %v10121_v5 = vld [vmem:[%s11462_s29 + $0x1c4] sm:$0xf0] }
 0x6a5   : > { %v8803_v63 = vor.u32 %v10107_v46, %v8802_v45  ;;  %v8858_v41 = vld [vmem:[%s11462_s29 + $0x1c0] sm:$0xf]  ;;  %v2765_v48 = vperm.slane %v12497_v50, 1  ;;  %v10117_v46 = vld [vmem:[%s11462_s29 + $0x1a4] sm:$0xf0] }
 0x6a6   : > { %v8842_v45 = vld [vmem:[%s11462_s29 + $0x1a0] sm:$0xf] }
 0x6a7   : > { %4472 = vmatpush.bf16.msra.mxu2 %v7859_v60  ;;  %4486 = vmatpush.bf16.msra.mxu3 %v8371_v12  ;;  %v12470_v60 = vpop.f32.mrf.mxu2  ;;  %v8691_v12 = vor.u32 %v10079_v4, %v8690_v40  ;;  %v10105_v4 = vld [vmem:[%s11462_s29 + $0x144] sm:$0xf0]  ;;  %v4114_v22 = vadd.f32 %v12404_v47, %v2765_v48 }
 0x6a8   : > { %4500 = vmatpush.bf16.msra.mxu0 %v7863_v15  ;;  %4514 = vmatpush.bf16.msra.mxu1 %v8375_v35  ;;  %v10077_v15 = vld [vmem:[%s11462_s29 + $0x64] sm:$0xf0]  ;;  %v12474_v35 = vpop.f32.mrf.mxu1 }
 0x6a9   : > { %v8683_v33 = vor.u32 %v10077_v15, %v8682_v14  ;;  %v8722_v14 = vld [vmem:[%s11462_s29 + $0xb0] sm:$0xf]  ;;  %v10087_v15 = vld [vmem:[%s11462_s29 + $0xb4] sm:$0xf0] }
 0x6ab   : > { %4473 = vmatpush.bf16.msra.mxu2 %v7795_v28  ;;  %4487 = vmatpush.bf16.msra.mxu3 %v8307_v30  ;;  %v8874_v28 = vld [vmem:[%s11462_s29 + $0x1e0] sm:$0xf]  ;;  %v10125_v30 = vld [vmem:[%s11462_s29 + $0x1e4] sm:$0xf0] }
 0x6ac   : > { %4501 = vmatpush.bf16.msra.mxu0 %v7799_v36  ;;  %4515 = vmatpush.bf16.msra.mxu1 %v8311_v37  ;;  %v8747_v36 = vor.u32 %v10093_v21, %v8746_v19  ;;  %v8674_v37 = vld [vmem:[%s11462_s29 + $0x50] sm:$0xf]  ;;  %v8875_v42 = vor.u32 %v10125_v30, %v8874_v28  ;;  %v12499_v51 = vpop.f32.mrf.mxu0  ;;  %v10119_v21 = vld [vmem:[%s11462_s29 + $0x1b4] sm:$0xf0]  ;;  %v4116_v28 = vadd.f32 %v12433_v20, %v2765_v48  ;;  %v8778_v20 = vld [vmem:[%s11462_s29 + $0x120] sm:$0xf] }
 0x6ad   : > { %v8675_v52 = vor.u32 %v10075_v39, %v8674_v37  ;;  %v8850_v19 = vld [vmem:[%s11462_s29 + $0x1b0] sm:$0xf]  ;;  %v8723_v37 = vor.u32 %v10087_v15, %v8722_v14  ;;  %v8650_v39 = vld [vmem:[%s11462_s29 + $0x20] sm:$0xf]  ;;  %v10099_v48 = vld [vmem:[%s11462_s29 + $0x114] sm:$0xf0] }
 0x6af   : > { %4474 = vmatpush.bf16.msra.mxu2 %v7731_v53  ;;  %4488 = vmatpush.bf16.msra.mxu3 %v8243_v49  ;;  %v8866_v53 = vld [vmem:[%s11462_s29 + $0x1d0] sm:$0xf]  ;;  %v10123_v49 = vld [vmem:[%s11462_s29 + $0x1d4] sm:$0xf0]  ;;  %v12506_v40 = vpop.f32.mrf.mxu2 }
 0x6b0   : > { %4502 = vmatpush.bf16.msra.mxu0 %v7735_v58  ;;  %4516 = vmatpush.bf16.msra.mxu1 %v8247_v56  ;;  %v8739_v58 = vor.u32 %v10091_v44, %v8738_v27  ;;  %v8666_v56 = vld [vmem:[%s11462_s29 + $0x40] sm:$0xf]  ;;  %v10085_v27 = vld [vmem:[%s11462_s29 + $0xa4] sm:$0xf0] }
 0x6b1   : > { %v8667_v59 = vor.u32 %v10073_v29, %v8666_v56  ;;  %v10101_v44 = vld [vmem:[%s11462_s29 + $0x124] sm:$0xf0]  ;;  %v2766_v29 = vperm.slane %v12497_v50, 2 }
 0x6b3   : > { %4475 = vmatpush.bf16.msra.mxu2 %v7667_v6  ;;  %4489 = vmatpush.bf16.msra.mxu3 %v8179_v8  ;;  %v2764_v6 = vperm.slane %v12497_v50, 0  ;;  %v12513_v8 = vpop.f32.mrf.mxu1 }
 0x6b4   : > { %4503 = vmatpush.bf16.msra.mxu0 %v7671_v10  ;;  %4517 = vmatpush.bf16.msra.mxu1 %v8183_v11  ;;  %v10071_v10 = vld [vmem:[%s11462_s29 + $0x34] sm:$0xf0]  ;;  %v12517_v11 = vpop.f32.mrf.mxu3 }
 0x6b5   : > { %v4086_v23 = vadd.f32 %v12411_v0, %v2764_v6  ;;  %v4088_v30 = vadd.f32 %v12438_v25, %v2764_v6  ;;  %v8851_v0 = vor.u32 %v10119_v21, %v8850_v19  ;;  %v12535_v25 = vpop.f32.mrf.mxu0  ;;  %v8834_v6 = vld [vmem:[%s11462_s29 + $0x190] sm:$0xf]  ;;  %v10081_v19 = vld [vmem:[%s11462_s29 + $0x84] sm:$0xf0]  ;;  %v4142_v21 = vadd.f32 %v12470_v60, %v2766_v29 }
 0x6b6   : > { %4476 = vmatmul.bf16.vlgmr.msra.gmra.mxu2 %v12034_v61  ;;  %4490 = vmatmul.bf16.vlgmr.msra.gmra.mxu3 %v12038_v62  ;;  %v9074_v60 = vld [vmem:[%s11462_s29 + $0x370] sm:$0xf] }
 0x6b7   : > { %6114 = vmatpush.bf16.msrb.mxu2 %v8691_v12  ;;  %6128 = vmatpush.bf16.msrb.mxu3 %v8755_v13  ;;  %v8795_v12 = vor.u32 %v10105_v4, %v8794_v2  ;;  %v8859_v13 = vor.u32 %v10121_v5, %v8858_v41  ;;  %v10083_v2 = vld [vmem:[%s11462_s29 + $0x94] sm:$0xf0]  ;;  %v8770_v4 = vld [vmem:[%s11462_s29 + $0x110] sm:$0xf]  ;;  %v4144_v5 = vadd.f32 %v12506_v40, %v2766_v29 }
 0x6b8   : > { %6142 = vmatpush.bf16.msrb.mxu0 %v8819_v17  ;;  %6156 = vmatpush.bf16.msrb.mxu1 %v8883_v18  ;;  %v8786_v17 = vld [vmem:[%s11462_s29 + $0x130] sm:$0xf]  ;;  %v10103_v18 = vld [vmem:[%s11462_s29 + $0x134] sm:$0xf0] }
 0x6b9   : > { %4504 = vmatmul.bf16.vlgmr.msra.gmra.mxu0 %v12034_v61  ;;  %4518 = vmatmul.bf16.vlgmr.msra.gmra.mxu1 %v12038_v62  ;;  %v8867_v61 = vor.u32 %v10123_v49, %v8866_v53  ;;  %v8730_v62 = vld [vmem:[%s11462_s29 + $0xc0] sm:$0xf]  ;;  %v8787_v47 = vor.u32 %v10103_v18, %v8786_v17  ;;  %v12541_v53 = vadd.f32 %v12416_v3, %v4114_v22  ;;  %v10065_v17 = vld [vmem:[%s11462_s29 + $0x4] sm:$0xf0] }
 0x6ba   : > { %v8731_v9 = vor.u32 %v10089_v1, %v8730_v62  ;;  %v12544_v49 = vadd.f32 %v12420_v7, %v4086_v23  ;;  %v8706_v1 = vld [vmem:[%s11462_s29 + $0x90] sm:$0xf]  ;;  %v8698_v18 = vld [vmem:[%s11462_s29 + $0x80] sm:$0xf]  ;;  %v8771_v22 = vor.u32 %v10099_v48, %v8770_v4  ;;  %v10173_v4 = vld [vmem:[%s11462_s29 + $0x364] sm:$0xf0] }
 0x6bb   : > { %6115 = vmatpush.bf16.msrb.mxu2 %v8683_v33  ;;  %6129 = vmatpush.bf16.msrb.mxu3 %v8747_v36  ;;  %v2767_v33 = vperm.slane %v12497_v50, 3  ;;  %v8659_v36 = vor.u32 %v10071_v10, %v8658_v16  ;;  %v12558_v62 = vpop.f32.mrf.mxu1  ;;  %v8707_v15 = vor.u32 %v10083_v2, %v8706_v1  ;;  %v8762_v23 = vld [vmem:[%s11462_s29 + $0x100] sm:$0xf]  ;;  %v10157_v1 = vld [vmem:[%s11462_s29 + $0x2e4] sm:$0xf0] }
 0x6bc   : > { %6143 = vmatpush.bf16.msrb.mxu0 %v8811_v24  ;;  %6157 = vmatpush.bf16.msrb.mxu1 %v8875_v42  ;;  %v10069_v24 = vld [vmem:[%s11462_s29 + $0x24] sm:$0xf0]  ;;  %v8714_v42 = vld [vmem:[%s11462_s29 + $0xa0] sm:$0xf]  ;;  %v4524_v16 = vmax.f32 %v12544_v49, 0.0 }
 0x6bd   : > { %v4170_v56 = vadd.f32 %v12465_v31, %v2767_v33  ;;  %v8651_v3 = vor.u32 %v10069_v24, %v8650_v39  ;;  %v8715_v7 = vor.u32 %v10085_v27, %v8714_v42  ;;  %v8843_v31 = vor.u32 %v10117_v46, %v8842_v45  ;;  %v8946_v39 = vld [vmem:[%s11462_s29 + $0x270] sm:$0xf]  ;;  %v10143_v24 = vld [vmem:[%s11462_s29 + $0x274] sm:$0xf0]  ;;  %v12593_v42 = vpop.f32.mrf.mxu0  ;;  %v9066_v2 = vld [vmem:[%s11462_s29 + $0x360] sm:$0xf] }
 0x6be   : > { %v4172_v41 = vadd.f32 %v12499_v51, %v2767_v33  ;;  %v8634_v51 = vld [vmem:[%s11462_s29] sm:$0xf]  ;;  %v9138_v45 = vld [vmem:[%s11462_s29 + $0x3f0] sm:$0xf]  ;;  %v10191_v46 = vld [vmem:[%s11462_s29 + $0x3f4] sm:$0xf0]  ;;  %v8947_v29 = vor.u32 %v10143_v24, %v8946_v39 }
 0x6bf   : > { %6116 = vmatpush.bf16.msrb.mxu2 %v8675_v52  ;;  %6130 = vmatpush.bf16.msrb.mxu3 %v8739_v58  ;;  %v12547_v52 = vadd.f32 %v12442_v34, %v4116_v28  ;;  %v12550_v58 = vadd.f32 %v12450_v43, %v4088_v30  ;;  %v8642_v34 = vld [vmem:[%s11462_s29 + $0x10] sm:$0xf]  ;;  %v8779_v43 = vor.u32 %v10101_v44, %v8778_v20  ;;  %v10097_v28 = vld [vmem:[%s11462_s29 + $0x104] sm:$0xf0]  ;;  %v8826_v30 = vld [vmem:[%s11462_s29 + $0x180] sm:$0xf] }
 0x6c0   : > { %6144 = vmatpush.bf16.msrb.mxu0 %v8803_v63  ;;  %6158 = vmatpush.bf16.msrb.mxu1 %v8867_v61  ;;  %v12554_v63 = vpop.f32.mrf.mxu2  ;;  %v10067_v61 = vld [vmem:[%s11462_s29 + $0x14] sm:$0xf0]  ;;  %v12576_v40 = vadd.f32 %v12474_v35, %v4170_v56  ;;  %v4186_v33 = vadd.f32 %v12513_v8, %v4172_v41  ;;  %v8635_v27 = vor.u32 %v10065_v17, %v8634_v51  ;;  %v9130_v41 = vld [vmem:[%s11462_s29 + $0x3e0] sm:$0xf] }
 0x6c1   : > { %v4541_v10 = vmax.f32 %v12547_v52, 0.0  ;;  %v8643_v14 = vor.u32 %v10067_v61, %v8642_v34  ;;  %v8699_v20 = vor.u32 %v10081_v19, %v8698_v18  ;;  %v10175_v44 = vld [vmem:[%s11462_s29 + $0x374] sm:$0xf0]  ;;  %v10141_v34 = vld [vmem:[%s11462_s29 + $0x264] sm:$0xf0] }
 0x6c2   : > { %v4527_v8 = vmax.f32 %v12576_v40, 0.0  ;;  %v4543_v52 = vmax.f32 %v4186_v33, 0.0  ;;  %v8994_v18 = vld [vmem:[%s11462_s29 + $0x2d0] sm:$0xf]  ;;  %v10155_v19 = vld [vmem:[%s11462_s29 + $0x2d4] sm:$0xf0] }
 0x6c3   : > { %6117 = vmatpush.bf16.msrb.mxu2 %v8667_v59  ;;  %6131 = vmatpush.bf16.msrb.mxu3 %v8731_v9  ;;  %v10115_v59 = vld [vmem:[%s11462_s29 + $0x194] sm:$0xf0]  ;;  %v4525_v9 = vmax.f32 %v12541_v53, 0.0  ;;  %v8763_v53 = vor.u32 %v10097_v28, %v8762_v23  ;;  %v12604_v61 = vpop.f32.mrf.mxu1  ;;  %v9122_v23 = vld [vmem:[%s11462_s29 + $0x3d0] sm:$0xf]  ;;  %v2768_v33 = vperm.slane %v12497_v50, 4  ;;  %v8995_v39 = vor.u32 %v10155_v19, %v8994_v18 }
 0x6c4   : > { %6145 = vmatpush.bf16.msrb.mxu0 %v8795_v12  ;;  %6159 = vmatpush.bf16.msrb.mxu1 %v8859_v13  ;;  %v4540_v12 = vmax.f32 %v12550_v58, 0.0  ;;  %v12572_v13 = vpop.f32.mrf.mxu3  ;;  %v8835_v35 = vor.u32 %v10115_v59, %v8834_v6  ;;  %v12618_v40 = vpack.c.bf16 %v4543_v52, %v4527_v8  ;;  %v10187_v28 = vld [vmem:[%s11462_s29 + $0x3d4] sm:$0xf0]  ;;  %v8922_v24 = vld [vmem:[%s11462_s29 + $0x240] sm:$0xf] }
 0x6c5   : > { %v12612_v48 = vpack.c.bf16 %v4541_v10, %v4525_v9  ;;  %v8930_v9 = vld [vmem:[%s11462_s29 + $0x250] sm:$0xf]  ;;  %v9114_v8 = vld [vmem:[%s11462_s29 + $0x3c0] sm:$0xf]  ;;  %v4198_v52 = vadd.f32 %v12554_v63, %v2768_v33  ;;  %v10149_v18 = vld [vmem:[%s11462_s29 + $0x2a4] sm:$0xf0] }
 0x6c6   : > { %v12614_v6 = vpack.c.bf16 %v4540_v12, %v4524_v16  ;;  %v10139_v16 = vld [vmem:[%s11462_s29 + $0x254] sm:$0xf0]  ;;  %v9067_v12 = vor.u32 %v10173_v4, %v9066_v2  ;;  %v9106_v2 = vld [vmem:[%s11462_s29 + $0x3b0] sm:$0xf] }
 0x6c7   : > { %6118 = vmatpush.bf16.msrb.mxu2 %v8659_v36  ;;  %6132 = vmatpush.bf16.msrb.mxu3 %v8723_v37  ;;  %v4158_v36 = vadd.f32 %v12517_v11, %v4144_v5  ;;  %v10113_v37 = vld [vmem:[%s11462_s29 + $0x184] sm:$0xf0]  ;;  %v4156_v11 = vadd.f32 %v12482_v32, %v4142_v21  ;;  %v9075_v32 = vor.u32 %v10175_v44, %v9074_v60  ;;  %v9058_v21 = vld [vmem:[%s11462_s29 + $0x350] sm:$0xf]  ;;  %v10183_v4 = vld [vmem:[%s11462_s29 + $0x3b4] sm:$0xf0] }
 0x6c8   : > { %6146 = vmatpush.bf16.msrb.mxu0 %v8787_v47  ;;  %6160 = vmatpush.bf16.msrb.mxu1 %v8851_v0  ;;  %v9010_v47 = vld [vmem:[%s11462_s29 + $0x2f0] sm:$0xf]  ;;  %v10159_v0 = vld [vmem:[%s11462_s29 + $0x2f4] sm:$0xf0]  ;;  %v8827_v49 = vor.u32 %v10113_v37, %v8826_v30  ;;  %v12600_v56 = vpop.f32.mrf.mxu2  ;;  %v10189_v5 = vld [vmem:[%s11462_s29 + $0x3e4] sm:$0xf0]  ;;  %v8931_v37 = vor.u32 %v10139_v16, %v8930_v9 }
 0x6c9   : > { %v4542_v58 = vmax.f32 %v4158_v36, 0.0  ;;  %v4526_v59 = vmax.f32 %v4156_v11, 0.0  ;;  %v9131_v17 = vor.u32 %v10189_v5, %v9130_v41  ;;  %v2769_v30 = vperm.slane %v12497_v50, 5  ;;  %v10153_v44 = vld [vmem:[%s11462_s29 + $0x2c4] sm:$0xf0] }
 0x6ca   : > { %v10185_v11 = vld [vmem:[%s11462_s29 + $0x3c4] sm:$0xf0]  ;;  %v12667_v5 = vadd.f32 %v12572_v13, %v4198_v52  ;;  %v8906_v16 = vld [vmem:[%s11462_s29 + $0x220] sm:$0xf]  ;;  %v9090_v52 = vld [vmem:[%s11462_s29 + $0x390] sm:$0xf] }
 0x6cb   : > { %6119 = vmatpush.bf16.msrb.mxu2 %v8651_v3  ;;  %6133 = vmatpush.bf16.msrb.mxu3 %v8715_v7  ;;  %v9011_v3 = vor.u32 %v10159_v0, %v9010_v47  ;;  %v8938_v7 = vld [vmem:[%s11462_s29 + $0x260] sm:$0xf]  ;;  %v12622_v10 = vpack.c.bf16 %v4542_v58, %v4526_v59  ;;  %v10137_v47 = vld [vmem:[%s11462_s29 + $0x244] sm:$0xf0]  ;;  %v12642_v0 = vpop.f32.mrf.mxu1  ;;  %v4228_v41 = vadd.f32 %v12593_v42, %v2769_v30  ;;  %v2771_v59 = vperm.slane %v12497_v50, 7 }
 0x6cc   : > { %6147 = vmatpush.bf16.msrb.mxu0 %v8779_v43  ;;  %6161 = vmatpush.bf16.msrb.mxu1 %v8843_v31  ;;  %v9139_v43 = vor.u32 %v10191_v46, %v9138_v45  ;;  %v9002_v31 = vld [vmem:[%s11462_s29 + $0x2e0] sm:$0xf]  ;;  %v12616_v51 = vpop.f32.mrf.mxu3  ;;  %v10169_v46 = vld [vmem:[%s11462_s29 + $0x344] sm:$0xf0]  ;;  %v8923_v58 = vor.u32 %v10137_v47, %v8922_v24  ;;  %v9107_v42 = vor.u32 %v10183_v4, %v9106_v2  ;;  %v4528_v47 = vmax.f32 %v12667_v5, 0.0 }
 0x6cd   : > { %v9050_v45 = vld [vmem:[%s11462_s29 + $0x340] sm:$0xf] }
 0x6ce   : > { %v9034_v13 = vld [vmem:[%s11462_s29 + $0x320] sm:$0xf] }
 0x6cf   : > { %6120 = vmatpush.bf16.msrb.mxu2 %v8643_v14  ;;  %6134 = vmatpush.bf16.msrb.mxu3 %v8707_v15  ;;  %v8939_v14 = vor.u32 %v10141_v34, %v8938_v7  ;;  %v9003_v15 = vor.u32 %v10157_v1, %v9002_v31  ;;  %v10135_v7 = vld [vmem:[%s11462_s29 + $0x234] sm:$0xf0]  ;;  %v9051_v34 = vor.u32 %v10169_v46, %v9050_v45  ;;  %v9042_v31 = vld [vmem:[%s11462_s29 + $0x330] sm:$0xf]  ;;  %v9322_v5 = vld [vmem:[%s11462_s29 + $0x560] sm:$0xf] }
 0x6d0   : > { %6148 = vmatpush.bf16.msrb.mxu0 %v8771_v22  ;;  %6162 = vmatpush.bf16.msrb.mxu1 %v8835_v35  ;;  %v12627_v22 = vpop.f32.mrf.mxu0  ;;  %v10171_v35 = vld [vmem:[%s11462_s29 + $0x354] sm:$0xf0]  ;;  %v12638_v36 = vpop.f32.mrf.mxu2  ;;  %v8962_v46 = vld [vmem:[%s11462_s29 + $0x290] sm:$0xf] }
 0x6d1   : > { %v9059_v60 = vor.u32 %v10171_v35, %v9058_v21  ;;  %v10167_v1 = vld [vmem:[%s11462_s29 + $0x334] sm:$0xf0]  ;;  %v10165_v21 = vld [vmem:[%s11462_s29 + $0x324] sm:$0xf0]  ;;  %v9098_v35 = vld [vmem:[%s11462_s29 + $0x3a0] sm:$0xf] }
 0x6d3   : > { %6121 = vmatpush.bf16.msrb.mxu2 %v8635_v27  ;;  %6135 = vmatpush.bf16.msrb.mxu3 %v8699_v20  ;;  %v9123_v27 = vor.u32 %v10187_v28, %v9122_v23  ;;  %v8986_v20 = vld [vmem:[%s11462_s29 + $0x2c0] sm:$0xf]  ;;  %v10181_v23 = vld [vmem:[%s11462_s29 + $0x3a4] sm:$0xf0]  ;;  %v4297_v24 = vpop.f32.mrf.mxu1 }
 0x6d4   : > { %6149 = vmatpush.bf16.msrb.mxu0 %v8763_v53  ;;  %6163 = vmatpush.bf16.msrb.mxu1 %v8827_v49  ;;  %v4226_v53 = vadd.f32 %v12535_v25, %v2769_v30  ;;  %v12651_v49 = vpop.f32.mrf.mxu3  ;;  %v10151_v25 = vld [vmem:[%s11462_s29 + $0x2b4] sm:$0xf0]  ;;  %v12680_v30 = vadd.f32 %v12604_v61, %v4228_v41  ;;  %v8898_v61 = vld [vmem:[%s11462_s29 + $0x210] sm:$0xf]  ;;  %v10145_v41 = vld [vmem:[%s11462_s29 + $0x284] sm:$0xf0] }
 0x6d6   : > { %6122 = vmatmul.bf16.vlgmr.msrb.gmra.mxu2 %v12614_v6  ;;  %6136 = vmatmul.bf16.vlgmr.msrb.gmra.mxu3 %v12612_v48  ;;  %v12663_v63 = vadd.f32 %v12558_v62, %v4226_v53  ;;  %v10133_v62 = vld [vmem:[%s11462_s29 + $0x224] sm:$0xf0]  ;;  %v10163_v53 = vld [vmem:[%s11462_s29 + $0x314] sm:$0xf0] }
 0x6d7   : > { %6170 = vmatpush.bf16.msra.mxu2 %v8947_v29  ;;  %6184 = vmatpush.bf16.msra.mxu3 %v9011_v3  ;;  %v8987_v29 = vor.u32 %v10153_v44, %v8986_v20  ;;  %v8914_v3 = vld [vmem:[%s11462_s29 + $0x230] sm:$0xf]  ;;  %v10131_v44 = vld [vmem:[%s11462_s29 + $0x214] sm:$0xf0] }
 0x6d8   : > { %6198 = vmatpush.bf16.msra.mxu0 %v9075_v32  ;;  %6212 = vmatpush.bf16.msra.mxu1 %v9139_v43  ;;  %v9115_v32 = vor.u32 %v10185_v11, %v9114_v8  ;;  %v8978_v43 = vld [vmem:[%s11462_s29 + $0x2b0] sm:$0xf]  ;;  %v4255_v19 = vpop.f32.mrf.mxu2  ;;  %v4529_v28 = vmax.f32 %v12663_v63, 0.0  ;;  %v10147_v8 = vld [vmem:[%s11462_s29 + $0x294] sm:$0xf0] }
 0x6d9   : > { %6150 = vmatmul.bf16.vlgmr.msrb.gmra.mxu0 %v12622_v10  ;;  %6164 = vmatmul.bf16.vlgmr.msrb.gmra.mxu1 %v12618_v40  ;;  %v8979_v9 = vor.u32 %v10151_v25, %v8978_v43  ;;  %v9026_v11 = vld [vmem:[%s11462_s29 + $0x310] sm:$0xf]  ;;  %v8899_v25 = vor.u32 %v10131_v44, %v8898_v61  ;;  %v10239_v44 = vld [vmem:[%s11462_s29 + $0x574] sm:$0xf0] }
 0x6da   : > { %v9027_v2 = vor.u32 %v10163_v53, %v9026_v11  ;;  %v9330_v61 = vld [vmem:[%s11462_s29 + $0x570] sm:$0xf]  ;;  %v9386_v11 = vld [vmem:[%s11462_s29 + $0x5e0] sm:$0xf]  ;;  %v10253_v53 = vld [vmem:[%s11462_s29 + $0x5e4] sm:$0xf0] }
 0x6db   : > { %6171 = vmatpush.bf16.msra.mxu2 %v8939_v14  ;;  %6185 = vmatpush.bf16.msra.mxu3 %v9003_v15  ;;  %v4283_v14 = vpop.f32.mrf.mxu0  ;;  %v8915_v15 = vor.u32 %v10135_v7, %v8914_v3  ;;  %v4282_v7 = vadd.f32 %v12627_v22, %v2771_v59  ;;  %v8954_v22 = vld [vmem:[%s11462_s29 + $0x280] sm:$0xf] }
 0x6dc   : > { %6199 = vmatpush.bf16.msra.mxu0 %v9067_v12  ;;  %6213 = vmatpush.bf16.msra.mxu1 %v9131_v17  ;;  %v9043_v12 = vor.u32 %v10167_v1, %v9042_v31  ;;  %v8970_v17 = vld [vmem:[%s11462_s29 + $0x2a0] sm:$0xf]  ;;  %v8963_v31 = vor.u32 %v10147_v8, %v8962_v46  ;;  %v10221_v46 = vld [vmem:[%s11462_s29 + $0x4e4] sm:$0xf0] }
 0x6dd   : > { %v8971_v20 = vor.u32 %v10149_v18, %v8970_v17  ;;  %v8890_v1 = vld [vmem:[%s11462_s29 + $0x200] sm:$0xf]  ;;  %v9266_v17 = vld [vmem:[%s11462_s29 + $0x4f0] sm:$0xf]  ;;  %v10223_v18 = vld [vmem:[%s11462_s29 + $0x4f4] sm:$0xf0] }
 0x6df   : > { %6172 = vmatpush.bf16.msra.mxu2 %v8931_v37  ;;  %6186 = vmatpush.bf16.msra.mxu3 %v8995_v39  ;;  %v4200_v37 = vadd.f32 %v12600_v56, %v2768_v33  ;;  %v2770_v39 = vperm.slane %v12497_v50, 6  ;;  %v4269_v56 = vpop.f32.mrf.mxu3  ;;  %v9035_v50 = vor.u32 %v10165_v21, %v9034_v13  ;;  %v9099_v33 = vor.u32 %v10181_v23, %v9098_v35  ;;  %v9394_v23 = vld [vmem:[%s11462_s29 + $0x5f0] sm:$0xf] }
 0x6e0   : > { %6200 = vmatpush.bf16.msra.mxu0 %v9059_v60  ;;  %6214 = vmatpush.bf16.msra.mxu1 %v9123_v27  ;;  %v4284_v60 = vadd.f32 %v4283_v14, %v2771_v59  ;;  %v8907_v27 = vor.u32 %v10133_v62, %v8906_v16  ;;  %v9018_v59 = vld [vmem:[%s11462_s29 + $0x300] sm:$0xf]  ;;  %v10161_v14 = vld [vmem:[%s11462_s29 + $0x304] sm:$0xf0]  ;;  %v9202_v16 = vld [vmem:[%s11462_s29 + $0x470] sm:$0xf]  ;;  %v4296_v62 = vadd.f32 %v12642_v0, %v4282_v7 }
 0x6e1   : > { %v4256_v45 = vadd.f32 %v4255_v19, %v2770_v39  ;;  %v4214_v3 = vadd.f32 %v12616_v51, %v4200_v37  ;;  %v10129_v51 = vld [vmem:[%s11462_s29 + $0x204] sm:$0xf0]  ;;  %v8955_v35 = vor.u32 %v10145_v41, %v8954_v22  ;;  %v9331_v7 = vor.u32 %v10239_v44, %v9330_v61  ;;  %v10219_v22 = vld [vmem:[%s11462_s29 + $0x4d4] sm:$0xf0] }
 0x6e2   : > { %v8891_v21 = vor.u32 %v10129_v51, %v8890_v1  ;;  %v10203_v1 = vld [vmem:[%s11462_s29 + $0x454] sm:$0xf0]  ;;  %v9250_v51 = vld [vmem:[%s11462_s29 + $0x4d0] sm:$0xf] }
 0x6e3   : > { %6173 = vmatpush.bf16.msra.mxu2 %v8923_v58  ;;  %6187 = vmatpush.bf16.msra.mxu3 %v8987_v29  ;;  %v10179_v58 = vld [vmem:[%s11462_s29 + $0x394] sm:$0xf0]  ;;  %v4545_v29 = vmax.f32 %v12680_v30, 0.0  ;;  %v12699_v43 = vpop.f32.mrf.mxu0  ;;  %v4544_v13 = vmax.f32 %v4214_v3, 0.0  ;;  %v4531_v3 = vmax.f32 %v4296_v62, 0.0 }
 0x6e4   : > { %6201 = vmatpush.bf16.msra.mxu0 %v9051_v34  ;;  %6215 = vmatpush.bf16.msra.mxu1 %v9115_v32  ;;  %v4254_v34 = vadd.f32 %v12638_v36, %v2770_v39  ;;  %v12697_v32 = vadd.f32 %v4297_v24, %v4284_v60  ;;  %v4270_v36 = vadd.f32 %v4269_v56, %v4256_v45  ;;  %v10255_v30 = vld [vmem:[%s11462_s29 + $0x5f4] sm:$0xf0]  ;;  %v12720_v39 = vpop.f32.mrf.mxu2  ;;  %v9194_v45 = vld [vmem:[%s11462_s29 + $0x460] sm:$0xf] }
 0x6e5   : > { %v9091_v4 = vor.u32 %v10179_v58, %v9090_v52  ;;  %v9395_v56 = vor.u32 %v10255_v30, %v9394_v23  ;;  %v12734_v52 = vpack.c.bf16 %v4545_v29, %v4529_v28  ;;  %v12738_v58 = vpack.c.bf16 %v4544_v13, %v4528_v47  ;;  %v10237_v47 = vld [vmem:[%s11462_s29 + $0x564] sm:$0xf0]  ;;  %v9186_v29 = vld [vmem:[%s11462_s29 + $0x450] sm:$0xf]  ;;  %v9242_v13 = vld [vmem:[%s11462_s29 + $0x4c0] sm:$0xf] }
 0x6e6   : > { %v4268_v19 = vadd.f32 %v12651_v49, %v4254_v34  ;;  %v4547_v0 = vmax.f32 %v12697_v32, 0.0  ;;  %v4546_v37 = vmax.f32 %v4270_v36, 0.0  ;;  %v9019_v49 = vor.u32 %v10161_v14, %v9018_v59  ;;  %v9378_v36 = vld [vmem:[%s11462_s29 + $0x5d0] sm:$0xf]  ;;  %v12769_v23 = vld [vmem:[%s11459_s20 + $0x8] sm:$0xff] }
 0x6e7   : > { %6174 = vmatpush.bf16.msra.mxu2 %v8915_v15  ;;  %6188 = vmatpush.bf16.msra.mxu3 %v8979_v9  ;;  %v9082_v15 = vld [vmem:[%s11462_s29 + $0x380] sm:$0xf]  ;;  %v10177_v9 = vld [vmem:[%s11462_s29 + $0x384] sm:$0xf0]  ;;  %v12722_v24 = vpop.f32.mrf.mxu3  ;;  %v9323_v41 = vor.u32 %v10237_v47, %v9322_v5  ;;  %v9187_v59 = vor.u32 %v10203_v1, %v9186_v29  ;;  %v9251_v14 = vor.u32 %v10219_v22, %v9250_v51  ;;  %v10199_v44 = vld [vmem:[%s11462_s29 + $0x434] sm:$0xf0] }
 0x6e8   : > { %6202 = vmatpush.bf16.msra.mxu0 %v9043_v12  ;;  %6216 = vmatpush.bf16.msra.mxu1 %v9107_v42  ;;  %v12711_v12 = vpop.f32.mrf.mxu1  ;;  %v10207_v42 = vld [vmem:[%s11462_s29 + $0x474] sm:$0xf0]  ;;  %v9083_v60 = vor.u32 %v10177_v9, %v9082_v15  ;;  %v4530_v8 = vmax.f32 %v4268_v19, 0.0  ;;  %v9314_v15 = vld [vmem:[%s11462_s29 + $0x550] sm:$0xf] }
 0x6e9   : > { %v10235_v9 = vld [vmem:[%s11462_s29 + $0x554] sm:$0xf0]  ;;  %v10217_v19 = vld [vmem:[%s11462_s29 + $0x4c4] sm:$0xf0]  ;;  %v9162_v5 = vld [vmem:[%s11462_s29 + $0x420] sm:$0xf] }
 0x6ea   : > { %v12740_v34 = vpack.c.bf16 %v4546_v37, %v4530_v8  ;;  %v9315_v30 = vor.u32 %v10235_v9, %v9314_v15  ;;  %v2772_v8 = vperm.slane %v12769_v23, 0  ;;  %v10197_v22 = vld [vmem:[%s11462_s29 + $0x424] sm:$0xf0] }
 0x6eb   : > { %6175 = vmatpush.bf16.msra.mxu2 %v8907_v27  ;;  %6189 = vmatpush.bf16.msra.mxu3 %v8971_v20  ;;  %v9203_v27 = vor.u32 %v10207_v42, %v9202_v16  ;;  %v9267_v20 = vor.u32 %v10223_v18, %v9266_v17  ;;  %v12742_v32 = vpop.f32.mrf.mxu0  ;;  %v9178_v16 = vld [vmem:[%s11462_s29 + $0x440] sm:$0xf]  ;;  %v10201_v18 = vld [vmem:[%s11462_s29 + $0x444] sm:$0xf0] }
 0x6ec   : > { %6203 = vmatpush.bf16.msra.mxu0 %v9035_v50  ;;  %6217 = vmatpush.bf16.msra.mxu1 %v9099_v33  ;;  %v10205_v50 = vld [vmem:[%s11462_s29 + $0x464] sm:$0xf0]  ;;  %v9258_v33 = vld [vmem:[%s11462_s29 + $0x4e0] sm:$0xf]  ;;  %v4311_v62 = vpop.f32.mrf.mxu2  ;;  %v9179_v37 = vor.u32 %v10201_v18, %v9178_v16  ;;  %v9163_v16 = vor.u32 %v10197_v22, %v9162_v5 }
 0x6ed   : > { %v9195_v63 = vor.u32 %v10205_v50, %v9194_v45  ;;  %v9259_v28 = vor.u32 %v10221_v46, %v9258_v33  ;;  %v9234_v45 = vld [vmem:[%s11462_s29 + $0x4b0] sm:$0xf]  ;;  %v10247_v33 = vld [vmem:[%s11462_s29 + $0x5b4] sm:$0xf0]  ;;  %v2773_v46 = vperm.slane %v12769_v23, 1  ;;  %v4312_v29 = vadd.f32 %v4311_v62, %v2772_v8 }
 0x6ee   : > { %v9362_v50 = vld [vmem:[%s11462_s29 + $0x5b0] sm:$0xf]  ;;  %v10229_v18 = vld [vmem:[%s11462_s29 + $0x524] sm:$0xf0]  ;;  %v9338_v5 = vld [vmem:[%s11462_s29 + $0x580] sm:$0xf] }
 0x6ef   : > { %6176 = vmatpush.bf16.msra.mxu2 %v8899_v25  ;;  %6190 = vmatpush.bf16.msra.mxu3 %v8963_v31  ;;  %v12747_v25 = vpack.c.bf16 %v4547_v0, %v4531_v3  ;;  %v9387_v31 = vor.u32 %v10253_v53, %v9386_v11  ;;  %v4325_v42 = vpop.f32.mrf.mxu3  ;;  %v4340_v47 = vadd.f32 %v12742_v32, %v2773_v46  ;;  %v2774_v32 = vperm.slane %v12769_v23, 2 }
 0x6f0   : > { %6204 = vmatpush.bf16.msra.mxu0 %v9027_v2  ;;  %6218 = vmatpush.bf16.msra.mxu1 %v9091_v4  ;;  %v10251_v2 = vld [vmem:[%s11462_s29 + $0x5d4] sm:$0xf0]  ;;  %v12757_v4 = vpop.f32.mrf.mxu1 }
 0x6f1   : > { %v9379_v17 = vor.u32 %v10251_v2, %v9378_v36  ;;  %v9226_v36 = vld [vmem:[%s11462_s29 + $0x4a0] sm:$0xf]  ;;  %v10213_v2 = vld [vmem:[%s11462_s29 + $0x4a4] sm:$0xf0] }
 0x6f2   : > { %v9227_v62 = vor.u32 %v10213_v2, %v9226_v36  ;;  %v9458_v36 = vld [vmem:[%s11462_s29 + $0x670] sm:$0xf]  ;;  %v10271_v2 = vld [vmem:[%s11462_s29 + $0x674] sm:$0xf0] }
 0x6f3   : > { %6177 = vmatpush.bf16.msra.mxu2 %v8891_v21  ;;  %6191 = vmatpush.bf16.msra.mxu3 %v8955_v35  ;;  %v9370_v21 = vld [vmem:[%s11462_s29 + $0x5c0] sm:$0xf]  ;;  %v10249_v35 = vld [vmem:[%s11462_s29 + $0x5c4] sm:$0xf0] }
 0x6f4   : > { %6205 = vmatpush.bf16.msra.mxu0 %v9019_v49  ;;  %6219 = vmatpush.bf16.msra.mxu1 %v9083_v60  ;;  %v9243_v49 = vor.u32 %v10217_v19, %v9242_v13  ;;  %v9306_v60 = vld [vmem:[%s11462_s29 + $0x540] sm:$0xf]  ;;  %v9371_v61 = vor.u32 %v10249_v35, %v9370_v21  ;;  %v9154_v13 = vld [vmem:[%s11462_s29 + $0x410] sm:$0xf]  ;;  %v12802_v19 = vadd.f32 %v12757_v4, %v4340_v47  ;;  %v10241_v47 = vld [vmem:[%s11462_s29 + $0x584] sm:$0xf0] }
 0x6f5   : > { %v12804_v21 = vadd.f32 %v4325_v42, %v4312_v29  ;;  %v10227_v42 = vld [vmem:[%s11462_s29 + $0x514] sm:$0xf0] }
 0x6f6   : > { %6178 = vmatmul.bf16.vlgmr.msra.gmra.mxu2 %v12738_v58  ;;  %6192 = vmatmul.bf16.vlgmr.msra.gmra.mxu3 %v12734_v52  ;;  %v12771_v0 = vpop.f32.mrf.mxu0 }
 0x6f7   : > { %6226 = vmatpush.bf16.msrb.mxu2 %v9203_v27  ;;  %6240 = vmatpush.bf16.msrb.mxu3 %v9267_v20  ;;  %v10233_v27 = vld [vmem:[%s11462_s29 + $0x544] sm:$0xf0]  ;;  %v9170_v20 = vld [vmem:[%s11462_s29 + $0x430] sm:$0xf] }
 0x6f8   : > { %6268 = vmatpush.bf16.msrb.mxu1 %v9395_v56  ;;  %6206 = vmatmul.bf16.vlgmr.msra.gmra.mxu0 %v12740_v34  ;;  %v10215_v56 = vld [vmem:[%s11462_s29 + $0x4b4] sm:$0xf0]  ;;  %v12783_v11 = vpop.f32.mrf.mxu1  ;;  %v9307_v53 = vor.u32 %v10233_v27, %v9306_v60  ;;  %v9171_v3 = vor.u32 %v10199_v44, %v9170_v20  ;;  %v4338_v60 = vadd.f32 %v12699_v43, %v2773_v46  ;;  %v9346_v20 = vld [vmem:[%s11462_s29 + $0x590] sm:$0xf]  ;;  %v10193_v46 = vld [vmem:[%s11462_s29 + $0x404] sm:$0xf0] }
 0x6f9   : > { %6220 = vmatmul.bf16.vlgmr.msra.gmra.mxu1 %v12747_v25  ;;  %6254 = vmatpush.bf16.msrb.mxu0 %v9331_v7  ;;  %v9235_v7 = vor.u32 %v10215_v56, %v9234_v45  ;;  %v4365_v1 = vpop.f32.mrf.mxu2  ;;  %v12789_v51 = vpop.f32.mrf.mxu3  ;;  %v4310_v44 = vadd.f32 %v12720_v39, %v2772_v8  ;;  %v9282_v45 = vld [vmem:[%s11462_s29 + $0x510] sm:$0xf]  ;;  %v9146_v56 = vld [vmem:[%s11462_s29 + $0x400] sm:$0xf]  ;;  %v4549_v39 = vmax.f32 %v12802_v19, 0.0  ;;  %v4548_v8 = vmax.f32 %v12804_v21, 0.0 }
 0x6fa   : > { %v4352_v29 = vadd.f32 %v12711_v12, %v4338_v60  ;;  %v10319_v12 = vld [vmem:[%s11462_s29 + $0x7f4] sm:$0xf0]  ;;  %v9339_v21 = vor.u32 %v10241_v47, %v9338_v5  ;;  %v9506_v5 = vld [vmem:[%s11462_s29 + $0x6d0] sm:$0xf]  ;;  %v10301_v47 = vld [vmem:[%s11462_s29 + $0x764] sm:$0xf0] }
 0x6fb   : > { %6227 = vmatpush.bf16.msrb.mxu2 %v9195_v63  ;;  %6241 = vmatpush.bf16.msrb.mxu3 %v9259_v28  ;;  %v9298_v63 = vld [vmem:[%s11462_s29 + $0x530] sm:$0xf]  ;;  %v10231_v28 = vld [vmem:[%s11462_s29 + $0x534] sm:$0xf0] }
 0x6fc   : > { %6269 = vmatpush.bf16.msrb.mxu1 %v9387_v31  ;;  %v9363_v31 = vor.u32 %v10247_v33, %v9362_v50  ;;  %v9299_v15 = vor.u32 %v10231_v28, %v9298_v63 }
 0x6fd   : > { %6255 = vmatpush.bf16.msrb.mxu0 %v9323_v41  ;;  %v9354_v41 = vld [vmem:[%s11462_s29 + $0x5a0] sm:$0xf] }
 0x6fe   : > { %v4395_v9 = vpop.f32.mrf.mxu0 }
 0x6ff   : > { %6228 = vmatpush.bf16.msrb.mxu2 %v9187_v59  ;;  %6242 = vmatpush.bf16.msrb.mxu3 %v9251_v14  ;;  %v10245_v59 = vld [vmem:[%s11462_s29 + $0x5a4] sm:$0xf0]  ;;  %v2775_v14 = vperm.slane %v12769_v23, 3 }
 0x700   : > { %6270 = vmatpush.bf16.msrb.mxu1 %v9379_v17  ;;  %v9290_v17 = vld [vmem:[%s11462_s29 + $0x520] sm:$0xf]  ;;  %v9355_v35 = vor.u32 %v10245_v59, %v9354_v41  ;;  %v4409_v63 = vpop.f32.mrf.mxu1  ;;  %v9522_v41 = vld [vmem:[%s11462_s29 + $0x6f0] sm:$0xf] }
 0x701   : > { %6256 = vmatpush.bf16.msrb.mxu0 %v9315_v30  ;;  %v10195_v30 = vld [vmem:[%s11462_s29 + $0x414] sm:$0xf0]  ;;  %v4396_v27 = vadd.f32 %v4395_v9, %v2775_v14  ;;  %v9291_v4 = vor.u32 %v10229_v18, %v9290_v17  ;;  %v4394_v50 = vadd.f32 %v12771_v0, %v2775_v14  ;;  %v4367_v28 = vpop.f32.mrf.mxu2  ;;  %v4381_v59 = vpop.f32.mrf.mxu3  ;;  %v9283_v14 = vor.u32 %v10227_v42, %v9282_v45  ;;  %v9274_v18 = vld [vmem:[%s11462_s29 + $0x500] sm:$0xf]  ;;  %v10317_v42 = vld [vmem:[%s11462_s29 + $0x7e4] sm:$0xf0] }
 0x702   : > { %v9155_v33 = vor.u32 %v10195_v30, %v9154_v13  ;;  %v4368_v22 = vadd.f32 %v4367_v28, %v2774_v32  ;;  %v10287_v9 = vld [vmem:[%s11462_s29 + $0x6f4] sm:$0xf0]  ;;  %v9450_v13 = vld [vmem:[%s11462_s29 + $0x660] sm:$0xf]  ;;  %v10269_v30 = vld [vmem:[%s11462_s29 + $0x664] sm:$0xf0] }
 0x703   : > { %6229 = vmatpush.bf16.msrb.mxu2 %v9179_v37  ;;  %6243 = vmatpush.bf16.msrb.mxu3 %v9243_v49  ;;  %v9218_v37 = vld [vmem:[%s11462_s29 + $0x490] sm:$0xf]  ;;  %v10211_v49 = vld [vmem:[%s11462_s29 + $0x494] sm:$0xf0] }
 0x704   : > { %6271 = vmatpush.bf16.msrb.mxu1 %v9371_v61  ;;  %v10243_v61 = vld [vmem:[%s11462_s29 + $0x594] sm:$0xf0]  ;;  %v9219_v43 = vor.u32 %v10211_v49, %v9218_v37  ;;  %v9514_v37 = vld [vmem:[%s11462_s29 + $0x6e0] sm:$0xf]  ;;  %v10285_v49 = vld [vmem:[%s11462_s29 + $0x6e4] sm:$0xf0] }
 0x705   : > { %6257 = vmatpush.bf16.msrb.mxu0 %v9307_v53  ;;  %v9210_v53 = vld [vmem:[%s11462_s29 + $0x480] sm:$0xf]  ;;  %v9347_v0 = vor.u32 %v10243_v61, %v9346_v20  ;;  %v9586_v61 = vld [vmem:[%s11462_s29 + $0x770] sm:$0xf] }
 0x707   : > { %6230 = vmatpush.bf16.msrb.mxu2 %v9171_v3  ;;  %6244 = vmatpush.bf16.msrb.mxu3 %v9235_v7  ;;  %v10209_v3 = vld [vmem:[%s11462_s29 + $0x484] sm:$0xf0]  ;;  %v4366_v7 = vadd.f32 %v4365_v1, %v2774_v32  ;;  %v4324_v1 = vadd.f32 %v12722_v24, %v4310_v44  ;;  %v4408_v32 = vadd.f32 %v12783_v11, %v4394_v50  ;;  %v4533_v11 = vmax.f32 %v4352_v29, 0.0  ;;  %v10303_v44 = vld [vmem:[%s11462_s29 + $0x774] sm:$0xf0] }
 0x708   : > { %6272 = vmatpush.bf16.msrb.mxu1 %v9363_v31  ;;  %v4410_v31 = vadd.f32 %v4409_v63, %v4396_v27  ;;  %v9211_v17 = vor.u32 %v10209_v3, %v9210_v53  ;;  %v10225_v24 = vld [vmem:[%s11462_s29 + $0x504] sm:$0xf0]  ;;  %v9523_v27 = vor.u32 %v10287_v9, %v9522_v41  ;;  %v9451_v53 = vor.u32 %v10269_v30, %v9450_v13  ;;  %v9498_v9 = vld [vmem:[%s11462_s29 + $0x6c0] sm:$0xf]  ;;  %v9426_v13 = vld [vmem:[%s11462_s29 + $0x630] sm:$0xf] }
 0x709   : > { %6258 = vmatpush.bf16.msrb.mxu0 %v9299_v15  ;;  %v9147_v15 = vor.u32 %v10193_v46, %v9146_v56  ;;  %v4380_v19 = vadd.f32 %v12789_v51, %v4366_v7  ;;  %v9642_v51 = vld [vmem:[%s11462_s29 + $0x7e0] sm:$0xf]  ;;  %v12844_v56 = vpack.c.bf16 %v4549_v39, %v4533_v11  ;;  %v4535_v50 = vmax.f32 %v4408_v32, 0.0  ;;  %v9442_v7 = vld [vmem:[%s11462_s29 + $0x650] sm:$0xf] }
 0x70a   : > { %v4551_v60 = vmax.f32 %v4410_v31, 0.0  ;;  %v9587_v3 = vor.u32 %v10303_v44, %v9586_v61  ;;  %v10267_v39 = vld [vmem:[%s11462_s29 + $0x654] sm:$0xf0]  ;;  %v9643_v28 = vor.u32 %v10317_v42, %v9642_v51  ;;  %v10281_v32 = vld [vmem:[%s11462_s29 + $0x6c4] sm:$0xf0] }
 0x70b   : > { %6231 = vmatpush.bf16.msrb.mxu2 %v9163_v16  ;;  %6245 = vmatpush.bf16.msrb.mxu3 %v9227_v62  ;;  %v9650_v16 = vld [vmem:[%s11462_s29 + $0x7f0] sm:$0xf]  ;;  %v4382_v62 = vadd.f32 %v4381_v59, %v4368_v22  ;;  %v4534_v46 = vmax.f32 %v4380_v19, 0.0  ;;  %v10283_v31 = vld [vmem:[%s11462_s29 + $0x6d4] sm:$0xf0] }
 0x70c   : > { %6273 = vmatpush.bf16.msrb.mxu1 %v9355_v35  ;;  %v9459_v35 = vor.u32 %v10271_v2, %v9458_v36  ;;  %v9651_v20 = vor.u32 %v10319_v12, %v9650_v16  ;;  %v12850_v63 = vpack.c.bf16 %v4551_v60, %v4535_v50  ;;  %v9634_v22 = vld [vmem:[%s11462_s29 + $0x7d0] sm:$0xf]  ;;  %v10315_v36 = vld [vmem:[%s11462_s29 + $0x7d4] sm:$0xf0]  ;;  %v9443_v2 = vor.u32 %v10267_v39, %v9442_v7  ;;  %v10265_v59 = vld [vmem:[%s11462_s29 + $0x644] sm:$0xf0] }
 0x70d   : > { %6259 = vmatpush.bf16.msrb.mxu0 %v9291_v4  ;;  %v4532_v4 = vmax.f32 %v4324_v1, 0.0  ;;  %v4550_v45 = vmax.f32 %v4382_v62, 0.0  ;;  %v9434_v1 = vld [vmem:[%s11462_s29 + $0x640] sm:$0xf]  ;;  %v9570_v16 = vld [vmem:[%s11462_s29 + $0x750] sm:$0xf] }
 0x70e   : > { %v10299_v12 = vld [vmem:[%s11462_s29 + $0x754] sm:$0xf0]  ;;  %v9626_v62 = vld [vmem:[%s11462_s29 + $0x7c0] sm:$0xf]  ;;  %v10297_v11 = vld [vmem:[%s11462_s29 + $0x744] sm:$0xf0] }
 0x70f   : > { %6232 = vmatpush.bf16.msrb.mxu2 %v9155_v33  ;;  %6246 = vmatpush.bf16.msrb.mxu3 %v9219_v43  ;;  %v9275_v33 = vor.u32 %v10225_v24, %v9274_v18  ;;  %v12846_v43 = vpack.c.bf16 %v4548_v8, %v4532_v4  ;;  %v9578_v8 = vld [vmem:[%s11462_s29 + $0x760] sm:$0xf]  ;;  %v12855_v29 = vpack.c.bf16 %v4550_v45, %v4534_v46  ;;  %v10263_v19 = vld [vmem:[%s11462_s29 + $0x634] sm:$0xf0]  ;;  %v10261_v51 = vld [vmem:[%s11462_s29 + $0x624] sm:$0xf0] }
 0x710   : > { %6274 = vmatpush.bf16.msrb.mxu1 %v9347_v0  ;;  %v9515_v0 = vor.u32 %v10285_v49, %v9514_v37  ;;  %v9579_v41 = vor.u32 %v10301_v47, %v9578_v8  ;;  %v9435_v18 = vor.u32 %v10265_v59, %v9434_v1  ;;  %v9571_v24 = vor.u32 %v10299_v12, %v9570_v16  ;;  %v9490_v37 = vld [vmem:[%s11462_s29 + $0x6b0] sm:$0xf]  ;;  %v9562_v49 = vld [vmem:[%s11462_s29 + $0x740] sm:$0xf]  ;;  %v10279_v60 = vld [vmem:[%s11462_s29 + $0x6b4] sm:$0xf0] }
 0x711   : > { %6260 = vmatpush.bf16.msrb.mxu0 %v9283_v14  ;;  %v9507_v14 = vor.u32 %v10283_v31, %v9506_v5  ;;  %v9427_v44 = vor.u32 %v10263_v19, %v9426_v13  ;;  %v9563_v4 = vor.u32 %v10297_v11, %v9562_v49  ;;  %v9418_v45 = vld [vmem:[%s11462_s29 + $0x620] sm:$0xf]  ;;  %v9491_v42 = vor.u32 %v10279_v60, %v9490_v37  ;;  %v9554_v46 = vld [vmem:[%s11462_s29 + $0x730] sm:$0xf]  ;;  %v10277_v39 = vld [vmem:[%s11462_s29 + $0x6a4] sm:$0xf0] }
 0x712   : > { %v2776_v5 = vperm.slane %v12769_v23, 4  ;;  %v2777_v8 = vperm.slane %v12769_v23, 5  ;;  %v9419_v47 = vor.u32 %v10261_v51, %v9418_v45  ;;  %v9474_v59 = vld [vmem:[%s11462_s29 + $0x690] sm:$0xf]  ;;  %v10275_v16 = vld [vmem:[%s11462_s29 + $0x694] sm:$0xf0] }
 0x713   : > { %6233 = vmatpush.bf16.msrb.mxu2 %v9147_v15  ;;  %6247 = vmatpush.bf16.msrb.mxu3 %v9211_v17  ;;  %v9635_v15 = vor.u32 %v10315_v36, %v9634_v22  ;;  %v10313_v17 = vld [vmem:[%s11462_s29 + $0x7c4] sm:$0xf0]  ;;  %v9410_v22 = vld [vmem:[%s11462_s29 + $0x610] sm:$0xf]  ;;  %v10259_v36 = vld [vmem:[%s11462_s29 + $0x614] sm:$0xf0]  ;;  %v9475_v37 = vor.u32 %v10275_v16, %v9474_v59 }
 0x714   : > { %6275 = vmatpush.bf16.msrb.mxu1 %v9339_v21  ;;  %v9627_v30 = vor.u32 %v10313_v17, %v9626_v62  ;;  %v9602_v12 = vld [vmem:[%s11462_s29 + $0x790] sm:$0xf]  ;;  %v9402_v13 = vld [vmem:[%s11462_s29 + $0x600] sm:$0xf]  ;;  %v10257_v19 = vld [vmem:[%s11462_s29 + $0x604] sm:$0xf0] }
 0x715   : > { %6261 = vmatpush.bf16.msrb.mxu0 %v9275_v33  ;;  %v9482_v33 = vld [vmem:[%s11462_s29 + $0x6a0] sm:$0xf]  ;;  %v10273_v11 = vld [vmem:[%s11462_s29 + $0x684] sm:$0xf0]  ;;  %v10291_v60 = vld [vmem:[%s11462_s29 + $0x714] sm:$0xf0] }
 0x716   : > { %6234 = vmatmul.bf16.vlgmr.msrb.gmra.mxu2 %v12846_v43  ;;  %6248 = vmatmul.bf16.vlgmr.msrb.gmra.mxu3 %v12844_v56  ;;  %v4449_v21 = vpop.f32.mrf.mxu0  ;;  %v12880_v61 = vpop.f32.mrf.mxu1  ;;  %v10078_v45 = vld [vmem:[%s11462_s29 + $0x74] sm:$0xf] }
 0x717   : > { %6282 = vmatpush.bf16.msra.mxu2 %v9459_v35  ;;  %6296 = vmatpush.bf16.msra.mxu3 %v9523_v27  ;;  %v9499_v35 = vor.u32 %v10281_v32, %v9498_v9  ;;  %v9618_v27 = vld [vmem:[%s11462_s29 + $0x7b0] sm:$0xf]  ;;  %v10307_v32 = vld [vmem:[%s11462_s29 + $0x794] sm:$0xf0]  ;;  %v4450_v17 = vadd.f32 %v4449_v21, %v2777_v8  ;;  %v10110_v59 = vld [vmem:[%s11462_s29 + $0x174] sm:$0xf] }
 0x718   : > { %6324 = vmatpush.bf16.msra.mxu1 %v9651_v20  ;;  %6262 = vmatmul.bf16.vlgmr.msrb.gmra.mxu0 %v12855_v29  ;;  %v10311_v20 = vld [vmem:[%s11462_s29 + $0x7b4] sm:$0xf0]  ;;  %v9603_v49 = vor.u32 %v10307_v32, %v9602_v12  ;;  %v9538_v21 = vld [vmem:[%s11462_s29 + $0x710] sm:$0xf]  ;;  %v10092_v12 = vld [vmem:[%s11462_s29 + $0xe4] sm:$0xf] }
 0x719   : > { %6276 = vmatmul.bf16.vlgmr.msrb.gmra.mxu1 %v12850_v63  ;;  %6310 = vmatpush.bf16.msra.mxu0 %v9587_v3  ;;  %v9619_v50 = vor.u32 %v10311_v20, %v9618_v27  ;;  %v4421_v3 = vpop.f32.mrf.mxu2  ;;  %v4435_v7 = vpop.f32.mrf.mxu3  ;;  %v8748_v32 = vld [vmem:[%s11462_s29 + $0xe8] sm:$0xf0] }
 0x71a   : > { %v4422_v62 = vadd.f32 %v4421_v3, %v2776_v5 }
 0x71b   : > { %6283 = vmatpush.bf16.msra.mxu2 %v9451_v53  ;;  %6297 = vmatpush.bf16.msra.mxu3 %v9515_v0  ;;  %v10295_v53 = vld [vmem:[%s11462_s29 + $0x734] sm:$0xf0]  ;;  %v9610_v0 = vld [vmem:[%s11462_s29 + $0x7a0] sm:$0xf] }
 0x71c   : > { %6325 = vmatpush.bf16.msra.mxu1 %v9643_v28  ;;  %v10309_v28 = vld [vmem:[%s11462_s29 + $0x7a4] sm:$0xf0]  ;;  %v9555_v31 = vor.u32 %v10295_v53, %v9554_v46  ;;  %v4436_v51 = vadd.f32 %v4435_v7, %v4422_v62  ;;  %v8756_v46 = vld [vmem:[%s11462_s29 + $0xf8] sm:$0xf0]  ;;  %v4464_v53 = vadd.f32 %v12880_v61, %v4450_v17  ;;  %v10076_v61 = vld [vmem:[%s11462_s29 + $0x64] sm:$0xf] }
 0x71d   : > { %6311 = vmatpush.bf16.msra.mxu0 %v9579_v41  ;;  %v9483_v41 = vor.u32 %v10277_v39, %v9482_v33  ;;  %v9611_v1 = vor.u32 %v10309_v28, %v9610_v0  ;;  %v10094_v33 = vld [vmem:[%s11462_s29 + $0xf4] sm:$0xf]  ;;  %v9403_v39 = vor.u32 %v10257_v19, %v9402_v13  ;;  %v9539_v0 = vor.u32 %v10291_v60, %v9538_v21  ;;  %v8812_v21 = vld [vmem:[%s11462_s29 + $0x168] sm:$0xf0] }
 0x71e   : > { %v10126_v28 = vld [vmem:[%s11462_s29 + $0x1f4] sm:$0xf]  ;;  %v4537_v62 = vmax.f32 %v4464_v53, 0.0  ;;  %v8804_v53 = vld [vmem:[%s11462_s29 + $0x158] sm:$0xf0] }
 0x71f   : > { %6284 = vmatpush.bf16.msra.mxu2 %v9443_v2  ;;  %6298 = vmatpush.bf16.msra.mxu3 %v9507_v14  ;;  %v4451_v2 = vpop.f32.mrf.mxu0  ;;  %v9546_v14 = vld [vmem:[%s11462_s29 + $0x720] sm:$0xf] }
 0x720   : > { %6326 = vmatpush.bf16.msra.mxu1 %v9635_v15  ;;  %v10293_v15 = vld [vmem:[%s11462_s29 + $0x724] sm:$0xf0]  ;;  %v4452_v9 = vadd.f32 %v4451_v2, %v2777_v8  ;;  %v8884_v8 = vld [vmem:[%s11462_s29 + $0x1f8] sm:$0xf0] }
 0x721   : > { %6312 = vmatpush.bf16.msra.mxu0 %v9571_v24  ;;  %v9547_v24 = vor.u32 %v10293_v15, %v9546_v14  ;;  %v4423_v20 = vpop.f32.mrf.mxu2  ;;  %v4437_v3 = vpop.f32.mrf.mxu3  ;;  %v8820_v14 = vld [vmem:[%s11462_s29 + $0x178] sm:$0xf0]  ;;  %v4536_v15 = vmax.f32 %v4436_v51, 0.0  ;;  %v8887_v16 = vor.u32 %v10126_v28, %v8884_v8  ;;  %v8732_v28 = vld [vmem:[%s11462_s29 + $0xc8] sm:$0xf0] }
 0x722   : > { %v8823_v19 = vor.u32 %v10110_v59, %v8820_v14  ;;  %v10120_v8 = vld [vmem:[%s11462_s29 + $0x1c4] sm:$0xf]  ;;  %v8660_v59 = vld [vmem:[%s11462_s29 + $0x38] sm:$0xf0]  ;;  %v10086_v14 = vld [vmem:[%s11462_s29 + $0xb4] sm:$0xf] }
 0x723   : > { %6285 = vmatpush.bf16.msra.mxu2 %v9435_v18  ;;  %6299 = vmatpush.bf16.msra.mxu3 %v9499_v35  ;;  %v9411_v18 = vor.u32 %v10259_v36, %v9410_v22  ;;  %v9466_v35 = vld [vmem:[%s11462_s29 + $0x680] sm:$0xf]  ;;  %v10289_v22 = vld [vmem:[%s11462_s29 + $0x704] sm:$0xf0]  ;;  %v8684_v36 = vld [vmem:[%s11462_s29 + $0x68] sm:$0xf0] }
 0x724   : > { %6327 = vmatpush.bf16.msra.mxu1 %v9627_v30  ;;  %v4465_v30 = vpop.f32.mrf.mxu1 }
 0x725   : > { %6313 = vmatpush.bf16.msra.mxu0 %v9563_v4  ;;  %v4466_v27 = vadd.f32 %v4465_v30, %v4452_v9  ;;  %v10305_v4 = vld [vmem:[%s11462_s29 + $0x784] sm:$0xf0]  ;;  %v8687_v30 = vor.u32 %v10076_v61, %v8684_v36  ;;  %v10104_v61 = vld [vmem:[%s11462_s29 + $0x144] sm:$0xf]  ;;  %v8796_v36 = vld [vmem:[%s11462_s29 + $0x148] sm:$0xf0] }
 0x727   : > { %6286 = vmatpush.bf16.msra.mxu2 %v9427_v44  ;;  %6300 = vmatpush.bf16.msra.mxu3 %v9491_v42  ;;  %v9594_v44 = vld [vmem:[%s11462_s29 + $0x780] sm:$0xf]  ;;  %v4424_v42 = vadd.f32 %v4423_v20, %v2776_v5  ;;  %v9467_v5 = vor.u32 %v10273_v11, %v9466_v35  ;;  %v4553_v2 = vmax.f32 %v4466_v27, 0.0  ;;  %v10108_v11 = vld [vmem:[%s11462_s29 + $0x164] sm:$0xf] }
 0x728   : > { %6328 = vmatpush.bf16.msra.mxu1 %v9619_v50  ;;  %v8692_v50 = vld [vmem:[%s11462_s29 + $0x78] sm:$0xf0]  ;;  %v10090_v20 = vld [vmem:[%s11462_s29 + $0xd4] sm:$0xf]  ;;  %v8815_v51 = vor.u32 %v10108_v11, %v8812_v21  ;;  %v8716_v11 = vld [vmem:[%s11462_s29 + $0xa8] sm:$0xf0] }
 0x729   : > { %6314 = vmatpush.bf16.msra.mxu0 %v9555_v31  ;;  %v4438_v7 = vadd.f32 %v4437_v3, %v4424_v42  ;;  %v9595_v31 = vor.u32 %v10305_v4, %v9594_v44  ;;  %v12927_v35 = vpack.c.bf16 %v4553_v2, %v4537_v62  ;;  %v8676_v27 = vld [vmem:[%s11462_s29 + $0x58] sm:$0xf0]  ;;  %v10122_v4 = vld [vmem:[%s11462_s29 + $0x1d4] sm:$0xf] }
 0x72a   : > { %v8740_v44 = vld [vmem:[%s11462_s29 + $0xd8] sm:$0xf0] }
 0x72b   : > { %6287 = vmatpush.bf16.msra.mxu2 %v9419_v47  ;;  %6301 = vmatpush.bf16.msra.mxu3 %v9483_v41  ;;  %v9530_v47 = vld [vmem:[%s11462_s29 + $0x700] sm:$0xf]  ;;  %v8695_v41 = vor.u32 %v10078_v45, %v8692_v50  ;;  %v4552_v9 = vmax.f32 %v4438_v7, 0.0  ;;  %v8868_v45 = vld [vmem:[%s11462_s29 + $0x1d8] sm:$0xf0]  ;;  %v8743_v50 = vor.u32 %v10090_v20, %v8740_v44 }
 0x72c   : > { %6329 = vmatpush.bf16.msra.mxu1 %v9611_v1  ;;  %v8759_v1 = vor.u32 %v10094_v33, %v8756_v46  ;;  %v9531_v17 = vor.u32 %v10289_v22, %v9530_v47  ;;  %v10072_v33 = vld [vmem:[%s11462_s29 + $0x44] sm:$0xf]  ;;  %v10106_v46 = vld [vmem:[%s11462_s29 + $0x154] sm:$0xf]  ;;  %v8871_v3 = vor.u32 %v10122_v4, %v8868_v45  ;;  %v8860_v47 = vld [vmem:[%s11462_s29 + $0x1c8] sm:$0xf0] }
 0x72d   : > { %6315 = vmatpush.bf16.msra.mxu0 %v9547_v24  ;;  %v8876_v24 = vld [vmem:[%s11462_s29 + $0x1e8] sm:$0xf0]  ;;  %v12925_v13 = vpack.c.bf16 %v4552_v9, %v4536_v15  ;;  %v8807_v7 = vor.u32 %v10106_v46, %v8804_v53  ;;  %v10070_v22 = vld [vmem:[%s11462_s29 + $0x34] sm:$0xf]  ;;  %v8724_v15 = vld [vmem:[%s11462_s29 + $0xb8] sm:$0xf0] }
 0x72e   : > { %v2779_v9 = vperm.slane %v12769_v23, 7  ;;  %v8663_v62 = vor.u32 %v10070_v22, %v8660_v59  ;;  %v10116_v20 = vld [vmem:[%s11462_s29 + $0x1a4] sm:$0xf]  ;;  %v8844_v44 = vld [vmem:[%s11462_s29 + $0x1a8] sm:$0xf0]  ;;  %v2778_v4 = vperm.slane %v12769_v23, 6 }
 0x72f   : > { %6288 = vmatpush.bf16.msra.mxu2 %v9411_v18  ;;  %6302 = vmatpush.bf16.msra.mxu3 %v9475_v37  ;;  %v10124_v18 = vld [vmem:[%s11462_s29 + $0x1e4] sm:$0xf]  ;;  %v8751_v37 = vor.u32 %v10092_v12, %v8748_v32  ;;  %v8852_v12 = vld [vmem:[%s11462_s29 + $0x1b8] sm:$0xf0]  ;;  %v8799_v32 = vor.u32 %v10104_v61, %v8796_v36  ;;  %v8780_v46 = vld [vmem:[%s11462_s29 + $0x128] sm:$0xf0] }
 0x730   : > { %6330 = vmatpush.bf16.msra.mxu1 %v9603_v49  ;;  %v10074_v49 = vld [vmem:[%s11462_s29 + $0x54] sm:$0xf]  ;;  %v8879_v60 = vor.u32 %v10124_v18, %v8876_v24  ;;  %v10068_v18 = vld [vmem:[%s11462_s29 + $0x24] sm:$0xf]  ;;  %v8708_v23 = vld [vmem:[%s11462_s29 + $0x98] sm:$0xf0] }
 0x731   : > { %6316 = vmatpush.bf16.msra.mxu0 %v9539_v0  ;;  %v8679_v42 = vor.u32 %v10074_v49, %v8676_v27  ;;  %v10088_v0 = vld [vmem:[%s11462_s29 + $0xc4] sm:$0xf]  ;;  %v10102_v24 = vld [vmem:[%s11462_s29 + $0x134] sm:$0xf]  ;;  %v8636_v36 = vld [vmem:[%s11462_s29 + $0x8] sm:$0xf0] }
 0x732   : > { %v10084_v49 = vld [vmem:[%s11462_s29 + $0xa4] sm:$0xf] }
 0x733   : > { %6289 = vmatpush.bf16.msra.mxu2 %v9403_v39  ;;  %6303 = vmatpush.bf16.msra.mxu3 %v9467_v5  ;;  %v8668_v39 = vld [vmem:[%s11462_s29 + $0x48] sm:$0xf0]  ;;  %v10064_v61 = vld [vmem:[%s11462_s29 + $0x4] sm:$0xf] }
 0x734   : > { %6331 = vmatpush.bf16.msra.mxu1 %v9595_v31  ;;  %v8671_v5 = vor.u32 %v10072_v33, %v8668_v39  ;;  %v8735_v31 = vor.u32 %v10088_v0, %v8732_v28  ;;  %v10100_v33 = vld [vmem:[%s11462_s29 + $0x124] sm:$0xf]  ;;  %v8644_v39 = vld [vmem:[%s11462_s29 + $0x18] sm:$0xf0]  ;;  %v10082_v0 = vld [vmem:[%s11462_s29 + $0x94] sm:$0xf] }
 0x735   : > { %6317 = vmatpush.bf16.msra.mxu0 %v9531_v17  ;;  %v8727_v17 = vor.u32 %v10086_v14, %v8724_v15  ;;  %v8783_v22 = vor.u32 %v10100_v33, %v8780_v46  ;;  %v8711_v59 = vor.u32 %v10082_v0, %v8708_v23  ;;  %v8700_v14 = vld [vmem:[%s11462_s29 + $0x88] sm:$0xf0]  ;;  %v10098_v15 = vld [vmem:[%s11462_s29 + $0x114] sm:$0xf]  ;;  %v10096_v33 = vld [vmem:[%s11462_s29 + $0x104] sm:$0xf] }
 0x736   : > { %6290 = vmatmul.bf16.vlgmr.msra.gmra.mxu2 %v12925_v13  ;;  %6304 = vmatmul.bf16.vlgmr.msra.gmra.mxu3 %v12927_v35  ;;  %v4505_v2 = vpop.f32.mrf.mxu0  ;;  %v8764_v46 = vld [vmem:[%s11462_s29 + $0x108] sm:$0xf0]  ;;  %v10156_v23 = vld [vmem:[%s11462_s29 + $0x2e4] sm:$0xf] }
 0x737   : > { %6338 = vmatpush.bf16.msrb.mxu2 %v8695_v41  ;;  %6352 = vmatpush.bf16.msrb.mxu3 %v8759_v1  ;;  %v4519_v41 = vpop.f32.mrf.mxu1  ;;  %v8863_v1 = vor.u32 %v10120_v8, %v8860_v47  ;;  %v4506_v21 = vadd.f32 %v4505_v2, %v2779_v9  ;;  %v10114_v47 = vld [vmem:[%s11462_s29 + $0x194] sm:$0xf]  ;;  %v10080_v2 = vld [vmem:[%s11462_s29 + $0x84] sm:$0xf]  ;;  %v8940_v0 = vld [vmem:[%s11462_s29 + $0x268] sm:$0xf0] }
 0x738   : > { %6380 = vmatpush.bf16.msrb.mxu1 %v8887_v16  ;;  %v10118_v16 = vld [vmem:[%s11462_s29 + $0x1b4] sm:$0xf] }
 0x739   : > { %6366 = vmatpush.bf16.msrb.mxu0 %v8823_v19  ;;  %v8788_v19 = vld [vmem:[%s11462_s29 + $0x138] sm:$0xf0]  ;;  %v4491_v27 = vpop.f32.mrf.mxu3  ;;  %v4520_v28 = vadd.f32 %v4519_v41, %v4506_v21 }
 0x73a   : > { %v8791_v45 = vor.u32 %v10102_v24, %v8788_v19  ;;  %v8948_v19 = vld [vmem:[%s11462_s29 + $0x278] sm:$0xf0] }
 0x73b   : > { %6339 = vmatpush.bf16.msrb.mxu2 %v8687_v30  ;;  %6353 = vmatpush.bf16.msrb.mxu3 %v8751_v37  ;;  %v8855_v30 = vor.u32 %v10118_v16, %v8852_v12  ;;  %v8652_v37 = vld [vmem:[%s11462_s29 + $0x28] sm:$0xf0]  ;;  %v10112_v12 = vld [vmem:[%s11462_s29 + $0x184] sm:$0xf]  ;;  %v9012_v21 = vld [vmem:[%s11462_s29 + $0x2f8] sm:$0xf0] }
 0x73c   : > { %6381 = vmatpush.bf16.msrb.mxu1 %v8879_v60  ;;  %v4477_v60 = vpop.f32.mrf.mxu2 }
 0x73d   : > { %6367 = vmatpush.bf16.msrb.mxu0 %v8815_v51  ;;  %v8655_v51 = vor.u32 %v10068_v18, %v8652_v37 }
 0x73e   : > { %v4507_v53 = vpop.f32.mrf.mxu0 }
 0x73f   : > { %6340 = vmatpush.bf16.msrb.mxu2 %v8679_v42  ;;  %6354 = vmatpush.bf16.msrb.mxu3 %v8743_v50  ;;  %v8719_v42 = vor.u32 %v10084_v49, %v8716_v11  ;;  %v10066_v50 = vld [vmem:[%s11462_s29 + $0x14] sm:$0xf]  ;;  %v4508_v8 = vadd.f32 %v4507_v53, %v2779_v9  ;;  %v8772_v9 = vld [vmem:[%s11462_s29 + $0x118] sm:$0xf0]  ;;  %v10140_v53 = vld [vmem:[%s11462_s29 + $0x264] sm:$0xf] }
 0x740   : > { %6382 = vmatpush.bf16.msrb.mxu1 %v8871_v3  ;;  %v8847_v3 = vor.u32 %v10116_v20, %v8844_v44  ;;  %v8647_v41 = vor.u32 %v10066_v50, %v8644_v39  ;;  %v8775_v11 = vor.u32 %v10098_v15, %v8772_v9  ;;  %v9140_v20 = vld [vmem:[%s11462_s29 + $0x3f8] sm:$0xf0]  ;;  %v10154_v15 = vld [vmem:[%s11462_s29 + $0x2d4] sm:$0xf] }
 0x741   : > { %6368 = vmatpush.bf16.msrb.mxu0 %v8807_v7  ;;  %v8836_v7 = vld [vmem:[%s11462_s29 + $0x198] sm:$0xf0] }
 0x742   : > { %v8839_v16 = vor.u32 %v10114_v47, %v8836_v7  ;;  %v10188_v7 = vld [vmem:[%s11462_s29 + $0x3e4] sm:$0xf] }
 0x743   : > { %6341 = vmatpush.bf16.msrb.mxu2 %v8671_v5  ;;  %6355 = vmatpush.bf16.msrb.mxu3 %v8735_v31  ;;  %v4478_v5 = vadd.f32 %v4477_v60, %v2778_v4  ;;  %v4521_v31 = vpop.f32.mrf.mxu1  ;;  %v10190_v60 = vld [vmem:[%s11462_s29 + $0x3f4] sm:$0xf] }
 0x744   : > { %6383 = vmatpush.bf16.msrb.mxu1 %v8863_v1  ;;  %v4522_v1 = vadd.f32 %v4521_v31, %v4508_v8  ;;  %v4479_v24 = vpop.f32.mrf.mxu2  ;;  %v9143_v39 = vor.u32 %v10190_v60, %v9140_v20  ;;  %v8767_v31 = vor.u32 %v10096_v33, %v8764_v46  ;;  %v10170_v60 = vld [vmem:[%s11462_s29 + $0x354] sm:$0xf]  ;;  %v9060_v20 = vld [vmem:[%s11462_s29 + $0x358] sm:$0xf0]  ;;  %v13026_v33 = vld [vmem:[%s901_s3] sm:$0x3] }
 0x745   : > { %6369 = vmatpush.bf16.msrb.mxu0 %v8799_v32  ;;  %v8828_v32 = vld [vmem:[%s11462_s29 + $0x188] sm:$0xf0]  ;;  %v4492_v37 = vadd.f32 %v4491_v27, %v4478_v5  ;;  %v4480_v49 = vadd.f32 %v4479_v24, %v2778_v4  ;;  %v10136_v24 = vld [vmem:[%s11462_s29 + $0x244] sm:$0xf]  ;;  %v9063_v46 = vor.u32 %v10170_v60, %v9060_v20 }
 0x746   : > { %v4555_v18 = vmax.f32 %v4522_v1, 0.0  ;;  %v8831_v4 = vor.u32 %v10112_v12, %v8828_v32  ;;  %v9132_v5 = vld [vmem:[%s11462_s29 + $0x3e8] sm:$0xf0]  ;;  %v10186_v12 = vld [vmem:[%s11462_s29 + $0x3d4] sm:$0xf] }
 0x747   : > { %6342 = vmatpush.bf16.msrb.mxu2 %v8663_v62  ;;  %6356 = vmatpush.bf16.msrb.mxu3 %v8727_v17  ;;  %v10142_v62 = vld [vmem:[%s11462_s29 + $0x274] sm:$0xf]  ;;  %v4539_v17 = vmax.f32 %v4520_v28, 0.0  ;;  %v9004_v28 = vld [vmem:[%s11462_s29 + $0x2e8] sm:$0xf0]  ;;  %v4538_v8 = vmax.f32 %v4492_v37, 0.0 }
 0x748   : > { %6384 = vmatpush.bf16.msrb.mxu1 %v8855_v30  ;;  %v10158_v30 = vld [vmem:[%s11462_s29 + $0x2f4] sm:$0xf]  ;;  %v8951_v50 = vor.u32 %v10142_v62, %v8948_v19  ;;  %v9007_v1 = vor.u32 %v10156_v23, %v9004_v28  ;;  %v9124_v32 = vld [vmem:[%s11462_s29 + $0x3d8] sm:$0xf0]  ;;  %v10172_v62 = vld [vmem:[%s11462_s29 + $0x364] sm:$0xf] }
 0x749   : > { %6370 = vmatpush.bf16.msrb.mxu0 %v8791_v45  ;;  %v12987_v44 = vpack.c.bf16 %v4555_v18, %v4539_v17  ;;  %v4493_v45 = vpop.f32.mrf.mxu3  ;;  %v9068_v17 = vld [vmem:[%s11462_s29 + $0x368] sm:$0xf0]  ;;  %v9127_v18 = vor.u32 %v10186_v12, %v9124_v32 }
 0x74a   : > { %v4494_v27 = vadd.f32 %v4493_v45, %v4480_v49  ;;  %v8924_v19 = vld [vmem:[%s11462_s29 + $0x248] sm:$0xf0]  ;;  %v9071_v37 = vor.u32 %v10172_v62, %v9068_v17  ;;  %v10130_v17 = vld [vmem:[%s11462_s29 + $0x214] sm:$0xf] }
 0x74b   : > { %6343 = vmatpush.bf16.msrb.mxu2 %v8655_v51  ;;  %6357 = vmatpush.bf16.msrb.mxu3 %v8719_v42  ;;  %v8639_v51 = vor.u32 %v10064_v61, %v8636_v36  ;;  %v8703_v42 = vor.u32 %v10080_v2, %v8700_v14  ;;  %v9076_v61 = vld [vmem:[%s11462_s29 + $0x378] sm:$0xf0]  ;;  %v8943_v2 = vor.u32 %v10140_v53, %v8940_v0  ;;  %v8988_v49 = vld [vmem:[%s11462_s29 + $0x2c8] sm:$0xf0]  ;;  %v10168_v0 = vld [vmem:[%s11462_s29 + $0x344] sm:$0xf] }
 0x74c   : > { %6385 = vmatpush.bf16.msrb.mxu1 %v8847_v3  ;;  %v9015_v3 = vor.u32 %v10158_v30, %v9012_v21  ;;  %v4554_v47 = vmax.f32 %v4494_v27, 0.0  ;;  %v8932_v14 = vld [vmem:[%s11462_s29 + $0x258] sm:$0xf0]  ;;  %v10152_v30 = vld [vmem:[%s11462_s29 + $0x2c4] sm:$0xf]  ;;  %v8927_v45 = vor.u32 %v10136_v24, %v8924_v19 }
 0x74d   : > { %6371 = vmatpush.bf16.msrb.mxu0 %v8783_v22  ;;  %6332 = vmatmul.bf16.vlgmr.msra.gmra.mxu1 %v12987_v44  ;;  %v10174_v22 = vld [vmem:[%s11462_s29 + $0x374] sm:$0xf]  ;;  %v9116_v21 = vld [vmem:[%s11462_s29 + $0x3c8] sm:$0xf0]  ;;  %v8980_v53 = vld [vmem:[%s11462_s29 + $0x2b8] sm:$0xf0] }
 0x74e   : > { %v13000_v36 = vpack.c.bf16 %v4554_v47, %v4538_v8  ;;  %v9079_v9 = vor.u32 %v10174_v22, %v9076_v61  ;;  %v9052_v23 = vld [vmem:[%s11462_s29 + $0x348] sm:$0xf0]  ;;  %v4830_v8 = vperm.slane %v13026_v33, 0  ;;  %v10148_v22 = vld [vmem:[%s11462_s29 + $0x2a4] sm:$0xf] }
 0x74f   : > { %6344 = vmatpush.bf16.msrb.mxu2 %v8647_v41  ;;  %6358 = vmatpush.bf16.msrb.mxu3 %v8711_v59  ;;  %v9135_v41 = vor.u32 %v10188_v7, %v9132_v5  ;;  %v10138_v59 = vld [vmem:[%s11462_s29 + $0x254] sm:$0xf]  ;;  %v10132_v5 = vld [vmem:[%s11462_s29 + $0x224] sm:$0xf]  ;;  %v9055_v61 = vor.u32 %v10168_v0, %v9052_v23  ;;  %v8964_v19 = vld [vmem:[%s11462_s29 + $0x298] sm:$0xf0] }
 0x750   : > { %6386 = vmatpush.bf16.msrb.mxu1 %v8839_v16  ;;  %v8996_v16 = vld [vmem:[%s11462_s29 + $0x2d8] sm:$0xf0]  ;;  %6318 = vmatmul.bf16.vlgmr.msra.gmra.mxu0 %v13000_v36 }
 0x751   : > { %6372 = vmatpush.bf16.msrb.mxu0 %v8775_v11  ;;  %v10184_v11 = vld [vmem:[%s11462_s29 + $0x3c4] sm:$0xf] }
 0x752   : > { %v9119_v27 = vor.u32 %v10184_v11, %v9116_v21  ;;  %v10164_v11 = vld [vmem:[%s11462_s29 + $0x324] sm:$0xf]  ;;  %v9036_v21 = vld [vmem:[%s11462_s29 + $0x328] sm:$0xf0] }
 0x753   : > { %6345 = vmatpush.bf16.msrb.mxu2 %v8639_v51  ;;  %6359 = vmatpush.bf16.msrb.mxu3 %v8703_v42  ;;  %v10134_v51 = vld [vmem:[%s11462_s29 + $0x234] sm:$0xf]  ;;  %v8991_v42 = vor.u32 %v10152_v30, %v8988_v49 }
 0x754   : > { %6387 = vmatpush.bf16.msrb.mxu1 %v8831_v4  ;;  %v8916_v4 = vld [vmem:[%s11462_s29 + $0x238] sm:$0xf0]  ;;  %v10178_v30 = vld [vmem:[%s11462_s29 + $0x394] sm:$0xf] }
 0x755   : > { %6373 = vmatpush.bf16.msrb.mxu0 %v8767_v31  ;;  %v8919_v28 = vor.u32 %v10134_v51, %v8916_v4  ;;  %v8908_v31 = vld [vmem:[%s11462_s29 + $0x228] sm:$0xf0]  ;;  %v10144_v4 = vld [vmem:[%s11462_s29 + $0x284] sm:$0xf] }
 0x756   : > { %6346 = vmatmul.bf16.vlgmr.msrb.gmra.mxu2 %v12614_v6  ;;  %6360 = vmatmul.bf16.vlgmr.msrb.gmra.mxu3 %v12612_v48  ;;  %v8935_v6 = vor.u32 %v10138_v59, %v8932_v14  ;;  %v8999_v48 = vor.u32 %v10154_v15, %v8996_v16  ;;  %v10166_v15 = vld [vmem:[%s11462_s29 + $0x334] sm:$0xf]  ;;  %v8911_v12 = vor.u32 %v10132_v5, %v8908_v31  ;;  %v6151_v32 = vpop.f32.mrf.mxu0  ;;  %v6165_v49 = vpop.f32.mrf.mxu1  ;;  %v8892_v51 = vld [vmem:[%s11462_s29 + $0x208] sm:$0xf0] }
 0x757   : > { %6394 = vmatpush.bf16.msra.mxu2 %v8951_v50  ;;  %6408 = vmatpush.bf16.msra.mxu3 %v9015_v3  ;;  %v10150_v50 = vld [vmem:[%s11462_s29 + $0x2b4] sm:$0xf] }
 0x758   : > { %6436 = vmatpush.bf16.msra.mxu1 %v9143_v39  ;;  %v10182_v3 = vld [vmem:[%s11462_s29 + $0x3b4] sm:$0xf]  ;;  %v9108_v39 = vld [vmem:[%s11462_s29 + $0x3b8] sm:$0xf0]  ;;  %v8983_v47 = vor.u32 %v10150_v50, %v8980_v53  ;;  %v8956_v50 = vld [vmem:[%s11462_s29 + $0x288] sm:$0xf0]  ;;  %v9039_v53 = vor.u32 %v10164_v11, %v9036_v21 }
 0x759   : > { %6422 = vmatpush.bf16.msra.mxu0 %v9079_v9  ;;  %v9111_v7 = vor.u32 %v10182_v3, %v9108_v39  ;;  %v6123_v59 = vpop.f32.mrf.mxu2  ;;  %v6137_v14 = vpop.f32.mrf.mxu3  ;;  %v9044_v9 = vld [vmem:[%s11462_s29 + $0x338] sm:$0xf0]  ;;  %v9084_v3 = vld [vmem:[%s11462_s29 + $0x388] sm:$0xf0] }
 0x75a   : > { %v6124_v16 = vadd.f32 %v6123_v59, %v4830_v8  ;;  %v9047_v24 = vor.u32 %v10166_v15, %v9044_v9  ;;  %v9028_v39 = vld [vmem:[%s11462_s29 + $0x318] sm:$0xf0] }
 0x75b   : > { %6395 = vmatpush.bf16.msra.mxu2 %v8943_v2  ;;  %6409 = vmatpush.bf16.msra.mxu3 %v9007_v1  ;;  %v8972_v2 = vld [vmem:[%s11462_s29 + $0x2a8] sm:$0xf0]  ;;  %v10180_v1 = vld [vmem:[%s11462_s29 + $0x3a4] sm:$0xf] }
 0x75c   : > { %6437 = vmatpush.bf16.msra.mxu1 %v9135_v41  ;;  %v9100_v41 = vld [vmem:[%s11462_s29 + $0x3a8] sm:$0xf0] }
 0x75d   : > { %6423 = vmatpush.bf16.msra.mxu0 %v9071_v37  ;;  %6388 = vmatmul.bf16.vlgmr.msrb.gmra.mxu1 %v12618_v40  ;;  %v8975_v40 = vor.u32 %v10148_v22, %v8972_v2  ;;  %v9103_v62 = vor.u32 %v10180_v1, %v9100_v41  ;;  %v9092_v37 = vld [vmem:[%s11462_s29 + $0x398] sm:$0xf0]  ;;  %v8959_v41 = vor.u32 %v10144_v4, %v8956_v50 }
 0x75e   : > { %v9268_v22 = vld [vmem:[%s11462_s29 + $0x4f8] sm:$0xf0] }
 0x75f   : > { %6396 = vmatpush.bf16.msra.mxu2 %v8935_v6  ;;  %6410 = vmatpush.bf16.msra.mxu3 %v8999_v48  ;;  %v8900_v6 = vld [vmem:[%s11462_s29 + $0x218] sm:$0xf0]  ;;  %v10146_v48 = vld [vmem:[%s11462_s29 + $0x294] sm:$0xf] }
 0x760   : > { %6438 = vmatpush.bf16.msra.mxu1 %v9127_v18  ;;  %v6138_v18 = vadd.f32 %v6137_v14, %v6124_v16  ;;  %6374 = vmatmul.bf16.vlgmr.msrb.gmra.mxu0 %v12622_v10  ;;  %v8903_v20 = vor.u32 %v10130_v17, %v8900_v6  ;;  %v10162_v10 = vld [vmem:[%s11462_s29 + $0x314] sm:$0xf]  ;;  %v9396_v2 = vld [vmem:[%s11462_s29 + $0x5f8] sm:$0xf0]  ;;  %v9020_v16 = vld [vmem:[%s11462_s29 + $0x308] sm:$0xf0] }
 0x761   : > { %6424 = vmatpush.bf16.msra.mxu0 %v9063_v46  ;;  %v10176_v46 = vld [vmem:[%s11462_s29 + $0x384] sm:$0xf]  ;;  %v6125_v23 = vpop.f32.mrf.mxu2  ;;  %v6139_v1 = vpop.f32.mrf.mxu3  ;;  %v9031_v15 = vor.u32 %v10162_v10, %v9028_v39  ;;  %v9196_v17 = vld [vmem:[%s11462_s29 + $0x468] sm:$0xf0]  ;;  %v9252_v50 = vld [vmem:[%s11462_s29 + $0x4d8] sm:$0xf0] }
 0x762   : > { %v6152_v60 = vadd.f32 %v6151_v32, %v6138_v18  ;;  %v6126_v5 = vadd.f32 %v6125_v23, %v4830_v8  ;;  %v9087_v59 = vor.u32 %v10176_v46, %v9084_v3  ;;  %v10160_v8 = vld [vmem:[%s11462_s29 + $0x304] sm:$0xf]  ;;  %v9260_v18 = vld [vmem:[%s11462_s29 + $0x4e8] sm:$0xf0]  ;;  %v10250_v46 = vld [vmem:[%s11462_s29 + $0x5d4] sm:$0xf] }
 0x763   : > { %6397 = vmatpush.bf16.msra.mxu2 %v8927_v45  ;;  %6411 = vmatpush.bf16.msra.mxu3 %v8991_v42  ;;  %v10128_v45 = vld [vmem:[%s11462_s29 + $0x204] sm:$0xf]  ;;  %v8967_v42 = vor.u32 %v10146_v48, %v8964_v19  ;;  %v9388_v19 = vld [vmem:[%s11462_s29 + $0x5e8] sm:$0xf0]  ;;  %v9023_v11 = vor.u32 %v10160_v8, %v9020_v16  ;;  %v10246_v8 = vld [vmem:[%s11462_s29 + $0x5b4] sm:$0xf] }
 0x764   : > { %6439 = vmatpush.bf16.msra.mxu1 %v9119_v27  ;;  %v9095_v27 = vor.u32 %v10178_v30, %v9092_v37  ;;  %v13060_v0 = vadd.f32 %v6165_v49, %v6152_v60  ;;  %v8895_v31 = vor.u32 %v10128_v45, %v8892_v51  ;;  %v6140_v14 = vadd.f32 %v6139_v1, %v6126_v5  ;;  %v10220_v6 = vld [vmem:[%s11462_s29 + $0x4e4] sm:$0xf]  ;;  %v6167_v30 = vpop.f32.mrf.mxu1  ;;  %v10238_v37 = vld [vmem:[%s11462_s29 + $0x574] sm:$0xf]  ;;  %v9332_v49 = vld [vmem:[%s11462_s29 + $0x578] sm:$0xf0] }
 0x765   : > { %6425 = vmatpush.bf16.msra.mxu0 %v9055_v61  ;;  %v10254_v61 = vld [vmem:[%s11462_s29 + $0x5f4] sm:$0xf]  ;;  %v9335_v4 = vor.u32 %v10238_v37, %v9332_v49  ;;  %v10236_v3 = vld [vmem:[%s11462_s29 + $0x564] sm:$0xf]  ;;  %v9324_v10 = vld [vmem:[%s11462_s29 + $0x568] sm:$0xf0] }
 0x766   : > { %v10202_v51 = vld [vmem:[%s11462_s29 + $0x454] sm:$0xf]  ;;  %v10200_v23 = vld [vmem:[%s11462_s29 + $0x444] sm:$0xf]  ;;  %v9364_v16 = vld [vmem:[%s11462_s29 + $0x5b8] sm:$0xf0] }
 0x767   : > { %6398 = vmatpush.bf16.msra.mxu2 %v8919_v28  ;;  %6412 = vmatpush.bf16.msra.mxu3 %v8983_v47  ;;  %v10206_v28 = vld [vmem:[%s11462_s29 + $0x474] sm:$0xf]  ;;  %v9204_v47 = vld [vmem:[%s11462_s29 + $0x478] sm:$0xf0]  ;;  %v10248_v5 = vld [vmem:[%s11462_s29 + $0x5c4] sm:$0xf] }
 0x768   : > { %6440 = vmatpush.bf16.msra.mxu1 %v9111_v7  ;;  %v10222_v7 = vld [vmem:[%s11462_s29 + $0x4f4] sm:$0xf]  ;;  %v9207_v9 = vor.u32 %v10206_v28, %v9204_v47  ;;  %v9180_v28 = vld [vmem:[%s11462_s29 + $0x448] sm:$0xf0]  ;;  %v10216_v47 = vld [vmem:[%s11462_s29 + $0x4c4] sm:$0xf] }
 0x769   : > { %6426 = vmatpush.bf16.msra.mxu0 %v9047_v24  ;;  %v9271_v32 = vor.u32 %v10222_v7, %v9268_v22  ;;  %v10252_v24 = vld [vmem:[%s11462_s29 + $0x5e4] sm:$0xf]  ;;  %v9244_v7 = vld [vmem:[%s11462_s29 + $0x4c8] sm:$0xf0]  ;;  %v10234_v22 = vld [vmem:[%s11462_s29 + $0x554] sm:$0xf] }
 0x76a   : > { %v9391_v45 = vor.u32 %v10252_v24, %v9388_v19  ;;  %v9247_v1 = vor.u32 %v10216_v47, %v9244_v7  ;;  %v10244_v37 = vld [vmem:[%s11462_s29 + $0x5a4] sm:$0xf]  ;;  %v9356_v49 = vld [vmem:[%s11462_s29 + $0x5a8] sm:$0xf0] }
 0x76b   : > { %6399 = vmatpush.bf16.msra.mxu2 %v8911_v12  ;;  %6413 = vmatpush.bf16.msra.mxu3 %v8975_v40  ;;  %v6153_v12 = vpop.f32.mrf.mxu0  ;;  %v9399_v40 = vor.u32 %v10254_v61, %v9396_v2  ;;  %v9316_v61 = vld [vmem:[%s11462_s29 + $0x558] sm:$0xf0]  ;;  %v9183_v2 = vor.u32 %v10200_v23, %v9180_v28  ;;  %v10228_v28 = vld [vmem:[%s11462_s29 + $0x524] sm:$0xf]  ;;  %v9292_v47 = vld [vmem:[%s11462_s29 + $0x528] sm:$0xf0] }
 0x76c   : > { %6441 = vmatpush.bf16.msra.mxu1 %v9103_v62  ;;  %v10204_v62 = vld [vmem:[%s11462_s29 + $0x464] sm:$0xf]  ;;  %v6154_v48 = vadd.f32 %v6153_v12, %v6140_v14  ;;  %v9172_v14 = vld [vmem:[%s11462_s29 + $0x438] sm:$0xf0] }
 0x76d   : > { %6427 = vmatpush.bf16.msra.mxu0 %v9039_v53  ;;  %v9199_v21 = vor.u32 %v10204_v62, %v9196_v17  ;;  %v9380_v53 = vld [vmem:[%s11462_s29 + $0x5d8] sm:$0xf0]  ;;  %v10232_v12 = vld [vmem:[%s11462_s29 + $0x544] sm:$0xf]  ;;  %v9367_v17 = vor.u32 %v10246_v8, %v9364_v16  ;;  %v10270_v16 = vld [vmem:[%s11462_s29 + $0x674] sm:$0xf] }
 0x76e   : > { %v13078_v60 = vadd.f32 %v6167_v30, %v6154_v48  ;;  %v9383_v39 = vor.u32 %v10250_v46, %v9380_v53  ;;  %v9164_v48 = vld [vmem:[%s11462_s29 + $0x428] sm:$0xf0]  ;;  %v10194_v46 = vld [vmem:[%s11462_s29 + $0x414] sm:$0xf]  ;;  %v10192_v7 = vld [vmem:[%s11462_s29 + $0x404] sm:$0xf] }
 0x76f   : > { %6400 = vmatpush.bf16.msra.mxu2 %v8903_v20  ;;  %6414 = vmatpush.bf16.msra.mxu3 %v8967_v42  ;;  %v9263_v20 = vor.u32 %v10220_v6, %v9260_v18  ;;  %v9188_v42 = vld [vmem:[%s11462_s29 + $0x458] sm:$0xf0]  ;;  %v10196_v6 = vld [vmem:[%s11462_s29 + $0x424] sm:$0xf]  ;;  %v9228_v30 = vld [vmem:[%s11462_s29 + $0x4a8] sm:$0xf0] }
 0x770   : > { %6442 = vmatpush.bf16.msra.mxu1 %v9095_v27  ;;  %v10218_v27 = vld [vmem:[%s11462_s29 + $0x4d4] sm:$0xf]  ;;  %v10212_v18 = vld [vmem:[%s11462_s29 + $0x4a4] sm:$0xf] }
 0x771   : > { %6428 = vmatpush.bf16.msra.mxu0 %v9031_v15  ;;  %v10214_v15 = vld [vmem:[%s11462_s29 + $0x4b4] sm:$0xf] }
 0x772   : > { %v10210_v53 = vld [vmem:[%s11462_s29 + $0x494] sm:$0xf] }
 0x773   : > { %6401 = vmatpush.bf16.msra.mxu2 %v8895_v31  ;;  %6415 = vmatpush.bf16.msra.mxu3 %v8959_v41  ;;  %v9372_v31 = vld [vmem:[%s11462_s29 + $0x5c8] sm:$0xf0] }
 0x774   : > { %6443 = vmatpush.bf16.msra.mxu1 %v9087_v59  ;;  %v9375_v41 = vor.u32 %v10248_v5, %v9372_v31  ;;  %v10198_v59 = vld [vmem:[%s11462_s29 + $0x434] sm:$0xf]  ;;  %v9148_v5 = vld [vmem:[%s11462_s29 + $0x408] sm:$0xf0] }
 0x775   : > { %6429 = vmatpush.bf16.msra.mxu0 %v9023_v11 }
 0x776   : > { %6402 = vmatmul.bf16.vlgmr.msra.gmra.mxu2 %v12738_v58  ;;  %6416 = vmatmul.bf16.vlgmr.msra.gmra.mxu3 %v12734_v52  ;;  %v9191_v58 = vor.u32 %v10202_v51, %v9188_v42  ;;  %v9255_v52 = vor.u32 %v10218_v27, %v9252_v50  ;;  %v6207_v51 = vpop.f32.mrf.mxu0  ;;  %v9167_v42 = vor.u32 %v10196_v6, %v9164_v48  ;;  %v10318_v6 = vld [vmem:[%s11462_s29 + $0x7f4] sm:$0xf]  ;;  %v9652_v48 = vld [vmem:[%s11462_s29 + $0x7f8] sm:$0xf0] }
 0x777   : > { %6450 = vmatpush.bf16.msrb.mxu2 %v9207_v9  ;;  %6464 = vmatpush.bf16.msrb.mxu3 %v9271_v32  ;;  %v9319_v9 = vor.u32 %v10234_v22, %v9316_v61  ;;  %v9308_v32 = vld [vmem:[%s11462_s29 + $0x548] sm:$0xf0]  ;;  %v9359_v50 = vor.u32 %v10244_v37, %v9356_v49  ;;  %v10208_v61 = vld [vmem:[%s11462_s29 + $0x484] sm:$0xf] }
 0x778   : > { %6492 = vmatpush.bf16.msrb.mxu1 %v9399_v40  ;;  %6430 = vmatmul.bf16.vlgmr.msra.gmra.mxu0 %v12740_v34  ;;  %v9236_v34 = vld [vmem:[%s11462_s29 + $0x4b8] sm:$0xf0]  ;;  %v9175_v40 = vor.u32 %v10198_v59, %v9172_v14  ;;  %v9311_v19 = vor.u32 %v10232_v12, %v9308_v32  ;;  %v9295_v14 = vor.u32 %v10228_v28, %v9292_v47  ;;  %v10286_v32 = vld [vmem:[%s11462_s29 + $0x6f4] sm:$0xf]  ;;  %v10224_v49 = vld [vmem:[%s11462_s29 + $0x504] sm:$0xf] }
 0x779   : > { %6444 = vmatmul.bf16.vlgmr.msra.gmra.mxu1 %v12747_v25  ;;  %6478 = vmatpush.bf16.msrb.mxu0 %v9335_v4  ;;  %v9327_v25 = vor.u32 %v10236_v3, %v9324_v10  ;;  %v9239_v62 = vor.u32 %v10214_v15, %v9236_v34  ;;  %v6179_v24 = vpop.f32.mrf.mxu2  ;;  %v9231_v4 = vor.u32 %v10212_v18, %v9228_v30  ;;  %v6221_v3 = vpop.f32.mrf.mxu1  ;;  %v9340_v15 = vld [vmem:[%s11462_s29 + $0x588] sm:$0xf0]  ;;  %v9284_v34 = vld [vmem:[%s11462_s29 + $0x518] sm:$0xf0]  ;;  %v10266_v28 = vld [vmem:[%s11462_s29 + $0x654] sm:$0xf] }
 0x77a   : > { %v6180_v11 = vadd.f32 %v6179_v24, %v13060_v0  ;;  %v9156_v0 = vld [vmem:[%s11462_s29 + $0x418] sm:$0xf0] }
 0x77b   : > { %6451 = vmatpush.bf16.msrb.mxu2 %v9199_v21  ;;  %6465 = vmatpush.bf16.msrb.mxu3 %v9263_v20  ;;  %v6193_v21 = vpop.f32.mrf.mxu3  ;;  %v10230_v20 = vld [vmem:[%s11462_s29 + $0x534] sm:$0xf]  ;;  %v9460_v12 = vld [vmem:[%s11462_s29 + $0x678] sm:$0xf0] }
 0x77c   : > { %6493 = vmatpush.bf16.msrb.mxu1 %v9391_v45  ;;  %v9300_v45 = vld [vmem:[%s11462_s29 + $0x538] sm:$0xf0]  ;;  %v6194_v27 = vadd.f32 %v6193_v21, %v6180_v11  ;;  %v9463_v37 = vor.u32 %v10270_v16, %v9460_v12  ;;  %v9276_v11 = vld [vmem:[%s11462_s29 + $0x508] sm:$0xf0]  ;;  %v10298_v16 = vld [vmem:[%s11462_s29 + $0x754] sm:$0xf] }
 0x77d   : > { %6479 = vmatpush.bf16.msrb.mxu0 %v9327_v25  ;;  %v9303_v10 = vor.u32 %v10230_v20, %v9300_v45  ;;  %v9159_v25 = vor.u32 %v10194_v46, %v9156_v0  ;;  %v9655_v45 = vor.u32 %v10318_v6, %v9652_v48  ;;  %v10316_v46 = vld [vmem:[%s11462_s29 + $0x7e4] sm:$0xf]  ;;  %v9644_v0 = vld [vmem:[%s11462_s29 + $0x7e8] sm:$0xf0]  ;;  %v9444_v47 = vld [vmem:[%s11462_s29 + $0x658] sm:$0xf0] }
 0x77e   : > { %v6208_v23 = vadd.f32 %v6207_v51, %v6194_v27  ;;  %v10268_v51 = vld [vmem:[%s11462_s29 + $0x664] sm:$0xf]  ;;  %v9572_v12 = vld [vmem:[%s11462_s29 + $0x758] sm:$0xf0]  ;;  %v10278_v48 = vld [vmem:[%s11462_s29 + $0x6b4] sm:$0xf] }
 0x77f   : > { %6452 = vmatpush.bf16.msrb.mxu2 %v9191_v58  ;;  %6466 = vmatpush.bf16.msrb.mxu3 %v9255_v52  ;;  %v9220_v58 = vld [vmem:[%s11462_s29 + $0x498] sm:$0xf0]  ;;  %v10242_v52 = vld [vmem:[%s11462_s29 + $0x594] sm:$0xf]  ;;  %v10284_v27 = vld [vmem:[%s11462_s29 + $0x6e4] sm:$0xf] }
 0x780   : > { %6494 = vmatpush.bf16.msrb.mxu1 %v9383_v39  ;;  %v9348_v39 = vld [vmem:[%s11462_s29 + $0x598] sm:$0xf0]  ;;  %v9223_v31 = vor.u32 %v10210_v53, %v9220_v58  ;;  %v10302_v53 = vld [vmem:[%s11462_s29 + $0x774] sm:$0xf]  ;;  %v9279_v58 = vor.u32 %v10224_v49, %v9276_v11 }
 0x781   : > { %6480 = vmatpush.bf16.msrb.mxu0 %v9319_v9  ;;  %v9351_v22 = vor.u32 %v10242_v52, %v9348_v39  ;;  %v6181_v59 = vpop.f32.mrf.mxu2  ;;  %v10226_v9 = vld [vmem:[%s11462_s29 + $0x514] sm:$0xf]  ;;  %v9428_v6 = vld [vmem:[%s11462_s29 + $0x638] sm:$0xf0] }
 0x782   : > { %v6182_v8 = vadd.f32 %v6181_v59, %v13078_v60  ;;  %v9287_v30 = vor.u32 %v10226_v9, %v9284_v34  ;;  %v10264_v59 = vld [vmem:[%s11462_s29 + $0x644] sm:$0xf]  ;;  %v9500_v9 = vld [vmem:[%s11462_s29 + $0x6c8] sm:$0xf0] }
 0x783   : > { %6453 = vmatpush.bf16.msrb.mxu2 %v9183_v2  ;;  %6467 = vmatpush.bf16.msrb.mxu3 %v9247_v1  ;;  %v9212_v2 = vld [vmem:[%s11462_s29 + $0x488] sm:$0xf0]  ;;  %v10240_v1 = vld [vmem:[%s11462_s29 + $0x584] sm:$0xf] }
 0x784   : > { %6495 = vmatpush.bf16.msrb.mxu1 %v9375_v41  ;;  %v13130_v41 = vadd.f32 %v6221_v3, %v6208_v23  ;;  %v9215_v24 = vor.u32 %v10208_v61, %v9212_v2  ;;  %v9343_v60 = vor.u32 %v10240_v1, %v9340_v15  ;;  %v9588_v3 = vld [vmem:[%s11462_s29 + $0x778] sm:$0xf0]  ;;  %v9647_v23 = vor.u32 %v10316_v46, %v9644_v0  ;;  %v10300_v61 = vld [vmem:[%s11462_s29 + $0x764] sm:$0xf]  ;;  %v9580_v2 = vld [vmem:[%s11462_s29 + $0x768] sm:$0xf0] }
 0x785   : > { %6481 = vmatpush.bf16.msrb.mxu0 %v9311_v19  ;;  %v6209_v19 = vpop.f32.mrf.mxu0  ;;  %v10280_v15 = vld [vmem:[%s11462_s29 + $0x6c4] sm:$0xf]  ;;  %v9612_v46 = vld [vmem:[%s11462_s29 + $0x7a8] sm:$0xf0] }
 0x786   : > { %v10312_v34 = vld [vmem:[%s11462_s29 + $0x7c4] sm:$0xf] }
 0x787   : > { %6454 = vmatpush.bf16.msrb.mxu2 %v9175_v40  ;;  %6468 = vmatpush.bf16.msrb.mxu3 %v9239_v62  ;;  %v6195_v40 = vpop.f32.mrf.mxu3  ;;  %v9151_v62 = vor.u32 %v10192_v7, %v9148_v5  ;;  %v9591_v7 = vor.u32 %v10302_v53, %v9588_v3  ;;  %v9508_v5 = vld [vmem:[%s11462_s29 + $0x6d8] sm:$0xf0]  ;;  %v10294_v53 = vld [vmem:[%s11462_s29 + $0x734] sm:$0xf] }
 0x788   : > { %6496 = vmatpush.bf16.msrb.mxu1 %v9367_v17  ;;  %v9524_v17 = vld [vmem:[%s11462_s29 + $0x6f8] sm:$0xf0]  ;;  %v6196_v18 = vadd.f32 %v6195_v40, %v6182_v8  ;;  %v9628_v8 = vld [vmem:[%s11462_s29 + $0x7c8] sm:$0xf0]  ;;  %v9503_v40 = vor.u32 %v10280_v15, %v9500_v9  ;;  %v10256_v15 = vld [vmem:[%s11462_s29 + $0x604] sm:$0xf] }
 0x789   : > { %6482 = vmatpush.bf16.msrb.mxu0 %v9303_v10  ;;  %v9527_v20 = vor.u32 %v10286_v32, %v9524_v17  ;;  %v10262_v17 = vld [vmem:[%s11462_s29 + $0x634] sm:$0xf]  ;;  %v9556_v3 = vld [vmem:[%s11462_s29 + $0x738] sm:$0xf0]  ;;  %v10272_v9 = vld [vmem:[%s11462_s29 + $0x684] sm:$0xf] }
 0x78a   : > { %v6210_v21 = vadd.f32 %v6209_v19, %v6196_v18  ;;  %v9575_v18 = vor.u32 %v10298_v16, %v9572_v12  ;;  %v10296_v19 = vld [vmem:[%s11462_s29 + $0x744] sm:$0xf]  ;;  %v9468_v12 = vld [vmem:[%s11462_s29 + $0x688] sm:$0xf0] }
 0x78b   : > { %6455 = vmatpush.bf16.msrb.mxu2 %v9167_v42  ;;  %6469 = vmatpush.bf16.msrb.mxu3 %v9231_v4  ;;  %v9452_v42 = vld [vmem:[%s11462_s29 + $0x668] sm:$0xf0]  ;;  %v6223_v4 = vpop.f32.mrf.mxu1 }
 0x78c   : > { %6497 = vmatpush.bf16.msrb.mxu1 %v9359_v50  ;;  %v9516_v50 = vld [vmem:[%s11462_s29 + $0x6e8] sm:$0xf0]  ;;  %v13152_v10 = vadd.f32 %v6223_v4, %v6210_v21  ;;  %v9455_v52 = vor.u32 %v10268_v51, %v9452_v42  ;;  %v10260_v21 = vld [vmem:[%s11462_s29 + $0x624] sm:$0xf] }
 0x78d   : > { %6483 = vmatpush.bf16.msrb.mxu0 %v9295_v14  ;;  %v9519_v39 = vor.u32 %v10284_v27, %v9516_v50  ;;  %v9436_v14 = vld [vmem:[%s11462_s29 + $0x648] sm:$0xf0]  ;;  %v10308_v50 = vld [vmem:[%s11462_s29 + $0x7a4] sm:$0xf] }
 0x78e   : > { %v9439_v32 = vor.u32 %v10264_v59, %v9436_v14  ;;  %v9484_v4 = vld [vmem:[%s11462_s29 + $0x6a8] sm:$0xf0] }
 0x78f   : > { %6456 = vmatpush.bf16.msrb.mxu2 %v9159_v25  ;;  %6470 = vmatpush.bf16.msrb.mxu3 %v9223_v31  ;;  %v10282_v25 = vld [vmem:[%s11462_s29 + $0x6d4] sm:$0xf] }
 0x790   : > { %6498 = vmatpush.bf16.msrb.mxu1 %v9351_v22  ;;  %v10314_v31 = vld [vmem:[%s11462_s29 + $0x7d4] sm:$0xf]  ;;  %v9636_v22 = vld [vmem:[%s11462_s29 + $0x7d8] sm:$0xf0] }
 0x791   : > { %6484 = vmatpush.bf16.msrb.mxu0 %v9287_v30  ;;  %v9639_v1 = vor.u32 %v10314_v31, %v9636_v22  ;;  %v9564_v30 = vld [vmem:[%s11462_s29 + $0x748] sm:$0xf0]  ;;  %v9476_v31 = vld [vmem:[%s11462_s29 + $0x698] sm:$0xf0]  ;;  %v10306_v22 = vld [vmem:[%s11462_s29 + $0x794] sm:$0xf] }
 0x792   : > { %v9567_v27 = vor.u32 %v10296_v19, %v9564_v30 }
 0x793   : > { %6457 = vmatpush.bf16.msrb.mxu2 %v9151_v62  ;;  %6471 = vmatpush.bf16.msrb.mxu3 %v9215_v24  ;;  %v9631_v62 = vor.u32 %v10312_v34, %v9628_v8  ;;  %v10310_v24 = vld [vmem:[%s11462_s29 + $0x7b4] sm:$0xf] }
 0x794   : > { %6499 = vmatpush.bf16.msrb.mxu1 %v9343_v60  ;;  %v9620_v60 = vld [vmem:[%s11462_s29 + $0x7b8] sm:$0xf0] }
 0x795   : > { %6485 = vmatpush.bf16.msrb.mxu0 %v9279_v58  ;;  %v9623_v11 = vor.u32 %v10310_v24, %v9620_v60  ;;  %v6263_v58 = vpop.f32.mrf.mxu0  ;;  %v9471_v24 = vor.u32 %v10272_v9, %v9468_v12 }
 0x796   : > { %6458 = vmatmul.bf16.vlgmr.msrb.gmra.mxu2 %v12846_v43  ;;  %6472 = vmatmul.bf16.vlgmr.msrb.gmra.mxu3 %v12844_v56  ;;  %v9447_v43 = vor.u32 %v10266_v28, %v9444_v47  ;;  %v9511_v56 = vor.u32 %v10282_v25, %v9508_v5  ;;  %v9615_v28 = vor.u32 %v10308_v50, %v9612_v46  ;;  %v10258_v47 = vld [vmem:[%s11462_s29 + $0x614] sm:$0xf]  ;;  %v9412_v25 = vld [vmem:[%s11462_s29 + $0x618] sm:$0xf0] }
 0x797   : > { %6506 = vmatpush.bf16.msra.mxu2 %v9463_v37  ;;  %6520 = vmatpush.bf16.msra.mxu3 %v9527_v20  ;;  %v9431_v37 = vor.u32 %v10262_v17, %v9428_v6  ;;  %v9420_v20 = vld [vmem:[%s11462_s29 + $0x628] sm:$0xf0]  ;;  %v9559_v5 = vor.u32 %v10294_v53, %v9556_v3  ;;  %v10290_v17 = vld [vmem:[%s11462_s29 + $0x714] sm:$0xf]  ;;  %v9540_v6 = vld [vmem:[%s11462_s29 + $0x718] sm:$0xf0] }
 0x798   : > { %6548 = vmatpush.bf16.msra.mxu1 %v9655_v45  ;;  %6486 = vmatmul.bf16.vlgmr.msrb.gmra.mxu0 %v12855_v29  ;;  %v9492_v29 = vld [vmem:[%s11462_s29 + $0x6b8] sm:$0xf0]  ;;  %v10276_v45 = vld [vmem:[%s11462_s29 + $0x6a4] sm:$0xf]  ;;  %v9543_v30 = vor.u32 %v10290_v17, %v9540_v6 }
 0x799   : > { %6500 = vmatmul.bf16.vlgmr.msrb.gmra.mxu1 %v12850_v63  ;;  %6534 = vmatpush.bf16.msra.mxu0 %v9591_v7  ;;  %v9583_v63 = vor.u32 %v10300_v61, %v9580_v2  ;;  %v9495_v49 = vor.u32 %v10278_v48, %v9492_v29  ;;  %v6235_v51 = vpop.f32.mrf.mxu2  ;;  %v6249_v42 = vpop.f32.mrf.mxu3  ;;  %v10274_v7 = vld [vmem:[%s11462_s29 + $0x694] sm:$0xf]  ;;  %v9604_v61 = vld [vmem:[%s11462_s29 + $0x798] sm:$0xf0] }
 0x79a   : > { %v6236_v0 = vadd.f32 %v6235_v51, %v13130_v41  ;;  %v6277_v41 = vpop.f32.mrf.mxu1  ;;  %v9479_v59 = vor.u32 %v10274_v7, %v9476_v31  ;;  %v9607_v14 = vor.u32 %v10306_v22, %v9604_v61 }
 0x79b   : > { %6507 = vmatpush.bf16.msra.mxu2 %v9455_v52  ;;  %6521 = vmatpush.bf16.msra.mxu3 %v9519_v39  ;;  %v9423_v52 = vor.u32 %v10260_v21, %v9420_v20 }
 0x79c   : > { %6549 = vmatpush.bf16.msra.mxu1 %v9647_v23  ;;  %v6250_v39 = vadd.f32 %v6249_v42, %v6236_v0  ;;  %v9487_v23 = vor.u32 %v10276_v45, %v9484_v4 }
 0x79d   : > { %6535 = vmatpush.bf16.msra.mxu0 %v9583_v63  ;;  %v9404_v63 = vld [vmem:[%s11462_s29 + $0x608] sm:$0xf0]  ;;  %v6265_v19 = vpop.f32.mrf.mxu0 }
 0x79e   : > { %v6264_v2 = vadd.f32 %v6263_v58, %v6250_v39 }
 0x79f   : > { %6508 = vmatpush.bf16.msra.mxu2 %v9447_v43  ;;  %6522 = vmatpush.bf16.msra.mxu3 %v9511_v56  ;;  %v10292_v43 = vld [vmem:[%s11462_s29 + $0x724] sm:$0xf]  ;;  %v9548_v56 = vld [vmem:[%s11462_s29 + $0x728] sm:$0xf0] }
 0x7a0   : > { %6550 = vmatpush.bf16.msra.mxu1 %v9639_v1  ;;  %v9415_v1 = vor.u32 %v10258_v47, %v9412_v25  ;;  %v6278_v34 = vadd.f32 %v6277_v41, %v6264_v2  ;;  %v9551_v16 = vor.u32 %v10292_v43, %v9548_v56  ;;  %v4831_v41 = vperm.slane %v13026_v33, 1 }
 0x7a1   : > { %6536 = vmatpush.bf16.msra.mxu0 %v9575_v18  ;;  %v6237_v8 = vpop.f32.mrf.mxu2  ;;  %v6251_v48 = vpop.f32.mrf.mxu3  ;;  %v9407_v18 = vor.u32 %v10256_v15, %v9404_v63 }
 0x7a2   : > { %v6279_v21 = vpop.f32.mrf.mxu1 }
 0x7a3   : > { %6509 = vmatpush.bf16.msra.mxu2 %v9439_v32  ;;  %6523 = vmatpush.bf16.msra.mxu3 %v9503_v40  ;;  %v10304_v32 = vld [vmem:[%s11462_s29 + $0x784] sm:$0xf]  ;;  %v9596_v40 = vld [vmem:[%s11462_s29 + $0x788] sm:$0xf0] }
 0x7a4   : > { %6551 = vmatpush.bf16.msra.mxu1 %v9631_v62  ;;  %v6238_v62 = vadd.f32 %v6237_v8, %v13152_v10  ;;  %v9599_v60 = vor.u32 %v10304_v32, %v9596_v40 }
 0x7a5   : > { %6537 = vmatpush.bf16.msra.mxu0 %v9567_v27 }
 0x7a6   : > { %v6252_v29 = vadd.f32 %v6251_v48, %v6238_v62 }
 0x7a7   : > { %6510 = vmatpush.bf16.msra.mxu2 %v9431_v37  ;;  %6524 = vmatpush.bf16.msra.mxu3 %v9495_v49  ;;  %v10288_v49 = vld [vmem:[%s11462_s29 + $0x704] sm:$0xf] }
 0x7a8   : > { %6552 = vmatpush.bf16.msra.mxu1 %v9623_v11  ;;  %v6266_v37 = vadd.f32 %v6265_v19, %v6252_v29  ;;  %v9532_v11 = vld [vmem:[%s11462_s29 + $0x708] sm:$0xf0] }
 0x7a9   : > { %6538 = vmatpush.bf16.msra.mxu0 %v9559_v5  ;;  %v9535_v20 = vor.u32 %v10288_v49, %v9532_v11 }
 0x7aa   : > { %v6280_v10 = vadd.f32 %v6279_v21, %v6266_v37 }
 0x7ab   : > { %6511 = vmatpush.bf16.msra.mxu2 %v9423_v52  ;;  %6525 = vmatpush.bf16.msra.mxu3 %v9487_v23 }
 0x7ac   : > { %6553 = vmatpush.bf16.msra.mxu1 %v9615_v28 }
 0x7ad   : > { %6539 = vmatpush.bf16.msra.mxu0 %v9551_v16 }
 0x7af   : > { %6512 = vmatpush.bf16.msra.mxu2 %v9415_v1  ;;  %6526 = vmatpush.bf16.msra.mxu3 %v9479_v59 }
 0x7b0   : > { %6554 = vmatpush.bf16.msra.mxu1 %v9607_v14 }
 0x7b1   : > { %6540 = vmatpush.bf16.msra.mxu0 %v9543_v30 }
 0x7b3   : > { %6513 = vmatpush.bf16.msra.mxu2 %v9407_v18  ;;  %6527 = vmatpush.bf16.msra.mxu3 %v9471_v24 }
 0x7b4   : > { %6555 = vmatpush.bf16.msra.mxu1 %v9599_v60 }
 0x7b5   : > { %6541 = vmatpush.bf16.msra.mxu0 %v9535_v20 }
 0x7b6   : > { %6514 = vmatmul.bf16.vlgmr.msra.gmra.mxu2 %v12925_v13  ;;  %6528 = vmatmul.bf16.vlgmr.msra.gmra.mxu3 %v12927_v35 }
 0x7b7   : > { %6556 = vmatmul.bf16.vlgmr.msra.gmra.mxu1 %v12987_v44 }
 0x7b8   : > { %6542 = vmatmul.bf16.vlgmr.msra.gmra.mxu0 %v13000_v36 }
 0x7b9   : > { %v6291_v45 = vpop.f32.mrf.mxu2  ;;  %v6305_v51 = vpop.f32.mrf.mxu3 }
 0x7ba   : > { %v6292_v42 = vadd.f32 %v6291_v45, %v6278_v34 }
 0x7bc   : > { %v6306_v27 = vadd.f32 %v6305_v51, %v6292_v42 }
 0x7c1   : > { %v6293_v4 = vpop.f32.mrf.mxu2  ;;  %v6307_v46 = vpop.f32.mrf.mxu3 }
 0x7c2   : > { %v6294_v50 = vadd.f32 %v6293_v4, %v6280_v10 }
 0x7c4   : > { %v6308_v0 = vadd.f32 %v6307_v46, %v6294_v50 }
 0x7ca   : > { %v6333_v53 = vpop.f32.mrf.mxu1 }
 0x7cd   : > { %v6319_v3 = vpop.f32.mrf.mxu0 }
 0x7ce   : > { %v6320_v58 = vadd.f32 %v6319_v3, %v6306_v27 }
 0x7d0   : > { %v13214_v52 = vadd.f32 %v6333_v53, %v6320_v58 }
 0x7d2   : > { %v6335_v39 = vpop.f32.mrf.mxu1 }
 0x7d5   : > { %v6321_v13 = vpop.f32.mrf.mxu0 }
 0x7d6   : > { %v6322_v35 = vadd.f32 %v6321_v13, %v6308_v0 }
 0x7d8   : > { %v13216_v44 = vadd.f32 %v6335_v39, %v6322_v35 }
 0x7d9   : > { %v6347_v23 = vpop.f32.mrf.mxu2  ;;  %v6361_v28 = vpop.f32.mrf.mxu3 }
 0x7da   : > { %v6389_v47 = vpop.f32.mrf.mxu1  ;;  %v6348_v22 = vadd.f32 %v6347_v23, %v4831_v41 }
 0x7dc   : > { %v6362_v2 = vadd.f32 %v6361_v28, %v6348_v22  ;;  %v6562_v28 = vadd.f32 %v13214_v52, %v12021_v54 }
 0x7dd   : > { %v6375_v36 = vpop.f32.mrf.mxu0 }
 0x7de   : > { %v6376_v1 = vadd.f32 %v6375_v36, %v6362_v2  ;;  %v6564_v2 = vadd.f32 %v13216_v44, %v12025_v26 }
 0x7e0   : > { %v6390_v15 = vadd.f32 %v6389_v47, %v6376_v1 }
 0x7e1   : > { %v6349_v25 = vpop.f32.mrf.mxu2  ;;  %v6363_v5 = vpop.f32.mrf.mxu3 }
 0x7e2   : > { %v6391_v31 = vpop.f32.mrf.mxu1  ;;  %v6350_v14 = vadd.f32 %v6349_v25, %v4831_v41 }
 0x7e4   : > { %v6364_v63 = vadd.f32 %v6363_v5, %v6350_v14 }
 0x7e5   : > { %v6377_v7 = vpop.f32.mrf.mxu0 }
 0x7e6   : > { %v6378_v8 = vadd.f32 %v6377_v7, %v6364_v63 }
 0x7e8   : > { %v6392_v33 = vadd.f32 %v6391_v31, %v6378_v8 }
 0x7f5   : > { %v6431_v56 = vpop.f32.mrf.mxu0 }
 0x7f6   : > { %v6445_v59 = vpop.f32.mrf.mxu1 }
 0x7f9   : > { %v6403_v61 = vpop.f32.mrf.mxu2  ;;  %v6417_v43 = vpop.f32.mrf.mxu3 }
 0x7fa   : > { %v6404_v9 = vadd.f32 %v6403_v61, %v6390_v15 }
 0x7fc   : > { %v6418_v32 = vadd.f32 %v6417_v43, %v6404_v9 }
 0x7fd   : > { %v6433_v12 = vpop.f32.mrf.mxu0 }
 0x7fe   : > { %v6447_v40 = vpop.f32.mrf.mxu1  ;;  %v6432_v62 = vadd.f32 %v6431_v56, %v6418_v32 }
 0x800   : > { %v6446_v24 = vadd.f32 %v6445_v59, %v6432_v62 }
 0x801   : > { %v6405_v34 = vpop.f32.mrf.mxu2  ;;  %v6419_v16 = vpop.f32.mrf.mxu3 }
 0x802   : > { %v6406_v17 = vadd.f32 %v6405_v34, %v6392_v33 }
 0x804   : > { %v6420_v29 = vadd.f32 %v6419_v16, %v6406_v17 }
 0x806   : > { %v6434_v30 = vadd.f32 %v6433_v12, %v6420_v29  ;;  %v6566_v29 = vld [vmem:[%s13328_s24] sm:$0x3] }
 0x808   : > { %v6448_v11 = vadd.f32 %v6447_v40, %v6434_v30 }
 0x815   : > { %v6487_v18 = vpop.f32.mrf.mxu0 }
 0x816   : > { %v6501_v60 = vpop.f32.mrf.mxu1 }
 0x819   : > { %v6459_v6 = vpop.f32.mrf.mxu2  ;;  %v6473_v48 = vpop.f32.mrf.mxu3 }
 0x81a   : > { %v6460_v19 = vadd.f32 %v6459_v6, %v6446_v24 }
 0x81c   : > { %v6474_v37 = vadd.f32 %v6473_v48, %v6460_v19  ;;  %v6567_v19 = vld [vmem:[%s13329_s27] sm:$0x3] }
 0x81d   : > { %v6489_v10 = vpop.f32.mrf.mxu0 }
 0x81e   : > { %v6488_v20 = vadd.f32 %v6487_v18, %v6474_v37  ;;  %v6503_v51 = vpop.f32.mrf.mxu1 }
 0x820   : > { %v6502_v27 = vadd.f32 %v6501_v60, %v6488_v20  ;;  %v6629_v20 = vperm.slane %v6567_v19, 1 }
 0x821   : > { %v6461_v49 = vpop.f32.mrf.mxu2  ;;  %v6475_v21 = vpop.f32.mrf.mxu3 }
 0x822   : > { %v6462_v45 = vadd.f32 %v6461_v49, %v6448_v11  ;;  %v6619_v49 = vperm.slane %v6566_v29, 0  ;;  %v6620_v11 = vperm.slane %v6566_v29, 1 }
 0x824   : > { %v6476_v42 = vadd.f32 %v6475_v21, %v6462_v45 }
 0x826   : > { %v6490_v53 = vadd.f32 %v6489_v10, %v6476_v42  ;;  %v6628_v10 = vperm.slane %v6567_v19, 0 }
 0x828   : > { %v6504_v35 = vadd.f32 %v6503_v51, %v6490_v53 }
 0x834   : > { %v6557_v58 = vpop.f32.mrf.mxu1 }
 0x835   : > { %v6543_v0 = vpop.f32.mrf.mxu0 }
 0x839   : > { %v6515_v4 = vpop.f32.mrf.mxu2  ;;  %v6529_v46 = vpop.f32.mrf.mxu3 }
 0x83a   : > { %v6516_v50 = vadd.f32 %v6515_v4, %v6502_v27 }
 0x83c   : > { %v6530_v3 = vadd.f32 %v6529_v46, %v6516_v50  ;;  %v6559_v22 = vpop.f32.mrf.mxu1 }
 0x83d   : > { %v6545_v5 = vpop.f32.mrf.mxu0 }
 0x83e   : > { %v6544_v13 = vadd.f32 %v6543_v0, %v6530_v3 }
 0x840   : > { %v6558_v39 = vadd.f32 %v6557_v58, %v6544_v13 }
 0x841   : > { %v6517_v23 = vpop.f32.mrf.mxu2  ;;  %v6531_v25 = vpop.f32.mrf.mxu3 }
 0x842   : > { %v6518_v36 = vadd.f32 %v6517_v23, %v6504_v35  ;;  %v6563_v47 = vadd.f32 %v6558_v39, %v12023_v55 }
 0x844   : > { %v6532_v7 = vadd.f32 %v6531_v25, %v6518_v36  ;;  %v6568_v41 = vadd.f32 %v6563_v47, %v6562_v28 }
 0x846   : > { %v6546_v31 = vadd.f32 %v6545_v5, %v6532_v7  ;;  %6569 = vadd.xlane.f32.xlu2 %v6568_v41 }
 0x848   : > { %v6560_v61 = vadd.f32 %v6559_v22, %v6546_v31 }
 0x84a   : > { %v6565_v43 = vadd.f32 %v6560_v61, %v12027_v57 }
 0x84c   : > { %v6571_v56 = vadd.f32 %v6565_v43, %v6564_v2 }
 0x84e   : > { %6572 = vadd.xlane.f32.xlu2 %v6571_v56 }
 0x8b9   : > { %v6570_v1 = vpop.xlane.xlu2 %6569 }
 0x8ba   : > { %v6574_v54 = vmul.f32 %v6570_v1, %v11889_v38 }
 0x8bc   : > { %v6576_v52 = vsub.f32 %v6562_v28, %v6574_v54  ;;  %v6577_v55 = vsub.f32 %v6563_v47, %v6574_v54 }
 0x8be   : > { %v6580_v59 = vmul.f32 %v6576_v52, %v6576_v52  ;;  %v6581_v14 = vmul.f32 %v6577_v55, %v6577_v55 }
 0x8c0   : > { %v6584_v15 = vadd.f32 %v6581_v14, %v6580_v59 }
 0x8c1   : > { %v6573_v63 = vpop.xlane.xlu2 %6572 }
 0x8c2   : > { %v6575_v9 = vmul.f32 %v6573_v63, %v11889_v38  ;;  %6585 = vadd.xlane.f32.xlu0 %v6584_v15 }
 0x8c4   : > { %v6578_v34 = vsub.f32 %v6564_v2, %v6575_v9  ;;  %v6579_v8 = vsub.f32 %v6565_v43, %v6575_v9 }
 0x8c6   : > { %v6582_v16 = vmul.f32 %v6578_v34, %v6578_v34  ;;  %v6583_v26 = vmul.f32 %v6579_v8, %v6579_v8 }
 0x8c8   : > { %v6587_v57 = vadd.f32 %v6583_v26, %v6582_v16 }
 0x8ca   : > { %6588 = vadd.xlane.f32.xlu1 %v6587_v57 }
 0x935   : > { %v6586_v44 = vpop.xlane.xlu0 %6585 }
 0x936   : > { %v6590_v12 = vmul.f32 %v6586_v44, %v11889_v38 }
 0x938   : > { %v6592_v32 = vadd.f32 1e-05, %v6590_v12 }
 0x93a   : > { %10466 = vrsqrt.f32 %v6592_v32  ;;  %vm6600_vm14 = vweird.f32 %v6592_v32 }
 0x93d   : > { %v6589_v40 = vpop.xlane.xlu1 %6588 }
 0x93e   : > { %v6591_v33 = vmul.f32 %v6589_v40, %v11889_v38 }
 0x940   : > { %v10467_v62 = vpop.eup %10466  ;;  %v6593_v17 = vadd.f32 1e-05, %v6591_v33 }
 0x941   : > { %v6595_v6 = vmul.f32 %v10467_v62, %v6592_v32  ;;  %vm6601_vm13 = vweird.f32 %v10467_v62 }
 0x942   : > { %10468 = vrsqrt.f32 %v6593_v17  ;;  %vm6602_vm15 = vmor %vm6600_vm14, %vm6601_vm13  ;;  %vm6610_vm1 = vweird.f32 %v6593_v17 }
 0x943   : > { %v6596_v48 = vmul.f32 %v10467_v62, %v6595_v6 }
 0x945   : > { %v6597_v18 = vmul.f32 0.5, %v6596_v48 }
 0x947   : > { %v6598_v24 = vsub.f32 1.5, %v6597_v18 }
 0x948   : > { %v10469_v60 = vpop.eup %10468 }
 0x949   : > { %v6599_v30 = vmul.f32 %v10467_v62, %v6598_v24  ;;  %v6605_v37 = vmul.f32 %v10469_v60, %v6593_v17  ;;  %vm6611_vm0 = vweird.f32 %v10469_v60 }
 0x94a   : > { %vm6612_vm2 = vmor %vm6610_vm1, %vm6611_vm0 }
 0x94b   : > { %v6603_v38 = vsel %vm6602_vm15, %v10467_v62, %v6599_v30  ;;  %v6606_v21 = vmul.f32 %v10469_v60, %v6605_v37 }
 0x94c   : > { %v6614_v45 = vmul.f32 %v6603_v38, %v6576_v52  ;;  %v6615_v51 = vmul.f32 %v6603_v38, %v6577_v55 }
 0x94d   : > { %v6607_v42 = vmul.f32 0.5, %v6606_v21 }
 0x94e   : > { %v6623_v27 = vmul.f32 %v6619_v49, %v6614_v45  ;;  %v6624_v4 = vmul.f32 %v6620_v11, %v6615_v51 }
 0x94f   : > { %v6608_v50 = vsub.f32 1.5, %v6607_v42 }
 0x950   : > { %v6632_v46 = vadd.f32 %v6628_v10, %v6623_v27  ;;  %v6633_v0 = vadd.f32 %v6629_v20, %v6624_v4 }
 0x951   : > { %v6609_v53 = vmul.f32 %v10469_v60, %v6608_v50 }
 0x952   : > { %6636 = vst [vmem:[#allocation2 + $0x10] sm:$0xff] %v6632_v46 }
 0x953   : > { %6637 = vst [vmem:[#allocation2] sm:$0xff] %v6633_v0  ;;  %v6613_v3 = vsel %vm6612_vm2, %v10469_v60, %v6609_v53 }
 0x954   : > { %v6616_v58 = vmul.f32 %v6613_v3, %v6578_v34  ;;  %v6617_v13 = vmul.f32 %v6613_v3, %v6579_v8 }
 0x956   : > { %v6625_v35 = vmul.f32 %v6619_v49, %v6616_v58  ;;  %v6626_v39 = vmul.f32 %v6620_v11, %v6617_v13 }
 0x957   : > { %6643 = sbr.rel (%p9656_p4) target bundleno = 2400 (0x960), region = 156 }
 0x958   : > { %v6634_v23 = vadd.f32 %v6628_v10, %v6625_v35  ;;  %v6635_v36 = vadd.f32 %v6629_v20, %v6626_v39 }
 0x95a   : > { %6638 = vst [vmem:[#allocation2 + $0x18] sm:$0xff] %v6634_v23 }
 0x95b   : > { %6639 = vst [vmem:[#allocation2 + $0x8] sm:$0xff] %v6635_v36 }
 0x95c   : > { %6644 = vst [vmem:[#allocation27] sm:$0xff] %v6632_v46 }
 0x95d   : > { %6645 = vst [vmem:[#allocation27 + $0x8] sm:$0xff] %v6633_v0 }
 0x95e   : > { %6646 = vst [vmem:[#allocation27 + $0x10] sm:$0xff] %v6634_v23 }
 0x95f   : > { %6647 = vst [vmem:[#allocation27 + $0x18] sm:$0xff] %v6635_v36 }
 0x960 PF: > { %s13331_s18 = sld [smem:[#allocation39_spill]]  ;;  %s11010_s22 = smov [#allocation27]  }
 0x961   : > { %s6653_s25 = sshll.u32 %s11010_s22, 4  ;;  %s13332_s20 = sld [smem:[#allocation54_spill]]  ;;  %s6654_s25 = int_to_ptr.vmem [resolvable:$true] %s6653_s25 }
 0x962   : > { %s11011_s3 = smov 256   ;;  %s11012_s1 = smov 16  }
 0x966   : > { %p10396_p5 = scmp.eq.s32.totalorder %s13331_s18, 1 }
 0x967   : > { %s6655_s29 = sshll.u32 %s13332_s20, 4  ;;  %s6656_s29 = int_to_ptr.hbm [resolvable:$true] %s6655_s29 }
 0x968   : > { %10377 = dma.vmem_to_hbm [thread:$0]  (%p10396_p5), %s6654_s25, 512, %s6656_s29, [#allocation5], %s11011_s3, %s11011_s3, %s11012_s1  }
 0x969   : > { %10977 = dma.done.wait (%p10396_p5), [#allocation5], 512  }
 0x96a   : > { %10979 = vsyncadd (%p10396_p5), [#allocation5], 4294966784 }
 0x96b PF: > { %s13333_s27 = sld [smem:[#allocation40_spill]] }
 0x96c   : > { %s13334_s24 = sld [smem:[#allocation37_spill]] }
 0x96d   : > { %s13335_s25 = sld [smem:[#allocation38_spill]] }
 0x96e   : > { %s13336_s26 = sld [smem:[#allocation41_spill]] }
 0x971   : > { %p45_p8 = scmp.ge.s32.totalorder %s13333_s27, 4  }
 0x973   :  { %47 = sbr.rel (!%p45_p8) target bundleno = 28 (0x1c), region = 277 }
 0x978   :  { %6672 = vsyncpa [#allocation4], 1 }
 0x979   :  { %6674 = vsyncpa [#allocation4 + $0x1], 1 }
 0x97a   :  { %6675 = vsyncpa [#allocation7], 1 }
 0x97b   :  { %6676 = vsyncpa [#allocation10], 1 }
 0x97c   :  { %6678 = vsyncpa [#allocation10 + $0x1], 1 }
 0x97d   :  { %6679 = vsyncpa [#allocation13], 1 }
 0x97e   :  { %6681 = vsyncpa [#allocation13 + $0x1], 1 }
 0x97f   :  { %6682 = vsyncpa [#allocation16], 1 }
 0x980   :  { %6684 = vsyncpa [#allocation16 + $0x1], 1 }
 0x981   :  { %6685 = vsyncpa [#allocation19], 1 }
 0x982   :  { %6687 = vsyncpa [#allocation19 + $0x1], 1 }
 0x983   :  { %6688 = vsyncpa [#allocation22], 1 }
 0x984   :  { %6690 = vsyncpa [#allocation22 + $0x1], 1 }
 0x985   :  { %6691 = vsyncpa [#allocation25], 1 }
 0x986   :  { %6693 = vsyncpa [#allocation25 + $0x1], 1 }
 0x987   :  { %6694 = vsyncpa [#allocation5], 1 }
 0x988   :  { %6696 = vsyncpa [#allocation5 + $0x1], 1 }

</bundles_post_ra>
